<compile_context>
chip_gen: v7x
topology: tpu7x:2x2x1
jax: 0.10.0
libtpu: 0.0.40
codegen_flags: <defaults>
</compile_context>

<pallas_src>
import math
import functools

import numpy as np
import jax
import jax.numpy as jnp
from jax.experimental import pallas as pl
from jax.experimental.pallas import tpu as pltpu


def _gaussian_1d(window_size: int, sigma: float = 1.5) -> np.ndarray:
    """Normalized 1D Gaussian, identical to gaussian() in the reference."""
    g = np.array(
        [math.exp(-((x - window_size // 2) ** 2) / (2.0 * sigma ** 2))
         for x in range(window_size)],
        dtype=np.float64,
    )
    return (g / g.sum()).astype(np.float32)


def _banded_conv_matrix(n: int, g: np.ndarray) -> np.ndarray:
    """(n, n) banded matrix M with M[i, j] = g[j - i + pad].

    Left-multiplying a plane by M applies the zero-padded 'same' 1D
    correlation with g along the first axis (exactly F.conv2d's padding).
    """
    ws = len(g)
    pad = ws // 2
    m = np.zeros((n, n), np.float32)
    for i in range(n):
        for k in range(ws):
            j = i + k - pad
            if 0 <= j < n:
                m[i, j] = g[k]
    return m


def _ssim_kernel(img1_ref, img2_ref, ght_ref, gvbig_ref, o_ref,
                 *, C, H, W, inv_n):
    # img refs:  (C, H, W) for one batch element (leading batch dim squeezed).
    # ght_ref:   (W, W)     horizontal banded Gaussian (right-multiply).
    # gvbig_ref: (5*C*H, 5*C*H) = kron(I_{5C}, Gv) vertical banded Gaussian.
    # o_ref:     (1, 1, 128) per-batch SSIM broadcast over lanes.
    C1 = 0.01 ** 2
    C2 = 0.03 ** 2
    rows = C * H

    # Load + cast the whole block once; free reshape (C,H,W) -> (C*H, W).
    x = img1_ref[...].astype(jnp.float32).reshape(rows, W)
    y = img2_ref[...].astype(jnp.float32).reshape(rows, W)

    # One slab with all 5 product planes for all C channels: (5*C*H, W).
    slab = jnp.concatenate([x, y, x * x, y * y, x * y], axis=0)

    # Horizontal 'same' Gaussian pass for every plane: one MXU matmul.
    h1 = jnp.dot(slab, ght_ref[...],
                 preferred_element_type=jnp.float32,
                 precision=jax.lax.Precision.HIGHEST)
    # Vertical pass: block-diagonal banded matrix, one MXU matmul.
    blur = jnp.dot(gvbig_ref[...], h1,
                   preferred_element_type=jnp.float32,
                   precision=jax.lax.Precision.HIGHEST)

    mu1 = blur[0 * rows:1 * rows]
    mu2 = blur[1 * rows:2 * rows]
    s11 = blur[2 * rows:3 * rows]
    s22 = blur[3 * rows:4 * rows]
    s12 = blur[4 * rows:5 * rows]

    mu1_sq = mu1 * mu1
    mu2_sq = mu2 * mu2
    mu1_mu2 = mu1 * mu2
    sigma1_sq = s11 - mu1_sq
    sigma2_sq = s22 - mu2_sq
    sigma12 = s12 - mu1_mu2

    num = (2.0 * mu1_mu2 + C1) * (2.0 * sigma12 + C2)
    den = (mu1_sq + mu2_sq + C1) * (sigma1_sq + sigma2_sq + C2)

    # mean over (C, H, W) == sum / (C*H*W); single cross-lane reduction.
    ssim_b = jnp.sum(num / den) * inv_n

    # Lane-dense store (128-wide broadcast) instead of a masked scalar store.
    o_ref[...] = jnp.broadcast_to(ssim_b, o_ref.shape)


def ssim_pallas(img1, img2, window_size: int = 11):
    """SSIM with size_average=False: one value per batch element."""
    B, C, H, W = img1.shape
    g = _gaussian_1d(window_size)

    gv = _banded_conv_matrix(H, g)                         # (H, H)
    ght = _banded_conv_matrix(W, g).T                      # (W, W)
    gvbig = np.kron(np.eye(5 * C, dtype=np.float32), gv)   # (5CH, 5CH)
    rows = 5 * C * H

    kernel = functools.partial(
        _ssim_kernel, C=C, H=H, W=W, inv_n=1.0 / float(C * H * W))

    out = pl.pallas_call(
        kernel,
        out_shape=jax.ShapeDtypeStruct((B, 1, 128), jnp.float32),
        grid=(B,),
        in_specs=[
            pl.BlockSpec((None, C, H, W), lambda b: (b, 0, 0, 0)),
            pl.BlockSpec((None, C, H, W), lambda b: (b, 0, 0, 0)),
            pl.BlockSpec((W, W), lambda b: (0, 0)),          # constant; DMA'd once
            pl.BlockSpec((rows, rows), lambda b: (0, 0)),    # constant; DMA'd once
        ],
        out_specs=pl.BlockSpec((1, 1, 128), lambda b: (b, 0, 0)),
        compiler_params=pltpu.CompilerParams(
            dimension_semantics=("parallel",)),
    )(img1, img2, jnp.asarray(ght), jnp.asarray(gvbig))

    return out[:, 0, 0]


def ssim_ref(img1, img2, window_size: int = 11):
    """Pure-JAX reference mirroring _ssim() from the PyTorch module."""
    B, C, H, W = img1.shape
    pad = window_size // 2
    g1d = jnp.asarray(_gaussian_1d(window_size))
    win2d = jnp.outer(g1d, g1d)
    kern = jnp.broadcast_to(win2d, (C, 1, window_size, window_size))

    def conv(x):
        return jax.lax.conv_general_dilated(
            x, kern, window_strides=(1, 1),
            padding=[(pad, pad), (pad, pad)],
            dimension_numbers=("NCHW", "OIHW", "NCHW"),
            feature_group_count=C,
            precision=jax.lax.Precision.HIGHEST)

    img1 = img1.astype(jnp.float32)
    img2 = img2.astype(jnp.float32)
    mu1, mu2 = conv(img1), conv(img2)
    mu1_sq, mu2_sq, mu1_mu2 = mu1 * mu1, mu2 * mu2, mu1 * mu2
    sigma1_sq = conv(img1 * img1) - mu1_sq
    sigma2_sq = conv(img2 * img2) - mu2_sq
    sigma12 = conv(img1 * img2) - mu1_mu2
    C1, C2 = 0.01 ** 2, 0.03 ** 2
    ssim_map = ((2 * mu1_mu2 + C1) * (2 * sigma12 + C2)) / (
        (mu1_sq + mu2_sq + C1) * (sigma1_sq + sigma2_sq + C2))
    return ssim_map.mean(axis=(1, 2, 3))


if __name__ == "__main__":
    key = jax.random.PRNGKey(0)
    k1, k2 = jax.random.split(key)
    B, C, H, W = 2, 4, 16, 16
    img1 = jax.random.uniform(k1, (B, C, H, W), dtype=jnp.float32)
    img2 = jax.random.uniform(k2, (B, C, H, W), dtype=jnp.float32)

    out = jax.block_until_ready(ssim_pallas(img1, img2, window_size=11))
    ref = jax.block_until_ready(ssim_ref(img1, img2, window_size=11))
    np.testing.assert_allclose(np.asarray(out), np.asarray(ref),
                               rtol=1e-4, atol=1e-5)

    print("KERNEL_OK")
</pallas_src>

<mosaic_0001>
module attributes {stable_mosaic.version = 11 : i64} {
  func.func @_ssim_kernel(%arg0: i32, %arg1: memref<1x4x16x16xf32, #tpu.memory_space<vmem>>, %arg2: memref<1x4x16x16xf32, #tpu.memory_space<vmem>>, %arg3: memref<16x16xf32, #tpu.memory_space<vmem>>, %arg4: memref<320x320xf32, #tpu.memory_space<vmem>>, %arg5: memref<1x1x128xf32, #tpu.memory_space<vmem>>) attributes {dimension_semantics = [#tpu.dimension_semantics<parallel>], iteration_bounds = array<i64: 2>, scalar_prefetch = 0 : i64, scratch_operands = 0 : i64, tpu.core_type = #tpu.core_type<tc>, window_params = [{transform_indices = @transform_0, window_bounds = array<i64: 1, 4, 16, 16>}, {transform_indices = @transform_1, window_bounds = array<i64: 1, 4, 16, 16>}, {pipeline_mode = #tpu.pipeline_mode<synchronous>, transform_indices = @transform_2, window_bounds = array<i64: 16, 16>}, {pipeline_mode = #tpu.pipeline_mode<synchronous>, transform_indices = @transform_3, window_bounds = array<i64: 320, 320>}, {transform_indices = @transform_4, window_bounds = array<i64: 1, 1, 128>}]} {
    %c0 = arith.constant 0 : index
    %c0_0 = arith.constant 0 : index
    %c0_1 = arith.constant 0 : index
    %c0_2 = arith.constant 0 : index
    %0 = vector.load %arg1[%c0, %c0_0, %c0_1, %c0_2] : memref<1x4x16x16xf32, #tpu.memory_space<vmem>>, vector<1x4x16x16xf32>
    %1 = vector.shape_cast %0 : vector<1x4x16x16xf32> to vector<4x16x16xf32>
    %2 = vector.shape_cast %1 : vector<4x16x16xf32> to vector<64x16xf32>
    %c0_3 = arith.constant 0 : index
    %c0_4 = arith.constant 0 : index
    %c0_5 = arith.constant 0 : index
    %c0_6 = arith.constant 0 : index
    %3 = vector.load %arg2[%c0_3, %c0_4, %c0_5, %c0_6] : memref<1x4x16x16xf32, #tpu.memory_space<vmem>>, vector<1x4x16x16xf32>
    %4 = vector.shape_cast %3 : vector<1x4x16x16xf32> to vector<4x16x16xf32>
    %5 = vector.shape_cast %4 : vector<4x16x16xf32> to vector<64x16xf32>
    %6 = arith.mulf %2, %2 : vector<64x16xf32>
    %7 = arith.mulf %5, %5 : vector<64x16xf32>
    %8 = arith.mulf %2, %5 : vector<64x16xf32>
    %9 = tpu.concatenate %2, %5, %6, %7, %8 in 0 : vector<64x16xf32>, vector<64x16xf32>, vector<64x16xf32>, vector<64x16xf32>, vector<64x16xf32> -> vector<320x16xf32>
    %c0_7 = arith.constant 0 : index
    %c0_8 = arith.constant 0 : index
    %10 = vector.load %arg3[%c0_7, %c0_8] : memref<16x16xf32, #tpu.memory_space<vmem>>, vector<16x16xf32>
    %cst = arith.constant dense<0.000000e+00> : vector<320x16xf32>
    %11 = tpu.matmul %9, %10, %cst {dimension_numbers = #tpu.dot_dimension_numbers<[1], [0], [0], [1], [0, 0, 1, 1], [], []>, precision = #tpu.contract_precision<fp32>} : vector<320x16xf32>, vector<16x16xf32>, vector<320x16xf32> -> vector<320x16xf32>
    %c0_9 = arith.constant 0 : index
    %c0_10 = arith.constant 0 : index
    %12 = vector.load %arg4[%c0_9, %c0_10] : memref<320x320xf32, #tpu.memory_space<vmem>>, vector<320x320xf32>
    %cst_11 = arith.constant dense<0.000000e+00> : vector<320x16xf32>
    %13 = tpu.matmul %12, %11, %cst_11 {dimension_numbers = #tpu.dot_dimension_numbers<[1], [0], [0], [1], [0, 0, 1, 1], [], []>, precision = #tpu.contract_precision<fp32>} : vector<320x320xf32>, vector<320x16xf32>, vector<320x16xf32> -> vector<320x16xf32>
    %14 = vector.extract_strided_slice %13 {offsets = [0, 0], sizes = [64, 16], strides = [1, 1]} : vector<320x16xf32> to vector<64x16xf32>
    %15 = vector.extract_strided_slice %13 {offsets = [64, 0], sizes = [64, 16], strides = [1, 1]} : vector<320x16xf32> to vector<64x16xf32>
    %16 = vector.extract_strided_slice %13 {offsets = [128, 0], sizes = [64, 16], strides = [1, 1]} : vector<320x16xf32> to vector<64x16xf32>
    %17 = vector.extract_strided_slice %13 {offsets = [192, 0], sizes = [64, 16], strides = [1, 1]} : vector<320x16xf32> to vector<64x16xf32>
    %18 = vector.extract_strided_slice %13 {offsets = [256, 0], sizes = [64, 16], strides = [1, 1]} : vector<320x16xf32> to vector<64x16xf32>
    %19 = arith.mulf %14, %14 : vector<64x16xf32>
    %20 = arith.mulf %15, %15 : vector<64x16xf32>
    %21 = arith.mulf %14, %15 : vector<64x16xf32>
    %22 = arith.subf %16, %19 : vector<64x16xf32>
    %23 = arith.subf %17, %20 : vector<64x16xf32>
    %24 = arith.subf %18, %21 : vector<64x16xf32>
    %cst_12 = arith.constant 2.000000e+00 : f32
    %25 = vector.broadcast %cst_12 : f32 to vector<64x16xf32>
    %26 = arith.mulf %25, %21 : vector<64x16xf32>
    %cst_13 = arith.constant 9.99999974E-5 : f32
    %27 = vector.broadcast %cst_13 : f32 to vector<64x16xf32>
    %28 = arith.addf %26, %27 : vector<64x16xf32>
    %cst_14 = arith.constant 2.000000e+00 : f32
    %29 = vector.broadcast %cst_14 : f32 to vector<64x16xf32>
    %30 = arith.mulf %29, %24 : vector<64x16xf32>
    %cst_15 = arith.constant 8.99999984E-4 : f32
    %31 = vector.broadcast %cst_15 : f32 to vector<64x16xf32>
    %32 = arith.addf %30, %31 : vector<64x16xf32>
    %33 = arith.mulf %28, %32 : vector<64x16xf32>
    %34 = arith.addf %19, %20 : vector<64x16xf32>
    %cst_16 = arith.constant 9.99999974E-5 : f32
    %35 = vector.broadcast %cst_16 : f32 to vector<64x16xf32>
    %36 = arith.addf %34, %35 : vector<64x16xf32>
    %37 = arith.addf %22, %23 : vector<64x16xf32>
    %cst_17 = arith.constant 8.99999984E-4 : f32
    %38 = vector.broadcast %cst_17 : f32 to vector<64x16xf32>
    %39 = arith.addf %37, %38 : vector<64x16xf32>
    %40 = arith.mulf %36, %39 : vector<64x16xf32>
    %41 = arith.divf %33, %40 : vector<64x16xf32>
    %42 = vector.shape_cast %41 : vector<64x16xf32> to vector<1x64x16xf32>
    %cst_18 = arith.constant dense<0.000000e+00> : vector<1xf32>
    %43 = vector.multi_reduction <add>, %42, %cst_18 [1, 2] : vector<1x64x16xf32> to vector<1xf32>
    %44 = vector.shape_cast %43 : vector<1xf32> to vector<1x1x1xf32>
    %45 = vector.extract %44[0, 0, 0] : f32 from vector<1x1x1xf32>
    %cst_19 = arith.constant 9.765625E-4 : f32
    %46 = arith.mulf %45, %cst_19 : f32
    %47 = vector.broadcast %46 : f32 to vector<1x1x128xf32>
    %c0_20 = arith.constant 0 : index
    %c0_21 = arith.constant 0 : index
    %c0_22 = arith.constant 0 : index
    %48 = vector.load %arg5[%c0_20, %c0_21, %c0_22] : memref<1x1x128xf32, #tpu.memory_space<vmem>>, vector<1x1x128xf32>
    tpu.vector_store %arg5[%c0_20, %c0_21, %c0_22], %47 {strides = array<i32>} : memref<1x1x128xf32, #tpu.memory_space<vmem>>, vector<1x1x128xf32>,
    return
  }
  func.func @transform_0(%arg0: i32) -> (i32, i32, i32, i32) {
    %c0_i32 = arith.constant 0 : i32
    %c0_i32_0 = arith.constant 0 : i32
    %c0_i32_1 = arith.constant 0 : i32
    %c0_i32_2 = arith.constant 0 : i32
    return %arg0, %c0_i32, %c0_i32_0, %c0_i32_1 : i32, i32, i32, i32
  }
  func.func @transform_1(%arg0: i32) -> (i32, i32, i32, i32) {
    %c0_i32 = arith.constant 0 : i32
    %c0_i32_0 = arith.constant 0 : i32
    %c0_i32_1 = arith.constant 0 : i32
    %c0_i32_2 = arith.constant 0 : i32
    return %arg0, %c0_i32, %c0_i32_0, %c0_i32_1 : i32, i32, i32, i32
  }
  func.func @transform_2(%arg0: i32) -> (i32, i32) {
    %c0_i32 = arith.constant 0 : i32
    %c0_i32_0 = arith.constant 0 : i32
    %c0_i32_1 = arith.constant 0 : i32
    return %c0_i32, %c0_i32_0 : i32, i32
  }
  func.func @transform_3(%arg0: i32) -> (i32, i32) {
    %c0_i32 = arith.constant 0 : i32
    %c0_i32_0 = arith.constant 0 : i32
    %c0_i32_1 = arith.constant 0 : i32
    return %c0_i32, %c0_i32_0 : i32, i32
  }
  func.func @transform_4(%arg0: i32) -> (i32, i32, i32) {
    %c0_i32 = arith.constant 0 : i32
    %c0_i32_0 = arith.constant 0 : i32
    %c0_i32_1 = arith.constant 0 : i32
    return %arg0, %c0_i32, %c0_i32_0 : i32, i32, i32
  }
}

</mosaic_0001>

<bundles_post_ra>
// kernel: tpu_custom_call.1
= control target key start
LH: loop header
LB: loop body
LE: loop exit
PB: predicated region body
PF: predicated region fallthrough
CT: control target
= control target key end

     0   :  { %s16441_s0 = inlined_call_operand.hbm [shape: f32[2,4,16,16], index: 0, kind: input, shape index: {}]   ;;  %s16442_s1 = inlined_call_operand.hbm [shape: f32[2,4,16,16], index: 1, kind: input, shape index: {}]   ;;  %s16443_s2 = inlined_call_operand.hbm [shape: f32[16,16], index: 2, kind: input, shape index: {}]   ;;  %s16444_s3 = inlined_call_operand.hbm [shape: f32[320,320], index: 3, kind: input, shape index: {}]   ;;  %s16445_s4 = inlined_call_operand.hbm [shape: f32[2,1,128], index: 4, kind: output, shape index: {}]  }
   0x1   :  { %17243 = sst [smem:[#allocation307_spill]] %s16441_s0 }
   0x2   :  { %9 = vsyncpa [#allocation3], 0 }
   0x3   :  { %11 = vsyncpa [#allocation3 + $0x1], 0 }
   0x4   :  { %12 = vsyncpa [#allocation6], 0 }
   0x5   :  { %14 = vsyncpa [#allocation6 + $0x1], 0 }
   0x6   :  { %15 = vsyncpa [#allocation9], 0 }
   0x7   :  { %16 = vsyncpa [#allocation4], 0 }
   0x8   :  { %18 = vsyncpa [#allocation4 + $0x1], 0  ;;  %s11136_s15 = smov 0   ;;  %s11138_s16 = smov 0  }
   0x9   :  { %s11140_s17 = smov 0   ;;  %s11142_s18 = smov 0  }
   0xa LB: > { %s11157_s19 = sadd.s32 4294967295, %s11099_s18   ;;  %s8376_s20 = sadd.s32 4294967294, %s11099_s18   ;;  %s11099_s18 = sphi %s11142_s18, %s19160_s18   ;;  %s11095_s17 = sphi %s11140_s17, %s19159_s17   ;;  %s11091_s16 = sphi %s11138_s16, %s19158_s16   ;;  %s11087_s15 = sphi %s11136_s15, %s19157_s15  }
   0xb   : > { %p44_p0 = scmp.ne.s32.totalorder %s11091_s16, %s11087_s15  ;;  %p16446_p1 = scmp.eq.s32.totalorder %s11157_s19, 0 }
   0xc   : > { %p142_p3 = scmp.eq.s32.totalorder %s8376_s20, 1  ;;  %p8377_p5 = scmp.ge.s32.totalorder %s11099_s18, 1 }
   0xd   : > { %p11166_p4 = por %p16446_p1, %p44_p0  ;;  %p149_p7 = scmp.lt.s32.totalorder %s11099_s18, 3 }
   0xe   : > { %p11171_p6 = por %p142_p3, %p44_p0  ;;  %s11101_s24 = smov [#allocation7]  }
   0xf   : > { %s17244_s21 = scalar_select %p11166_p4, 1, 0 }
  0x10   : > { %s17245_s22 = scalar_select %p11171_p6, 1, 0 }
  0x11   : > { %p11176_p8 = pnand %p8377_p5, %p149_p7  ;;  %s161_s25 = sshll.u32 %s11101_s24, 4  ;;  %s11180_s25 = int_to_ptr.vmem [resolvable:$true] %s161_s25 }
  0x12   : > { %s11102_s27 = smov [#allocation8]   ;;  %s10905_s5 = scalar_lea.hbm %s16443_s2, 256 }
  0x13   : > { %p10826_p9 = pneg %p11176_p8  ;;  %s174_s28 = sshll.u32 %s11102_s27, 4  ;;  %s11191_s28 = int_to_ptr.vmem [resolvable:$true] %s174_s28 }
  0x14   : > { %p10906_p12 = scmp.ne.s32.totalorder %s16443_s2, %s10905_s5  ;;  %p10912_p5 = scmp.lt.u32.totalorder %s10905_s5, %s16443_s2 }
  0x15   : > { %p11187_p11 = pnand %p10826_p9, %p16446_p1 }
  0x17   : > { %p10907_p13 = pneg %p11187_p11 }
  0x19   : > { %p10908_p0 = pnand %p10907_p13, %p10906_p12 }
  0x1b   : > { %p10909_p3 = pneg %p10908_p0 }
  0x1d   : > { %p10914_p7 = pnand %p10912_p5, %p10909_p3 }
  0x1f   : > { %10917 = shalt.err (!%p10914_p7)
}
  0x20   : > { %s10918_s10 = scalar_lea.vmem %s11180_s25, 256  ;;  %p10926_p2 = scmp.lt.s32.totalorder %s11180_s25, %s11180_s25 }
  0x21   : > { %p10919_p9 = scmp.ne.s32.totalorder %s11180_s25, %s10918_s10  ;;  %p10927_p12 = scmp.lt.s32.totalorder %s10918_s10, %s10918_s10 }
  0x23   : > { %p10921_p10 = pnand %p10919_p9, %p10907_p13  ;;  %p10928_p0 = por %p10927_p12, %p10926_p2 }
  0x25   : > { %p10922_p1 = pneg %p10921_p10 }
  0x27   : > { %p10929_p6 = pnand %p10928_p0, %p10922_p1 }
  0x29   : > { %10932 = shalt.err (!%p10929_p6)
}
  0x2a   : > { %s16447_s11 = smov 128   ;;  %s16449_s12 = smov 8  }
  0x2b   : > { %10829 = dma.hbm_to_vmem [thread:$0]  (!%p11187_p11), %s16443_s2, 256, %s11180_s25, [#allocation6], %s16447_s11, %s16447_s11, %s16449_s12  }
  0x2c   : > { %s10933_s27 = scalar_lea.hbm %s16444_s3, 15360 }
  0x2d   : > { %p10934_p1 = scmp.ne.s32.totalorder %s16444_s3, %s10933_s27  ;;  %p10940_p10 = scmp.lt.u32.totalorder %s10933_s27, %s16444_s3 }
  0x2f   : > { %p10936_p2 = pnand %p10934_p1, %p10907_p13 }
  0x31   : > { %p10937_p6 = pneg %p10936_p2 }
  0x33   : > { %p10942_p3 = pnand %p10940_p10, %p10937_p6 }
  0x35   : > { %10945 = shalt.err (!%p10942_p3)
}
  0x36   : > { %s10946_s25 = scalar_lea.vmem %s11191_s28, 15360  ;;  %p10954_p12 = scmp.lt.s32.totalorder %s11191_s28, %s11191_s28 }
  0x37   : > { %p10947_p5 = scmp.ne.s32.totalorder %s11191_s28, %s10946_s25  ;;  %p10955_p0 = scmp.lt.s32.totalorder %s10946_s25, %s10946_s25 }
  0x39   : > { %p10949_p7 = pnand %p10947_p5, %p10907_p13  ;;  %p10956_p1 = por %p10955_p0, %p10954_p12 }
  0x3b   : > { %p10950_p9 = pneg %p10949_p7 }
  0x3d   : > { %p10957_p2 = pnand %p10956_p1, %p10950_p9 }
  0x3f   : > { %10960 = shalt.err (!%p10957_p2)
}
  0x40   : > { %s11105_s7 = smov 384   ;;  %s11106_s8 = smov 24  }
  0x41   : > { %10832 = dma.hbm_to_vmem [thread:$0]  (!%p11187_p11), %s16444_s3, 15360, %s11191_s28, [#allocation9], %s11105_s7, %s11105_s7, %s11106_s8  }
  0x42   : > { %s11249_s13 = sadd.s32 1, %s11099_s18   ;;  %s31_s20 = sadd.s32 1, %s11095_s17 }
  0x43   : > { %s28_s14 = ssub.s32 %s11099_s18, %s11249_s13  ;;  %p38_p6 = scmp.ne.s32.totalorder %s11095_s17, %s11091_s16 }
  0x44   : > { %p29_p13 = scmp.eq.s32.totalorder %s28_s14, 0  ;;  %p39_p10 = scmp.eq.s32.totalorder %s11099_s18, 0 }
  0x45   : > { %p17248_p5 = scmp.eq.s32.totalorder %s11157_s19, 1  ;;  %p10846_p9 = scmp.lt.s32.totalorder %s11099_s18, 2 }
  0x46   : > { %s11258_s24 = scalar_select %p29_p13, %s11095_s17, %s31_s20  }
  0x47   : > { %p40_p3 = por %p39_p10, %p38_p6  ;;  %p11262_p7 = por %p17248_p5, %p38_p6 }
  0x48   : > { %s188_s26 = sand.u32 1, %s11095_s17   ;;  %s8395_s28 = sshll.u32 %s11099_s18, 10 }
  0x49   : > { %s17249_s27 = scalar_select %p11262_p7, 1, 0 }
  0x4a   : > { %s8381_s29 = sshll.u32 %s188_s26, 6  ;;  %s17250_s0 = sld [smem:[#allocation307_spill]] }
  0x4b   : > { %s192_s25 = scalar_lea.vmem [#allocation2], %s8381_s29  ;;  %p11276_p11 = pnand %p10846_p9, %p40_p3 }
  0x4c   : > { %s199_s7 = sshll.u32 %s192_s25, 4  ;;  %s11283_s14 = scalar_lea.hbm %s16442_s1, %s8395_s28  ;;  %s11274_s7 = int_to_ptr.vmem [resolvable:$true] %s199_s7 }
  0x4d   : > { %s213_s20 = scalar_lea.vmem [#allocation5], %s8381_s29  ;;  %s11287_s5 = scalar_lea.sflag [#allocation3], %s188_s26 }
  0x4e   : > { %s11285_s30 = sshll.u32 %s213_s20, 4  ;;  %p10963_p0 = pneg %p11276_p11  ;;  %s11319_s30 = int_to_ptr.vmem [resolvable:$true] %s11285_s30 }
  0x50   : > { %s11272_s6 = scalar_lea.hbm %s17250_s0, %s8395_s28  ;;  %s10966_s9 = scalar_lea.hbm %s17250_s0, 2048 }
  0x51   : > { %s10961_s25 = scalar_lea.hbm %s11272_s6, 1024  ;;  %p10967_p13 = scmp.lt.u32.totalorder %s11272_s6, %s17250_s0 }
  0x52   : > { %p10962_p12 = scmp.ne.s32.totalorder %s11272_s6, %s10961_s25  ;;  %p10968_p6 = scmp.lt.u32.totalorder %s10966_s9, %s10961_s25 }
  0x53   : > { %p10970_p3 = scmp.lt.u32.totalorder %s10961_s25, %s11272_s6 }
  0x54   : > { %p10964_p1 = pnand %p10963_p0, %p10962_p12  ;;  %p10969_p10 = por %p10968_p6, %p10967_p13 }
  0x56   : > { %p10965_p2 = pneg %p10964_p1  ;;  %p10971_p5 = por %p10970_p3, %p10969_p10 }
  0x58   : > { %p10972_p9 = pnand %p10971_p5, %p10965_p2 }
  0x5a   : > { %10975 = shalt.err (!%p10972_p9)
}
  0x5b   : > { %s10976_s26 = scalar_lea.vmem %s11274_s7, 1024  ;;  %s11107_s11 = smov [#allocation2]  }
  0x5c   : > { %p10977_p12 = scmp.ne.s32.totalorder %s11274_s7, %s10976_s26  ;;  %s10981_s12 = sshll.u32 %s11107_s11, 4  ;;  %s10982_s12 = int_to_ptr.vmem [resolvable:$false] %s10981_s12 }
  0x5d   : > { %s10983_s29 = scalar_lea.vmem %s10982_s12, 2048  ;;  %p10984_p4 = scmp.lt.s32.totalorder %s11274_s7, %s10982_s12 }
  0x5e   : > { %p10979_p1 = pnand %p10977_p12, %p10963_p0  ;;  %p10985_p13 = scmp.lt.s32.totalorder %s10983_s29, %s10976_s26 }
  0x60   : > { %p10980_p7 = pneg %p10979_p1  ;;  %p10986_p6 = por %p10985_p13, %p10984_p4 }
  0x62   : > { %p10987_p10 = pnand %p10986_p6, %p10980_p7 }
  0x64   : > { %10990 = shalt.err (!%p10987_p10)
}
  0x65   : > { %s17252_s20 = smov 8   ;;  %s17253_s25 = smov 128  }
  0x66   : > { %10836 = dma.hbm_to_vmem [thread:$0]  (!%p11276_p11), %s11272_s6, 1024, %s11274_s7, %s11287_s5, %s17253_s25, %s17253_s25, %s17252_s20  }
  0x67   : > { %s209_s9 = sand.u32 1, %s11099_s18   ;;  %s10991_s28 = scalar_lea.hbm %s11283_s14, 1024 }
  0x68   : > { %s11322_s10 = scalar_lea.sflag [#allocation6], %s209_s9  ;;  %p10992_p4 = scmp.ne.s32.totalorder %s11283_s14, %s10991_s28 }
  0x69   : > { %s10996_s12 = scalar_lea.hbm %s16442_s1, 2048  ;;  %p10997_p3 = scmp.lt.u32.totalorder %s11283_s14, %s16442_s1 }
  0x6a   : > { %p10994_p7 = pnand %p10992_p4, %p10963_p0  ;;  %p10998_p5 = scmp.lt.u32.totalorder %s10996_s12, %s10991_s28 }
  0x6b   : > { %p11000_p12 = scmp.lt.u32.totalorder %s10991_s28, %s11283_s14 }
  0x6c   : > { %p10995_p2 = pneg %p10994_p7  ;;  %p10999_p9 = por %p10998_p5, %p10997_p3 }
  0x6e   : > { %p11001_p1 = por %p11000_p12, %p10999_p9 }
  0x70   : > { %p11002_p13 = pnand %p11001_p1, %p10995_p2 }
  0x72   : > { %11005 = shalt.err (!%p11002_p13)
}
  0x73   : > { %s11006_s6 = scalar_lea.vmem %s11319_s30, 1024  ;;  %s11108_s7 = smov [#allocation5]  }
  0x74   : > { %p11007_p6 = scmp.ne.s32.totalorder %s11319_s30, %s11006_s6  ;;  %s11011_s5 = sshll.u32 %s11108_s7, 4  ;;  %s11012_s5 = int_to_ptr.vmem [resolvable:$false] %s11011_s5 }
  0x75   : > { %s11013_s0 = scalar_lea.vmem %s11012_s5, 2048  ;;  %p11014_p7 = scmp.lt.s32.totalorder %s11319_s30, %s11012_s5 }
  0x76   : > { %p11009_p10 = pnand %p11007_p6, %p10963_p0  ;;  %p11015_p3 = scmp.lt.s32.totalorder %s11013_s0, %s11006_s6 }
  0x78   : > { %p11010_p4 = pneg %p11009_p10  ;;  %p11016_p5 = por %p11015_p3, %p11014_p7 }
  0x7a   : > { %p11017_p9 = pnand %p11016_p5, %p11010_p4 }
  0x7c   : > { %11020 = shalt.err (!%p11017_p9)
}
  0x7d   : > { %10839 = dma.hbm_to_vmem [thread:$0]  (!%p11276_p11), %s11283_s14, 1024, %s11319_s30, %s11322_s10, %s17253_s25, %s17253_s25, %s17252_s20  }
  0x7e   : > { %232 = sbr.rel (%p11176_p8) target bundleno = 2251 (0x8cb), region = 36 }
  0x85   : > { %s11354_s9 = sand.u32 1, %s11091_s16   ;;  %p17254_p0 = scmp.ne.s32.totalorder %s17244_s21, 0 }
  0x86   : > { %s8388_s28 = sshll.u32 %s11354_s9, 6  ;;  %s235_s26 = scalar_lea.sflag [#allocation3], %s11354_s9 }
  0x87   : > { %s11358_s11 = scalar_lea.vmem [#allocation2], %s8388_s28 }
  0x88   : > { %11066 = dma.done.wait (%p17254_p0), %s235_s26, 1024  }
  0x89   : > { %11068 = vsyncadd (%p17254_p0), %s235_s26, 4294966272  ;;  %s243_s8 = sand.u32 1, %s11157_s19   ;;  %s11365_s14 = scalar_lea.vmem [#allocation5], %s8388_s28 }
  0x8a   : > { %s244_s23 = scalar_lea.sflag [#allocation6], %s243_s8 }
  0x8b   : > { %11070 = dma.done.wait (%p17254_p0), %s244_s23, 1024  }
  0x8c   : > { %11072 = vsyncadd (%p17254_p0), %s244_s23, 4294966272  ;;  %p17255_p8 = scmp.eq.s32.totalorder %s11157_s19, 0 }
  0x8e   : > { %11074 = dma.done.wait (%p17255_p8), [#allocation6], 256   ;;  %p17256_p11 = pmov %p17255_p8 }
  0x8f   : > { %p17257_p2 = pmov %p17255_p8 }
  0x90   : > { %11076 = vsyncadd (%p17256_p11), [#allocation6], 4294967040 }
  0x91   : > { %11078 = dma.done.wait (%p17257_p2), [#allocation9], 15360   ;;  %p17258_p12 = pmov %p17257_p2 }
  0x92   : > { %vm326_vm0 = vcmask 130048   ;;  %v324_v0 = vld [vmem:[#allocation7] sm:$0xff]  ;;  %v325_v1 = vld [vmem:[#allocation7 + $0x8] sm:$0xff]  ;;  %v11388_v7 = vld [vmem:[%s11358_s11 + $0x10] sm:$0xff]  ;;  %vm2703_vm1 = vcmask 523264   ;;  %s283_s21 = scalar_lea.vmem [#allocation10], %s11354_s9 }
  0x93   : > { %11080 = vsyncadd (%p17258_p12), [#allocation9], 4294951936  ;;  %v11380_v2 = vld [vmem:[%s11358_s11] sm:$0xff]  ;;  %v448_v3 = vand.u32 4294901760, %v324_v0  ;;  %v451_v4 = vand.u32 4294901760, %v325_v1  ;;  %v11385_v6 = vld [vmem:[%s11358_s11 + $0x8] sm:$0xff] }
  0x94   : > { %v328_v5 = vsel %vm326_vm0, %v11380_v2, 0  ;;  %v11392_v8 = vmul.f32 %v11380_v2, %v11380_v2  ;;  %v331_v10 = vsel %vm326_vm0, %v11385_v6, 0  ;;  %v334_v11 = vsel %vm326_vm0, %v11388_v7, 0  ;;  %v11401_v12 = vld [vmem:[%s11358_s11 + $0x18] sm:$0xff]  ;;  %v11404_v13 = vld [vmem:[%s11358_s11 + $0x20] sm:$0xff]  ;;  %v11415_v18 = vld [vmem:[%s11358_s11 + $0x28] sm:$0xff] }
  0x95   : > { %v11394_v9 = vand.u32 4294901760, %v328_v5  ;;  %v11406_v14 = vpack.c.bf16 %v451_v4, %v448_v3  ;;  %v11408_v15 = vand.u32 4294901760, %v331_v10  ;;  %v11410_v16 = vsub.f32 %v324_v0, %v448_v3  ;;  %v11463_v39 = vld [vmem:[%s11358_s11 + $0x30] sm:$0xff]  ;;  %v11470_v44 = vld [vmem:[%s11365_s14] sm:$0xff]  ;;  %v11480_v49 = vld [vmem:[%s11358_s11 + $0x38] sm:$0xff]  ;;  %s8268_s30 = sshll.u32 %s283_s21, 4  ;;  %s16399_s30 = int_to_ptr.vmem [resolvable:$true] %s8268_s30 }
  0x96   : > { %v11412_v17 = vsub.f32 %v325_v1, %v451_v4  ;;  %v11420_v20 = vand.u32 4294901760, %v334_v11  ;;  %v337_v21 = vsel %vm326_vm0, %v11401_v12, 0  ;;  %v340_v22 = vsel %vm326_vm0, %v11404_v13, 0  ;;  %v11483_v50 = vld [vmem:[%s11365_s14 + $0x8] sm:$0xff]  ;;  %v11497_v59 = vld [vmem:[%s11365_s14 + $0x10] sm:$0xff]  ;;  %v11500_v60 = vld [vmem:[%s11365_s14 + $0x18] sm:$0xff] }
  0x97   : > { %v11418_v19 = vsub.f32 %v328_v5, %v11394_v9  ;;  %9778 = vmatprep.subr.bf16.mxu0 %v11406_v14  ;;  %v11428_v23 = vsub.f32 %v331_v10, %v11408_v15  ;;  %v16465_v24 = vand.u32 4294901760, %v11410_v16  ;;  %v11432_v26 = vand.u32 4294901760, %v337_v21  ;;  %v11517_v10 = vld [vmem:[%s11365_s14 + $0x20] sm:$0xff]  ;;  %s8392_s20 = sshll.u32 %s11157_s19, 4  ;;  %s8256_s7 = scalar_lea.sflag [#allocation4], %s11354_s9 }
  0x98   : > { %v16464_v25 = vand.u32 4294901760, %v11412_v17  ;;  %9780 = vmatpush3.bf16.msra.mxu0 %v11406_v14  ;;  %v11437_v28 = vsub.f32 %v334_v11, %v11420_v20  ;;  %v11439_v29 = vand.u32 4294901760, %v340_v22  ;;  %v343_v30 = vsel %vm326_vm0, %v11415_v18, 0  ;;  %s16397_s6 = scalar_lea.hbm %s16445_s4, %s8392_s20  ;;  %s11021_s5 = scalar_lea.vmem %s16399_s30, 16 }
  0x99   : > { %17259 = vst [vmem:[#allocation16_spill] sm:$0xff] %v11418_v19  ;;  %17260 = vst [vmem:[#allocation17_spill] sm:$0xff] %v11428_v23  ;;  %v16462_v27 = vand.u32 4294901760, %v11418_v19  ;;  %v16461_v31 = vand.u32 4294901760, %v11428_v23  ;;  %v918_v32 = vsub.f32 %v11410_v16, %v16465_v24  ;;  %v11451_v34 = vsub.f32 %v337_v21, %v11432_v26  ;;  %p11022_p1 = scmp.ne.s32.totalorder %s16399_s30, %s11021_s5  ;;  %p19154_p13 = scmp.ne.s32.totalorder %s17249_s27, 0 }
  0x9a   : > { %17261 = vst [vmem:[#allocation18_spill] sm:$0xff] %v11437_v28  ;;  %v925_v33 = vsub.f32 %v11412_v17, %v16464_v25  ;;  %v16459_v36 = vand.u32 4294901760, %v11437_v28  ;;  %v11458_v37 = vsub.f32 %v340_v22, %v11439_v29  ;;  %v11460_v38 = vand.u32 4294901760, %v343_v30  ;;  %s11110_s19 = smov [#allocation10]  }
  0x9b   : > { %17262 = vst [vmem:[#allocation19_spill] sm:$0xff] %v11451_v34  ;;  %v517_v35 = vsub.f32 %v11418_v19, %v16462_v27  ;;  %v527_v40 = vsub.f32 %v11428_v23, %v16461_v31  ;;  %v919_v41 = vand.u32 4294901760, %v918_v32  ;;  %v16456_v43 = vand.u32 4294901760, %v11451_v34  ;;  %p11023_p6 = pnand %p11022_p1, %p19154_p13  ;;  %s11025_s0 = sshll.u32 %s11110_s19, 4  ;;  %s11026_s0 = int_to_ptr.vmem [resolvable:$false] %s11025_s0 }
  0x9c   : > { %17263 = vst [vmem:[#allocation20_spill] sm:$0xff] %v11458_v37  ;;  %v926_v42 = vand.u32 4294901760, %v925_v33  ;;  %v537_v46 = vsub.f32 %v11437_v28, %v16459_v36  ;;  %v16455_v47 = vand.u32 4294901760, %v11458_v37  ;;  %v11477_v48 = vsub.f32 %v343_v30, %v11460_v38  ;;  %s11027_s28 = scalar_lea.vmem %s11026_s0, 32  ;;  %p11028_p4 = scmp.lt.s32.totalorder %s16399_s30, %s11026_s0 }
  0x9d   : > { %v518_v45 = vand.u32 4294901760, %v517_v35  ;;  %v528_v51 = vand.u32 4294901760, %v527_v40  ;;  %v547_v53 = vsub.f32 %v11451_v34, %v16456_v43  ;;  %v346_v54 = vsel %vm326_vm0, %v11463_v39, 0  ;;  %v11582_v43 = vld [vmem:[%s11365_s14 + $0x38] sm:$0xff]  ;;  %p11024_p10 = pneg %p11023_p6  ;;  %p11029_p7 = scmp.lt.s32.totalorder %s11027_s28, %s11021_s5 }
  0x9e   : > { %17264 = vst [vmem:[#allocation21_spill] sm:$0xff] %v11477_v48  ;;  %v9781_v52 = vpack.c.bf16 %v926_v42, %v919_v41  ;;  %v538_v55 = vand.u32 4294901760, %v537_v46  ;;  %v557_v56 = vsub.f32 %v11458_v37, %v16455_v47  ;;  %v16454_v57 = vand.u32 4294901760, %v11477_v48  ;;  %v11534_v41 = vld [vmem:[%s11365_s14 + $0x28] sm:$0xff] }
  0x9f   : > { %8941 = vmatprep.mubr.f32.mxu0 %v518_v45  ;;  %v11494_v58 = vand.u32 4294901760, %v346_v54  ;;  %v548_v61 = vand.u32 4294901760, %v547_v53  ;;  %v349_v62 = vsel %vm326_vm0, %v11480_v49, 0  ;;  %v352_v63 = vsel %vm326_vm0, %v11470_v44, 0  ;;  %p11030_p3 = por %p11029_p7, %p11028_p4 }
  0xa0   : > { %8942 = vmatmul.mubr.f32.vlgmr.msra.gmra.mrb[0].mxu0 %v528_v51  ;;  %9782 = vmatprep.subr.bf16.mxu0 %v9781_v52  ;;  %v355_v0 = vsel %vm326_vm0, %v11483_v50, 0  ;;  %v558_v1 = vand.u32 4294901760, %v557_v56  ;;  %v567_v3 = vsub.f32 %v11477_v48, %v16454_v57  ;;  %v11514_v5 = vand.u32 4294901760, %v349_v62 }
  0xa1   : > { %9784 = vmatpush3.bf16.msra.mxu0 %v9781_v52  ;;  %8944 = vmatprep.mubr.f32.mxu0 %v538_v55  ;;  %v11512_v4 = vsub.f32 %v346_v54, %v11494_v58  ;;  %v11519_v11 = vand.u32 4294901760, %v352_v63  ;;  %v11521_v21 = vand.u32 4294901760, %v355_v0  ;;  %v358_v22 = vsel %vm326_vm0, %v11497_v59, 0  ;;  %p11031_p5 = pnand %p11030_p3, %p11024_p10 }
  0xa2   : > { %v361_v30 = vsel %vm326_vm0, %v11500_v60, 0  ;;  %v568_v32 = vand.u32 4294901760, %v567_v3  ;;  %v11529_v35 = vsub.f32 %v349_v62, %v11514_v5  ;;  %v11531_v40 = vand.u32 4294901760, %v358_v22 }
  0xa3   : > { %17265 = vst [vmem:[#allocation22_spill] sm:$0xff] %v11512_v4  ;;  %v16453_v33 = vand.u32 4294901760, %v11512_v4  ;;  %v11537_v42 = vsub.f32 %v352_v63, %v11519_v11  ;;  %v11540_v45 = vsub.f32 %v355_v0, %v11521_v21  ;;  %v11542_v46 = vand.u32 4294901760, %v361_v30  ;;  %v11563_v0 = vld [vmem:[%s11365_s14 + $0x30] sm:$0xff] }
  0xa4   : > { %17266 = vst [vmem:[#allocation23_spill] sm:$0xff] %v11529_v35  ;;  %8945 = vmatmul.mubr.f32.gmra.mrb[2].mxu0 %v548_v61  ;;  %v364_v51 = vsel %vm326_vm0, %v11517_v10, 0  ;;  %v16457_v53 = vand.u32 4294901760, %v11529_v35  ;;  %v11551_v54 = vsub.f32 %v358_v22, %v11531_v40  ;;  %v367_v63 = vsel %vm326_vm0, %v11534_v41, 0 }
  0xa5   : > { %17267 = vst [vmem:[#allocation24_spill] sm:$0xff] %v11537_v42  ;;  %17268 = vst [vmem:[#allocation25_spill] sm:$0xff] %v11540_v45  ;;  %8947 = vmatprep.mubr.f32.mxu0 %v558_v1  ;;  %v577_v52 = vsub.f32 %v11512_v4, %v16453_v33  ;;  %v11553_v55 = vand.u32 4294901760, %v364_v51  ;;  %v16458_v56 = vand.u32 4294901760, %v11537_v42  ;;  %v16460_v61 = vand.u32 4294901760, %v11540_v45 }
  0xa6   : > { %17269 = vst [vmem:[#allocation26_spill] sm:$0xff] %v11551_v54  ;;  %v11558_v62 = vsub.f32 %v361_v30, %v11542_v46  ;;  %v587_v3 = vsub.f32 %v11529_v35, %v16457_v53  ;;  %v16463_v22 = vand.u32 4294901760, %v11551_v54  ;;  %v11579_v47 = vand.u32 4294901760, %v367_v63 }
  0xa7   : > { %v578_v1 = vand.u32 4294901760, %v577_v52  ;;  %v11570_v33 = vsub.f32 %v364_v51, %v11553_v55  ;;  %v597_v30 = vsub.f32 %v11537_v42, %v16458_v56  ;;  %v607_v57 = vsub.f32 %v11540_v45, %v16460_v61 }
  0xa8   : > { %17270 = vst [vmem:[#allocation27_spill] sm:$0xff] %v11558_v62  ;;  %8948 = vmatmul.mubr.f32.gmra.mrb[4].mxu0 %v568_v32  ;;  %v16466_v52 = vand.u32 4294901760, %v11558_v62  ;;  %v588_v53 = vand.u32 4294901760, %v587_v3  ;;  %v617_v32 = vsub.f32 %v11551_v54, %v16463_v22  ;;  %v370_v56 = vsel %vm326_vm0, %v11563_v0, 0 }
  0xa9   : > { %17271 = vst [vmem:[#allocation28_spill] sm:$0xff] %v11570_v33  ;;  %8950 = vmatprep.mubr.f32.mxu0 %v578_v1  ;;  %v16467_v51 = vand.u32 4294901760, %v11570_v33  ;;  %v598_v36 = vand.u32 4294901760, %v597_v30  ;;  %v11594_v31 = vsub.f32 %v367_v63, %v11579_v47  ;;  %v608_v27 = vand.u32 4294901760, %v607_v57 }
  0xaa   : > { %v627_v61 = vsub.f32 %v11558_v62, %v16466_v52  ;;  %v618_v1 = vand.u32 4294901760, %v617_v32  ;;  %v11596_v3 = vand.u32 4294901760, %v370_v56  ;;  %v373_v22 = vsel %vm326_vm0, %v11582_v43, 0 }
  0xab   : > { %17272 = vst [vmem:[#allocation29_spill] sm:$0xff] %v11594_v31  ;;  %v637_v25 = vsub.f32 %v11570_v33, %v16467_v51  ;;  %v16474_v30 = vand.u32 4294901760, %v11594_v31  ;;  %v11604_v24 = vand.u32 4294901760, %v373_v22  ;;  %v376_v63 = vsel %vm326_vm0, %v11392_v8, 0 }
  0xac   : > { %8951 = vmatmul.mubr.f32.gmra.mrb[6].mxu0 %v588_v53  ;;  %v628_v57 = vand.u32 4294901760, %v627_v61  ;;  %v11609_v32 = vsub.f32 %v370_v56, %v11596_v3  ;;  %v11611_v52 = vand.u32 4294901760, %v376_v63  ;;  %v301_v53 = vmul.f32 %v11385_v6, %v11385_v6 }
  0xad   : > { %8953 = vmatprep.mubr.f32.mxu0 %v598_v36  ;;  %v647_v51 = vsub.f32 %v11594_v31, %v16474_v30  ;;  %v11619_v33 = vsub.f32 %v373_v22, %v11604_v24  ;;  %v302_v8 = vmul.f32 %v11388_v7, %v11388_v7  ;;  %v303_v36 = vmul.f32 %v11401_v12, %v11401_v12 }
  0xae   : > { %17273 = vst [vmem:[#allocation30_spill] sm:$0xff] %v11609_v32  ;;  %17274 = vst [vmem:[#allocation31_spill] sm:$0xff] %v11611_v52  ;;  %v16485_v56 = vand.u32 4294901760, %v11609_v32  ;;  %v11627_v61 = vsub.f32 %v376_v63, %v11611_v52  ;;  %v379_v62 = vsel %vm326_vm0, %v301_v53, 0  ;;  %v304_v54 = vmul.f32 %v11404_v13, %v11404_v13 }
  0xaf   : > { %17275 = vst [vmem:[#allocation32_spill] sm:$0xff] %v11619_v33  ;;  %v638_v30 = vand.u32 4294901760, %v637_v25  ;;  %v11633_v31 = vand.u32 4294901760, %v379_v62  ;;  %v382_v45 = vsel %vm326_vm0, %v302_v8, 0  ;;  %v385_v53 = vsel %vm326_vm0, %v303_v36, 0 }
  0xb0   : > { %17276 = vst [vmem:[#allocation33_spill] sm:$0xff] %v11627_v61  ;;  %8954 = vmatmul.mubr.f32.gmra.mrb[8].mxu0 %v608_v27  ;;  %v657_v42 = vsub.f32 %v11609_v32, %v16485_v56  ;;  %v11640_v35 = vand.u32 4294901760, %v382_v45  ;;  %v11646_v25 = vand.u32 4294901760, %v385_v53  ;;  %v388_v22 = vsel %vm326_vm0, %v304_v54, 0 }
  0xb1   : > { %17277 = vst [vmem:[#allocation34_spill] sm:$0xff] %v11633_v31  ;;  %8956 = vmatprep.mubr.f32.mxu0 %v618_v1  ;;  %v11644_v27 = vsub.f32 %v379_v62, %v11633_v31  ;;  %v648_v4 = vand.u32 4294901760, %v647_v51  ;;  %v17281_v1 = vand.u32 4294901760, %v11619_v33  ;;  %v11655_v63 = vand.u32 4294901760, %v388_v22 }
  0xb2   : > { %17278 = vst [vmem:[#allocation35_spill] sm:$0xff] %v11640_v35  ;;  %17280 = vst [vmem:[#allocation37_spill] sm:$0xff] %v11646_v25  ;;  %v11653_v56 = vsub.f32 %v382_v45, %v11640_v35  ;;  %v17284_v36 = vand.u32 4294901760, %v11627_v61  ;;  %v11662_v48 = vsub.f32 %v385_v53, %v11646_v25  ;;  %v305_v54 = vmul.f32 %v11415_v18, %v11415_v18 }
  0xb3   : > { %17279 = vst [vmem:[#allocation36_spill] sm:$0xff] %v11644_v27  ;;  %v667_v8 = vsub.f32 %v11619_v33, %v17281_v1  ;;  %17283 = vst [vmem:[#allocation39_spill] sm:$0xff] %v11655_v63  ;;  %v658_v51 = vand.u32 4294901760, %v657_v42  ;;  %v11668_v1 = vsub.f32 %v388_v22, %v11655_v63  ;;  %v307_v53 = vmul.f32 %v11480_v49, %v11480_v49 }
  0xb4   : > { %17282 = vst [vmem:[#allocation38_spill] sm:$0xff] %v11653_v56  ;;  %8957 = vmatmul.mubr.f32.gmra.mrb[10].mxu0 %v628_v57  ;;  %v677_v62 = vsub.f32 %v11627_v61, %v17284_v36  ;;  %17285 = vst [vmem:[#allocation40_spill] sm:$0xff] %v11662_v48  ;;  %v306_v57 = vmul.f32 %v11463_v39, %v11463_v39  ;;  %v391_v32 = vsel %vm326_vm0, %v305_v54, 0  ;;  %v17287_v61 = vand.u32 4294901760, %v11644_v27 }
  0xb5   : > { %8959 = vmatprep.mubr.f32.mxu0 %v638_v30  ;;  %17286 = vst [vmem:[#allocation41_spill] sm:$0xff] %v11668_v1  ;;  %v11679_v42 = vand.u32 4294901760, %v391_v32  ;;  %v668_v22 = vand.u32 4294901760, %v667_v8  ;;  %v397_v36 = vsel %vm326_vm0, %v307_v53, 0  ;;  %v17290_v54 = vand.u32 4294901760, %v11653_v56 }
  0xb6   : > { %v687_v30 = vsub.f32 %v11644_v27, %v17287_v61  ;;  %v394_v45 = vsel %vm326_vm0, %v306_v57, 0  ;;  %v678_v33 = vand.u32 4294901760, %v677_v62  ;;  %v11692_v27 = vand.u32 4294901760, %v397_v36 }
  0xb7   : > { %17288 = vst [vmem:[#allocation42_spill] sm:$0xff] %v11679_v42  ;;  %v11682_v37 = vand.u32 4294901760, %v394_v45  ;;  %v697_v34 = vsub.f32 %v11653_v56, %v17290_v54  ;;  %v11690_v61 = vsub.f32 %v391_v32, %v11679_v42  ;;  %v309_v57 = vmul.f32 %v11483_v50, %v11483_v50 }
  0xb8   : > { %8960 = vmatmul.mubr.f32.gmra.mrb[12].mxu0 %v648_v4  ;;  %17292 = vst [vmem:[#allocation45_spill] sm:$0xff] %v11692_v27  ;;  %v17293_v4 = vand.u32 4294901760, %v11662_v48  ;;  %v688_v53 = vand.u32 4294901760, %v687_v30  ;;  %v11706_v32 = vsub.f32 %v397_v36, %v11692_v27  ;;  %v310_v28 = vmul.f32 %v11497_v59, %v11497_v59 }
  0xb9   : > { %17289 = vst [vmem:[#allocation43_spill] sm:$0xff] %v11682_v37  ;;  %8962 = vmatprep.mubr.f32.mxu0 %v658_v51  ;;  %17291 = vst [vmem:[#allocation44_spill] sm:$0xff] %v11690_v61  ;;  %v11698_v62 = vsub.f32 %v394_v45, %v11682_v37  ;;  %v308_v51 = vmul.f32 %v11470_v44, %v11470_v44  ;;  %v311_v56 = vmul.f32 %v11500_v60, %v11500_v60 }
  0xba   : > { %v707_v8 = vsub.f32 %v11662_v48, %v17293_v4  ;;  %17295 = vst [vmem:[#allocation47_spill] sm:$0xff] %v11706_v32  ;;  %v403_v48 = vsel %vm326_vm0, %v309_v57, 0  ;;  %v698_v30 = vand.u32 4294901760, %v697_v34  ;;  %v17296_v54 = vand.u32 4294901760, %v11668_v1 }
  0xbb   : > { %17294 = vst [vmem:[#allocation46_spill] sm:$0xff] %v11698_v62  ;;  %v400_v45 = vsel %vm326_vm0, %v308_v51, 0  ;;  %v11720_v19 = vand.u32 4294901760, %v403_v48  ;;  %v406_v4 = vsel %vm326_vm0, %v310_v28, 0  ;;  %v409_v51 = vsel %vm326_vm0, %v311_v56, 0 }
  0xbc   : > { %8963 = vmatmul.mubr.f32.gmra.mrb[14].mxu0 %v668_v22  ;;  %v717_v36 = vsub.f32 %v11668_v1, %v17296_v54  ;;  %v11718_v23 = vand.u32 4294901760, %v400_v45  ;;  %v708_v22 = vand.u32 4294901760, %v707_v8  ;;  %v312_v57 = vmul.f32 %v11517_v10, %v11517_v10 }
  0xbd   : > { %8965 = vmatprep.mubr.f32.mxu0 %v678_v33  ;;  %17298 = vst [vmem:[#allocation49_spill] sm:$0xff] %v11720_v19  ;;  %v17299_v27 = vand.u32 4294901760, %v11690_v61  ;;  %v17300_v33 = vand.u32 4294901760, %v11698_v62  ;;  %v11737_v28 = vsub.f32 %v403_v48, %v11720_v19  ;;  %v11739_v56 = vand.u32 4294901760, %v406_v4 }
  0xbe   : > { %17297 = vst [vmem:[#allocation48_spill] sm:$0xff] %v11718_v23  ;;  %v11734_v37 = vsub.f32 %v400_v45, %v11718_v23  ;;  %v11741_v8 = vand.u32 4294901760, %v409_v51  ;;  %v412_v42 = vsel %vm326_vm0, %v312_v57, 0  ;;  %v313_v45 = vmul.f32 %v11534_v41, %v11534_v41 }
  0xbf   : > { %v727_v34 = vsub.f32 %v11690_v61, %v17299_v27  ;;  %v737_v54 = vsub.f32 %v11698_v62, %v17300_v33  ;;  %17302 = vst [vmem:[#allocation51_spill] sm:$0xff] %v11739_v56  ;;  %v316_v27 = vmul.f32 %v11470_v44, %v11380_v2  ;;  %v718_v33 = vand.u32 4294901760, %v717_v36 }
  0xc0   : > { %17301 = vst [vmem:[#allocation50_spill] sm:$0xff] %v11734_v37  ;;  %8966 = vmatmul.mubr.f32.gmra.mrb[16].mxu0 %v688_v53  ;;  %17303 = vst [vmem:[#allocation52_spill] sm:$0xff] %v11741_v8  ;;  %v11747_v62 = vand.u32 4294901760, %v412_v42  ;;  %v11750_v53 = vsub.f32 %v406_v4, %v11739_v56  ;;  %v11753_v48 = vsub.f32 %v409_v51, %v11741_v8  ;;  %v17306_v2 = vand.u32 4294901760, %v11706_v32 }
  0xc1   : > { %8968 = vmatprep.mubr.f32.mxu0 %v698_v30  ;;  %v314_v57 = vmul.f32 %v11563_v0, %v11563_v0  ;;  %v728_v61 = vand.u32 4294901760, %v727_v34  ;;  %v315_v4 = vmul.f32 %v11582_v43, %v11582_v43  ;;  %v738_v36 = vand.u32 4294901760, %v737_v54 }
  0xc2   : > { %17304 = vst [vmem:[#allocation53_spill] sm:$0xff] %v11747_v62  ;;  %17305 = vst [vmem:[#allocation54_spill] sm:$0xff] %v11750_v53  ;;  %v747_v44 = vsub.f32 %v11706_v32, %v17306_v2  ;;  %v11763_v30 = vsub.f32 %v412_v42, %v11747_v62  ;;  %v415_v1 = vsel %vm326_vm0, %v313_v45, 0  ;;  %v17307_v34 = vand.u32 4294901760, %v11734_v37 }
  0xc3   : > { %v418_v8 = vsel %vm326_vm0, %v314_v57, 0  ;;  %v11775_v32 = vand.u32 4294901760, %v415_v1  ;;  %v421_v51 = vsel %vm326_vm0, %v315_v4, 0  ;;  %v424_v57 = vsel %vm326_vm0, %v316_v27, 0 }
  0xc4   : > { %8969 = vmatmul.mubr.f32.gmra.mrb[18].mxu0 %v708_v22  ;;  %v757_v56 = vsub.f32 %v11734_v37, %v17307_v34  ;;  %v11778_v54 = vand.u32 4294901760, %v418_v8  ;;  %v748_v34 = vand.u32 4294901760, %v747_v44  ;;  %v17311_v2 = vand.u32 4294901760, %v11737_v28 }
  0xc5   : > { %8971 = vmatprep.mubr.f32.mxu0 %v718_v33  ;;  %17308 = vst [vmem:[#allocation55_spill] sm:$0xff] %v11775_v32  ;;  %v11782_v45 = vsub.f32 %v415_v1, %v11775_v32  ;;  %v11784_v33 = vand.u32 4294901760, %v421_v51  ;;  %v11793_v22 = vand.u32 4294901760, %v424_v57  ;;  %v17313_v1 = vand.u32 4294901760, %v11750_v53 }
  0xc6   : > { %17309 = vst [vmem:[#allocation56_spill] sm:$0xff] %v11778_v54  ;;  %v767_v42 = vsub.f32 %v11737_v28, %v17311_v2  ;;  %v11791_v37 = vsub.f32 %v418_v8, %v11778_v54  ;;  %v758_v4 = vand.u32 4294901760, %v757_v56  ;;  %v17314_v62 = vand.u32 4294901760, %v11753_v48 }
  0xc7   : > { %17310 = vst [vmem:[#allocation57_spill] sm:$0xff] %v11784_v33  ;;  %17312 = vst [vmem:[#allocation58_spill] sm:$0xff] %v11793_v22  ;;  %v777_v32 = vsub.f32 %v11750_v53, %v17313_v1  ;;  %v317_v27 = vmul.f32 %v11483_v50, %v11385_v6  ;;  %v17315_v44 = vand.u32 4294901760, %v11763_v30  ;;  %v318_v56 = vmul.f32 %v11497_v59, %v11388_v7 }
  0xc8   : > { %8972 = vmatmul.mubr.f32.gmra.mrb[20].mxu0 %v728_v61  ;;  %v787_v61 = vsub.f32 %v11753_v48, %v17314_v62  ;;  %v11813_v53 = vsub.f32 %v421_v51, %v11784_v33  ;;  %v320_v6 = vmul.f32 %v11517_v10, %v11404_v13  ;;  %v768_v50 = vand.u32 4294901760, %v767_v42 }
  0xc9   : > { %8974 = vmatprep.mubr.f32.mxu0 %v738_v36  ;;  %v797_v8 = vsub.f32 %v11763_v30, %v17315_v44  ;;  %v319_v36 = vmul.f32 %v11500_v60, %v11401_v12  ;;  %v427_v62 = vsel %vm326_vm0, %v317_v27, 0  ;;  %v11819_v44 = vsub.f32 %v424_v57, %v11793_v22 }
  0xca   : > { %v11821_v2 = vand.u32 4294901760, %v427_v62  ;;  %v430_v7 = vsel %vm326_vm0, %v318_v56, 0  ;;  %v778_v12 = vand.u32 4294901760, %v777_v32  ;;  %v788_v51 = vand.u32 4294901760, %v787_v61 }
  0xcb   : > { %v11824_v59 = vand.u32 4294901760, %v430_v7  ;;  %v433_v60 = vsel %vm326_vm0, %v319_v36, 0  ;;  %v798_v27 = vand.u32 4294901760, %v797_v8  ;;  %v17318_v1 = vand.u32 4294901760, %v11782_v45 }
  0xcc   : > { %8975 = vmatmul.mubr.f32.gmra.mrb[22].mxu0 %v748_v34  ;;  %17316 = vst [vmem:[#allocation59_spill] sm:$0xff] %v11821_v2  ;;  %v17319_v10 = vand.u32 4294901760, %v11791_v37  ;;  %v16538_v57 = vand.u32 4294901760, %v11813_v53  ;;  %v436_v34 = vsel %vm326_vm0, %v320_v6, 0  ;;  %v321_v32 = vmul.f32 %v11534_v41, %v11415_v18 }
  0xcd   : > { %8977 = vmatprep.mubr.f32.mxu0 %v758_v4  ;;  %17317 = vst [vmem:[#allocation60_spill] sm:$0xff] %v11824_v59  ;;  %v807_v13 = vsub.f32 %v11782_v45, %v17318_v1  ;;  %v16536_v4 = vand.u32 4294901760, %v11819_v44  ;;  %v11839_v61 = vsub.f32 %v427_v62, %v11821_v2  ;;  %v11842_v8 = vsub.f32 %v430_v7, %v11824_v59 }
  0xce   : > { %v817_v42 = vsub.f32 %v11791_v37, %v17319_v10  ;;  %v11844_v56 = vand.u32 4294901760, %v433_v60  ;;  %v11846_v36 = vand.u32 4294901760, %v436_v34  ;;  %v439_v1 = vsel %vm326_vm0, %v321_v32, 0 }
  0xcf   : > { %v322_v6 = vmul.f32 %v11563_v0, %v11463_v39  ;;  %v323_v18 = vmul.f32 %v11582_v43, %v11480_v49  ;;  %v808_v41 = vand.u32 4294901760, %v807_v13  ;;  %v827_v62 = vsub.f32 %v11813_v53, %v16538_v57 }
  0xd0   : > { %8978 = vmatmul.mubr.f32.gmra.mrb[24].mxu0 %v768_v50  ;;  %17320 = vst [vmem:[#allocation61_spill] sm:$0xff] %v11844_v56  ;;  %17321 = vst [vmem:[#allocation62_spill] sm:$0xff] %v11846_v36  ;;  %v818_v50 = vand.u32 4294901760, %v817_v42  ;;  %v837_v10 = vsub.f32 %v11819_v44, %v16536_v4  ;;  %v16537_v39 = vand.u32 4294901760, %v11839_v61  ;;  %v11864_v43 = vsub.f32 %v433_v60, %v11844_v56 }
  0xd1   : > { %8980 = vmatprep.mubr.f32.mxu0 %v778_v12  ;;  %v442_v7 = vsel %vm326_vm0, %v322_v6, 0  ;;  %v9785_v12 = vpack.c.bf16 %v11412_v17, %v11410_v16  ;;  %v11866_v49 = vand.u32 4294901760, %v439_v1  ;;  %v16539_v0 = vand.u32 4294901760, %v11842_v8 }
  0xd2   : > { %17322 = vst [vmem:[#allocation63_spill] sm:$0xff] %v11864_v43  ;;  %v11870_v13 = vsub.f32 %v436_v34, %v11846_v36  ;;  %v11872_v42 = vand.u32 4294901760, %v442_v7  ;;  %v828_v32 = vand.u32 4294901760, %v827_v62  ;;  %v847_v60 = vsub.f32 %v11839_v61, %v16537_v39 }
  0xd3   : > { %17323 = vst [vmem:[#allocation64_spill] sm:$0xff] %v11866_v49  ;;  %9786 = vmatprep.subr.bf16.mxu0 %v9785_v12  ;;  %v16540_v6 = vand.u32 4294901760, %v11864_v43  ;;  %v838_v34 = vand.u32 4294901760, %v837_v10 }
  0xd4   : > { %8981 = vmatmul.mubr.f32.gmra.mrb[26].mxu0 %v788_v51  ;;  %17324 = vst [vmem:[#allocation65_spill] sm:$0xff] %v11872_v42  ;;  %v445_v51 = vsel %vm326_vm0, %v323_v18, 0  ;;  %v857_v18 = vsub.f32 %v11842_v8, %v16539_v0  ;;  %v16546_v62 = vand.u32 4294901760, %v11870_v13  ;;  %v848_v39 = vand.u32 4294901760, %v847_v60 }
  0xd5   : > { %8983 = vmatprep.mubr.f32.mxu0 %v798_v27  ;;  %v11880_v27 = vsub.f32 %v439_v1, %v11866_v49  ;;  %v11882_v4 = vand.u32 4294901760, %v445_v51  ;;  %v867_v1 = vsub.f32 %v11864_v43, %v16540_v6 }
  0xd6   : > { %v858_v10 = vand.u32 4294901760, %v857_v18  ;;  %v877_v0 = vsub.f32 %v11870_v13, %v16546_v62  ;;  %v17339_v62 = vld [vmem:[#allocation20_spill] sm:$0xff] }
  0xd7   : > { %17325 = vst [vmem:[#allocation66_spill] sm:$0xff] %v11882_v4  ;;  %v16545_v57 = vand.u32 4294901760, %v11880_v27 }
  0xd8   : > { %8984 = vmatmul.mubr.f32.gmra.mrb[28].mxu0 %v808_v41  ;;  %v11889_v41 = vsub.f32 %v442_v7, %v11872_v42  ;;  %v878_v43 = vand.u32 4294901760, %v877_v0  ;;  %v17328_v0 = vld [vmem:[#allocation45_spill] sm:$0xff] }
  0xd9   : > { %8986 = vmatprep.mubr.f32.mxu0 %v818_v50  ;;  %v11896_v50 = vsub.f32 %v445_v51, %v11882_v4  ;;  %v887_v60 = vsub.f32 %v11880_v27, %v16545_v57  ;;  %v17338_v57 = vld [vmem:[#allocation19_spill] sm:$0xff] }
  0xda   : > { %v16544_v7 = vand.u32 4294901760, %v11889_v41 }
  0xdb   : > { %v16543_v6 = vand.u32 4294901760, %v11896_v50 }
  0xdc   : > { %8987 = vmatmul.mubr.f32.gmra.mrb[30].mxu0 %v828_v32  ;;  %v868_v32 = vand.u32 4294901760, %v867_v1  ;;  %v897_v51 = vsub.f32 %v11889_v41, %v16544_v7  ;;  %v17337_v7 = vld [vmem:[#allocation18_spill] sm:$0xff] }
  0xdd   : > { %8989 = vmatprep.mubr.f32.mxu0 %v838_v34  ;;  %v888_v34 = vand.u32 4294901760, %v887_v60  ;;  %v907_v18 = vsub.f32 %v11896_v50, %v16543_v6  ;;  %v17331_v60 = vld [vmem:[#allocation53_spill] sm:$0xff] }
  0xde   : > { %v17336_v6 = vld [vmem:[#allocation17_spill] sm:$0xff] }
  0xdf   : > { %v908_v1 = vand.u32 4294901760, %v907_v18  ;;  %v17334_v18 = vand.u32 4294901760, %v11410_v16  ;;  %v17343_v16 = vld [vmem:[#allocation24_spill] sm:$0xff] }
  0xe0   : > { %8990 = vmatmul.mubr.f32.gmra.mrb[32].mxu0 %v848_v39  ;;  %v898_v39 = vand.u32 4294901760, %v897_v51  ;;  %v17332_v51 = vld [vmem:[#allocation55_spill] sm:$0xff] }
  0xe1   : > { %8992 = vmatprep.mubr.f32.mxu0 %v858_v10  ;;  %v17329_v10 = vld [vmem:[#allocation51_spill] sm:$0xff] }
  0xe4   : > { %8993 = vmatmul.mubr.f32.gmra.mrb[34].mxu0 %v868_v32  ;;  %v17330_v32 = vld [vmem:[#allocation52_spill] sm:$0xff] }
  0xe5   : > { %8995 = vmatprep.mubr.f32.mxu0 %v878_v43  ;;  %v17327_v43 = vld [vmem:[#allocation43_spill] sm:$0xff] }
  0xe8   : > { %8996 = vmatmul.mubr.f32.gmra.mrb[36].mxu0 %v888_v34  ;;  %v17333_v34 = vld [vmem:[#allocation16_spill] sm:$0xff] }
  0xe9   : > { %8998 = vmatprep.mubr.f32.mxu0 %v898_v39  ;;  %v17335_v39 = vand.u32 4294901760, %v11412_v17  ;;  %v17344_v17 = vld [vmem:[#allocation25_spill] sm:$0xff] }
  0xec   : > { %8999 = vmatmul.mubr.f32.gmra.mrb[38].mxu0 %v908_v1  ;;  %v9793_v1 = vpack.c.bf16 %v17335_v39, %v17334_v18  ;;  %v17345_v18 = vld [vmem:[#allocation26_spill] sm:$0xff]  ;;  %v17346_v39 = vld [vmem:[#allocation27_spill] sm:$0xff] }
  0xed   : > { %9005 = vmatprep.mubr.f32.mxu0 %v11394_v9 }
  0xf0   : > { %9006 = vmatmul.mubr.f32.vlgmr.msra.gmra.mrb[0].mxu0 %v11408_v15 }
  0xf1   : > { %9788 = vmatpush3.bf16.msra.mxu0 %v9785_v12  ;;  %9008 = vmatprep.mubr.f32.mxu0 %v11420_v20  ;;  %v17326_v12 = vld [vmem:[#allocation42_spill] sm:$0xff] }
  0xf2   : > { %9790 = vmatprep.subr.bf16.mxu0 %v11406_v14 }
  0xf4   : > { %9009 = vmatmul.mubr.f32.gmra.mrb[2].mxu0 %v11432_v26 }
  0xf5   : > { %9011 = vmatprep.mubr.f32.mxu0 %v11439_v29 }
  0xf8   : > { %9012 = vmatmul.mubr.f32.gmra.mrb[4].mxu0 %v11460_v38 }
  0xf9   : > { %9014 = vmatprep.mubr.f32.mxu0 %v11494_v58 }
  0xfc   : > { %9015 = vmatmul.mubr.f32.gmra.mrb[6].mxu0 %v11514_v5 }
  0xfd   : > { %9017 = vmatprep.mubr.f32.mxu0 %v11519_v11 }
 0x100   : > { %9018 = vmatmul.mubr.f32.gmra.mrb[8].mxu0 %v11521_v21 }
 0x101   : > { %9020 = vmatprep.mubr.f32.mxu0 %v11531_v40 }
 0x104   : > { %9021 = vmatmul.mubr.f32.gmra.mrb[10].mxu0 %v11542_v46 }
 0x105   : > { %9023 = vmatprep.mubr.f32.mxu0 %v11553_v55 }
 0x108   : > { %9024 = vmatmul.mubr.f32.gmra.mrb[12].mxu0 %v11579_v47 }
 0x109   : > { %9026 = vmatprep.mubr.f32.mxu0 %v11596_v3 }
 0x10c   : > { %9027 = vmatmul.mubr.f32.gmra.mrb[14].mxu0 %v11604_v24 }
 0x10d   : > { %9029 = vmatprep.mubr.f32.mxu0 %v11611_v52 }
 0x110   : > { %9030 = vmatmul.mubr.f32.gmra.mrb[16].mxu0 %v11633_v31  ;;  %v17366_v31 = vand.u32 4294901760, %v17339_v62 }
 0x111   : > { %9032 = vmatprep.mubr.f32.mxu0 %v11640_v35  ;;  %v17365_v35 = vand.u32 4294901760, %v17338_v57 }
 0x114   : > { %9033 = vmatmul.mubr.f32.gmra.mrb[18].mxu0 %v11646_v25  ;;  %v17364_v25 = vand.u32 4294901760, %v17337_v7 }
 0x115   : > { %9035 = vmatprep.mubr.f32.mxu0 %v11655_v63  ;;  %v17363_v63 = vand.u32 4294901760, %v17336_v6 }
 0x118   : > { %9036 = vmatmul.mubr.f32.gmra.mrb[20].mxu0 %v17326_v12  ;;  %v17362_v12 = vand.u32 4294901760, %v17333_v34 }
 0x119   : > { %9038 = vmatprep.mubr.f32.mxu0 %v17327_v43  ;;  %v17361_v43 = vld [vmem:[#allocation63_spill] sm:$0xff] }
 0x11c   : > { %9039 = vmatmul.mubr.f32.gmra.mrb[22].mxu0 %v17328_v0  ;;  %v17360_v0 = vld [vmem:[#allocation54_spill] sm:$0xff] }
 0x11d   : > { %9041 = vmatprep.mubr.f32.mxu0 %v11718_v23  ;;  %v17359_v23 = vld [vmem:[#allocation50_spill] sm:$0xff] }
 0x120   : > { %9042 = vmatmul.mubr.f32.gmra.mrb[24].mxu0 %v11720_v19  ;;  %v17358_v19 = vld [vmem:[#allocation47_spill] sm:$0xff] }
 0x121   : > { %9044 = vmatprep.mubr.f32.mxu0 %v17329_v10  ;;  %v17357_v10 = vld [vmem:[#allocation46_spill] sm:$0xff] }
 0x124   : > { %9045 = vmatmul.mubr.f32.gmra.mrb[26].mxu0 %v17330_v32  ;;  %v17356_v32 = vld [vmem:[#allocation44_spill] sm:$0xff] }
 0x125   : > { %9047 = vmatprep.mubr.f32.mxu0 %v17331_v60  ;;  %v17355_v60 = vld [vmem:[#allocation41_spill] sm:$0xff] }
 0x128   : > { %9048 = vmatmul.mubr.f32.gmra.mrb[28].mxu0 %v17332_v51  ;;  %v17354_v51 = vld [vmem:[#allocation40_spill] sm:$0xff] }
 0x129   : > { %9050 = vmatprep.mubr.f32.mxu0 %v11778_v54  ;;  %v17353_v54 = vld [vmem:[#allocation38_spill] sm:$0xff] }
 0x12c   : > { %9051 = vmatmul.mubr.f32.gmra.mrb[30].mxu0 %v11784_v33  ;;  %v17352_v33 = vld [vmem:[#allocation36_spill] sm:$0xff] }
 0x12d   : > { %9053 = vmatprep.mubr.f32.mxu0 %v11793_v22  ;;  %v17351_v22 = vld [vmem:[#allocation33_spill] sm:$0xff] }
 0x130   : > { %9054 = vmatmul.mubr.f32.gmra.mrb[32].mxu0 %v11821_v2  ;;  %v17350_v2 = vld [vmem:[#allocation32_spill] sm:$0xff] }
 0x131   : > { %9056 = vmatprep.mubr.f32.mxu0 %v11824_v59  ;;  %v17349_v59 = vld [vmem:[#allocation30_spill] sm:$0xff] }
 0x134   : > { %9057 = vmatmul.mubr.f32.gmra.mrb[34].mxu0 %v11844_v56  ;;  %v17348_v56 = vld [vmem:[#allocation29_spill] sm:$0xff] }
 0x135   : > { %9059 = vmatprep.mubr.f32.mxu0 %v11846_v36  ;;  %v17347_v36 = vld [vmem:[#allocation28_spill] sm:$0xff] }
 0x138   : > { %9060 = vmatmul.mubr.f32.gmra.mrb[36].mxu0 %v11866_v49  ;;  %v17342_v49 = vld [vmem:[#allocation23_spill] sm:$0xff] }
 0x139   : > { %9062 = vmatprep.mubr.f32.mxu0 %v11872_v42  ;;  %v17340_v42 = vld [vmem:[#allocation21_spill] sm:$0xff] }
 0x13a   : > { %v17367_v52 = vand.u32 4294901760, %v17340_v42 }
 0x13c   : > { %9063 = vmatmul.mubr.f32.gmra.mrb[38].mxu0 %v11882_v4  ;;  %v17341_v4 = vld [vmem:[#allocation22_spill] sm:$0xff] }
 0x13d   : > { %9069 = vmatprep.mubr.f32.mxu0 %v17333_v34  ;;  %v17410_v34 = vld [vmem:[#allocation48_spill] sm:$0xff] }
 0x140   : > { %9070 = vmatmul.mubr.f32.vlgmr.msra.gmra.mrb[0].mxu0 %v17336_v6  ;;  %v17370_v6 = vand.u32 4294901760, %v17343_v16 }
 0x141   : > { %9792 = vmatpush3.bf16.msra.mxu0 %v11406_v14  ;;  %9072 = vmatprep.mubr.f32.mxu0 %v17337_v7  ;;  %v17380_v7 = vand.u32 4294901760, %v17353_v54 }
 0x142   : > { %9794 = vmatprep.subr.bf16.mxu0 %v9793_v1 }
 0x144   : > { %9073 = vmatmul.mubr.f32.gmra.mrb[2].mxu0 %v17338_v57  ;;  %v17375_v57 = vand.u32 4294901760, %v17348_v56 }
 0x145   : > { %9075 = vmatprep.mubr.f32.mxu0 %v17339_v62  ;;  %v17379_v62 = vand.u32 4294901760, %v17352_v33 }
 0x148   : > { %9076 = vmatmul.mubr.f32.gmra.mrb[4].mxu0 %v17340_v42  ;;  %v17378_v42 = vand.u32 4294901760, %v17351_v22 }
 0x149   : > { %9078 = vmatprep.mubr.f32.mxu0 %v17341_v4 }
 0x14c   : > { %9079 = vmatmul.mubr.f32.gmra.mrb[6].mxu0 %v17342_v49 }
 0x14d   : > { %9081 = vmatprep.mubr.f32.mxu0 %v17343_v16  ;;  %v17412_v16 = vld [vmem:[#allocation51_spill] sm:$0xff] }
 0x150   : > { %9082 = vmatmul.mubr.f32.gmra.mrb[8].mxu0 %v17344_v17 }
 0x151   : > { %9084 = vmatprep.mubr.f32.mxu0 %v17345_v18 }
 0x154   : > { %9085 = vmatmul.mubr.f32.gmra.mrb[10].mxu0 %v17346_v39 }
 0x155   : > { %9087 = vmatprep.mubr.f32.mxu0 %v17347_v36 }
 0x158   : > { %9088 = vmatmul.mubr.f32.gmra.mrb[12].mxu0 %v17348_v56  ;;  %v17382_v56 = vand.u32 4294901760, %v17355_v60 }
 0x159   : > { %9090 = vmatprep.mubr.f32.mxu0 %v17349_v59 }
 0x15c   : > { %9091 = vmatmul.mubr.f32.gmra.mrb[14].mxu0 %v17350_v2 }
 0x15d   : > { %9093 = vmatprep.mubr.f32.mxu0 %v17351_v22  ;;  %v17385_v22 = vand.u32 4294901760, %v17358_v19 }
 0x160   : > { %9094 = vmatmul.mubr.f32.gmra.mrb[16].mxu0 %v17352_v33  ;;  %v17386_v33 = vand.u32 4294901760, %v17359_v23 }
 0x161   : > { %9096 = vmatprep.mubr.f32.mxu0 %v17353_v54  ;;  %v17387_v54 = vand.u32 4294901760, %v11737_v28 }
 0x164   : > { %9097 = vmatmul.mubr.f32.gmra.mrb[18].mxu0 %v17354_v51 }
 0x165   : > { %9099 = vmatprep.mubr.f32.mxu0 %v17355_v60  ;;  %v17389_v60 = vand.u32 4294901760, %v11753_v48 }
 0x168   : > { %9100 = vmatmul.mubr.f32.gmra.mrb[20].mxu0 %v17356_v32 }
 0x169   : > { %9102 = vmatprep.mubr.f32.mxu0 %v17357_v10 }
 0x16c   : > { %9103 = vmatmul.mubr.f32.gmra.mrb[22].mxu0 %v17358_v19  ;;  %v17392_v19 = vand.u32 4294901760, %v11791_v37 }
 0x16d   : > { %9105 = vmatprep.mubr.f32.mxu0 %v17359_v23  ;;  %v17393_v23 = vand.u32 4294901760, %v11813_v53 }
 0x170   : > { %9106 = vmatmul.mubr.f32.gmra.mrb[24].mxu0 %v11737_v28  ;;  %v17394_v28 = vand.u32 4294901760, %v11819_v44 }
 0x171   : > { %9108 = vmatprep.mubr.f32.mxu0 %v17360_v0 }
 0x174   : > { %9109 = vmatmul.mubr.f32.gmra.mrb[26].mxu0 %v11753_v48  ;;  %v17396_v48 = vand.u32 4294901760, %v11842_v8 }
 0x175   : > { %9111 = vmatprep.mubr.f32.mxu0 %v11763_v30 }
 0x178   : > { %9112 = vmatmul.mubr.f32.gmra.mrb[28].mxu0 %v11782_v45 }
 0x179   : > { %9114 = vmatprep.mubr.f32.mxu0 %v11791_v37  ;;  %v17399_v37 = vand.u32 4294901760, %v11880_v27 }
 0x17c   : > { %9115 = vmatmul.mubr.f32.gmra.mrb[30].mxu0 %v11813_v53  ;;  %v17400_v53 = vand.u32 4294901760, %v11889_v41 }
 0x17d   : > { %9117 = vmatprep.mubr.f32.mxu0 %v11819_v44  ;;  %v17401_v44 = vand.u32 4294901760, %v11896_v50 }
 0x180   : > { %9118 = vmatmul.mubr.f32.gmra.mrb[32].mxu0 %v11839_v61 }
 0x181   : > { %9120 = vmatprep.mubr.f32.mxu0 %v11842_v8  ;;  %v17404_v8 = vld [vmem:[#allocation35_spill] sm:$0xff] }
 0x184   : > { %9121 = vmatmul.mubr.f32.gmra.mrb[34].mxu0 %v17361_v43 }
 0x185   : > { %9123 = vmatprep.mubr.f32.mxu0 %v11870_v13 }
 0x188   : > { %9124 = vmatmul.mubr.f32.gmra.mrb[36].mxu0 %v11880_v27  ;;  %v17406_v27 = vld [vmem:[#allocation39_spill] sm:$0xff] }
 0x189   : > { %9126 = vmatprep.mubr.f32.mxu0 %v11889_v41  ;;  %v17407_v41 = vld [vmem:[#allocation42_spill] sm:$0xff] }
 0x18c   : > { %9127 = vmatmul.mubr.f32.gmra.mrb[38].mxu0 %v11896_v50  ;;  %v17408_v50 = vld [vmem:[#allocation43_spill] sm:$0xff] }
 0x18d   : > { %9133 = vmatprep.mubr.f32.mxu0 %v17362_v12  ;;  %v17368_v12 = vand.u32 4294901760, %v17341_v4  ;;  %v17376_v4 = vand.u32 4294901760, %v17349_v59  ;;  %v17383_v59 = vand.u32 4294901760, %v17356_v32  ;;  %v17390_v32 = vand.u32 4294901760, %v11763_v30 }
 0x18e   : > { %v17397_v30 = vand.u32 4294901760, %v17361_v43  ;;  %v17409_v43 = vld [vmem:[#allocation45_spill] sm:$0xff] }
 0x190   : > { %9134 = vmatmul.mubr.f32.vlgmr.msra.gmra.mrb[0].mxu0 %v17363_v63  ;;  %v17369_v63 = vand.u32 4294901760, %v17342_v49  ;;  %v17377_v49 = vand.u32 4294901760, %v17350_v2  ;;  %v17384_v2 = vand.u32 4294901760, %v17357_v10  ;;  %v17391_v10 = vand.u32 4294901760, %v11782_v45 }
 0x191   : > { %9796 = vmatpush3.bf16.msra.mxu0 %v9793_v1  ;;  %9136 = vmatprep.mubr.f32.mxu0 %v17364_v25  ;;  %v17371_v25 = vand.u32 4294901760, %v17344_v17  ;;  %v17398_v45 = vand.u32 4294901760, %v11870_v13  ;;  %v17405_v13 = vld [vmem:[#allocation37_spill] sm:$0xff]  ;;  %v17413_v17 = vld [vmem:[#allocation52_spill] sm:$0xff] }
 0x192   : > { %9798 = vmatprep.subr.bf16.mxu0 %v11406_v14  ;;  %v17411_v1 = vld [vmem:[#allocation49_spill] sm:$0xff] }
 0x194   : > { %9137 = vmatmul.mubr.f32.gmra.mrb[2].mxu0 %v17365_v35  ;;  %v17372_v35 = vand.u32 4294901760, %v17345_v18  ;;  %v17414_v18 = vld [vmem:[#allocation53_spill] sm:$0xff] }
 0x195   : > { %9139 = vmatprep.mubr.f32.mxu0 %v17366_v31  ;;  %v17373_v31 = vand.u32 4294901760, %v17346_v39  ;;  %v17415_v39 = vld [vmem:[#allocation55_spill] sm:$0xff] }
 0x198   : > { %9140 = vmatmul.mubr.f32.gmra.mrb[4].mxu0 %v17367_v52  ;;  %v17374_v52 = vand.u32 4294901760, %v17347_v36  ;;  %v17381_v36 = vand.u32 4294901760, %v17354_v51  ;;  %v17388_v51 = vand.u32 4294901760, %v17360_v0  ;;  %v17395_v0 = vand.u32 4294901760, %v11839_v61  ;;  %v17403_v61 = vld [vmem:[#allocation34_spill] sm:$0xff] }
 0x199   : > { %9142 = vmatprep.mubr.f32.mxu0 %v17368_v12  ;;  %v17416_v12 = vld [vmem:[#allocation56_spill] sm:$0xff] }
 0x19c   : > { %9143 = vmatmul.mubr.f32.gmra.mrb[6].mxu0 %v17369_v63  ;;  %v17417_v63 = vld [vmem:[#allocation57_spill] sm:$0xff] }
 0x19d   : > { %9145 = vmatprep.mubr.f32.mxu0 %v17370_v6  ;;  %v17418_v6 = vld [vmem:[#allocation58_spill] sm:$0xff] }
 0x1a0   : > { %9146 = vmatmul.mubr.f32.gmra.mrb[8].mxu0 %v17371_v25  ;;  %v17419_v25 = vld [vmem:[#allocation59_spill] sm:$0xff] }
 0x1a1   : > { %9148 = vmatprep.mubr.f32.mxu0 %v17372_v35  ;;  %v17420_v35 = vld [vmem:[#allocation60_spill] sm:$0xff] }
 0x1a4   : > { %9149 = vmatmul.mubr.f32.gmra.mrb[10].mxu0 %v17373_v31  ;;  %v17421_v31 = vld [vmem:[#allocation61_spill] sm:$0xff] }
 0x1a5   : > { %9151 = vmatprep.mubr.f32.mxu0 %v17374_v52  ;;  %v17422_v52 = vld [vmem:[#allocation62_spill] sm:$0xff] }
 0x1a8   : > { %9152 = vmatmul.mubr.f32.gmra.mrb[12].mxu0 %v17375_v57  ;;  %v17423_v57 = vld [vmem:[#allocation64_spill] sm:$0xff] }
 0x1a9   : > { %9154 = vmatprep.mubr.f32.mxu0 %v17376_v4  ;;  %v17424_v4 = vld [vmem:[#allocation65_spill] sm:$0xff] }
 0x1ac   : > { %9155 = vmatmul.mubr.f32.gmra.mrb[14].mxu0 %v17377_v49  ;;  %v17425_v49 = vld [vmem:[#allocation66_spill] sm:$0xff] }
 0x1ad   : > { %9157 = vmatprep.mubr.f32.mxu0 %v17378_v42 }
 0x1b0   : > { %9158 = vmatmul.mubr.f32.gmra.mrb[16].mxu0 %v17379_v62 }
 0x1b1   : > { %9160 = vmatprep.mubr.f32.mxu0 %v17380_v7 }
 0x1b4   : > { %9161 = vmatmul.mubr.f32.gmra.mrb[18].mxu0 %v17381_v36  ;;  %v2587_v36 = vld [vmem:[#allocation8 + $0x20] sm:$0xff] }
 0x1b5   : > { %9163 = vmatprep.mubr.f32.mxu0 %v17382_v56  ;;  %v2608_v56 = vld [vmem:[#allocation8 + $0xc8] sm:$0xff] }
 0x1b8   : > { %9164 = vmatmul.mubr.f32.gmra.mrb[20].mxu0 %v17383_v59  ;;  %v2586_v59 = vld [vmem:[#allocation8 + $0x18] sm:$0xff] }
 0x1b9   : > { %9166 = vmatprep.mubr.f32.mxu0 %v17384_v2  ;;  %v12190_v2 = vand.u32 4294901760, %v2587_v36 }
 0x1bb   : > { %17434 = vst [vmem:[#allocation24_spill] sm:$0xff] %v12190_v2 }
 0x1bc   : > { %9167 = vmatmul.mubr.f32.gmra.mrb[22].mxu0 %v17385_v22  ;;  %v2607_v22 = vld [vmem:[#allocation8 + $0xc0] sm:$0xff] }
 0x1bd   : > { %9169 = vmatprep.mubr.f32.mxu0 %v17386_v33  ;;  %v2590_v33 = vld [vmem:[#allocation8 + $0x38] sm:$0xff] }
 0x1c0   : > { %9170 = vmatmul.mubr.f32.gmra.mrb[24].mxu0 %v17387_v54 }
 0x1c1   : > { %9172 = vmatprep.mubr.f32.mxu0 %v17388_v51 }
 0x1c4   : > { %9173 = vmatmul.mubr.f32.gmra.mrb[26].mxu0 %v17389_v60  ;;  %v12194_v60 = vand.u32 4294901760, %v2608_v56 }
 0x1c5   : > { %9175 = vmatprep.mubr.f32.mxu0 %v17390_v32  ;;  %v12196_v32 = vand.u32 4294901760, %v2586_v59 }
 0x1c6   : > { %17435 = vst [vmem:[#allocation25_spill] sm:$0xff] %v12194_v60 }
 0x1c7   : > { %17436 = vst [vmem:[#allocation26_spill] sm:$0xff] %v12196_v32 }
 0x1c8   : > { %9176 = vmatmul.mubr.f32.gmra.mrb[28].mxu0 %v17391_v10  ;;  %v12198_v10 = vand.u32 4294901760, %v2607_v22 }
 0x1c9   : > { %9178 = vmatprep.mubr.f32.mxu0 %v17392_v19  ;;  %v12200_v19 = vand.u32 4294901760, %v2590_v33 }
 0x1ca   : > { %17437 = vst [vmem:[#allocation27_spill] sm:$0xff] %v12198_v10 }
 0x1cb   : > { %17438 = vst [vmem:[#allocation28_spill] sm:$0xff] %v12200_v19 }
 0x1cc   : > { %9179 = vmatmul.mubr.f32.gmra.mrb[30].mxu0 %v17393_v23  ;;  %v2611_v23 = vld [vmem:[#allocation8 + $0xe0] sm:$0xff] }
 0x1cd   : > { %9181 = vmatprep.mubr.f32.mxu0 %v17394_v28  ;;  %v2589_v28 = vld [vmem:[#allocation8 + $0x30] sm:$0xff] }
 0x1d0   : > { %9182 = vmatmul.mubr.f32.gmra.mrb[32].mxu0 %v17395_v0  ;;  %v2610_v0 = vld [vmem:[#allocation8 + $0xd8] sm:$0xff] }
 0x1d1   : > { %9184 = vmatprep.mubr.f32.mxu0 %v17396_v48  ;;  %v12203_v48 = vsub.f32 %v2587_v36, %v12190_v2 }
 0x1d3   : > { %17439 = vst [vmem:[#allocation29_spill] sm:$0xff] %v12203_v48 }
 0x1d4   : > { %9185 = vmatmul.mubr.f32.gmra.mrb[34].mxu0 %v17397_v30  ;;  %v2593_v30 = vld [vmem:[#allocation8 + $0x50] sm:$0xff] }
 0x1d5   : > { %9187 = vmatprep.mubr.f32.mxu0 %v17398_v45 }
 0x1d8   : > { %9188 = vmatmul.mubr.f32.gmra.mrb[36].mxu0 %v17399_v37 }
 0x1d9   : > { %9190 = vmatprep.mubr.f32.mxu0 %v17400_v53  ;;  %v12216_v53 = vsub.f32 %v2608_v56, %v12194_v60 }
 0x1db   : > { %17440 = vst [vmem:[#allocation30_spill] sm:$0xff] %v12216_v53 }
 0x1dc   : > { %9191 = vmatmul.mubr.f32.gmra.mrb[38].mxu0 %v17401_v44  ;;  %v2614_v44 = vld [vmem:[#allocation8 + $0xf8] sm:$0xff] }
 0x1dd   : > { %9197 = vmatprep.mubr.f32.mxu0 %v11394_v9 }
 0x1e0   : > { %9198 = vmatmul.mubr.f32.vlgmr.msra.gmra.mrb[0].mxu0 %v11408_v15 }
 0x1e1   : > { %9800 = vmatpush3.bf16.msra.mxu0 %v11406_v14  ;;  %9200 = vmatprep.mubr.f32.mxu0 %v11420_v20  ;;  %v17402_v14 = vld [vmem:[#allocation31_spill] sm:$0xff] }
 0x1e4   : > { %9201 = vmatmul.mubr.f32.gmra.mrb[2].mxu0 %v11432_v26 }
 0x1e5   : > { %9203 = vmatprep.mubr.f32.mxu0 %v11439_v29 }
 0x1e8   : > { %9204 = vmatmul.mubr.f32.gmra.mrb[4].mxu0 %v11460_v38 }
 0x1e9   : > { %9206 = vmatprep.mubr.f32.mxu0 %v11494_v58 }
 0x1ec   : > { %9207 = vmatmul.mubr.f32.gmra.mrb[6].mxu0 %v11514_v5 }
 0x1ed   : > { %9209 = vmatprep.mubr.f32.mxu0 %v11519_v11 }
 0x1f0   : > { %9210 = vmatmul.mubr.f32.gmra.mrb[8].mxu0 %v11521_v21 }
 0x1f1   : > { %9212 = vmatprep.mubr.f32.mxu0 %v11531_v40 }
 0x1f4   : > { %9213 = vmatmul.mubr.f32.gmra.mrb[10].mxu0 %v11542_v46 }
 0x1f5   : > { %9215 = vmatprep.mubr.f32.mxu0 %v11553_v55 }
 0x1f8   : > { %9216 = vmatmul.mubr.f32.gmra.mrb[12].mxu0 %v11579_v47 }
 0x1f9   : > { %9218 = vmatprep.mubr.f32.mxu0 %v11596_v3 }
 0x1fc   : > { %9219 = vmatmul.mubr.f32.gmra.mrb[14].mxu0 %v11604_v24 }
 0x1fd   : > { %9221 = vmatprep.mubr.f32.mxu0 %v17402_v14 }
 0x200   : > { %9222 = vmatmul.mubr.f32.gmra.mrb[16].mxu0 %v17403_v61 }
 0x201   : > { %9224 = vmatprep.mubr.f32.mxu0 %v17404_v8 }
 0x204   : > { %9225 = vmatmul.mubr.f32.gmra.mrb[18].mxu0 %v17405_v13 }
 0x205   : > { %9227 = vmatprep.mubr.f32.mxu0 %v17406_v27 }
 0x208   : > { %9228 = vmatmul.mubr.f32.gmra.mrb[20].mxu0 %v17407_v41 }
 0x209   : > { %9230 = vmatprep.mubr.f32.mxu0 %v17408_v50 }
 0x20c   : > { %9231 = vmatmul.mubr.f32.gmra.mrb[22].mxu0 %v17409_v43 }
 0x20d   : > { %9233 = vmatprep.mubr.f32.mxu0 %v17410_v34 }
 0x210   : > { %9234 = vmatmul.mubr.f32.gmra.mrb[24].mxu0 %v17411_v1 }
 0x211   : > { %9236 = vmatprep.mubr.f32.mxu0 %v17412_v16 }
 0x214   : > { %9237 = vmatmul.mubr.f32.gmra.mrb[26].mxu0 %v17413_v17 }
 0x215   : > { %9239 = vmatprep.mubr.f32.mxu0 %v17414_v18 }
 0x218   : > { %9240 = vmatmul.mubr.f32.gmra.mrb[28].mxu0 %v17415_v39 }
 0x219   : > { %9242 = vmatprep.mubr.f32.mxu0 %v17416_v12 }
 0x21c   : > { %9243 = vmatmul.mubr.f32.gmra.mrb[30].mxu0 %v17417_v63 }
 0x21d   : > { %9245 = vmatprep.mubr.f32.mxu0 %v17418_v6 }
 0x220   : > { %9246 = vmatmul.mubr.f32.gmra.mrb[32].mxu0 %v17419_v25 }
 0x221   : > { %9248 = vmatprep.mubr.f32.mxu0 %v17420_v35 }
 0x224   : > { %9249 = vmatmul.mubr.f32.gmra.mrb[34].mxu0 %v17421_v31 }
 0x225   : > { %9251 = vmatprep.mubr.f32.mxu0 %v17422_v52 }
 0x228   : > { %9252 = vmatmul.mubr.f32.gmra.mrb[36].mxu0 %v17423_v57 }
 0x229   : > { %9254 = vmatprep.mubr.f32.mxu0 %v17424_v4 }
 0x22c   : > { %9255 = vmatmul.mubr.f32.gmra.mrb[38].mxu0 %v17425_v49 }
 0x22d   : > { %9261 = vmatprep.mubr.f32.mxu0 %v11394_v9  ;;  %v16593_v9 = vmov 0.0|0.0  }
 0x22e   : > { %9801 = vmatprep.subr.bf16.mxu0 %v16593_v9  ;;  %10185 = vmatprep.subr.bf16.mxu1 %v16593_v9  ;;  %v2619_v9 = vld [vmem:[#allocation8 + $0x120] sm:$0xff] }
 0x230   : > { %9262 = vmatmul.mubr.f32.vlgmr.msra.gmra.mrb[0].mxu0 %v11408_v15  ;;  %v2584_v15 = vld [vmem:[#allocation8 + $0x8] sm:$0xff] }
 0x231   : > { %9264 = vmatprep.mubr.f32.mxu0 %v11420_v20  ;;  %v2605_v20 = vld [vmem:[#allocation8 + $0xb0] sm:$0xff] }
 0x234   : > { %9265 = vmatmul.mubr.f32.gmra.mrb[2].mxu0 %v11432_v26  ;;  %v12164_v26 = vand.u32 4294901760, %v2605_v20 }
 0x235   : > { %9267 = vmatprep.mubr.f32.mxu0 %v11439_v29 }
 0x236   : > { %17427 = vst [vmem:[#allocation17_spill] sm:$0xff] %v12164_v26 }
 0x238   : > { %9268 = vmatmul.mubr.f32.gmra.mrb[4].mxu0 %v11460_v38  ;;  %v12170_v38 = vsub.f32 %v2605_v20, %v12164_v26 }
 0x239   : > { %9270 = vmatprep.mubr.f32.mxu0 %v11494_v58 }
 0x23a   : > { %17429 = vst [vmem:[#allocation19_spill] sm:$0xff] %v12170_v38  ;;  %v16583_v58 = vand.u32 4294901760, %v12170_v38 }
 0x23c   : > { %9271 = vmatmul.mubr.f32.gmra.mrb[6].mxu0 %v11514_v5 }
 0x23d   : > { %9273 = vmatprep.mubr.f32.mxu0 %v11519_v11  ;;  %v3028_v11 = vsub.f32 %v12170_v38, %v16583_v58 }
 0x240   : > { %9274 = vmatmul.mubr.f32.gmra.mrb[8].mxu0 %v11521_v21 }
 0x241   : > { %9276 = vmatprep.mubr.f32.mxu0 %v11531_v40  ;;  %v3029_v40 = vand.u32 4294901760, %v3028_v11 }
 0x243   : > { %3030 = vmatprep.mubr.f32.mxu1 %v3029_v40 }
 0x244   : > { %9277 = vmatmul.mubr.f32.gmra.mrb[10].mxu0 %v11542_v46  ;;  %v2583_v46 = vld [vmem:[#allocation8] sm:$0xff] }
 0x245   : > { %9279 = vmatprep.mubr.f32.mxu0 %v11553_v55  ;;  %v2604_v55 = vld [vmem:[#allocation8 + $0xa8] sm:$0xff] }
 0x246   : > { %v12182_v42 = vand.u32 4294901760, %v2604_v55 }
 0x248   : > { %9280 = vmatmul.mubr.f32.gmra.mrb[12].mxu0 %v11579_v47  ;;  %17431 = vst [vmem:[#allocation21_spill] sm:$0xff] %v12182_v42  ;;  %v12188_v7 = vsub.f32 %v2604_v55, %v12182_v42  ;;  %v2597_v42 = vld [vmem:[#allocation8 + $0x70] sm:$0xff] }
 0x249   : > { %9282 = vmatprep.mubr.f32.mxu0 %v11596_v3  ;;  %v12180_v3 = vand.u32 4294901760, %v2583_v46 }
 0x24a   : > { %17433 = vst [vmem:[#allocation23_spill] sm:$0xff] %v12188_v7  ;;  %v16582_v51 = vand.u32 4294901760, %v12188_v7 }
 0x24b   : > { %17430 = vst [vmem:[#allocation20_spill] sm:$0xff] %v12180_v3  ;;  %v12185_v62 = vsub.f32 %v2583_v46, %v12180_v3 }
 0x24c   : > { %9283 = vmatmul.mubr.f32.gmra.mrb[14].mxu0 %v11604_v24  ;;  %v12162_v24 = vand.u32 4294901760, %v2584_v15  ;;  %v12213_v37 = vsub.f32 %v12188_v7, %v16582_v51  ;;  %v2585_v7 = vld [vmem:[#allocation8 + $0x10] sm:$0xff] }
 0x24d   : > { %9285 = vmatprep.mubr.f32.mxu0 %v17402_v14  ;;  %17432 = vst [vmem:[#allocation22_spill] sm:$0xff] %v12185_v62  ;;  %v16588_v54 = vand.u32 4294901760, %v12185_v62  ;;  %v2592_v14 = vld [vmem:[#allocation8 + $0x48] sm:$0xff] }
 0x24e   : > { %17426 = vst [vmem:[#allocation16_spill] sm:$0xff] %v12162_v24  ;;  %v12167_v29 = vsub.f32 %v2584_v15, %v12162_v24 }
 0x24f   : > { %v12208_v45 = vsub.f32 %v12185_v62, %v16588_v54 }
 0x250   : > { %9286 = vmatmul.mubr.f32.gmra.mrb[16].mxu0 %v17403_v61  ;;  %17428 = vst [vmem:[#allocation18_spill] sm:$0xff] %v12167_v29  ;;  %v16589_v47 = vand.u32 4294901760, %v12167_v29  ;;  %v12219_v61 = vsub.f32 %v2586_v59, %v12196_v32 }
 0x251   : > { %9288 = vmatprep.mubr.f32.mxu0 %v17404_v8  ;;  %v12221_v8 = vand.u32 4294901760, %v2611_v23 }
 0x252   : > { %v2923_v5 = vsub.f32 %v12167_v29, %v16589_v47  ;;  %17441 = vst [vmem:[#allocation32_spill] sm:$0xff] %v12219_v61 }
 0x253   : > { %17442 = vst [vmem:[#allocation33_spill] sm:$0xff] %v12221_v8 }
 0x254   : > { %9289 = vmatmul.mubr.f32.gmra.mrb[18].mxu0 %v17405_v13  ;;  %v2924_v21 = vand.u32 4294901760, %v2923_v5  ;;  %v12223_v13 = vand.u32 4294901760, %v2589_v28 }
 0x255   : > { %9291 = vmatprep.mubr.f32.mxu0 %v17406_v27  ;;  %v12225_v27 = vand.u32 4294901760, %v2610_v0 }
 0x256   : > { %17443 = vst [vmem:[#allocation36_spill] sm:$0xff] %v12223_v13 }
 0x257   : > { %17444 = vst [vmem:[#allocation38_spill] sm:$0xff] %v12225_v27 }
 0x258   : > { %9292 = vmatmul.mubr.f32.gmra.mrb[20].mxu0 %v17407_v41  ;;  %v2613_v41 = vld [vmem:[#allocation8 + $0xf0] sm:$0xff] }
 0x259   : > { %9294 = vmatprep.mubr.f32.mxu0 %v17408_v50  ;;  %v12228_v50 = vsub.f32 %v2607_v22, %v12198_v10  ;;  %v2594_v10 = vld [vmem:[#allocation8 + $0x58] sm:$0xff] }
 0x25b   : > { %17445 = vst [vmem:[#allocation40_spill] sm:$0xff] %v12228_v50  ;;  %v16585_v15 = vand.u32 4294901760, %v12228_v50 }
 0x25c   : > { %9295 = vmatmul.mubr.f32.gmra.mrb[22].mxu0 %v17409_v43  ;;  %v12231_v43 = vsub.f32 %v2590_v33, %v12200_v19 }
 0x25d   : > { %9297 = vmatprep.mubr.f32.mxu0 %v17410_v34  ;;  %v12233_v34 = vand.u32 4294901760, %v2593_v30 }
 0x25e   : > { %17446 = vst [vmem:[#allocation41_spill] sm:$0xff] %v12231_v43  ;;  %v16587_v20 = vand.u32 4294901760, %v12231_v43 }
 0x25f   : > { %17447 = vst [vmem:[#allocation44_spill] sm:$0xff] %v12233_v34  ;;  %v12258_v5 = vsub.f32 %v2593_v30, %v12233_v34  ;;  %v12298_v30 = vsub.f32 %v12228_v50, %v16585_v15 }
 0x260   : > { %9298 = vmatmul.mubr.f32.gmra.mrb[24].mxu0 %v17411_v1  ;;  %v16586_v1 = vand.u32 4294901760, %v12203_v48 }
 0x261   : > { %9300 = vmatprep.mubr.f32.mxu0 %v17412_v16  ;;  %v12236_v16 = vand.u32 4294901760, %v2614_v44  ;;  %17454 = vst [vmem:[#allocation34_spill] sm:$0xff] %v12258_v5 }
 0x263   : > { %17448 = vst [vmem:[#allocation46_spill] sm:$0xff] %v12236_v16  ;;  %v12268_v40 = vsub.f32 %v2614_v44, %v12236_v16  ;;  %v12303_v44 = vsub.f32 %v12231_v43, %v16587_v20 }
 0x264   : > { %9301 = vmatmul.mubr.f32.gmra.mrb[26].mxu0 %v17413_v17  ;;  %v12238_v17 = vand.u32 4294901760, %v2592_v14 }
 0x265   : > { %9303 = vmatprep.mubr.f32.mxu0 %v17414_v18  ;;  %v2596_v18 = vld [vmem:[#allocation8 + $0x68] sm:$0xff]  ;;  %17456 = vst [vmem:[#allocation37_spill] sm:$0xff] %v12268_v40  ;;  %v16596_v51 = vand.u32 4294901760, %v12268_v40 }
 0x266   : > { %17449 = vst [vmem:[#allocation47_spill] sm:$0xff] %v12238_v17  ;;  %v12260_v11 = vand.u32 4294901760, %v2596_v18  ;;  %v12271_v46 = vsub.f32 %v2592_v14, %v12238_v17  ;;  %v16595_v14 = vand.u32 4294901760, %v12258_v5  ;;  %v2606_v17 = vld [vmem:[#allocation8 + $0xb8] sm:$0xff] }
 0x267   : > { %v2726_v24 = vsel %vm2703_vm1, %v2606_v17, 0 }
 0x268   : > { %9304 = vmatmul.mubr.f32.gmra.mrb[28].mxu0 %v17415_v39  ;;  %17455 = vst [vmem:[#allocation35_spill] sm:$0xff] %v12260_v11  ;;  %17457 = vst [vmem:[#allocation39_spill] sm:$0xff] %v12271_v46  ;;  %v16601_v58 = vand.u32 4294901760, %v12271_v46  ;;  %v2598_v39 = vld [vmem:[#allocation8 + $0x78] sm:$0xff] }
 0x269   : > { %9306 = vmatprep.mubr.f32.mxu0 %v17416_v12  ;;  %v12380_v12 = vand.u32 4294901760, %v2619_v9 }
 0x26b   : > { %17470 = vst [vmem:[#allocation58_spill] sm:$0xff] %v12380_v12 }
 0x26c   : > { %9307 = vmatmul.mubr.f32.gmra.mrb[30].mxu0 %v17417_v63  ;;  %v16581_v63 = vand.u32 4294901760, %v12216_v53 }
 0x26d   : > { %9309 = vmatprep.mubr.f32.mxu0 %v17418_v6  ;;  %v12243_v6 = vand.u32 4294901760, %v2613_v41 }
 0x26e   : > { %v12278_v36 = vsub.f32 %v12216_v53, %v16581_v63 }
 0x26f   : > { %17450 = vst [vmem:[#allocation50_spill] sm:$0xff] %v12243_v6  ;;  %v12281_v56 = vsub.f32 %v2613_v41, %v12243_v6  ;;  %v12307_v41 = vsub.f32 %v2596_v18, %v12260_v11  ;;  %v2599_v18 = vld [vmem:[#allocation8 + $0x80] sm:$0xff] }
 0x270   : > { %9310 = vmatmul.mubr.f32.gmra.mrb[32].mxu0 %v17419_v25  ;;  %v2617_v25 = vld [vmem:[#allocation8 + $0x110] sm:$0xff]  ;;  %v12358_v15 = vand.u32 4294901760, %v2599_v18 }
 0x271   : > { %9312 = vmatprep.mubr.f32.mxu0 %v17420_v35  ;;  %v16584_v35 = vand.u32 4294901760, %v12219_v61  ;;  %v12273_v55 = vand.u32 4294901760, %v2617_v25  ;;  %17459 = vst [vmem:[#allocation43_spill] sm:$0xff] %v12281_v56  ;;  %17462 = vst [vmem:[#allocation49_spill] sm:$0xff] %v12307_v41  ;;  %v17469_v53 = vand.u32 4294901760, %v12307_v41 }
 0x272   : > { %17466 = vst [vmem:[#allocation55_spill] sm:$0xff] %v12358_v15  ;;  %v12390_v50 = vsub.f32 %v2599_v18, %v12358_v15  ;;  %v2626_v18 = vld [vmem:[#allocation8 + $0x158] sm:$0xff] }
 0x273   : > { %17458 = vst [vmem:[#allocation42_spill] sm:$0xff] %v12273_v55  ;;  %v12290_v33 = vsub.f32 %v12219_v61, %v16584_v35  ;;  %v12313_v35 = vsub.f32 %v2617_v25, %v12273_v55 }
 0x274   : > { %9313 = vmatmul.mubr.f32.gmra.mrb[34].mxu0 %v17421_v31  ;;  %v12247_v31 = vsub.f32 %v2611_v23, %v12221_v8  ;;  %17472 = vst [vmem:[#allocation59_spill] sm:$0xff] %v12390_v50  ;;  %v17493_v16 = vand.u32 4294901760, %v12390_v50 }
 0x275   : > { %9315 = vmatprep.mubr.f32.mxu0 %v17422_v52  ;;  %v12250_v52 = vsub.f32 %v2589_v28, %v12223_v13  ;;  %17463 = vst [vmem:[#allocation51_spill] sm:$0xff] %v12313_v35  ;;  %v17471_v47 = vand.u32 4294901760, %v12313_v35 }
 0x276   : > { %17451 = vst [vmem:[#allocation54_spill] sm:$0xff] %v12247_v31  ;;  %v16590_v23 = vand.u32 4294901760, %v12247_v31  ;;  %v12461_v55 = vsub.f32 %v12390_v50, %v17493_v16 }
 0x277   : > { %17452 = vst [vmem:[#allocation63_spill] sm:$0xff] %v12250_v52  ;;  %v16591_v28 = vand.u32 4294901760, %v12250_v52  ;;  %v12387_v38 = vsub.f32 %v12313_v35, %v17471_v47  ;;  %v2622_v35 = vld [vmem:[#allocation8 + $0x138] sm:$0xff] }
 0x278   : > { %9316 = vmatmul.mubr.f32.gmra.mrb[36].mxu0 %v17423_v57  ;;  %v12253_v57 = vsub.f32 %v2610_v0, %v12225_v27  ;;  %v12327_v63 = vsub.f32 %v12247_v31, %v16590_v23  ;;  %v12344_v23 = vsub.f32 %v12258_v5, %v16595_v14  ;;  %v12372_v31 = vand.u32 4294901760, %v2598_v39 }
 0x279   : > { %9318 = vmatprep.mubr.f32.mxu0 %v17424_v4  ;;  %v2595_v4 = vld [vmem:[#allocation8 + $0x60] sm:$0xff]  ;;  %v12332_v25 = vsub.f32 %v12250_v52, %v16591_v28  ;;  %v12350_v28 = vsub.f32 %v12268_v40, %v16596_v51  ;;  %v2602_v51 = vld [vmem:[#allocation8 + $0x98] sm:$0xff] }
 0x27a   : > { %17453 = vst [vmem:[#allocation31_spill] sm:$0xff] %v12253_v57  ;;  %v12283_v59 = vand.u32 4294901760, %v2595_v4  ;;  %v16592_v0 = vand.u32 4294901760, %v12253_v57  ;;  %17468 = vst [vmem:[#allocation57_spill] sm:$0xff] %v12372_v31  ;;  %v12407_v43 = vsub.f32 %v2598_v39, %v12372_v31  ;;  %v12409_v61 = vand.u32 4294901760, %v2602_v51 }
 0x27c   : > { %9319 = vmatmul.mubr.f32.gmra.mrb[38].mxu0 %v17425_v49  ;;  %v2616_v49 = vld [vmem:[#allocation8 + $0x108] sm:$0xff]  ;;  %17460 = vst [vmem:[#allocation45_spill] sm:$0xff] %v12283_v59  ;;  %v12318_v20 = vsub.f32 %v2595_v4, %v12283_v59  ;;  %v12337_v4 = vsub.f32 %v12253_v57, %v16592_v0  ;;  %v12355_v0 = vsub.f32 %v12271_v46, %v16601_v58  ;;  %17476 = vst [vmem:[#allocation61_spill] sm:$0xff] %v12407_v43  ;;  %v2635_v59 = vld [vmem:[#allocation8 + $0x1a0] sm:$0xff] }
 0x27d   : > { %2925 = vmatprep.mubr.f32.mxu0 %v2924_v21  ;;  %v12265_v21 = vsub.f32 %v12203_v48, %v16586_v1  ;;  %v12285_v22 = vand.u32 4294901760, %v2616_v49  ;;  %v16608_v1 = vand.u32 4294901760, %v12281_v56  ;;  %17477 = vst [vmem:[#allocation62_spill] sm:$0xff] %v12409_v61  ;;  %v2591_v48 = vld [vmem:[#allocation8 + $0x40] sm:$0xff]  ;;  %v12620_v2 = vand.u32 4294901760, %v2635_v59 }
 0x27e   : > { %17464 = vst [vmem:[#allocation52_spill] sm:$0xff] %v12318_v20  ;;  %v17473_v5 = vand.u32 4294901760, %v12318_v20 }
 0x27f   : > { %17461 = vst [vmem:[#allocation48_spill] sm:$0xff] %v12285_v22  ;;  %v12321_v54 = vsub.f32 %v2616_v49, %v12285_v22  ;;  %v2620_v49 = vld [vmem:[#allocation8 + $0x128] sm:$0xff]  ;;  %v12363_v14 = vsub.f32 %v12281_v56, %v16608_v1  ;;  %v12378_v1 = vsub.f32 %v12307_v41, %v17469_v53  ;;  %v2623_v56 = vld [vmem:[#allocation8 + $0x140] sm:$0xff]  ;;  %v2601_v53 = vld [vmem:[#allocation8 + $0x90] sm:$0xff]  ;;  %v12425_v22 = vand.u32 4294901760, %v2626_v18 }
 0x280   : > { %v12367_v40 = vand.u32 4294901760, %v2620_v49  ;;  %v2588_v41 = vld [vmem:[#allocation8 + $0x28] sm:$0xff]  ;;  %v12396_v52 = vsub.f32 %v12318_v20, %v17473_v5  ;;  %v12411_v46 = vand.u32 4294901760, %v2623_v56  ;;  %v2705_v5 = vsel %vm2703_vm1, %v2585_v7, 0  ;;  %v2625_v20 = vld [vmem:[#allocation8 + $0x150] sm:$0xff]  ;;  %17538 = vst [vmem:[#allocation107_spill] sm:$0xff] %v12620_v2 }
 0x281   : > { %17465 = vst [vmem:[#allocation53_spill] sm:$0xff] %v12321_v54  ;;  %v17474_v57 = vand.u32 4294901760, %v12321_v54  ;;  %17482 = vst [vmem:[#allocation68_spill] sm:$0xff] %v12425_v22  ;;  %v2629_v7 = vld [vmem:[#allocation8 + $0x170] sm:$0xff]  ;;  %v12428_v6 = vand.u32 4294901760, %v2705_v5  ;;  %v12430_v62 = vand.u32 4294901760, %v2625_v20 }
 0x282   : > { %17467 = vst [vmem:[#allocation56_spill] sm:$0xff] %v12367_v40  ;;  %v12404_v47 = vsub.f32 %v2620_v49, %v12367_v40  ;;  %17478 = vst [vmem:[#allocation64_spill] sm:$0xff] %v12411_v46  ;;  %v12418_v49 = vand.u32 4294901760, %v2601_v53  ;;  %v12423_v40 = vand.u32 4294901760, %v2622_v35  ;;  %v12438_v39 = vsub.f32 %v2623_v56, %v12411_v46  ;;  %v2628_v46 = vld [vmem:[#allocation8 + $0x168] sm:$0xff] }
 0x283   : > { %v12401_v58 = vsub.f32 %v12321_v54, %v17474_v57  ;;  %v12416_v57 = vsub.f32 %v2619_v9, %v12380_v12  ;;  %v2708_v54 = vsel %vm2703_vm1, %v2588_v41, 0  ;;  %17483 = vst [vmem:[#allocation69_spill] sm:$0xff] %v12428_v6  ;;  %17484 = vst [vmem:[#allocation70_spill] sm:$0xff] %v12430_v62  ;;  %v2711_v9 = vsel %vm2703_vm1, %v2591_v48, 0 }
 0x284   : > { %17475 = vst [vmem:[#allocation60_spill] sm:$0xff] %v12404_v47  ;;  %17480 = vst [vmem:[#allocation66_spill] sm:$0xff] %v12418_v49  ;;  %v12435_v41 = vsub.f32 %v2602_v51, %v12409_v61  ;;  %v12440_v29 = vand.u32 4294901760, %v2708_v54  ;;  %v12445_v27 = vsub.f32 %v2601_v53, %v12418_v49  ;;  %v12447_v8 = vand.u32 4294901760, %v2629_v7 }
 0x285   : > { %17479 = vst [vmem:[#allocation65_spill] sm:$0xff] %v12416_v57  ;;  %17481 = vst [vmem:[#allocation67_spill] sm:$0xff] %v12423_v40  ;;  %v12451_v12 = vsub.f32 %v2622_v35, %v12423_v40  ;;  %v12454_v51 = vsub.f32 %v2626_v18, %v12425_v22  ;;  %v12456_v56 = vand.u32 4294901760, %v2711_v9  ;;  %v17494_v53 = vand.u32 4294901760, %v12404_v47 }
 0x286   : > { %17485 = vst [vmem:[#allocation71_spill] sm:$0xff] %v12435_v41  ;;  %17486 = vst [vmem:[#allocation72_spill] sm:$0xff] %v12438_v39  ;;  %v12469_v35 = vsub.f32 %v2705_v5, %v12428_v6  ;;  %v12472_v18 = vsub.f32 %v2625_v20, %v12430_v62  ;;  %v17497_v48 = vand.u32 4294901760, %v12407_v43  ;;  %v12482_v50 = vsub.f32 %v2708_v54, %v12440_v29  ;;  %v2612_v6 = vld [vmem:[#allocation8 + $0xe8] sm:$0xff] }
 0x287   : > { %17487 = vst [vmem:[#allocation73_spill] sm:$0xff] %v12440_v29  ;;  %17488 = vst [vmem:[#allocation74_spill] sm:$0xff] %v12445_v27  ;;  %v12466_v60 = vsub.f32 %v12404_v47, %v17494_v53  ;;  %v12486_v5 = vsub.f32 %v2629_v7, %v12447_v8  ;;  %v12488_v47 = vand.u32 4294901760, %v2628_v46  ;;  %v2714_v20 = vsel %vm2703_vm1, %v2594_v10, 0  ;;  %v2632_v53 = vld [vmem:[#allocation8 + $0x188] sm:$0xff] }
 0x288   : > { %17489 = vst [vmem:[#allocation75_spill] sm:$0xff] %v12447_v8  ;;  %17490 = vst [vmem:[#allocation76_spill] sm:$0xff] %v12451_v12  ;;  %v12477_v22 = vsub.f32 %v12407_v43, %v17497_v48  ;;  %v17501_v62 = vand.u32 4294901760, %v12416_v57  ;;  %v12499_v54 = vsub.f32 %v2711_v9, %v12456_v56  ;;  %v17506_v16 = vand.u32 4294901760, %v12438_v39 }
 0x289   : > { %17491 = vst [vmem:[#allocation77_spill] sm:$0xff] %v12454_v51  ;;  %17492 = vst [vmem:[#allocation78_spill] sm:$0xff] %v12456_v56  ;;  %v12516_v7 = vand.u32 4294901760, %v2714_v20  ;;  %v17509_v43 = vand.u32 4294901760, %v12445_v27  ;;  %v12525_v26 = vsub.f32 %v2628_v46, %v12488_v47  ;;  %v17515_v40 = vand.u32 4294901760, %v12454_v51  ;;  %v2637_v56 = vld [vmem:[#allocation8 + $0x1b0] sm:$0xff] }
 0x28a   : > { %17495 = vst [vmem:[#allocation79_spill] sm:$0xff] %v12469_v35  ;;  %17496 = vst [vmem:[#allocation80_spill] sm:$0xff] %v12472_v18  ;;  %v12494_v48 = vsub.f32 %v12416_v57, %v17501_v62  ;;  %v17504_v62 = vand.u32 4294901760, %v12435_v41  ;;  %v12513_v9 = vsub.f32 %v12438_v39, %v17506_v16  ;;  %v17528_v31 = vand.u32 4294901760, %v12499_v54 }
 0x28b   : > { %17498 = vst [vmem:[#allocation81_spill] sm:$0xff] %v12482_v50  ;;  %17499 = vst [vmem:[#allocation82_spill] sm:$0xff] %v12486_v5  ;;  %v12521_v8 = vsub.f32 %v12445_v27, %v17509_v43  ;;  %v12537_v39 = vsub.f32 %v12454_v51, %v17515_v40  ;;  %v2717_v27 = vsel %vm2703_vm1, %v2597_v42, 0  ;;  %v17521_v42 = vand.u32 4294901760, %v12482_v50  ;;  %v2600_v51 = vld [vmem:[#allocation8 + $0x88] sm:$0xff] }
 0x28c   : > { %17500 = vst [vmem:[#allocation83_spill] sm:$0xff] %v12488_v47  ;;  %17502 = vst [vmem:[#allocation84_spill] sm:$0xff] %v12494_v48  ;;  %v12508_v57 = vsub.f32 %v12435_v41, %v17504_v62  ;;  %v12527_v62 = vand.u32 4294901760, %v2632_v53  ;;  %v17513_v41 = vand.u32 4294901760, %v12451_v12  ;;  %v17517_v47 = vand.u32 4294901760, %v12469_v35 }
 0x28d   : > { %17503 = vst [vmem:[#allocation85_spill] sm:$0xff] %v12499_v54  ;;  %17507 = vst [vmem:[#allocation87_spill] sm:$0xff] %v12513_v9  ;;  %v12558_v10 = vsub.f32 %v12482_v50, %v17521_v42  ;;  %v12561_v46 = vsub.f32 %v2714_v20, %v12516_v7  ;;  %v12572_v43 = vand.u32 4294901760, %v2717_v27  ;;  %v2720_v42 = vsel %vm2703_vm1, %v2600_v51, 0  ;;  %v2609_v20 = vld [vmem:[#allocation8 + $0xd0] sm:$0xff] }
 0x28e   : > { %17505 = vst [vmem:[#allocation86_spill] sm:$0xff] %v12508_v57  ;;  %17508 = vst [vmem:[#allocation88_spill] sm:$0xff] %v12516_v7  ;;  %v12532_v16 = vsub.f32 %v12451_v12, %v17513_v41  ;;  %v12546_v49 = vsub.f32 %v12469_v35, %v17517_v47  ;;  %v17519_v41 = vand.u32 4294901760, %v12472_v18  ;;  %v17524_v47 = vand.u32 4294901760, %v12486_v5 }
 0x28f   : > { %17510 = vst [vmem:[#allocation89_spill] sm:$0xff] %v12521_v8  ;;  %17511 = vst [vmem:[#allocation90_spill] sm:$0xff] %v12525_v26  ;;  %v12570_v40 = vsub.f32 %v2632_v53, %v12527_v62  ;;  %v17531_v34 = vand.u32 4294901760, %v12525_v26  ;;  %v12603_v15 = vsub.f32 %v2717_v27, %v12572_v43  ;;  %v12614_v32 = vand.u32 4294901760, %v2720_v42 }
 0x290   : > { %17512 = vst [vmem:[#allocation91_spill] sm:$0xff] %v12527_v62  ;;  %17514 = vst [vmem:[#allocation92_spill] sm:$0xff] %v12532_v16  ;;  %v12551_v12 = vsub.f32 %v12472_v18, %v17519_v41  ;;  %v12566_v35 = vsub.f32 %v12486_v5, %v17524_v47  ;;  %v2631_v18 = vld [vmem:[#allocation8 + $0x180] sm:$0xff]  ;;  %v12582_v47 = vsub.f32 %v12499_v54, %v17528_v31  ;;  %v2634_v54 = vld [vmem:[#allocation8 + $0x198] sm:$0xff]  ;;  %v2729_v51 = vsel %vm2703_vm1, %v2609_v20, 0 }
 0x291   : > { %17516 = vst [vmem:[#allocation93_spill] sm:$0xff] %v12537_v39  ;;  %17518 = vst [vmem:[#allocation94_spill] sm:$0xff] %v12546_v49  ;;  %v2603_v41 = vld [vmem:[#allocation8 + $0xa0] sm:$0xff]  ;;  %v12593_v31 = vand.u32 4294901760, %v2631_v18  ;;  %v12599_v62 = vsub.f32 %v12525_v26, %v17531_v34  ;;  %v2638_v26 = vld [vmem:[#allocation8 + $0x1b8] sm:$0xff]  ;;  %v12622_v3 = vand.u32 4294901760, %v2634_v54  ;;  %v12659_v17 = vsub.f32 %v2720_v42, %v12614_v32 }
 0x292   : > { %17520 = vst [vmem:[#allocation95_spill] sm:$0xff] %v12551_v12  ;;  %17522 = vst [vmem:[#allocation96_spill] sm:$0xff] %v12558_v10  ;;  %v2723_v34 = vsel %vm2703_vm1, %v2603_v41, 0  ;;  %v2732_v42 = vsel %vm2703_vm1, %v2612_v6, 0 }
 0x293   : > { %17523 = vst [vmem:[#allocation97_spill] sm:$0xff] %v12561_v46  ;;  %17525 = vst [vmem:[#allocation98_spill] sm:$0xff] %v12566_v35  ;;  %v12634_v53 = vsub.f32 %v2631_v18, %v12593_v31  ;;  %v12641_v7 = vand.u32 4294901760, %v2723_v34  ;;  %v12667_v35 = vsub.f32 %v2635_v59, %v12620_v2  ;;  %v17557_v59 = vand.u32 4294901760, %v12603_v15 }
 0x294   : > { %17526 = vst [vmem:[#allocation99_spill] sm:$0xff] %v12570_v40  ;;  %17527 = vst [vmem:[#allocation100_spill] sm:$0xff] %v12572_v43  ;;  %v17543_v43 = vmov 0.0|0.0   ;;  %v12727_v6 = vand.u32 4294901760, %v2732_v42 }
 0x295   : > { %17529 = vst [vmem:[#allocation101_spill] sm:$0xff] %v12582_v47  ;;  %17530 = vst [vmem:[#allocation102_spill] sm:$0xff] %v12593_v31 }
 0x296   : > { %17532 = vst [vmem:[#allocation103_spill] sm:$0xff] %v12599_v62  ;;  %17533 = vst [vmem:[#allocation104_spill] sm:$0xff] %v12603_v15 }
 0x297   : > { %17537 = vst [vmem:[#allocation106_spill] sm:$0xff] %v12614_v32  ;;  %17539 = vst [vmem:[#allocation108_spill] sm:$0xff] %v12622_v3 }
 0x298   : > { %17542 = vst [vmem:[#allocation110_spill] sm:$0xff] %v12634_v53  ;;  %17544 = vst [vmem:[#allocation111_spill] sm:$0xff] %v12641_v7 }
 0x299   : > { %17551 = vst [vmem:[#allocation115_spill] sm:$0xff] %v12659_v17  ;;  %17553 = vst [vmem:[#allocation117_spill] sm:$0xff] %v12667_v35 }
 0x29a   : > { %17569 = vst [vmem:[#allocation129_spill] sm:$0xff] %v12727_v6 }
 0x303   : > { %v12574_v61 = vpop.f32.mrb[0].mxu0 }
 0x304   : > { %v12585_v5 = vpop.f32.mrb[1].mxu0  ;;  %v17535_v13 = vand.u32 4294901760, %v12574_v61 }
 0x305   : > { %v17534_v11 = vand.u32 4294901760, %v12585_v5 }
 0x307   : > { %v12605_v50 = vpop.f32.mrb[2].mxu0  ;;  %v12611_v19 = vpack.c.bf16 %v17535_v13, %v17534_v11  ;;  %v17540_v11 = vand.u32 4294901760, %v12561_v46  ;;  %v12661_v13 = vand.u32 4294901760, %v2726_v24 }
 0x308   : > { %v12618_v27 = vpop.f32.mrb[3].mxu0  ;;  %v17547_v31 = vand.u32 4294901760, %v12605_v50 }
 0x309   : > { %17536 = vst [vmem:[#allocation105_spill] sm:$0xff] %v12611_v19  ;;  %9803 = vmatpush1.bf16.msra.mxu0 %v12611_v19  ;;  %10201 = vmatpush1.bf16.msra.mxu1 %v12611_v19  ;;  %v12631_v41 = vsub.f32 %v12561_v46, %v17540_v11  ;;  %v12643_v19 = vand.u32 4294901760, %v2638_v26  ;;  %v17546_v18 = vand.u32 4294901760, %v12618_v27  ;;  %v17549_v46 = vand.u32 4294901760, %v12570_v40  ;;  %17552 = vst [vmem:[#allocation116_spill] sm:$0xff] %v12661_v13 }
 0x30a   : > { %9804 = vmatprep.subr.bf16.mxu0 %v17543_v43  ;;  %10186 = vmatprep.subr.bf16.mxu1 %v17543_v43 }
 0x30b   : > { %17541 = vst [vmem:[#allocation109_spill] sm:$0xff] %v12631_v41  ;;  %17545 = vst [vmem:[#allocation112_spill] sm:$0xff] %v12643_v19  ;;  %v12645_v11 = vpop.f32.mrb[4].mxu0  ;;  %v12651_v20 = vpack.c.bf16 %v17547_v31, %v17546_v18  ;;  %v12656_v29 = vsub.f32 %v12570_v40, %v17549_v46  ;;  %v12670_v31 = vsub.f32 %v2634_v54, %v12622_v3  ;;  %v12672_v18 = vand.u32 4294901760, %v2729_v51 }
 0x30c   : > { %v12664_v47 = vpop.f32.mrb[5].mxu0  ;;  %v12679_v40 = vand.u32 4294901760, %v2637_v56  ;;  %v12686_v54 = vsub.f32 %v12603_v15, %v17557_v59  ;;  %v12689_v46 = vsub.f32 %v2723_v34, %v12641_v7  ;;  %v17562_v2 = vand.u32 4294901760, %v12645_v11  ;;  %v2641_v15 = vld [vmem:[#allocation8 + $0x1d0] sm:$0xff] }
 0x30d   : > { %17548 = vst [vmem:[#allocation113_spill] sm:$0xff] %v12651_v20  ;;  %17550 = vst [vmem:[#allocation114_spill] sm:$0xff] %v12656_v29  ;;  %9806 = vmatpush1.bf16.msra.mxu0 %v12651_v20  ;;  %10202 = vmatpush1.bf16.msra.mxu1 %v12651_v20  ;;  %v12692_v20 = vsub.f32 %v2638_v26, %v12643_v19  ;;  %v17561_v3 = vand.u32 4294901760, %v12664_v47  ;;  %v12706_v34 = vsub.f32 %v2726_v24, %v12661_v13 }
 0x30e   : > { %17554 = vst [vmem:[#allocation118_spill] sm:$0xff] %v12670_v31  ;;  %17555 = vst [vmem:[#allocation119_spill] sm:$0xff] %v12672_v18  ;;  %9807 = vmatprep.subr.bf16.mxu0 %v17543_v43  ;;  %10187 = vmatprep.subr.bf16.mxu1 %v17543_v43  ;;  %v12714_v10 = vsub.f32 %v2729_v51, %v12672_v18  ;;  %v17566_v24 = vand.u32 4294901760, %v12634_v53  ;;  %v12725_v59 = vsub.f32 %v2637_v56, %v12679_v40 }
 0x30f   : > { %17556 = vst [vmem:[#allocation120_spill] sm:$0xff] %v12679_v40  ;;  %17558 = vst [vmem:[#allocation121_spill] sm:$0xff] %v12686_v54  ;;  %v12695_v62 = vpop.f32.mrb[6].mxu0  ;;  %v12701_v32 = vpack.c.bf16 %v17562_v2, %v17561_v3  ;;  %v2615_v3 = vld [vmem:[#allocation8 + $0x100] sm:$0xff]  ;;  %v12734_v2 = vand.u32 4294901760, %v2641_v15  ;;  %v17574_v40 = vand.u32 4294901760, %v12659_v17 }
 0x310   : > { %17559 = vst [vmem:[#allocation122_spill] sm:$0xff] %v12689_v46  ;;  %17560 = vst [vmem:[#allocation123_spill] sm:$0xff] %v12692_v20  ;;  %v12709_v19 = vpop.f32.mrb[7].mxu0  ;;  %v12722_v41 = vsub.f32 %v12634_v53, %v17566_v24  ;;  %v17572_v56 = vand.u32 4294901760, %v12695_v62  ;;  %v2735_v7 = vsel %vm2703_vm1, %v2615_v3, 0  ;;  %v17576_v54 = vand.u32 4294901760, %v12667_v35 }
 0x311   : > { %17563 = vst [vmem:[#allocation124_spill] sm:$0xff] %v12701_v32  ;;  %17564 = vst [vmem:[#allocation125_spill] sm:$0xff] %v12706_v34  ;;  %9809 = vmatpush1.bf16.msra.mxu0 %v12701_v32  ;;  %10203 = vmatpush1.bf16.msra.mxu1 %v12701_v32  ;;  %v17571_v24 = vand.u32 4294901760, %v12709_v19  ;;  %v12747_v18 = vsub.f32 %v12659_v17, %v17574_v40  ;;  %v2640_v17 = vld [vmem:[#allocation8 + $0x1c8] sm:$0xff]  ;;  %v17583_v51 = vand.u32 4294901760, %v12692_v20  ;;  %v12788_v26 = vand.u32 4294901760, %v2735_v7 }
 0x312   : > { %17565 = vst [vmem:[#allocation126_spill] sm:$0xff] %v12714_v10  ;;  %17567 = vst [vmem:[#allocation127_spill] sm:$0xff] %v12722_v41  ;;  %9810 = vmatprep.subr.bf16.mxu0 %v17543_v43  ;;  %10188 = vmatprep.subr.bf16.mxu1 %v17543_v43  ;;  %v12757_v29 = vsub.f32 %v12667_v35, %v17576_v54  ;;  %v12771_v54 = vsub.f32 %v2732_v42, %v12727_v6  ;;  %v2618_v42 = vld [vmem:[#allocation8 + $0x118] sm:$0xff] }
 0x313   : > { %17568 = vst [vmem:[#allocation128_spill] sm:$0xff] %v12725_v59  ;;  %17570 = vst [vmem:[#allocation130_spill] sm:$0xff] %v12734_v2  ;;  %v12736_v32 = vpop.f32.mrb[8].mxu0  ;;  %v12742_v53 = vpack.c.bf16 %v17572_v56, %v17571_v24  ;;  %v17578_v24 = vand.u32 4294901760, %v12670_v31  ;;  %v12786_v3 = vsub.f32 %v2641_v15, %v12734_v2  ;;  %v12804_v15 = vand.u32 4294901760, %v2640_v17 }
 0x314   : > { %17575 = vst [vmem:[#allocation132_spill] sm:$0xff] %v12747_v18  ;;  %v12752_v13 = vpop.f32.mrb[9].mxu0  ;;  %17577 = vst [vmem:[#allocation133_spill] sm:$0xff] %v12757_v29  ;;  %v17588_v6 = vand.u32 4294901760, %v12736_v32  ;;  %v2738_v49 = vsel %vm2703_vm1, %v2618_v42, 0 }
 0x315   : > { %17573 = vst [vmem:[#allocation131_spill] sm:$0xff] %v12742_v53  ;;  %v12762_v56 = vsub.f32 %v12670_v31, %v17578_v24  ;;  %9812 = vmatpush1.bf16.msra.mxu0 %v12742_v53  ;;  %10204 = vmatpush1.bf16.msra.mxu1 %v12742_v53  ;;  %17580 = vst [vmem:[#allocation135_spill] sm:$0xff] %v12771_v54  ;;  %v17581_v24 = vand.u32 4294901760, %v12689_v46  ;;  %v12783_v31 = vsub.f32 %v12692_v20, %v17583_v51 }
 0x316   : > { %9813 = vmatprep.subr.bf16.mxu0 %v17543_v43  ;;  %10189 = vmatprep.subr.bf16.mxu1 %v17543_v43  ;;  %17585 = vst [vmem:[#allocation138_spill] sm:$0xff] %v12786_v3  ;;  %17586 = vst [vmem:[#allocation139_spill] sm:$0xff] %v12788_v26  ;;  %v17587_v53 = vand.u32 4294901760, %v12752_v13 }
 0x317   : > { %17579 = vst [vmem:[#allocation134_spill] sm:$0xff] %v12762_v56  ;;  %v12778_v40 = vsub.f32 %v12689_v46, %v17581_v24  ;;  %17584 = vst [vmem:[#allocation137_spill] sm:$0xff] %v12783_v31  ;;  %v12790_v35 = vpop.f32.mrb[10].mxu0  ;;  %v17590_v46 = vand.u32 4294901760, %v12706_v34  ;;  %v2621_v24 = vld [vmem:[#allocation8 + $0x130] sm:$0xff]  ;;  %v17606_v31 = vand.u32 4294901760, %v12786_v3 }
 0x318   : > { %v12796_v41 = vpack.c.bf16 %v17588_v6, %v17587_v53  ;;  %17592 = vst [vmem:[#allocation142_spill] sm:$0xff] %v12804_v15  ;;  %v12807_v2 = vpop.f32.mrb[11].mxu0  ;;  %v17593_v53 = vand.u32 4294901760, %v12714_v10  ;;  %v17599_v42 = vand.u32 4294901760, %v12790_v35  ;;  %v2741_v18 = vsel %vm2703_vm1, %v2621_v24, 0 }
 0x319   : > { %17582 = vst [vmem:[#allocation136_spill] sm:$0xff] %v12778_v40  ;;  %v12802_v51 = vsub.f32 %v12706_v34, %v17590_v46  ;;  %v17595_v46 = vand.u32 4294901760, %v12725_v59  ;;  %v2644_v34 = vld [vmem:[#allocation8 + $0x1e8] sm:$0xff]  ;;  %v17598_v12 = vand.u32 4294901760, %v12807_v2  ;;  %v12851_v40 = vand.u32 4294901760, %v2738_v49 }
 0x31a   : > { %17589 = vst [vmem:[#allocation140_spill] sm:$0xff] %v12796_v41  ;;  %v12814_v6 = vsub.f32 %v12714_v10, %v17593_v53  ;;  %9815 = vmatpush1.bf16.msra.mxu0 %v12796_v41  ;;  %10205 = vmatpush1.bf16.msra.mxu1 %v12796_v41  ;;  %v12832_v10 = vsub.f32 %v2735_v7, %v12788_v26  ;;  %v2643_v41 = vld [vmem:[#allocation8 + $0x1e0] sm:$0xff]  ;;  %v12853_v39 = vand.u32 4294901760, %v2644_v34  ;;  %v17604_v24 = vand.u32 4294901760, %v12771_v54 }
 0x31b   : > { %17591 = vst [vmem:[#allocation141_spill] sm:$0xff] %v12802_v51  ;;  %v12822_v20 = vsub.f32 %v12725_v59, %v17595_v46  ;;  %9816 = vmatprep.subr.bf16.mxu0 %v17543_v43  ;;  %10190 = vmatprep.subr.bf16.mxu1 %v17543_v43  ;;  %v2624_v46 = vld [vmem:[#allocation8 + $0x148] sm:$0xff]  ;;  %v12834_v59 = vpop.f32.mrb[12].mxu0  ;;  %v12840_v56 = vpack.c.bf16 %v17599_v42, %v17598_v12  ;;  %17602 = vst [vmem:[#allocation148_spill] sm:$0xff] %v12851_v40 }
 0x31c   : > { %17594 = vst [vmem:[#allocation143_spill] sm:$0xff] %v12814_v6  ;;  %17597 = vst [vmem:[#allocation145_spill] sm:$0xff] %v12832_v10  ;;  %v12844_v53 = vsub.f32 %v2640_v17, %v12804_v15  ;;  %v12848_v26 = vpop.f32.mrb[13].mxu0  ;;  %v12862_v42 = vsub.f32 %v12771_v54, %v17604_v24  ;;  %v2744_v29 = vsel %vm2703_vm1, %v2624_v46, 0  ;;  %v12870_v7 = vsub.f32 %v12786_v3, %v17606_v31 }
 0x31d   : > { %17596 = vst [vmem:[#allocation144_spill] sm:$0xff] %v12822_v20  ;;  %17600 = vst [vmem:[#allocation146_spill] sm:$0xff] %v12840_v56  ;;  %v12875_v17 = vand.u32 4294901760, %v2643_v41  ;;  %v17610_v24 = vand.u32 4294901760, %v12574_v61  ;;  %v17612_v46 = vand.u32 4294901760, %v12585_v5  ;;  %v17614_v31 = vand.u32 4294901760, %v12848_v26 }
 0x31e   : > { %17601 = vst [vmem:[#allocation147_spill] sm:$0xff] %v12844_v53  ;;  %17603 = vst [vmem:[#allocation149_spill] sm:$0xff] %v12853_v39  ;;  %9818 = vmatpush1.bf16.msra.mxu0 %v12840_v56  ;;  %10206 = vmatpush1.bf16.msra.mxu1 %v12840_v56  ;;  %v12873_v56 = vand.u32 4294901760, %v2741_v18  ;;  %v17615_v12 = vand.u32 4294901760, %v12834_v59 }
 0x31f   : > { %17605 = vst [vmem:[#allocation150_spill] sm:$0xff] %v12862_v42  ;;  %9819 = vmatprep.subr.bf16.mxu0 %v17543_v43  ;;  %10191 = vmatprep.subr.bf16.mxu1 %v17543_v43  ;;  %17607 = vst [vmem:[#allocation151_spill] sm:$0xff] %v12870_v7  ;;  %v12880_v15 = vsub.f32 %v12574_v61, %v17610_v24  ;;  %v12885_v54 = vsub.f32 %v12585_v5, %v17612_v46  ;;  %v12887_v20 = vpop.f32.mrb[14].mxu0  ;;  %v12905_v24 = vand.u32 4294901760, %v2744_v29 }
 0x320   : > { %17608 = vst [vmem:[#allocation152_spill] sm:$0xff] %v12873_v56  ;;  %17609 = vst [vmem:[#allocation153_spill] sm:$0xff] %v12875_v17  ;;  %v12893_v3 = vpack.c.bf16 %v17615_v12, %v17614_v31  ;;  %v12897_v16 = vpop.f32.mrb[15].mxu0  ;;  %v12900_v61 = vsub.f32 %v2738_v49, %v12851_v40  ;;  %v12903_v5 = vsub.f32 %v2644_v34, %v12853_v39  ;;  %v17620_v46 = vand.u32 4294901760, %v12605_v50  ;;  %v2647_v34 = vld [vmem:[#allocation8 + $0x200] sm:$0xff] }
 0x321   : > { %17611 = vst [vmem:[#allocation154_spill] sm:$0xff] %v12880_v15  ;;  %17613 = vst [vmem:[#allocation155_spill] sm:$0xff] %v12885_v54  ;;  %v17622_v12 = vand.u32 4294901760, %v12618_v27  ;;  %v12933_v51 = vsub.f32 %v2643_v41, %v12875_v17  ;;  %v17628_v39 = vand.u32 4294901760, %v12897_v16  ;;  %v12955_v6 = vsub.f32 %v2744_v29, %v12905_v24 }
 0x322   : > { %17616 = vst [vmem:[#allocation156_spill] sm:$0xff] %v12893_v3  ;;  %17617 = vst [vmem:[#allocation157_spill] sm:$0xff] %v12900_v61  ;;  %v12910_v8 = vsub.f32 %v12605_v50, %v17620_v46  ;;  %9821 = vmatpush1.bf16.msra.mxu0 %v12893_v3  ;;  %10207 = vmatpush1.bf16.msra.mxu1 %v12893_v3  ;;  %v17624_v46 = vand.u32 4294901760, %v12832_v10  ;;  %v17629_v50 = vand.u32 4294901760, %v12887_v20  ;;  %v17635_v41 = vand.u32 4294901760, %v12645_v11 }
 0x323   : > { %17618 = vst [vmem:[#allocation158_spill] sm:$0xff] %v12903_v5  ;;  %17619 = vst [vmem:[#allocation159_spill] sm:$0xff] %v12905_v24  ;;  %v12915_v31 = vsub.f32 %v12618_v27, %v17622_v12  ;;  %9822 = vmatprep.subr.bf16.mxu0 %v17543_v43  ;;  %10192 = vmatprep.subr.bf16.mxu1 %v17543_v43  ;;  %v12930_v12 = vsub.f32 %v2741_v18, %v12873_v56  ;;  %v12937_v3 = vpop.f32.mrb[16].mxu0  ;;  %v17642_v24 = vand.u32 4294901760, %v12885_v54 }
 0x324   : > { %17621 = vst [vmem:[#allocation160_spill] sm:$0xff] %v12910_v8  ;;  %v12927_v27 = vsub.f32 %v12832_v10, %v17624_v46  ;;  %17627 = vst [vmem:[#allocation164_spill] sm:$0xff] %v12933_v51  ;;  %v12943_v40 = vpack.c.bf16 %v17629_v50, %v17628_v39  ;;  %v17631_v46 = vand.u32 4294901760, %v12844_v53  ;;  %v12951_v17 = vpop.f32.mrb[17].mxu0  ;;  %v12957_v10 = vand.u32 4294901760, %v2647_v34 }
 0x325   : > { %17623 = vst [vmem:[#allocation161_spill] sm:$0xff] %v12915_v31  ;;  %17626 = vst [vmem:[#allocation163_spill] sm:$0xff] %v12930_v12  ;;  %v12968_v49 = vsub.f32 %v12645_v11, %v17635_v41  ;;  %v17637_v50 = vand.u32 4294901760, %v12664_v47  ;;  %v17639_v11 = vand.u32 4294901760, %v12951_v17  ;;  %v17640_v41 = vand.u32 4294901760, %v12937_v3 }
 0x326   : > { %17625 = vst [vmem:[#allocation162_spill] sm:$0xff] %v12927_v27  ;;  %17630 = vst [vmem:[#allocation165_spill] sm:$0xff] %v12943_v40  ;;  %v12948_v18 = vsub.f32 %v12844_v53, %v17631_v46  ;;  %9824 = vmatpush1.bf16.msra.mxu0 %v12943_v40  ;;  %10208 = vmatpush1.bf16.msra.mxu1 %v12943_v40  ;;  %v3525_v29 = vsub.f32 %v12885_v54, %v17642_v24  ;;  %v17643_v56 = vand.u32 4294901760, %v12880_v15 }
 0x327   : > { %17633 = vst [vmem:[#allocation167_spill] sm:$0xff] %v12955_v6  ;;  %17634 = vst [vmem:[#allocation168_spill] sm:$0xff] %v12957_v10  ;;  %9825 = vmatprep.subr.bf16.mxu0 %v17543_v43  ;;  %10193 = vmatprep.subr.bf16.mxu1 %v17543_v43  ;;  %v12978_v53 = vsub.f32 %v12664_v47, %v17637_v50  ;;  %v12980_v46 = vpop.f32.mrb[18].mxu0  ;;  %v12986_v40 = vpack.c.bf16 %v17640_v41, %v17639_v11  ;;  %v17644_v50 = vand.u32 4294901760, %v12900_v61  ;;  %v2627_v11 = vld [vmem:[#allocation8 + $0x160] sm:$0xff] }
 0x328   : > { %17632 = vst [vmem:[#allocation166_spill] sm:$0xff] %v12948_v18  ;;  %17636 = vst [vmem:[#allocation169_spill] sm:$0xff] %v12968_v49  ;;  %v3532_v39 = vsub.f32 %v12880_v15, %v17643_v56  ;;  %v12995_v47 = vpop.f32.mrb[19].mxu0  ;;  %v13004_v41 = vsub.f32 %v2647_v34, %v12957_v10  ;;  %v17647_v56 = vand.u32 4294901760, %v12915_v31  ;;  %v17648_v15 = vand.u32 4294901760, %v12910_v8 }
 0x329   : > { %17638 = vst [vmem:[#allocation170_spill] sm:$0xff] %v12978_v53  ;;  %17641 = vst [vmem:[#allocation171_spill] sm:$0xff] %v12986_v40  ;;  %v13000_v7 = vsub.f32 %v12900_v61, %v17644_v50  ;;  %v17649_v34 = vand.u32 4294901760, %v12903_v5  ;;  %v3526_v54 = vand.u32 4294901760, %v3525_v29  ;;  %v2747_v29 = vsel %vm2703_vm1, %v2627_v11, 0 }
 0x32a   : > { %17646 = vst [vmem:[#allocation173_spill] sm:$0xff] %v13004_v41  ;;  %9827 = vmatpush1.bf16.msra.mxu0 %v12986_v40  ;;  %10209 = vmatpush1.bf16.msra.mxu1 %v12986_v40  ;;  %v3539_v27 = vsub.f32 %v12915_v31, %v17647_v56  ;;  %v3546_v50 = vsub.f32 %v12910_v8, %v17648_v15  ;;  %v17651_v40 = vand.u32 4294901760, %v12930_v12  ;;  %v17653_v15 = vand.u32 4294901760, %v12933_v51 }
 0x32b   : > { %17645 = vst [vmem:[#allocation172_spill] sm:$0xff] %v13000_v7  ;;  %9828 = vmatprep.subr.bf16.mxu0 %v17543_v43  ;;  %10194 = vmatprep.subr.bf16.mxu1 %v17543_v43  ;;  %v13022_v24 = vsub.f32 %v12903_v5, %v17649_v34  ;;  %v13035_v8 = vpop.f32.mrb[20].mxu0  ;;  %v17655_v31 = vand.u32 4294901760, %v12995_v47  ;;  %v17656_v34 = vand.u32 4294901760, %v12980_v46  ;;  %v3533_v18 = vand.u32 4294901760, %v3532_v39 }
 0x32c   : > { %v13027_v56 = vsub.f32 %v12930_v12, %v17651_v40  ;;  %v13032_v61 = vsub.f32 %v12933_v51, %v17653_v15  ;;  %v13044_v12 = vpop.f32.mrb[21].mxu0  ;;  %v17658_v51 = vand.u32 4294901760, %v12955_v6  ;;  %v3547_v39 = vand.u32 4294901760, %v3546_v50  ;;  %v2646_v50 = vld [vmem:[#allocation8 + $0x1f8] sm:$0xff] }
 0x32d   : > { %17650 = vst [vmem:[#allocation174_spill] sm:$0xff] %v13022_v24  ;;  %v13041_v5 = vpack.c.bf16 %v17656_v34, %v17655_v31  ;;  %v3540_v31 = vand.u32 4294901760, %v3539_v27  ;;  %v17660_v34 = vand.u32 4294901760, %v12695_v62  ;;  %v17663_v11 = vand.u32 4294901760, %v13044_v12  ;;  %v2630_v40 = vld [vmem:[#allocation8 + $0x178] sm:$0xff] }
 0x32e   : > { %17652 = vst [vmem:[#allocation175_spill] sm:$0xff] %v13027_v56  ;;  %17654 = vst [vmem:[#allocation176_spill] sm:$0xff] %v13032_v61  ;;  %v13050_v10 = vsub.f32 %v12955_v6, %v17658_v51  ;;  %v17662_v51 = vand.u32 4294901760, %v12968_v49  ;;  %v17666_v6 = vand.u32 4294901760, %v12978_v53  ;;  %v17667_v27 = vand.u32 4294901760, %v12709_v19 }
 0x32f   : > { %17657 = vst [vmem:[#allocation177_spill] sm:$0xff] %v13041_v5  ;;  %9830 = vmatpush1.bf16.msra.mxu0 %v13041_v5  ;;  %10210 = vmatpush1.bf16.msra.mxu1 %v13041_v5  ;;  %v13060_v15 = vsub.f32 %v12695_v62, %v17660_v34  ;;  %v13069_v9 = vpop.f32.mrb[22].mxu0  ;;  %v17664_v62 = vand.u32 4294901760, %v13035_v8  ;;  %v13077_v5 = vpack.c.bf16 %v3533_v18, %v3526_v54  ;;  %v13092_v54 = vand.u32 4294901760, %v2747_v29 }
 0x330   : > { %17659 = vst [vmem:[#allocation178_spill] sm:$0xff] %v13050_v10  ;;  %9831 = vmatprep.subr.bf16.mxu0 %v17543_v43  ;;  %10195 = vmatprep.subr.bf16.mxu1 %v17543_v43  ;;  %v3560_v42 = vsub.f32 %v12968_v49, %v17662_v51  ;;  %v3553_v7 = vsub.f32 %v12978_v53, %v17666_v6  ;;  %v13089_v24 = vpop.f32.mrb[23].mxu0  ;;  %v17675_v18 = vand.u32 4294901760, %v12752_v13  ;;  %v17682_v10 = vand.u32 4294901760, %v12807_v2 }
 0x331   : > { %17661 = vst [vmem:[#allocation179_spill] sm:$0xff] %v13060_v15  ;;  %v13075_v34 = vpack.c.bf16 %v17664_v62, %v17663_v11  ;;  %v13086_v49 = vsub.f32 %v12709_v19, %v17667_v27  ;;  %17669 = vst [vmem:[#allocation182_spill] sm:$0xff] %v13092_v54  ;;  %v13097_v6 = vpack.c.bf16 %v3547_v39, %v3540_v31  ;;  %v17670_v62 = vand.u32 4294901760, %v13004_v41 }
 0x332   : > { %v13104_v27 = vand.u32 4294901760, %v2646_v50  ;;  %v17673_v11 = vand.u32 4294901760, %v12736_v32  ;;  %v3561_v31 = vand.u32 4294901760, %v3560_v42  ;;  %v2750_v39 = vsel %vm2703_vm1, %v2630_v40, 0 }
 0x333   : > { %17665 = vst [vmem:[#allocation180_spill] sm:$0xff] %v13075_v34  ;;  %17668 = vst [vmem:[#allocation181_spill] sm:$0xff] %v13086_v49  ;;  %9833 = vmatpush1.bf16.msra.mxu0 %v13075_v34  ;;  %10211 = vmatpush1.bf16.msra.mxu1 %v13075_v34  ;;  %v13102_v19 = vsub.f32 %v13004_v41, %v17670_v62  ;;  %v13118_v62 = vsub.f32 %v12752_v13, %v17675_v18  ;;  %v17677_v41 = vand.u32 4294901760, %v12790_v35  ;;  %v13125_v34 = vpop.f32.mrb[24].mxu0 }
 0x334   : > { %17672 = vst [vmem:[#allocation184_spill] sm:$0xff] %v13104_v27  ;;  %v13110_v56 = vsub.f32 %v12736_v32, %v17673_v11  ;;  %9834 = vmatprep.subr.bf16.mxu0 %v17543_v43  ;;  %10196 = vmatprep.subr.bf16.mxu1 %v17543_v43  ;;  %v17679_v32 = vand.u32 4294901760, %v13089_v24  ;;  %v17680_v11 = vand.u32 4294901760, %v13069_v9  ;;  %v3554_v42 = vand.u32 4294901760, %v3553_v7 }
 0x335   : > { %17671 = vst [vmem:[#allocation183_spill] sm:$0xff] %v13102_v19  ;;  %17676 = vst [vmem:[#allocation186_spill] sm:$0xff] %v13118_v62  ;;  %v13123_v51 = vsub.f32 %v12790_v35, %v17677_v41  ;;  %v13137_v13 = vsub.f32 %v12807_v2, %v17682_v10  ;;  %v13140_v35 = vpop.f32.mrb[25].mxu0  ;;  %v13143_v41 = vsub.f32 %v2747_v29, %v13092_v54  ;;  %v17685_v61 = vand.u32 4294901760, %v12834_v59 }
 0x336   : > { %17674 = vst [vmem:[#allocation185_spill] sm:$0xff] %v13110_v56  ;;  %v13131_v53 = vpack.c.bf16 %v17680_v11, %v17679_v32  ;;  %v17687_v7 = vand.u32 4294901760, %v12848_v26  ;;  %v13158_v2 = vand.u32 4294901760, %v2750_v39  ;;  %v17693_v29 = vand.u32 4294901760, %v13140_v35 }
 0x337   : > { %17678 = vst [vmem:[#allocation187_spill] sm:$0xff] %v13123_v51  ;;  %17683 = vst [vmem:[#allocation189_spill] sm:$0xff] %v13137_v13  ;;  %v13148_v32 = vsub.f32 %v12834_v59, %v17685_v61  ;;  %v17690_v59 = vand.u32 4294901760, %v13060_v15  ;;  %v13174_v10 = vpop.f32.mrb[26].mxu0  ;;  %v13182_v57 = vpack.c.bf16 %v3561_v31, %v3554_v42  ;;  %v17697_v40 = vand.u32 4294901760, %v13086_v49 }
 0x338   : > { %17681 = vst [vmem:[#allocation188_spill] sm:$0xff] %v13131_v53  ;;  %17684 = vst [vmem:[#allocation190_spill] sm:$0xff] %v13143_v41  ;;  %v13153_v11 = vsub.f32 %v12848_v26, %v17687_v7  ;;  %9836 = vmatpush1.bf16.msra.mxu0 %v13131_v53  ;;  %10212 = vmatpush1.bf16.msra.mxu1 %v13131_v53  ;;  %v13170_v7 = vsub.f32 %v2646_v50, %v13104_v27  ;;  %v17694_v53 = vand.u32 4294901760, %v13125_v34  ;;  %v13186_v27 = vpop.f32.mrb[27].mxu0 }
 0x339   : > { %17686 = vst [vmem:[#allocation191_spill] sm:$0xff] %v13148_v32  ;;  %17689 = vst [vmem:[#allocation193_spill] sm:$0xff] %v13158_v2  ;;  %9837 = vmatprep.subr.bf16.mxu0 %v17543_v43  ;;  %10197 = vmatprep.subr.bf16.mxu1 %v17543_v43  ;;  %v13166_v61 = vsub.f32 %v13060_v15, %v17690_v59  ;;  %v2650_v59 = vld [vmem:[#allocation8 + $0x218] sm:$0xff]  ;;  %v3567_v18 = vsub.f32 %v13086_v49, %v17697_v40  ;;  %v16913_v31 = vand.u32 4294901760, %v13186_v27 }
 0x33a   : > { %17688 = vst [vmem:[#allocation192_spill] sm:$0xff] %v13153_v11  ;;  %17691 = vst [vmem:[#allocation194_spill] sm:$0xff] %v13170_v7  ;;  %v13180_v54 = vpack.c.bf16 %v17694_v53, %v17693_v29  ;;  %v13198_v42 = vsub.f32 %v2750_v39, %v13158_v2  ;;  %v17699_v29 = vand.u32 4294901760, %v12887_v20  ;;  %v17701_v19 = vand.u32 4294901760, %v13110_v56 }
 0x33b   : > { %17692 = vst [vmem:[#allocation195_spill] sm:$0xff] %v13174_v10  ;;  %17696 = vst [vmem:[#allocation197_spill] sm:$0xff] %v13186_v27  ;;  %v3575_v40 = vand.u32 4294901760, %v13166_v61  ;;  %v13211_v15 = vand.u32 4294901760, %v2650_v59  ;;  %v13213_v50 = vpop.f32.mrb[28].mxu0  ;;  %v17703_v39 = vand.u32 4294901760, %v13174_v10 }
 0x33c   : > { %17695 = vst [vmem:[#allocation196_spill] sm:$0xff] %v13180_v54  ;;  %9839 = vmatpush1.bf16.msra.mxu0 %v13180_v54  ;;  %10213 = vmatpush1.bf16.msra.mxu1 %v13180_v54  ;;  %17698 = vst [vmem:[#allocation198_spill] sm:$0xff] %v13198_v42  ;;  %v13203_v26 = vsub.f32 %v12887_v20, %v17699_v29  ;;  %v3588_v53 = vsub.f32 %v13110_v56, %v17701_v19  ;;  %v17705_v29 = vand.u32 4294901760, %v13118_v62  ;;  %v13229_v2 = vpop.f32.mrb[29].mxu0 }
 0x33d   : > { %9840 = vmatprep.subr.bf16.mxu0 %v17543_v43  ;;  %10198 = vmatprep.subr.bf16.mxu1 %v17543_v43  ;;  %17702 = vst [vmem:[#allocation200_spill] sm:$0xff] %v13211_v15  ;;  %v13219_v20 = vpack.c.bf16 %v17703_v39, %v16913_v31  ;;  %v17706_v61 = vand.u32 4294901760, %v13123_v51  ;;  %17707 = vst [vmem:[#allocation202_spill] sm:$0xff] %v13229_v2  ;;  %v3568_v48 = vand.u32 4294901760, %v3567_v18  ;;  %v17708_v27 = vand.u32 4294901760, %v13137_v13 }
 0x33e   : > { %17700 = vst [vmem:[#allocation199_spill] sm:$0xff] %v13203_v26  ;;  %v3581_v54 = vsub.f32 %v13118_v62, %v17705_v29  ;;  %v17709_v31 = vand.u32 4294901760, %v13143_v41  ;;  %v17711_v18 = vand.u32 4294901760, %v13148_v32 }
 0x33f   : > { %17704 = vst [vmem:[#allocation201_spill] sm:$0xff] %v13219_v20  ;;  %v3602_v49 = vsub.f32 %v13123_v51, %v17706_v61  ;;  %v3595_v39 = vsub.f32 %v13137_v13, %v17708_v27  ;;  %v17710_v61 = vand.u32 4294901760, %v13153_v11  ;;  %v2633_v51 = vld [vmem:[#allocation8 + $0x190] sm:$0xff]  ;;  %v17716_v27 = vand.u32 4294901760, %v13213_v50 }
 0x340   : > { %v13237_v10 = vsub.f32 %v13143_v41, %v17709_v31  ;;  %9842 = vmatpush1.bf16.msra.mxu0 %v13219_v20  ;;  %10214 = vmatpush1.bf16.msra.mxu1 %v13219_v20  ;;  %v3616_v56 = vsub.f32 %v13148_v32, %v17711_v18  ;;  %v17712_v41 = vand.u32 4294901760, %v12897_v16  ;;  %v3589_v20 = vand.u32 4294901760, %v3588_v53 }
 0x341   : > { %v3609_v19 = vsub.f32 %v13153_v11, %v17710_v61  ;;  %9843 = vmatprep.subr.bf16.mxu0 %v17543_v43  ;;  %10199 = vmatprep.subr.bf16.mxu1 %v17543_v43  ;;  %v13258_v61 = vsub.f32 %v2650_v59, %v13211_v15  ;;  %v13260_v11 = vpop.f32.mrb[30].mxu0  ;;  %v17715_v18 = vand.u32 4294901760, %v13229_v2  ;;  %v3582_v32 = vand.u32 4294901760, %v3581_v54 }
 0x342   : > { %v13253_v29 = vsub.f32 %v12897_v16, %v17712_v41  ;;  %v3603_v13 = vand.u32 4294901760, %v3602_v49  ;;  %v17718_v16 = vand.u32 4294901760, %v13170_v7  ;;  %v17719_v53 = vand.u32 4294901760, %v12937_v3  ;;  %v13279_v62 = vpop.f32.mrb[31].mxu0 }
 0x343   : > { %17714 = vst [vmem:[#allocation204_spill] sm:$0xff] %v13258_v61  ;;  %v13266_v31 = vpack.c.bf16 %v17716_v27, %v17715_v18  ;;  %17721 = vst [vmem:[#allocation207_spill] sm:$0xff] %v13279_v62  ;;  %v3596_v2 = vand.u32 4294901760, %v3595_v39  ;;  %v2753_v27 = vsel %vm2703_vm1, %v2633_v51, 0  ;;  %v3610_v49 = vand.u32 4294901760, %v3609_v19  ;;  %v9311_v54 = vpop.f32.mrb[32].mxu0 }
 0x344   : > { %17713 = vst [vmem:[#allocation203_spill] sm:$0xff] %v13253_v29  ;;  %v13271_v41 = vsub.f32 %v13170_v7, %v17718_v16  ;;  %v13276_v59 = vsub.f32 %v12937_v3, %v17719_v53  ;;  %v3617_v18 = vand.u32 4294901760, %v3616_v56  ;;  %v17722_v16 = vand.u32 4294901760, %v13198_v42  ;;  %v2537_v56 = vpop.f32.mrb[33].mxu0 }
 0x345   : > { %17717 = vst [vmem:[#allocation205_spill] sm:$0xff] %v13266_v31  ;;  %9845 = vmatpush1.bf16.msra.mxu0 %v13266_v31  ;;  %10215 = vmatpush1.bf16.msra.mxu1 %v13266_v31  ;;  %v13293_v51 = vpack.c.bf16 %v3575_v40, %v3568_v48  ;;  %v17724_v39 = vand.u32 4294901760, %v13203_v26  ;;  %v17725_v19 = vand.u32 4294901760, %v12951_v17  ;;  %v17727_v53 = vand.u32 4294901760, %v13279_v62 }
 0x346   : > { %17720 = vst [vmem:[#allocation206_spill] sm:$0xff] %v13276_v59  ;;  %v13288_v3 = vsub.f32 %v13198_v42, %v17722_v16  ;;  %9846 = vmatprep.subr.bf16.mxu0 %v17543_v43  ;;  %10200 = vmatprep.subr.bf16.mxu1 %v17543_v43  ;;  %v17728_v7 = vand.u32 4294901760, %v13260_v11  ;;  %v13313_v40 = vand.u32 4294901760, %v2753_v27  ;;  %v5874_v42 = vand.u32 4294901760, %v9311_v54 }
 0x347   : > { %v13298_v15 = vsub.f32 %v13203_v26, %v17724_v39  ;;  %v13304_v16 = vsub.f32 %v12951_v17, %v17725_v19  ;;  %v13316_v26 = vpack.c.bf16 %v3589_v20, %v3582_v32  ;;  %v5871_v19 = vand.u32 4294901760, %v2537_v56 }
 0x348   : > { %17723 = vst [vmem:[#allocation208_spill] sm:$0xff] %v13288_v3  ;;  %v13310_v31 = vpack.c.bf16 %v17728_v7, %v17727_v53  ;;  %17730 = vst [vmem:[#allocation211_spill] sm:$0xff] %v13313_v40  ;;  %v13321_v62 = vpack.c.bf16 %v3603_v13, %v3596_v2  ;;  %v13323_v7 = vpack.c.bf16 %v3617_v18, %v3610_v49  ;;  %v17732_v32 = vand.u32 4294901760, %v13253_v29  ;;  %v2649_v2 = vld [vmem:[#allocation8 + $0x210] sm:$0xff]  ;;  %v9314_v53 = vpop.f32.mrb[34].mxu0 }
 0x349   : > { %17726 = vst [vmem:[#allocation209_spill] sm:$0xff] %v13304_v16  ;;  %v13326_v48 = vsub.f32 %v9311_v54, %v5874_v42  ;;  %v17733_v39 = vand.u32 4294901760, %v13258_v61  ;;  %v13341_v18 = vpack.c.bf16 %v5874_v42, %v5871_v19  ;;  %v13343_v54 = vsub.f32 %v2537_v56, %v5871_v19  ;;  %v2549_v3 = vpop.f32.mrb[35].mxu0 }
 0x34a   : > { %17729 = vst [vmem:[#allocation210_spill] sm:$0xff] %v13310_v31  ;;  %9848 = vmatpush1.bf16.msra.mxu0 %v13310_v31  ;;  %10216 = vmatpush1.bf16.msra.mxu1 %v13310_v31  ;;  %v13332_v20 = vsub.f32 %v13253_v29, %v17732_v32  ;;  %v13346_v31 = vsub.f32 %v2753_v27, %v13313_v40  ;;  %v17736_v32 = vand.u32 4294901760, %v12980_v46  ;;  %v5880_v29 = vand.u32 4294901760, %v9314_v53 }
 0x34b   : > { %17731 = vst [vmem:[#allocation212_spill] sm:$0xff] %v13326_v48  ;;  %9849 = vmatprep.subr.bf16.mxu1 %v17543_v43  ;;  %v13338_v13 = vsub.f32 %v13258_v61, %v17733_v39  ;;  %17734 = vst [vmem:[#allocation213_spill] sm:$0xff] %v13343_v54  ;;  %v17738_v39 = vand.u32 4294901760, %v12208_v45  ;;  %v17739_v49 = vand.u32 4294901760, %v12213_v37  ;;  %v16955_v42 = vand.u32 4294901760, %v13326_v48  ;;  %10090 = vmatprep.subr.bf16.mxu0 %v13341_v18  ;;  %v9317_v40 = vpop.f32.mrb[36].mxu0 }
 0x34c   : > { %17735 = vst [vmem:[#allocation214_spill] sm:$0xff] %v13346_v31  ;;  %v13351_v17 = vsub.f32 %v12980_v46, %v17736_v32  ;;  %v17740_v56 = vand.u32 4294901760, %v13276_v59  ;;  %v5877_v19 = vand.u32 4294901760, %v2549_v3  ;;  %v13368_v45 = vpack.c.bf16 %v13326_v48, %v13343_v54 }
 0x34d   : > { %2931 = vmatmul.mubr.f32.vlgmr.msra.gmra.mrb[40].mxu0 %v17738_v39  ;;  %3036 = vmatmul.mubr.f32.vlgmr.msra.gmra.mrb[0].mxu1 %v17739_v49  ;;  %v13370_v37 = vand.u32 4294901760, %v2649_v2  ;;  %v17742_v49 = vand.u32 4294901760, %v12995_v47  ;;  %v13377_v39 = vsub.f32 %v9314_v53, %v5880_v29  ;;  %v17749_v53 = vand.u32 4294901760, %v13343_v54 }
 0x34e   : > { %17737 = vst [vmem:[#allocation215_spill] sm:$0xff] %v13351_v17  ;;  %v13361_v27 = vsub.f32 %v13276_v59, %v17740_v56  ;;  %9851 = vmatpush1.bf16.msra.mxu1 %v13077_v5  ;;  %10092 = vmatpush3.bf16.msra.mxu0 %v13341_v18  ;;  %v17745_v5 = vand.u32 4294901760, %v12265_v21  ;;  %v6354_v56 = vsub.f32 %v13326_v48, %v16955_v42  ;;  %v2561_v42 = vpop.f32.mrb[37].mxu0  ;;  %v17750_v46 = vand.u32 4294901760, %v12290_v33 }
 0x34f   : > { %17741 = vst [vmem:[#allocation216_spill] sm:$0xff] %v13370_v37  ;;  %v13375_v32 = vsub.f32 %v12995_v47, %v17742_v49  ;;  %17744 = vst [vmem:[#allocation218_spill] sm:$0xff] %v13377_v39  ;;  %v13386_v61 = vpack.c.bf16 %v5880_v29, %v5877_v19  ;;  %v13388_v59 = vsub.f32 %v2549_v3, %v5877_v19  ;;  %v17748_v47 = vand.u32 4294901760, %v12278_v36 }
 0x350   : > { %2940 = vmatprep.mubr.f32.mxu0 %v17745_v5  ;;  %9852 = vmatprep.subr.bf16.mxu1 %v17543_v43  ;;  %v6347_v21 = vsub.f32 %v13343_v54, %v17749_v53  ;;  %v5886_v5 = vand.u32 4294901760, %v9317_v40  ;;  %v17751_v29 = vand.u32 4294901760, %v12298_v30  ;;  %v6355_v3 = vand.u32 4294901760, %v6354_v56  ;;  %v9320_v30 = vpop.f32.mrb[38].mxu0 }
 0x351   : > { %17743 = vst [vmem:[#allocation217_spill] sm:$0xff] %v13375_v32  ;;  %17746 = vst [vmem:[#allocation219_spill] sm:$0xff] %v13386_v61  ;;  %3045 = vmatprep.mubr.f32.mxu1 %v17748_v47  ;;  %2946 = vmatmul.mubr.f32.gmra.mrb[42].mxu0 %v17750_v46  ;;  %v16957_v36 = vand.u32 4294901760, %v13377_v39  ;;  %v17752_v19 = vand.u32 4294901760, %v13304_v16  ;;  %v5883_v48 = vand.u32 4294901760, %v2561_v42  ;;  %v13411_v46 = vsub.f32 %v2649_v2, %v13370_v37 }
 0x352   : > { %17747 = vst [vmem:[#allocation220_spill] sm:$0xff] %v13388_v59  ;;  %3051 = vmatmul.mubr.f32.gmra.mrb[2].mxu1 %v17751_v29  ;;  %10094 = vmatprep.subr.bf16.mxu0 %v13386_v61  ;;  %v6348_v53 = vand.u32 4294901760, %v6347_v21  ;;  %v17754_v56 = vand.u32 4294901760, %v13035_v8  ;;  %v17760_v33 = vand.u32 4294901760, %v12327_v63 }
 0x353   : > { %v13405_v47 = vsub.f32 %v13304_v16, %v17752_v19  ;;  %9854 = vmatpush1.bf16.msra.mxu1 %v13097_v6  ;;  %17753 = vst [vmem:[#allocation221_spill] sm:$0xff] %v13411_v46  ;;  %v13419_v19 = vsub.f32 %v9317_v40, %v5886_v5  ;;  %10096 = vmatpush3.bf16.msra.mxu0 %v13386_v61  ;;  %v17757_v6 = vand.u32 4294901760, %v12303_v44  ;;  %v5892_v44 = vand.u32 4294901760, %v9320_v30  ;;  %v17937_v16 = vld [vmem:[#allocation183_spill] sm:$0xff] }
 0x354   : > { %v13417_v29 = vsub.f32 %v13035_v8, %v17754_v56  ;;  %v6368_v21 = vsub.f32 %v13377_v39, %v16957_v36  ;;  %v13427_v2 = vpack.c.bf16 %v5886_v5, %v5883_v48  ;;  %v13429_v49 = vsub.f32 %v2561_v42, %v5883_v48  ;;  %3060 = vmatprep.mubr.f32.mxu1 %v17760_v33  ;;  %v2573_v56 = vpop.f32.mrb[39].mxu0 }
 0x355   : > { %17756 = vst [vmem:[#allocation223_spill] sm:$0xff] %v13419_v19  ;;  %2955 = vmatprep.mubr.f32.mxu0 %v17757_v6  ;;  %9855 = vmatprep.subr.bf16.mxu1 %v17543_v43  ;;  %v13434_v8 = vpack.c.bf16 %v6355_v3, %v6348_v53  ;;  %v17761_v6 = vand.u32 4294901760, %v12332_v25  ;;  %v17762_v5 = vand.u32 4294901760, %v12337_v4  ;;  %v17763_v48 = vand.u32 4294901760, %v13388_v59 }
 0x356   : > { %17755 = vst [vmem:[#allocation222_spill] sm:$0xff] %v13417_v29  ;;  %17758 = vst [vmem:[#allocation224_spill] sm:$0xff] %v13427_v2  ;;  %v6369_v63 = vand.u32 4294901760, %v6368_v21  ;;  %v16958_v33 = vand.u32 4294901760, %v13419_v19  ;;  %v17764_v3 = vand.u32 4294901760, %v13044_v12  ;;  %v17766_v36 = vand.u32 4294901760, %v13069_v9  ;;  %10098 = vmatprep.subr.bf16.mxu0 %v13427_v2 }
 0x357   : > { %17759 = vst [vmem:[#allocation225_spill] sm:$0xff] %v13429_v49  ;;  %2961 = vmatmul.mubr.f32.gmra.mrb[44].mxu0 %v17761_v6  ;;  %3066 = vmatmul.mubr.f32.gmra.mrb[4].mxu1 %v17762_v5  ;;  %v6361_v42 = vsub.f32 %v13388_v59, %v17763_v48  ;;  %v5889_v6 = vand.u32 4294901760, %v2573_v56  ;;  %v2636_v21 = vld [vmem:[#allocation8 + $0x1a8] sm:$0xff]  ;;  %v17768_v5 = vand.u32 4294901760, %v13089_v24 }
 0x358   : > { %v13448_v53 = vsub.f32 %v13044_v12, %v17764_v3  ;;  %v13453_v25 = vsub.f32 %v13069_v9, %v17766_v36  ;;  %9857 = vmatpush1.bf16.msra.mxu1 %v13182_v57  ;;  %v13463_v12 = vsub.f32 %v9320_v30, %v5892_v44  ;;  %10100 = vmatpush3.bf16.msra.mxu0 %v13427_v2  ;;  %v17771_v9 = vand.u32 4294901760, %v12344_v23 }
 0x359   : > { %v13461_v48 = vsub.f32 %v13089_v24, %v17768_v5  ;;  %v6362_v36 = vand.u32 4294901760, %v6361_v42  ;;  %v6382_v57 = vsub.f32 %v13419_v19, %v16958_v33  ;;  %v16963_v3 = vand.u32 4294901760, %v13375_v32  ;;  %9858 = vmatprep.subr.bf16.mxu1 %v17543_v43 }
 0x35a   : > { %17765 = vst [vmem:[#allocation226_spill] sm:$0xff] %v13448_v53  ;;  %17767 = vst [vmem:[#allocation227_spill] sm:$0xff] %v13453_v25  ;;  %2970 = vmatprep.mubr.f32.mxu0 %v17771_v9  ;;  %v13472_v40 = vpack.c.bf16 %v5892_v44, %v5889_v6  ;;  %v13474_v4 = vsub.f32 %v2573_v56, %v5889_v6  ;;  %v17774_v24 = vand.u32 4294901760, %v12350_v28  ;;  %v17775_v30 = vand.u32 4294901760, %v13429_v49 }
 0x35b   : > { %17769 = vst [vmem:[#allocation228_spill] sm:$0xff] %v13461_v48  ;;  %17770 = vst [vmem:[#allocation229_spill] sm:$0xff] %v13463_v12  ;;  %v16959_v42 = vand.u32 4294901760, %v13463_v12  ;;  %v17776_v5 = vand.u32 4294901760, %v12355_v0  ;;  %v17777_v9 = vand.u32 4294901760, %v12363_v14  ;;  %v13487_v44 = vpack.c.bf16 %v6369_v63, %v6362_v36 }
 0x35c   : > { %17772 = vst [vmem:[#allocation230_spill] sm:$0xff] %v13472_v40  ;;  %17773 = vst [vmem:[#allocation231_spill] sm:$0xff] %v13474_v4  ;;  %3075 = vmatprep.mubr.f32.mxu1 %v17774_v24  ;;  %v6375_v23 = vsub.f32 %v13429_v49, %v17775_v30  ;;  %v6383_v56 = vand.u32 4294901760, %v6382_v57  ;;  %v2756_v28 = vsel %vm2703_vm1, %v2636_v21, 0  ;;  %v16960_v6 = vand.u32 4294901760, %v13474_v4  ;;  %9860 = vmatpush1.bf16.msra.mxu1 %v13293_v51 }
 0x35d   : > { %2976 = vmatmul.mubr.f32.gmra.mrb[46].mxu0 %v17776_v5  ;;  %3081 = vmatmul.mubr.f32.gmra.mrb[6].mxu1 %v17777_v9  ;;  %v17778_v30 = vand.u32 4294901760, %v13351_v17  ;;  %v16964_v14 = vand.u32 4294901760, %v13346_v31  ;;  %v16961_v63 = vand.u32 4294901760, %v13417_v29  ;;  %v16962_v36 = vand.u32 4294901760, %v13448_v53 }
 0x35e   : > { %10102 = vmatprep.subr.bf16.mxu0 %v13472_v40  ;;  %v6376_v24 = vand.u32 4294901760, %v6375_v23  ;;  %v6396_v51 = vsub.f32 %v13463_v12, %v16959_v42  ;;  %v17779_v57 = vand.u32 4294901760, %v12378_v1  ;;  %v6389_v5 = vsub.f32 %v13474_v4, %v16960_v6  ;;  %v2653_v42 = vld [vmem:[#allocation8 + $0x230] sm:$0xff]  ;;  %9861 = vmatprep.subr.bf16.mxu1 %v17543_v43 }
 0x35f   : > { %v13496_v0 = vsub.f32 %v13351_v17, %v17778_v30  ;;  %10104 = vmatpush3.bf16.msra.mxu0 %v13472_v40  ;;  %v17780_v9 = vand.u32 4294901760, %v12387_v38  ;;  %v13517_v33 = vand.u32 4294901760, %v2756_v28  ;;  %v17782_v21 = vand.u32 4294901760, %v13125_v34  ;;  %v17922_v17 = vld [vmem:[#allocation175_spill] sm:$0xff] }
 0x360   : > { %2985 = vmatprep.mubr.f32.mxu0 %v17779_v57  ;;  %10106 = vmatprep.subr.bf16.mxu0 %v13434_v8  ;;  %v13515_v30 = vpack.c.bf16 %v6383_v56, %v6376_v24  ;;  %v17784_v57 = vand.u32 4294901760, %v12396_v52  ;;  %v17785_v6 = vand.u32 4294901760, %v12401_v58  ;;  %v3651_v38 = vsub.f32 %v13375_v32, %v16963_v3  ;;  %v17797_v3 = vld [vmem:[#allocation84_spill] sm:$0xff] }
 0x361   : > { %3090 = vmatprep.mubr.f32.mxu1 %v17780_v9  ;;  %17781 = vst [vmem:[#allocation232_spill] sm:$0xff] %v13517_v33  ;;  %v13522_v1 = vsub.f32 %v13125_v34, %v17782_v21  ;;  %v6397_v56 = vand.u32 4294901760, %v6396_v51  ;;  %v16965_v24 = vand.u32 4294901760, %v13411_v46  ;;  %v17786_v9 = vand.u32 4294901760, %v13140_v35  ;;  %9863 = vmatpush1.bf16.msra.mxu1 %v13316_v26 }
 0x362   : > { %2991 = vmatmul.mubr.f32.gmra.mrb[48].mxu0 %v17784_v57  ;;  %3096 = vmatmul.mubr.f32.gmra.mrb[8].mxu1 %v17785_v6  ;;  %v17788_v52 = vand.u32 4294901760, %v12461_v55  ;;  %v3638_v58 = vand.u32 4294901760, %v13405_v47  ;;  %v6390_v34 = vand.u32 4294901760, %v6389_v5  ;;  %v13544_v6 = vsub.f32 %v13346_v31, %v16964_v14 }
 0x363   : > { %17783 = vst [vmem:[#allocation233_spill] sm:$0xff] %v13522_v1  ;;  %v13535_v23 = vsub.f32 %v13140_v35, %v17786_v9  ;;  %v17789_v21 = vand.u32 4294901760, %v12466_v60  ;;  %v3665_v35 = vsub.f32 %v13448_v53, %v16962_v36  ;;  %v3672_v55 = vsub.f32 %v13417_v29, %v16961_v63  ;;  %9864 = vmatprep.subr.bf16.mxu1 %v17543_v43 }
 0x364   : > { %3000 = vmatprep.mubr.f32.mxu0 %v17788_v52  ;;  %v17790_v47 = vand.u32 4294901760, %v13453_v25  ;;  %v13558_v5 = vand.u32 4294901760, %v2653_v42  ;;  %v17792_v26 = vand.u32 4294901760, %v13332_v20  ;;  %v17793_v60 = vand.u32 4294901760, %v13298_v15 }
 0x365   : > { %17787 = vst [vmem:[#allocation234_spill] sm:$0xff] %v13535_v23  ;;  %3105 = vmatprep.mubr.f32.mxu1 %v17789_v21  ;;  %v13567_v9 = vpack.c.bf16 %v6397_v56, %v6390_v34  ;;  %v17794_v52 = vand.u32 4294901760, %v13461_v48  ;;  %v13573_v63 = vsub.f32 %v2756_v28, %v13517_v33  ;;  %v17796_v36 = vand.u32 4294901760, %v12477_v22  ;;  %v2639_v34 = vld [vmem:[#allocation8 + $0x1c0] sm:$0xff]  ;;  %v17802_v22 = vld [vmem:[#allocation86_spill] sm:$0xff]  ;;  %9866 = vmatpush1.bf16.msra.mxu1 %v13321_v62 }
 0x366   : > { %v3686_v51 = vsub.f32 %v13453_v25, %v17790_v47  ;;  %17791 = vst [vmem:[#allocation235_spill] sm:$0xff] %v13558_v5  ;;  %v13565_v57 = vpack.c.bf16 %v17793_v60, %v17792_v26  ;;  %v17798_v20 = vand.u32 4294901760, %v17797_v3  ;;  %v3652_v15 = vand.u32 4294901760, %v3651_v38  ;;  %v17799_v60 = vld [vmem:[#allocation195_spill] sm:$0xff]  ;;  %9867 = vmatprep.subr.bf16.mxu1 %v17543_v43 }
 0x367   : > { %v3679_v21 = vsub.f32 %v13461_v48, %v17794_v52  ;;  %17795 = vst [vmem:[#allocation236_spill] sm:$0xff] %v13573_v63  ;;  %3006 = vmatmul.mubr.f32.gmra.mrb[50].mxu0 %v17796_v36  ;;  %v3659_v26 = vand.u32 4294901760, %v13496_v0  ;;  %v13584_v56 = vsub.f32 %v13411_v46, %v16965_v24  ;;  %v17800_v52 = vand.u32 4294901760, %v17799_v60  ;;  %v17804_v3 = vld [vmem:[#allocation87_spill] sm:$0xff]  ;;  %v2645_v24 = vld [vmem:[#allocation8 + $0x1f0] sm:$0xff]  ;;  %v17917_v48 = vld [vmem:[#allocation172_spill] sm:$0xff] }
 0x368   : > { %3111 = vmatmul.mubr.f32.gmra.mrb[10].mxu1 %v17798_v20  ;;  %v17803_v36 = vand.u32 4294901760, %v17802_v22  ;;  %v17805_v38 = vand.u32 4294901760, %v17804_v3  ;;  %v17806_v0 = vand.u32 4294901760, %v13361_v27  ;;  %v3666_v28 = vand.u32 4294901760, %v3665_v35  ;;  %v17808_v22 = vld [vmem:[#allocation197_spill] sm:$0xff] }
 0x369   : > { %v13590_v14 = vsub.f32 %v17799_v60, %v17800_v52  ;;  %v3673_v47 = vand.u32 4294901760, %v3672_v55  ;;  %v3687_v46 = vand.u32 4294901760, %v3686_v51  ;;  %v13603_v60 = vsub.f32 %v2653_v42, %v13558_v5  ;;  %v2642_v52 = vld [vmem:[#allocation8 + $0x1d8] sm:$0xff]  ;;  %v17813_v42 = vld [vmem:[#allocation89_spill] sm:$0xff]  ;;  %v17815_v51 = vld [vmem:[#allocation92_spill] sm:$0xff]  ;;  %9869 = vmatpush1.bf16.msra.mxu1 %v13323_v7 }
 0x36a   : > { %3015 = vmatprep.mubr.f32.mxu0 %v17803_v36  ;;  %3120 = vmatprep.mubr.f32.mxu1 %v17805_v38  ;;  %v13598_v20 = vpack.c.bf16 %v17806_v0, %v3638_v58  ;;  %v17809_v36 = vand.u32 4294901760, %v17808_v22  ;;  %v3680_v27 = vand.u32 4294901760, %v3679_v21  ;;  %v2759_v38 = vsel %vm2703_vm1, %v2639_v34, 0  ;;  %v17818_v58 = vld [vmem:[#allocation202_spill] sm:$0xff] }
 0x36b   : > { %17801 = vst [vmem:[#allocation84_spill] sm:$0xff] %v13590_v14  ;;  %17807 = vst [vmem:[#allocation195_spill] sm:$0xff] %v13603_v60  ;;  %v17811_v62 = vand.u32 4294901760, %v13213_v50  ;;  %v17814_v55 = vand.u32 4294901760, %v17813_v42  ;;  %v17816_v0 = vand.u32 4294901760, %v17815_v51  ;;  %v17819_v5 = vand.u32 4294901760, %v17818_v58  ;;  %9870 = vmatprep.subr.bf16.mxu1 %v17543_v43 }
 0x36c   : > { %v13608_v3 = vsub.f32 %v17808_v22, %v17809_v36  ;;  %v13622_v22 = vpack.c.bf16 %v3659_v26, %v3652_v15  ;;  %v17817_v36 = vand.u32 4294901760, %v13522_v1  ;;  %v17825_v15 = vand.u32 4294901760, %v13535_v23 }
 0x36d   : > { %v13616_v35 = vsub.f32 %v13213_v50, %v17811_v62  ;;  %3021 = vmatmul.mubr.f32.gmra.mrb[52].mxu0 %v17814_v55  ;;  %3126 = vmatmul.mubr.f32.gmra.mrb[12].mxu1 %v17816_v0  ;;  %v13632_v50 = vsub.f32 %v17818_v58, %v17819_v5  ;;  %v17821_v62 = vld [vmem:[#allocation93_spill] sm:$0xff]  ;;  %v17823_v55 = vld [vmem:[#allocation94_spill] sm:$0xff]  ;;  %v17826_v34 = vand.u32 4294901760, %v13260_v11  ;;  %v17828_v5 = vld [vmem:[#allocation207_spill] sm:$0xff]  ;;  %v17918_v29 = vand.u32 4294901760, %v17917_v48 }
 0x36e   : > { %17810 = vst [vmem:[#allocation86_spill] sm:$0xff] %v13608_v3  ;;  %v3700_v21 = vsub.f32 %v13522_v1, %v17817_v36  ;;  %v17822_v42 = vand.u32 4294901760, %v17821_v62  ;;  %v17824_v51 = vand.u32 4294901760, %v17823_v55  ;;  %v3693_v26 = vsub.f32 %v13535_v23, %v17825_v15  ;;  %v2652_v0 = vld [vmem:[#allocation8 + $0x228] sm:$0xff]  ;;  %v17839_v15 = vld [vmem:[#allocation98_spill] sm:$0xff]  ;;  %9872 = vmatpush1.bf16.msra.mxu1 %v13565_v57 }
 0x36f   : > { %17812 = vst [vmem:[#allocation87_spill] sm:$0xff] %v13616_v35  ;;  %17820 = vst [vmem:[#allocation197_spill] sm:$0xff] %v13632_v50  ;;  %v2762_v36 = vsel %vm2703_vm1, %v2642_v52, 0  ;;  %v13645_v37 = vsub.f32 %v13260_v11, %v17826_v34  ;;  %v17829_v58 = vand.u32 4294901760, %v17828_v5  ;;  %v13655_v55 = vand.u32 4294901760, %v2759_v38  ;;  %9873 = vmatprep.subr.bf16.mxu1 %v17543_v43 }
 0x370   : > { %3135 = vmatprep.mubr.f32.mxu1 %v17822_v42  ;;  %9337 = vmatprep.mubr.f32.mxu0 %v17824_v51  ;;  %v13653_v42 = vpack.c.bf16 %v3673_v47, %v3666_v28  ;;  %v13659_v52 = vpack.c.bf16 %v3687_v46, %v3680_v27  ;;  %v17832_v11 = vand.u32 4294901760, %v13573_v63  ;;  %v17833_v47 = vld [vmem:[#allocation95_spill] sm:$0xff]  ;;  %v13672_v51 = vand.u32 4294901760, %v2652_v0 }
 0x371   : > { %17827 = vst [vmem:[#allocation89_spill] sm:$0xff] %v13645_v37  ;;  %v13650_v62 = vsub.f32 %v17828_v5, %v17829_v58  ;;  %17831 = vst [vmem:[#allocation202_spill] sm:$0xff] %v13655_v55  ;;  %v2656_v5 = vld [vmem:[#allocation8 + $0x248] sm:$0xff]  ;;  %v17834_v28 = vand.u32 4294901760, %v17833_v47  ;;  %v13674_v46 = vand.u32 4294901760, %v2762_v36  ;;  %v2765_v27 = vsel %vm2703_vm1, %v2645_v24, 0 }
 0x372   : > { %v13664_v34 = vsub.f32 %v13573_v63, %v17832_v11  ;;  %v17835_v58 = vld [vmem:[#allocation96_spill] sm:$0xff]  ;;  %17837 = vst [vmem:[#allocation93_spill] sm:$0xff] %v13672_v51  ;;  %v17840_v63 = vand.u32 4294901760, %v17839_v15  ;;  %v3694_v7 = vand.u32 4294901760, %v3693_v26  ;;  %v3701_v54 = vand.u32 4294901760, %v3700_v21  ;;  %v17844_v21 = vld [vmem:[#allocation101_spill] sm:$0xff]  ;;  %9875 = vmatpush1.bf16.msra.mxu1 %v13598_v20 }
 0x373   : > { %17830 = vst [vmem:[#allocation92_spill] sm:$0xff] %v13650_v62  ;;  %3141 = vmatmul.mubr.f32.gmra.mrb[14].mxu1 %v17834_v28  ;;  %v17836_v31 = vand.u32 4294901760, %v17835_v58  ;;  %17838 = vst [vmem:[#allocation94_spill] sm:$0xff] %v13674_v46  ;;  %v17841_v47 = vand.u32 4294901760, %v13590_v14  ;;  %v2655_v24 = vld [vmem:[#allocation8 + $0x240] sm:$0xff]  ;;  %v17845_v26 = vand.u32 4294901760, %v17844_v21  ;;  %v13722_v58 = vsub.f32 %v2762_v36, %v13674_v46  ;;  %9876 = vmatprep.subr.bf16.mxu1 %v17543_v43 }
 0x374   : > { %3150 = vmatprep.mubr.f32.mxu1 %v17840_v63  ;;  %v13693_v63 = vand.u32 4294901760, %v2656_v5  ;;  %v17846_v15 = vand.u32 4294901760, %v13608_v3  ;;  %v17847_v57 = vand.u32 4294901760, %v13603_v60  ;;  %v17849_v11 = vld [vmem:[#allocation103_spill] sm:$0xff]  ;;  %v17851_v21 = vld [vmem:[#allocation109_spill] sm:$0xff]  ;;  %v17853_v61 = vand.u32 4294901760, %v13616_v35 }
 0x375   : > { %9338 = vmatmul.mubr.f32.vlgmr.msra.gmra.mrb[54].mxu0 %v17836_v31  ;;  %v13684_v28 = vsub.f32 %v13590_v14, %v17841_v47  ;;  %v2648_v31 = vld [vmem:[#allocation8 + $0x208] sm:$0xff]  ;;  %v17850_v2 = vand.u32 4294901760, %v17849_v11  ;;  %17855 = vst [vmem:[#allocation101_spill] sm:$0xff] %v13722_v58  ;;  %v17860_v36 = vand.u32 4294901760, %v13650_v62  ;;  %v17923_v32 = vand.u32 4294901760, %v17922_v17 }
 0x376   : > { %10108 = vmatpush3.bf16.msra.mxu0 %v13434_v8  ;;  %v13691_v8 = vsub.f32 %v2759_v38, %v13655_v55  ;;  %17843 = vst [vmem:[#allocation95_spill] sm:$0xff] %v13693_v63  ;;  %9340 = vmatprep.mubr.f32.mxu0 %v17845_v26  ;;  %v3707_v47 = vsub.f32 %v13608_v3, %v17846_v15  ;;  %v13707_v38 = vand.u32 4294901760, %v2765_v27  ;;  %v17852_v26 = vand.u32 4294901760, %v17851_v21  ;;  %v2654_v3 = vld [vmem:[#allocation8 + $0x238] sm:$0xff] }
 0x377   : > { %10110 = vmatprep.subr.bf16.mxu0 %v13487_v44  ;;  %v13705_v40 = vsub.f32 %v13603_v60, %v17847_v57  ;;  %3156 = vmatmul.mubr.f32.gmra.mrb[16].mxu1 %v17850_v2  ;;  %v13716_v14 = vsub.f32 %v13616_v35, %v17853_v61  ;;  %v13719_v15 = vsub.f32 %v2652_v0, %v13672_v51  ;;  %v2768_v57 = vsel %vm2703_vm1, %v2648_v31, 0  ;;  %v2659_v60 = vld [vmem:[#allocation8 + $0x260] sm:$0xff]  ;;  %v17856_v2 = vld [vmem:[#allocation114_spill] sm:$0xff] }
 0x378   : > { %17842 = vst [vmem:[#allocation207_spill] sm:$0xff] %v13691_v8  ;;  %17848 = vst [vmem:[#allocation96_spill] sm:$0xff] %v13707_v38  ;;  %v17857_v11 = vand.u32 4294901760, %v17856_v2  ;;  %v13728_v21 = vpack.c.bf16 %v3701_v54, %v3694_v7  ;;  %v17858_v61 = vand.u32 4294901760, %v13632_v50  ;;  %v13734_v51 = vand.u32 4294901760, %v2655_v24  ;;  %v2651_v2 = vld [vmem:[#allocation8 + $0x220] sm:$0xff]  ;;  %9878 = vmatpush1.bf16.msra.mxu1 %v13622_v22 }
 0x379   : > { %9341 = vmatmul.mubr.f32.gmra.mrb[56].mxu0 %v17852_v26  ;;  %17854 = vst [vmem:[#allocation98_spill] sm:$0xff] %v13719_v15  ;;  %v3715_v26 = vand.u32 4294901760, %v13684_v28  ;;  %v17861_v31 = vand.u32 4294901760, %v13645_v37  ;;  %v13746_v28 = vsub.f32 %v2656_v5, %v13693_v63  ;;  %v17868_v7 = vld [vmem:[#allocation127_spill] sm:$0xff]  ;;  %v17870_v5 = vld [vmem:[#allocation132_spill] sm:$0xff]  ;;  %9879 = vmatprep.subr.bf16.mxu1 %v17543_v43 }
 0x37a   : > { %10112 = vmatpush3.bf16.msra.mxu0 %v13487_v44  ;;  %3165 = vmatprep.mubr.f32.mxu1 %v17857_v11  ;;  %v3721_v0 = vsub.f32 %v13632_v50, %v17858_v61  ;;  %17859 = vst [vmem:[#allocation103_spill] sm:$0xff] %v13734_v51  ;;  %v3735_v44 = vsub.f32 %v13650_v62, %v17860_v36  ;;  %v2658_v11 = vld [vmem:[#allocation8 + $0x258] sm:$0xff]  ;;  %v17863_v61 = vld [vmem:[#allocation121_spill] sm:$0xff]  ;;  %v13755_v62 = vand.u32 4294901760, %v2768_v57  ;;  %v17871_v63 = vand.u32 4294901760, %v17870_v5 }
 0x37b   : > { %10114 = vmatprep.subr.bf16.mxu0 %v13515_v30  ;;  %v3742_v54 = vsub.f32 %v13645_v37, %v17861_v31  ;;  %17862 = vst [vmem:[#allocation109_spill] sm:$0xff] %v13746_v28  ;;  %v17864_v35 = vand.u32 4294901760, %v17863_v61  ;;  %v13753_v36 = vsub.f32 %v2765_v27, %v13707_v38  ;;  %v13757_v31 = vand.u32 4294901760, %v2659_v60  ;;  %v17872_v27 = vld [vmem:[#allocation133_spill] sm:$0xff] }
 0x37c   : > { %17866 = vst [vmem:[#allocation121_spill] sm:$0xff] %v13755_v62  ;;  %v17869_v37 = vand.u32 4294901760, %v17868_v7  ;;  %v3708_v50 = vand.u32 4294901760, %v3707_v47  ;;  %v17873_v1 = vand.u32 4294901760, %v17872_v27  ;;  %v3722_v23 = vand.u32 4294901760, %v3721_v0  ;;  %v2662_v0 = vld [vmem:[#allocation8 + $0x278] sm:$0xff]  ;;  %9881 = vmatpush1.bf16.msra.mxu1 %v13653_v42 }
 0x37d   : > { %9343 = vmatprep.mubr.f32.mxu0 %v17864_v35  ;;  %17865 = vst [vmem:[#allocation114_spill] sm:$0xff] %v13753_v36  ;;  %17867 = vst [vmem:[#allocation237_spill] sm:$0xff] %v13757_v31  ;;  %v3729_v35 = vand.u32 4294901760, %v13716_v14  ;;  %v13770_v7 = vsub.f32 %v2655_v24, %v13734_v51  ;;  %v3736_v14 = vand.u32 4294901760, %v3735_v44  ;;  %v3743_v47 = vand.u32 4294901760, %v3742_v54  ;;  %v2657_v24 = vld [vmem:[#allocation8 + $0x250] sm:$0xff]  ;;  %9882 = vmatprep.subr.bf16.mxu1 %v17543_v43 }
 0x37e   : > { %3171 = vmatmul.mubr.f32.gmra.mrb[18].mxu1 %v17869_v37  ;;  %9344 = vmatmul.mubr.f32.gmra.mrb[58].mxu0 %v17871_v63  ;;  %v2771_v37 = vsel %vm2703_vm1, %v2651_v2, 0  ;;  %v13773_v63 = vand.u32 4294901760, %v2658_v11  ;;  %v17876_v5 = vand.u32 4294901760, %v13691_v8  ;;  %v17877_v27 = vld [vmem:[#allocation136_spill] sm:$0xff]  ;;  %v13788_v2 = vsub.f32 %v2768_v57, %v13755_v62 }
 0x37f   : > { %10116 = vmatpush3.bf16.msra.mxu0 %v13515_v30  ;;  %3180 = vmatprep.mubr.f32.mxu1 %v17873_v1  ;;  %17874 = vst [vmem:[#allocation127_spill] sm:$0xff] %v13770_v7  ;;  %v17878_v20 = vand.u32 4294901760, %v17877_v27  ;;  %v13791_v44 = vsub.f32 %v2659_v60, %v13757_v31  ;;  %v2774_v54 = vsel %vm2703_vm1, %v2654_v3, 0  ;;  %v17883_v1 = vld [vmem:[#allocation141_spill] sm:$0xff]  ;;  %v13798_v27 = vpack.c.bf16 %v3715_v26, %v3708_v50 }
 0x380   : > { %17875 = vst [vmem:[#allocation132_spill] sm:$0xff] %v13773_v63  ;;  %10118 = vmatprep.subr.bf16.mxu0 %v13567_v9  ;;  %v13780_v30 = vsub.f32 %v13691_v8, %v17876_v5  ;;  %17879 = vst [vmem:[#allocation133_spill] sm:$0xff] %v13788_v2  ;;  %v17881_v5 = vld [vmem:[#allocation134_spill] sm:$0xff]  ;;  %v17884_v51 = vand.u32 4294901760, %v17883_v1  ;;  %v17886_v57 = vand.u32 4294901760, %v13722_v58  ;;  %v13810_v31 = vand.u32 4294901760, %v2771_v37  ;;  %9884 = vmatpush1.bf16.msra.mxu1 %v13659_v52 }
 0x381   : > { %9346 = vmatprep.mubr.f32.mxu0 %v17878_v20  ;;  %17880 = vst [vmem:[#allocation136_spill] sm:$0xff] %v13791_v44  ;;  %v17882_v61 = vand.u32 4294901760, %v17881_v5  ;;  %v17885_v20 = vand.u32 4294901760, %v13719_v15  ;;  %v17888_v3 = vld [vmem:[#allocation137_spill] sm:$0xff]  ;;  %v13819_v26 = vand.u32 4294901760, %v2662_v0  ;;  %v2777_v1 = vsel %vm2703_vm1, %v2657_v24, 0  ;;  %9885 = vmatprep.subr.bf16.mxu1 %v17543_v43 }
 0x382   : > { %9347 = vmatmul.mubr.f32.gmra.mrb[60].mxu0 %v17884_v51  ;;  %v13808_v60 = vsub.f32 %v13722_v58, %v17886_v57  ;;  %17887 = vst [vmem:[#allocation134_spill] sm:$0xff] %v13810_v31  ;;  %v13817_v51 = vsub.f32 %v2658_v11, %v13773_v63  ;;  %v2660_v5 = vld [vmem:[#allocation8 + $0x268] sm:$0xff]  ;;  %v17892_v57 = vand.u32 4294901760, %v13746_v28  ;;  %v13832_v11 = vand.u32 4294901760, %v2774_v54 }
 0x383   : > { %3186 = vmatmul.mubr.f32.gmra.mrb[20].mxu1 %v17882_v61  ;;  %v13803_v22 = vsub.f32 %v13719_v15, %v17885_v20  ;;  %10120 = vmatpush3.bf16.msra.mxu0 %v13567_v9  ;;  %v17889_v61 = vand.u32 4294901760, %v17888_v3  ;;  %17891 = vst [vmem:[#allocation137_spill] sm:$0xff] %v13819_v26  ;;  %v13824_v20 = vpack.c.bf16 %v3729_v35, %v3722_v23  ;;  %v17896_v42 = vand.u32 4294901760, %v13753_v36  ;;  %v17897_v15 = vld [vmem:[#allocation144_spill] sm:$0xff]  ;;  %v17903_v35 = vld [vmem:[#allocation151_spill] sm:$0xff]  ;;  %v17905_v9 = vld [vmem:[#allocation162_spill] sm:$0xff] }
 0x384   : > { %17890 = vst [vmem:[#allocation141_spill] sm:$0xff] %v13817_v51  ;;  %10122 = vmatprep.subr.bf16.mxu0 %v13368_v45  ;;  %v13830_v3 = vsub.f32 %v13746_v28, %v17892_v57  ;;  %17893 = vst [vmem:[#allocation238_spill] sm:$0xff] %v13832_v11  ;;  %v13837_v24 = vpack.c.bf16 %v3743_v47, %v3736_v14  ;;  %v2661_v57 = vld [vmem:[#allocation8 + $0x270] sm:$0xff]  ;;  %v17898_v63 = vand.u32 4294901760, %v17897_v15  ;;  %v13854_v58 = vand.u32 4294901760, %v2777_v1  ;;  %v2663_v14 = vld [vmem:[#allocation8 + $0x280] sm:$0xff] }
 0x385   : > { %3195 = vmatprep.mubr.f32.mxu1 %v17889_v61  ;;  %v17894_v61 = vld [vmem:[#allocation143_spill] sm:$0xff]  ;;  %v13842_v23 = vsub.f32 %v13753_v36, %v17896_v42  ;;  %v2665_v28 = vld [vmem:[#allocation8 + $0x290] sm:$0xff]  ;;  %v13852_v47 = vsub.f32 %v2771_v37, %v13810_v31  ;;  %v2780_v42 = vsel %vm2703_vm1, %v2660_v5, 0  ;;  %v17904_v36 = vand.u32 4294901760, %v17903_v35  ;;  %9887 = vmatpush1.bf16.msra.mxu1 %v13728_v21 }
 0x386   : > { %v17895_v50 = vand.u32 4294901760, %v17894_v61  ;;  %v17899_v61 = vld [vmem:[#allocation150_spill] sm:$0xff]  ;;  %17902 = vst [vmem:[#allocation144_spill] sm:$0xff] %v13854_v58  ;;  %v17906_v8 = vand.u32 4294901760, %v17905_v9  ;;  %v13876_v9 = vand.u32 4294901760, %v2661_v57  ;;  %v13878_v35 = vand.u32 4294901760, %v2665_v28  ;;  %9888 = vmatprep.subr.bf16.mxu1 %v17543_v43 }
 0x387   : > { %3201 = vmatmul.mubr.f32.gmra.mrb[22].mxu1 %v17898_v63  ;;  %17901 = vst [vmem:[#allocation143_spill] sm:$0xff] %v13852_v47  ;;  %v17907_v63 = vand.u32 4294901760, %v13770_v7  ;;  %v2666_v5 = vld [vmem:[#allocation8 + $0x298] sm:$0xff]  ;;  %v17913_v52 = vand.u32 4294901760, %v13791_v44  ;;  %v13900_v53 = vsub.f32 %v2777_v1, %v13854_v58  ;;  %v17924_v48 = vand.u32 4294901760, %v13817_v51 }
 0x388   : > { %9349 = vmatprep.mubr.f32.mxu0 %v17895_v50  ;;  %v17900_v50 = vand.u32 4294901760, %v17899_v61  ;;  %3210 = vmatprep.mubr.f32.mxu1 %v17904_v36  ;;  %17910 = vst [vmem:[#allocation162_spill] sm:$0xff] %v13876_v9  ;;  %17911 = vst [vmem:[#allocation239_spill] sm:$0xff] %v13878_v35  ;;  %v13923_v17 = vsub.f32 %v2665_v28, %v13878_v35  ;;  %v17933_v15 = vld [vmem:[#allocation178_spill] sm:$0xff] }
 0x389   : > { %v13865_v61 = vsub.f32 %v13770_v7, %v17907_v63  ;;  %v2664_v63 = vld [vmem:[#allocation8 + $0x288] sm:$0xff]  ;;  %v13890_v36 = vsub.f32 %v13791_v44, %v17913_v52  ;;  %v2669_v7 = vld [vmem:[#allocation8 + $0x2b0] sm:$0xff]  ;;  %v17934_v28 = vand.u32 4294901760, %v17933_v15  ;;  %9890 = vmatpush1.bf16.msra.mxu1 %v13798_v27 }
 0x38a   : > { %9350 = vmatmul.mubr.f32.gmra.mrb[62].mxu0 %v17900_v50  ;;  %v13869_v50 = vsub.f32 %v2662_v0, %v13819_v26  ;;  %v17912_v0 = vand.u32 4294901760, %v13788_v2  ;;  %v17915_v26 = vld [vmem:[#allocation166_spill] sm:$0xff]  ;;  %v13915_v1 = vand.u32 4294901760, %v2664_v63  ;;  %17927 = vst [vmem:[#allocation175_spill] sm:$0xff] %v13923_v17  ;;  %9891 = vmatprep.subr.bf16.mxu1 %v17543_v43 }
 0x38b   : > { %9352 = vmatprep.mubr.f32.mxu0 %v17906_v8  ;;  %v13874_v8 = vsub.f32 %v2774_v54, %v13832_v11  ;;  %v13892_v54 = vand.u32 4294901760, %v2780_v42  ;;  %v17916_v25 = vand.u32 4294901760, %v17915_v26  ;;  %17919 = vst [vmem:[#allocation166_spill] sm:$0xff] %v13900_v53  ;;  %v17920_v52 = vld [vmem:[#allocation174_spill] sm:$0xff]  ;;  %v17931_v26 = vld [vmem:[#allocation176_spill] sm:$0xff] }
 0x38c   : > { %17908 = vst [vmem:[#allocation150_spill] sm:$0xff] %v13869_v50  ;;  %v13885_v37 = vsub.f32 %v13788_v2, %v17912_v0  ;;  %v2783_v0 = vsel %vm2703_vm1, %v2663_v14, 0  ;;  %v2786_v2 = vsel %vm2703_vm1, %v2666_v5, 0  ;;  %v17921_v44 = vand.u32 4294901760, %v17920_v52  ;;  %17925 = vst [vmem:[#allocation172_spill] sm:$0xff] %v13915_v1  ;;  %v2668_v14 = vld [vmem:[#allocation8 + $0x2a8] sm:$0xff] }
 0x38d   : > { %17909 = vst [vmem:[#allocation151_spill] sm:$0xff] %v13874_v8  ;;  %17914 = vst [vmem:[#allocation240_spill] sm:$0xff] %v13892_v54  ;;  %3216 = vmatmul.mubr.f32.gmra.mrb[24].mxu1 %v17916_v25  ;;  %v13931_v25 = vand.u32 4294901760, %v2783_v0  ;;  %v13933_v21 = vand.u32 4294901760, %v2786_v2  ;;  %v2672_v5 = vld [vmem:[#allocation8 + $0x2c8] sm:$0xff]  ;;  %v13946_v35 = vand.u32 4294901760, %v2668_v14 }
 0x38e   : > { %9353 = vmatmul.mubr.f32.gmra.mrb[64].mxu0 %v17918_v29  ;;  %3225 = vmatprep.mubr.f32.mxu1 %v17921_v44  ;;  %v13912_v29 = vsub.f32 %v13817_v51, %v17924_v48  ;;  %v13920_v44 = vsub.f32 %v2661_v57, %v13876_v9  ;;  %v13929_v48 = vsub.f32 %v2780_v42, %v13892_v54  ;;  %v17932_v57 = vand.u32 4294901760, %v17931_v26  ;;  %v2675_v9 = vld [vmem:[#allocation8 + $0x2e0] sm:$0xff] }
 0x38f   : > { %9355 = vmatprep.mubr.f32.mxu0 %v17923_v32  ;;  %v2789_v32 = vsel %vm2703_vm1, %v2669_v7, 0  ;;  %17929 = vst [vmem:[#allocation242_spill] sm:$0xff] %v13931_v25  ;;  %17930 = vst [vmem:[#allocation243_spill] sm:$0xff] %v13933_v21  ;;  %v17935_v51 = vand.u32 4294901760, %v13852_v47  ;;  %v17938_v54 = vand.u32 4294901760, %v17937_v16  ;;  %v17939_v26 = vand.u32 4294901760, %v13237_v10  ;;  %9893 = vmatpush1.bf16.msra.mxu1 %v13824_v20 }
 0x390   : > { %17926 = vst [vmem:[#allocation174_spill] sm:$0xff] %v13920_v44  ;;  %17928 = vst [vmem:[#allocation241_spill] sm:$0xff] %v13929_v48  ;;  %v13961_v7 = vand.u32 4294901760, %v2789_v32  ;;  %v2667_v42 = vld [vmem:[#allocation8 + $0x2a0] sm:$0xff]  ;;  %v17943_v16 = vand.u32 4294901760, %v13874_v8  ;;  %v13975_v15 = vsub.f32 %v2783_v0, %v13931_v25  ;;  %v13978_v27 = vsub.f32 %v2786_v2, %v13933_v21  ;;  %9894 = vmatprep.subr.bf16.mxu1 %v17543_v43 }
 0x391   : > { %3231 = vmatmul.mubr.f32.gmra.mrb[26].mxu1 %v17932_v57  ;;  %v13943_v52 = vsub.f32 %v13852_v47, %v17935_v51  ;;  %17936 = vst [vmem:[#allocation176_spill] sm:$0xff] %v13946_v35  ;;  %v17940_v57 = vand.u32 4294901760, %v13869_v50  ;;  %v13959_v51 = vsub.f32 %v2664_v63, %v13915_v1  ;;  %v17944_v1 = vand.u32 4294901760, %v13271_v41 }
 0x392   : > { %9356 = vmatmul.mubr.f32.gmra.mrb[66].mxu0 %v17934_v28  ;;  %3240 = vmatprep.mubr.f32.mxu1 %v17938_v54  ;;  %17942 = vst [vmem:[#allocation183_spill] sm:$0xff] %v13961_v7  ;;  %v13967_v10 = vsub.f32 %v13874_v8, %v17943_v16  ;;  %v2795_v16 = vsel %vm2703_vm1, %v2675_v9, 0  ;;  %v17945_v54 = vld [vmem:[#allocation208_spill] sm:$0xff]  ;;  %v17947_v8 = vand.u32 4294901760, %v13900_v53  ;;  %v13992_v0 = vsub.f32 %v2668_v14, %v13946_v35 }
 0x393   : > { %9358 = vmatprep.mubr.f32.mxu0 %v17939_v26  ;;  %v13956_v28 = vsub.f32 %v13869_v50, %v17940_v57  ;;  %17941 = vst [vmem:[#allocation178_spill] sm:$0xff] %v13959_v51  ;;  %v2792_v57 = vsel %vm2703_vm1, %v2672_v5, 0  ;;  %v2671_v50 = vld [vmem:[#allocation8 + $0x2c0] sm:$0xff]  ;;  %v17946_v26 = vand.u32 4294901760, %v17945_v54  ;;  %v13994_v2 = vand.u32 4294901760, %v2667_v42  ;;  %v2678_v5 = vld [vmem:[#allocation8 + $0x2f8] sm:$0xff]  ;;  %9896 = vmatpush1.bf16.msra.mxu1 %v13837_v24 }
 0x394   : > { %v13989_v63 = vsub.f32 %v13900_v53, %v17947_v8  ;;  %17948 = vst [vmem:[#allocation208_spill] sm:$0xff] %v13992_v0  ;;  %v17950_v9 = vand.u32 4294901760, %v13338_v13  ;;  %v17951_v41 = vand.u32 4294901760, %v13544_v6  ;;  %v14005_v8 = vand.u32 4294901760, %v2792_v57  ;;  %v2674_v53 = vld [vmem:[#allocation8 + $0x2d8] sm:$0xff]  ;;  %9897 = vmatprep.subr.bf16.mxu1 %v17543_v43 }
 0x395   : > { %3246 = vmatmul.mubr.f32.gmra.mrb[28].mxu1 %v17944_v1  ;;  %17949 = vst [vmem:[#allocation244_spill] sm:$0xff] %v13994_v2  ;;  %v17954_v14 = vand.u32 4294901760, %v13920_v44  ;;  %v17955_v6 = vand.u32 4294901760, %v13923_v17  ;;  %v14020_v1 = vand.u32 4294901760, %v2795_v16  ;;  %v17958_v20 = vand.u32 4294901760, %v13929_v48 }
 0x396   : > { %9359 = vmatmul.mubr.f32.gmra.mrb[68].mxu0 %v17946_v26  ;;  %3255 = vmatprep.mubr.f32.mxu1 %v17950_v9  ;;  %v14003_v26 = vsub.f32 %v2789_v32, %v13961_v7  ;;  %17953 = vst [vmem:[#allocation246_spill] sm:$0xff] %v14005_v8  ;;  %v2670_v32 = vld [vmem:[#allocation8 + $0x2b8] sm:$0xff]  ;;  %v17074_v47 = vand.u32 4294901760, %v13992_v0  ;;  %v14038_v54 = vsub.f32 %v2667_v42, %v13994_v2 }
 0x397   : > { %9361 = vmatprep.mubr.f32.mxu0 %v17951_v41  ;;  %v14011_v13 = vsub.f32 %v13920_v44, %v17954_v14  ;;  %v14016_v9 = vsub.f32 %v13923_v17, %v17955_v6  ;;  %v14018_v41 = vand.u32 4294901760, %v2671_v50  ;;  %17957 = vst [vmem:[#allocation248_spill] sm:$0xff] %v14020_v1  ;;  %v14027_v35 = vsub.f32 %v13929_v48, %v17958_v20 }
 0x398   : > { %17952 = vst [vmem:[#allocation245_spill] sm:$0xff] %v14003_v26  ;;  %v17069_v14 = vand.u32 4294901760, %v13975_v15  ;;  %v17959_v6 = vand.u32 4294901760, %v13584_v56  ;;  %v17960_v17 = vand.u32 4294901760, %v13664_v34  ;;  %17961 = vst [vmem:[#allocation249_spill] sm:$0xff] %v14038_v54  ;;  %v2798_v20 = vsel %vm2703_vm1, %v2678_v5, 0 }
 0x399   : > { %17956 = vst [vmem:[#allocation247_spill] sm:$0xff] %v14018_v41  ;;  %v17962_v48 = vand.u32 4294901760, %v13705_v40  ;;  %v17963_v44 = vand.u32 4294901760, %v13780_v30  ;;  %v17964_v56 = vand.u32 4294901760, %v13959_v51  ;;  %v14054_v42 = vand.u32 4294901760, %v2670_v32  ;;  %v2681_v5 = vld [vmem:[#allocation8 + $0x310] sm:$0xff] }
 0x39a   : > { %3261 = vmatmul.mubr.f32.gmra.mrb[30].mxu1 %v17959_v6  ;;  %9362 = vmatmul.mubr.f32.gmra.mrb[70].mxu0 %v17960_v17  ;;  %v14052_v6 = vsub.f32 %v2792_v57, %v14005_v8  ;;  %v14069_v57 = vsub.f32 %v13975_v15, %v17069_v14  ;;  %v17969_v17 = vand.u32 4294901760, %v13978_v27  ;;  %v14076_v40 = vand.u32 4294901760, %v2798_v20  ;;  %v2684_v30 = vld [vmem:[#allocation8 + $0x328] sm:$0xff] }
 0x39b   : > { %3270 = vmatprep.mubr.f32.mxu1 %v17962_v48  ;;  %9364 = vmatprep.mubr.f32.mxu0 %v17963_v44  ;;  %v14048_v34 = vsub.f32 %v13959_v51, %v17964_v56  ;;  %17966 = vst [vmem:[#allocation251_spill] sm:$0xff] %v14054_v42  ;;  %v14060_v44 = vsub.f32 %v2671_v50, %v14018_v41  ;;  %v17971_v50 = vand.u32 4294901760, %v13803_v22  ;;  %v2801_v51 = vsel %vm2703_vm1, %v2681_v5, 0 }
 0x39c   : > { %17965 = vst [vmem:[#allocation250_spill] sm:$0xff] %v14052_v6  ;;  %v14063_v48 = vsub.f32 %v2795_v16, %v14020_v1  ;;  %v14074_v24 = vsub.f32 %v13978_v27, %v17969_v17  ;;  %17970 = vst [vmem:[#allocation254_spill] sm:$0xff] %v14076_v40  ;;  %v17972_v16 = vand.u32 4294901760, %v13808_v60  ;;  %v14086_v14 = vsub.f32 %v13992_v0, %v17074_v47  ;;  %v2673_v0 = vld [vmem:[#allocation8 + $0x2d0] sm:$0xff]  ;;  %v2687_v47 = vld [vmem:[#allocation8 + $0x340] sm:$0xff] }
 0x39d   : > { %17967 = vst [vmem:[#allocation252_spill] sm:$0xff] %v14060_v44  ;;  %v14089_v17 = vand.u32 4294901760, %v2674_v53  ;;  %v17974_v41 = vand.u32 4294901760, %v13830_v3  ;;  %v17975_v22 = vand.u32 4294901760, %v13842_v23  ;;  %v14104_v56 = vsub.f32 %v2670_v32, %v14054_v42  ;;  %v2690_v42 = vld [vmem:[#allocation8 + $0x358] sm:$0xff] }
 0x39e   : > { %17968 = vst [vmem:[#allocation253_spill] sm:$0xff] %v14063_v48  ;;  %3276 = vmatmul.mubr.f32.gmra.mrb[32].mxu1 %v17971_v50  ;;  %9365 = vmatmul.mubr.f32.gmra.mrb[72].mxu0 %v17972_v16  ;;  %v17976_v50 = vand.u32 4294901760, %v14003_v26  ;;  %v2804_v23 = vsel %vm2703_vm1, %v2684_v30, 0  ;;  %v14116_v60 = vsub.f32 %v2798_v20, %v14076_v40  ;;  %v14118_v32 = vand.u32 4294901760, %v2801_v51 }
 0x39f   : > { %17973 = vst [vmem:[#allocation255_spill] sm:$0xff] %v14089_v17  ;;  %3285 = vmatprep.mubr.f32.mxu1 %v17974_v41  ;;  %9367 = vmatprep.mubr.f32.mxu0 %v17975_v22  ;;  %17977 = vst [vmem:[#allocation256_spill] sm:$0xff] %v14104_v56  ;;  %v14111_v41 = vpack.c.bf16 %v13377_v39, %v13388_v59  ;;  %v6207_v22 = vand.u32 4294901760, %v14069_v57  ;;  %v17980_v5 = vand.u32 4294901760, %v13865_v61  ;;  %v17981_v3 = vand.u32 4294901760, %v13885_v37  ;;  %v2677_v59 = vld [vmem:[#allocation8 + $0x2f0] sm:$0xff] }
 0x3a0   : > { %v14100_v16 = vsub.f32 %v14003_v26, %v17976_v50  ;;  %17978 = vst [vmem:[#allocation257_spill] sm:$0xff] %v14116_v60  ;;  %17979 = vst [vmem:[#allocation258_spill] sm:$0xff] %v14118_v32  ;;  %v17982_v39 = vand.u32 4294901760, %v14038_v54  ;;  %v14131_v50 = vsub.f32 %v2674_v53, %v14089_v17  ;;  %v14133_v20 = vand.u32 4294901760, %v2673_v0 }
 0x3a1   : > { %v17985_v61 = vand.u32 4294901760, %v13890_v36  ;;  %v17986_v37 = vand.u32 4294901760, %v13943_v52  ;;  %v14146_v30 = vand.u32 4294901760, %v2804_v23  ;;  %v17990_v36 = vand.u32 4294901760, %v14063_v48 }
 0x3a2   : > { %3291 = vmatmul.mubr.f32.gmra.mrb[34].mxu1 %v17980_v5  ;;  %9368 = vmatmul.mubr.f32.gmra.mrb[74].mxu0 %v17981_v3  ;;  %v14128_v57 = vsub.f32 %v14038_v54, %v17982_v39  ;;  %17983 = vst [vmem:[#allocation259_spill] sm:$0xff] %v14131_v50  ;;  %17984 = vst [vmem:[#allocation260_spill] sm:$0xff] %v14133_v20  ;;  %v17987_v3 = vand.u32 4294901760, %v14052_v6  ;;  %v17989_v54 = vand.u32 4294901760, %v14060_v44  ;;  %v14167_v53 = vand.u32 4294901760, %v2677_v59 }
 0x3a3   : > { %3300 = vmatprep.mubr.f32.mxu1 %v17985_v61  ;;  %9370 = vmatprep.mubr.f32.mxu0 %v17986_v37  ;;  %17988 = vst [vmem:[#allocation261_spill] sm:$0xff] %v14146_v30  ;;  %v14156_v52 = vsub.f32 %v14063_v48, %v17990_v36  ;;  %v2807_v61 = vsel %vm2703_vm1, %v2687_v47, 0  ;;  %v14161_v37 = vpack.c.bf16 %v13419_v19, %v13429_v49  ;;  %v17993_v36 = vand.u32 4294901760, %v13912_v29  ;;  %v2680_v49 = vld [vmem:[#allocation8 + $0x308] sm:$0xff] }
 0x3a4   : > { %v14143_v39 = vsub.f32 %v14052_v6, %v17987_v3  ;;  %v14151_v17 = vsub.f32 %v14060_v44, %v17989_v54  ;;  %v14165_v5 = vsub.f32 %v2801_v51, %v14118_v32  ;;  %17992 = vst [vmem:[#allocation263_spill] sm:$0xff] %v14167_v53  ;;  %v2676_v54 = vld [vmem:[#allocation8 + $0x2e8] sm:$0xff]  ;;  %v2810_v44 = vsel %vm2703_vm1, %v2690_v42, 0  ;;  %v2693_v6 = vld [vmem:[#allocation8 + $0x370] sm:$0xff] }
 0x3a5   : > { %v17994_v47 = vand.u32 4294901760, %v13967_v10  ;;  %v14177_v3 = vsub.f32 %v2673_v0, %v14133_v20  ;;  %v14181_v51 = vpack.c.bf16 %v13463_v12, %v13474_v4  ;;  %v17996_v42 = vand.u32 4294901760, %v13956_v28  ;;  %v2696_v12 = vld [vmem:[#allocation8 + $0x388] sm:$0xff]  ;;  %v2679_v20 = vld [vmem:[#allocation8 + $0x300] sm:$0xff] }
 0x3a6   : > { %17991 = vst [vmem:[#allocation262_spill] sm:$0xff] %v14165_v5  ;;  %3306 = vmatmul.mubr.f32.gmra.mrb[36].mxu1 %v17993_v36  ;;  %v17997_v29 = vand.u32 4294901760, %v13989_v63  ;;  %v6237_v10 = vand.u32 4294901760, %v14143_v39  ;;  %v17998_v36 = vand.u32 4294901760, %v14104_v56  ;;  %v14194_v0 = vsub.f32 %v2804_v23, %v14146_v30 }
 0x3a7   : > { %9371 = vmatmul.mubr.f32.gmra.mrb[76].mxu0 %v17994_v47  ;;  %17995 = vst [vmem:[#allocation264_spill] sm:$0xff] %v14177_v3  ;;  %3315 = vmatprep.mubr.f32.mxu1 %v17996_v42  ;;  %v14196_v19 = vand.u32 4294901760, %v2807_v61  ;;  %v3359_v28 = vand.u32 4294901760, %v14151_v17  ;;  %v14199_v42 = vand.u32 4294901760, %v2676_v54  ;;  %v14201_v63 = vand.u32 4294901760, %v2810_v44  ;;  %v2699_v17 = vld [vmem:[#allocation8 + $0x3a0] sm:$0xff] }
 0x3a8   : > { %9373 = vmatprep.mubr.f32.mxu0 %v17997_v29  ;;  %v14191_v47 = vsub.f32 %v14104_v56, %v17998_v36  ;;  %v2813_v39 = vsel %vm2703_vm1, %v2693_v6, 0  ;;  %v6247_v29 = vand.u32 4294901760, %v14156_v52  ;;  %v18002_v36 = vand.u32 4294901760, %v14116_v60 }
 0x3a9   : > { %17999 = vst [vmem:[#allocation265_spill] sm:$0xff] %v14196_v19  ;;  %18000 = vst [vmem:[#allocation266_spill] sm:$0xff] %v14199_v42  ;;  %v14212_v4 = vsub.f32 %v2677_v59, %v14167_v53  ;;  %v18004_v48 = vand.u32 4294901760, %v14011_v13  ;;  %v18005_v2 = vand.u32 4294901760, %v14027_v35  ;;  %v18006_v6 = vand.u32 4294901760, %v14131_v50  ;;  %v2682_v35 = vld [vmem:[#allocation8 + $0x318] sm:$0xff] }
 0x3aa   : > { %18001 = vst [vmem:[#allocation267_spill] sm:$0xff] %v14201_v63  ;;  %v14208_v56 = vsub.f32 %v14116_v60, %v18002_v36  ;;  %v14224_v60 = vand.u32 4294901760, %v2680_v49  ;;  %v2816_v59 = vsel %vm2703_vm1, %v2696_v12, 0  ;;  %v18008_v23 = vand.u32 4294901760, %v14016_v9 }
 0x3ab   : > { %18003 = vst [vmem:[#allocation268_spill] sm:$0xff] %v14212_v4  ;;  %3321 = vmatmul.mubr.f32.gmra.mrb[38].mxu1 %v18004_v48  ;;  %9374 = vmatmul.mubr.f32.gmra.mrb[78].mxu0 %v18005_v2  ;;  %v14221_v52 = vsub.f32 %v14131_v50, %v18006_v6  ;;  %v3365_v13 = vand.u32 4294901760, %v14191_v47  ;;  %v14232_v2 = vsub.f32 %v2807_v61, %v14196_v19  ;;  %v14234_v48 = vand.u32 4294901760, %v2813_v39  ;;  %v2683_v6 = vld [vmem:[#allocation8 + $0x320] sm:$0xff] }
 0x3ac   : > { %18007 = vst [vmem:[#allocation269_spill] sm:$0xff] %v14224_v60  ;;  %3330 = vmatprep.mubr.f32.mxu1 %v18008_v23  ;;  %9376 = vmatprep.mubr.f32.mxu0 %v6207_v22  ;;  %v14237_v36 = vsub.f32 %v2676_v54, %v14199_v42  ;;  %v14240_v50 = vsub.f32 %v2810_v44, %v14201_v63  ;;  %v14242_v12 = vand.u32 4294901760, %v2679_v20  ;;  %v2819_v9 = vsel %vm2703_vm1, %v2699_v17, 0  ;;  %v2702_v22 = vld [vmem:[#allocation8 + $0x3b8] sm:$0xff] }
 0x3ad   : > { %18009 = vst [vmem:[#allocation270_spill] sm:$0xff] %v14232_v2  ;;  %18010 = vst [vmem:[#allocation271_spill] sm:$0xff] %v14234_v48  ;;  %v6257_v47 = vand.u32 4294901760, %v14208_v56  ;;  %v18014_v23 = vand.u32 4294901760, %v14165_v5  ;;  %v14250_v53 = vand.u32 4294901760, %v2816_v59  ;;  %v18016_v54 = vand.u32 4294901760, %v14048_v34 }
 0x3ae   : > { %18011 = vst [vmem:[#allocation272_spill] sm:$0xff] %v14237_v36  ;;  %18012 = vst [vmem:[#allocation273_spill] sm:$0xff] %v14240_v50  ;;  %v18017_v44 = vand.u32 4294901760, %v14074_v24  ;;  %v3374_v42 = vand.u32 4294901760, %v14221_v52  ;;  %v18018_v17 = vand.u32 4294901760, %v14177_v3  ;;  %v14261_v26 = vsub.f32 %v2680_v49, %v14224_v60 }
 0x3af   : > { %18013 = vst [vmem:[#allocation274_spill] sm:$0xff] %v14242_v12  ;;  %v6266_v61 = vsub.f32 %v14165_v5, %v18014_v23  ;;  %18015 = vst [vmem:[#allocation275_spill] sm:$0xff] %v14250_v53  ;;  %3336 = vmatmul.mubr.f32.gmra.mrb[40].mxu1 %v18016_v54  ;;  %v14263_v23 = vand.u32 4294901760, %v2683_v6  ;;  %v18021_v5 = vand.u32 4294901760, %v14086_v14  ;;  %v18022_v34 = vand.u32 4294901760, %v14100_v16 }
 0x3b0   : > { %9377 = vmatmul.mubr.f32.gmra.mrb[80].mxu0 %v18017_v44  ;;  %v3379_v56 = vsub.f32 %v14177_v3, %v18018_v17  ;;  %18019 = vst [vmem:[#allocation276_spill] sm:$0xff] %v14261_v26  ;;  %v14271_v52 = vsub.f32 %v2813_v39, %v14234_v48  ;;  %v14273_v54 = vand.u32 4294901760, %v2819_v9  ;;  %v2822_v44 = vsel %vm2703_vm1, %v2702_v22, 0 }
 0x3b1   : > { %18020 = vst [vmem:[#allocation277_spill] sm:$0xff] %v14263_v23  ;;  %3345 = vmatprep.mubr.f32.mxu1 %v18021_v5  ;;  %9379 = vmatprep.mubr.f32.mxu0 %v18022_v34  ;;  %v18024_v49 = vand.u32 4294901760, %v14194_v0  ;;  %v14282_v16 = vsub.f32 %v2679_v20, %v14242_v12  ;;  %v2686_v5 = vld [vmem:[#allocation8 + $0x338] sm:$0xff]  ;;  %v6267_v34 = vand.u32 4294901760, %v6266_v61  ;;  %v18026_v39 = vand.u32 4294901760, %v14212_v4  ;;  %v2685_v12 = vld [vmem:[#allocation8 + $0x330] sm:$0xff] }
 0x3b2   : > { %18023 = vst [vmem:[#allocation278_spill] sm:$0xff] %v14273_v54  ;;  %v14288_v60 = vsub.f32 %v2816_v59, %v14250_v53  ;;  %v14290_v22 = vand.u32 4294901760, %v2682_v35  ;;  %v3380_v3 = vand.u32 4294901760, %v3379_v56  ;;  %v14296_v20 = vsub.f32 %v2683_v6, %v14263_v23  ;;  %v2689_v56 = vld [vmem:[#allocation8 + $0x350] sm:$0xff] }
 0x3b3   : > { %v6276_v17 = vsub.f32 %v14194_v0, %v18024_v49  ;;  %18025 = vst [vmem:[#allocation279_spill] sm:$0xff] %v14282_v16  ;;  %v3388_v24 = vsub.f32 %v14212_v4, %v18026_v39  ;;  %v18028_v49 = vand.u32 4294901760, %v14128_v57  ;;  %v14298_v61 = vand.u32 4294901760, %v2822_v44 }
 0x3b4   : > { %18027 = vst [vmem:[#allocation280_spill] sm:$0xff] %v14290_v22  ;;  %9380 = vmatmul.mubr.f32.gmra.mrb[82].mxu0 %v6237_v10  ;;  %18029 = vst [vmem:[#allocation281_spill] sm:$0xff] %v14296_v20  ;;  %v18031_v59 = vand.u32 4294901760, %v14232_v2  ;;  %v14305_v57 = vsub.f32 %v2819_v9, %v14273_v54  ;;  %v14307_v10 = vand.u32 4294901760, %v2686_v5  ;;  %v18033_v6 = vand.u32 4294901760, %v14237_v36 }
 0x3b5   : > { %3351 = vmatmul.mubr.f32.gmra.mrb[42].mxu1 %v18028_v49  ;;  %18030 = vst [vmem:[#allocation282_spill] sm:$0xff] %v14298_v61  ;;  %9382 = vmatprep.mubr.f32.mxu0 %v6247_v29  ;;  %v6277_v49 = vand.u32 4294901760, %v6276_v17  ;;  %v14318_v9 = vsub.f32 %v2682_v35, %v14290_v22  ;;  %v18037_v17 = vand.u32 4294901760, %v14261_v26  ;;  %v14329_v23 = vand.u32 4294901760, %v2689_v56 }
 0x3b6   : > { %3360 = vmatprep.mubr.f32.mxu1 %v3359_v28  ;;  %v6286_v39 = vsub.f32 %v14232_v2, %v18031_v59  ;;  %18032 = vst [vmem:[#allocation283_spill] sm:$0xff] %v14307_v10  ;;  %v3394_v14 = vsub.f32 %v14237_v36, %v18033_v6  ;;  %v18034_v28 = vand.u32 4294901760, %v14240_v50  ;;  %v3389_v59 = vand.u32 4294901760, %v3388_v24  ;;  %v2688_v24 = vld [vmem:[#allocation8 + $0x348] sm:$0xff] }
 0x3b7   : > { %18035 = vst [vmem:[#allocation284_spill] sm:$0xff] %v14318_v9  ;;  %v14320_v2 = vand.u32 4294901760, %v2685_v12  ;;  %v3403_v6 = vsub.f32 %v14261_v26, %v18037_v17  ;;  %18038 = vst [vmem:[#allocation286_spill] sm:$0xff] %v14329_v23  ;;  %v18039_v4 = vand.u32 4294901760, %v14271_v52  ;;  %v14336_v22 = vsub.f32 %v2686_v5, %v14307_v10  ;;  %v2695_v10 = vld [vmem:[#allocation8 + $0x380] sm:$0xff] }
 0x3b8   : > { %v6296_v29 = vsub.f32 %v14240_v50, %v18034_v28  ;;  %9383 = vmatmul.mubr.f32.gmra.mrb[84].mxu0 %v6257_v47  ;;  %v14327_v28 = vsub.f32 %v2822_v44, %v14298_v61  ;;  %v6287_v35 = vand.u32 4294901760, %v6286_v39  ;;  %v3395_v17 = vand.u32 4294901760, %v3394_v14  ;;  %v2692_v50 = vld [vmem:[#allocation8 + $0x368] sm:$0xff] }
 0x3b9   : > { %18036 = vst [vmem:[#allocation285_spill] sm:$0xff] %v14320_v2  ;;  %3366 = vmatmul.mubr.f32.gmra.mrb[44].mxu1 %v3365_v13  ;;  %9385 = vmatprep.mubr.f32.mxu0 %v6267_v34  ;;  %v6306_v13 = vsub.f32 %v14271_v52, %v18039_v4  ;;  %18040 = vst [vmem:[#allocation287_spill] sm:$0xff] %v14336_v22  ;;  %v18041_v44 = vand.u32 4294901760, %v14282_v16  ;;  %v14346_v4 = vsub.f32 %v2685_v12, %v14320_v2 }
 0x3ba   : > { %3375 = vmatprep.mubr.f32.mxu1 %v3374_v42  ;;  %v6297_v36 = vand.u32 4294901760, %v6296_v29  ;;  %v18042_v42 = vand.u32 4294901760, %v14288_v60  ;;  %v14348_v47 = vand.u32 4294901760, %v2688_v24  ;;  %v3404_v14 = vand.u32 4294901760, %v3403_v6  ;;  %v2691_v6 = vld [vmem:[#allocation8 + $0x360] sm:$0xff] }
 0x3bb   : > { %v3409_v26 = vsub.f32 %v14282_v16, %v18041_v44  ;;  %18043 = vst [vmem:[#allocation288_spill] sm:$0xff] %v14346_v4  ;;  %v18045_v5 = vand.u32 4294901760, %v14296_v20  ;;  %v14355_v16 = vsub.f32 %v2689_v56, %v14329_v23  ;;  %v18047_v12 = vand.u32 4294901760, %v14305_v57 }
 0x3bc   : > { %v6316_v34 = vsub.f32 %v14288_v60, %v18042_v42  ;;  %18044 = vst [vmem:[#allocation289_spill] sm:$0xff] %v14348_v47  ;;  %9386 = vmatmul.mubr.f32.gmra.mrb[86].mxu0 %v6277_v49  ;;  %v6307_v42 = vand.u32 4294901760, %v6306_v13  ;;  %v14361_v49 = vand.u32 4294901760, %v2692_v50  ;;  %v18049_v44 = vand.u32 4294901760, %v14318_v9 }
 0x3bd   : > { %3381 = vmatmul.mubr.f32.gmra.mrb[46].mxu1 %v3380_v3  ;;  %v3418_v29 = vsub.f32 %v14296_v20, %v18045_v5  ;;  %18046 = vst [vmem:[#allocation290_spill] sm:$0xff] %v14355_v16  ;;  %9388 = vmatprep.mubr.f32.mxu0 %v6287_v35  ;;  %v6326_v39 = vsub.f32 %v14305_v57, %v18047_v12  ;;  %v3410_v2 = vand.u32 4294901760, %v3409_v26  ;;  %v18051_v12 = vand.u32 4294901760, %v14327_v28 }
 0x3be   : > { %3390 = vmatprep.mubr.f32.mxu1 %v3389_v59  ;;  %18048 = vst [vmem:[#allocation291_spill] sm:$0xff] %v14361_v49  ;;  %v6317_v5 = vand.u32 4294901760, %v6316_v34  ;;  %v3424_v56 = vsub.f32 %v14318_v9, %v18049_v44  ;;  %v14368_v35 = vsub.f32 %v2688_v24, %v14348_v47  ;;  %v14374_v20 = vand.u32 4294901760, %v2691_v6 }
 0x3bf   : > { %v3419_v13 = vand.u32 4294901760, %v3418_v29  ;;  %v6336_v3 = vsub.f32 %v14327_v28, %v18051_v12  ;;  %v6327_v34 = vand.u32 4294901760, %v6326_v39  ;;  %v18053_v44 = vand.u32 4294901760, %v14336_v22  ;;  %v2698_v29 = vld [vmem:[#allocation8 + $0x398] sm:$0xff] }
 0x3c0   : > { %18050 = vst [vmem:[#allocation292_spill] sm:$0xff] %v14368_v35  ;;  %9389 = vmatmul.mubr.f32.gmra.mrb[88].mxu0 %v6297_v36  ;;  %18052 = vst [vmem:[#allocation293_spill] sm:$0xff] %v14374_v20  ;;  %v14380_v24 = vsub.f32 %v2692_v50, %v14361_v49  ;;  %v14382_v36 = vand.u32 4294901760, %v2695_v10  ;;  %v3425_v9 = vand.u32 4294901760, %v3424_v56  ;;  %v18056_v12 = vand.u32 4294901760, %v14346_v4 }
 0x3c1   : > { %3396 = vmatmul.mubr.f32.gmra.mrb[48].mxu1 %v3395_v17  ;;  %9391 = vmatprep.mubr.f32.mxu0 %v6307_v42  ;;  %v3433_v59 = vsub.f32 %v14336_v22, %v18053_v44  ;;  %v2694_v17 = vld [vmem:[#allocation8 + $0x378] sm:$0xff]  ;;  %v6337_v39 = vand.u32 4294901760, %v6336_v3  ;;  %v18057_v42 = vand.u32 4294901760, %v14355_v16  ;;  %v14392_v50 = vsub.f32 %v2691_v6, %v14374_v20  ;;  %v2697_v3 = vld [vmem:[#allocation8 + $0x390] sm:$0xff] }
 0x3c2   : > { %3405 = vmatprep.mubr.f32.mxu1 %v3404_v14  ;;  %18054 = vst [vmem:[#allocation294_spill] sm:$0xff] %v14380_v24  ;;  %18055 = vst [vmem:[#allocation295_spill] sm:$0xff] %v14382_v36  ;;  %v3439_v26 = vsub.f32 %v14346_v4, %v18056_v12  ;;  %v14394_v22 = vand.u32 4294901760, %v2694_v17  ;;  %v17153_v49 = vand.u32 4294901760, %v14380_v24  ;;  %v14398_v12 = vsub.f32 %v2695_v10, %v14382_v36  ;;  %v18065_v10 = vld [vmem:[#allocation69_spill] sm:$0xff] }
 0x3c3   : > { %v3448_v44 = vsub.f32 %v14355_v16, %v18057_v42  ;;  %18058 = vst [vmem:[#allocation296_spill] sm:$0xff] %v14392_v50  ;;  %v3434_v56 = vand.u32 4294901760, %v3433_v59  ;;  %v18062_v42 = vand.u32 4294901760, %v14368_v35 }
 0x3c4   : > { %9392 = vmatmul.mubr.f32.gmra.mrb[90].mxu0 %v6317_v5  ;;  %18059 = vst [vmem:[#allocation297_spill] sm:$0xff] %v14394_v22  ;;  %18060 = vst [vmem:[#allocation298_spill] sm:$0xff] %v14398_v12  ;;  %v2701_v5 = vld [vmem:[#allocation8 + $0x3b0] sm:$0xff]  ;;  %v3440_v14 = vand.u32 4294901760, %v3439_v26  ;;  %v14407_v59 = vsub.f32 %v2694_v17, %v14394_v22  ;;  %v3463_v26 = vsub.f32 %v14380_v24, %v17153_v49 }
 0x3c5   : > { %3411 = vmatmul.mubr.f32.gmra.mrb[50].mxu1 %v3410_v2  ;;  %9394 = vmatprep.mubr.f32.mxu0 %v6327_v34  ;;  %v14400_v2 = vand.u32 4294901760, %v2698_v29  ;;  %v3454_v6 = vsub.f32 %v14368_v35, %v18062_v42  ;;  %v3449_v16 = vand.u32 4294901760, %v3448_v44  ;;  %v14409_v34 = vand.u32 4294901760, %v2697_v3  ;;  %v2700_v44 = vld [vmem:[#allocation8 + $0x3a8] sm:$0xff] }
 0x3c6   : > { %3420 = vmatprep.mubr.f32.mxu1 %v3419_v13  ;;  %v17156_v13 = vand.u32 4294901760, %v14392_v50  ;;  %18063 = vst [vmem:[#allocation300_spill] sm:$0xff] %v14407_v59  ;;  %v18068_v17 = vld [vmem:[#allocation73_spill] sm:$0xff]  ;;  %v14429_v4 = vand.u32 4294901760, %v2700_v44 }
 0x3c7   : > { %18061 = vst [vmem:[#allocation299_spill] sm:$0xff] %v14400_v2  ;;  %18064 = vst [vmem:[#allocation301_spill] sm:$0xff] %v14409_v34  ;;  %v3455_v42 = vand.u32 4294901760, %v3454_v6  ;;  %v14427_v49 = vsub.f32 %v2697_v3, %v14409_v34  ;;  %v18071_v6 = vand.u32 4294901760, %v14398_v12  ;;  %v18074_v3 = vld [vmem:[#allocation88_spill] sm:$0xff] }
 0x3c8   : > { %9395 = vmatmul.mubr.f32.gmra.mrb[92].mxu0 %v6337_v39  ;;  %v14419_v39 = vand.u32 4294901760, %v2701_v5  ;;  %18070 = vst [vmem:[#allocation304_spill] sm:$0xff] %v14429_v4 }
 0x3c9   : > { %3426 = vmatmul.mubr.f32.gmra.mrb[52].mxu1 %v3425_v9  ;;  %9413 = vmatprep.mubr.f32.mxu0 %v18065_v10  ;;  %v14417_v9 = vsub.f32 %v2698_v29, %v14400_v2  ;;  %18069 = vst [vmem:[#allocation303_spill] sm:$0xff] %v14427_v49  ;;  %v3464_v29 = vand.u32 4294901760, %v3463_v26 }
 0x3ca   : > { %3435 = vmatprep.mubr.f32.mxu1 %v3434_v56  ;;  %18067 = vst [vmem:[#allocation302_spill] sm:$0xff] %v14419_v39  ;;  %v3469_v56 = vsub.f32 %v14392_v50, %v17156_v13  ;;  %v18073_v13 = vld [vmem:[#allocation78_spill] sm:$0xff]  ;;  %v18097_v50 = vld [vmem:[#allocation193_spill] sm:$0xff] }
 0x3cb   : > { %18066 = vst [vmem:[#allocation69_spill] sm:$0xff] %v14417_v9  ;;  %v17159_v24 = vand.u32 4294901760, %v14417_v9 }
 0x3cc   : > { %9414 = vmatmul.mubr.f32.vlgmr.msra.gmra.mrb[94].mxu0 %v18068_v17  ;;  %v14437_v17 = vsub.f32 %v2701_v5, %v14419_v39  ;;  %v3470_v35 = vand.u32 4294901760, %v3469_v56  ;;  %v18077_v56 = vld [vmem:[#allocation100_spill] sm:$0xff] }
 0x3cd   : > { %3441 = vmatmul.mubr.f32.gmra.mrb[54].mxu1 %v3440_v14  ;;  %10124 = vmatpush3.bf16.msra.mxu0 %v13368_v45  ;;  %v3478_v14 = vsub.f32 %v14398_v12, %v18071_v6  ;;  %v18075_v45 = vand.u32 4294901760, %v14407_v59  ;;  %v14447_v6 = vsub.f32 %v2700_v44, %v14429_v4  ;;  %v18079_v44 = vand.u32 4294901760, %v14427_v49 }
 0x3ce   : > { %3450 = vmatprep.mubr.f32.mxu1 %v3449_v16  ;;  %18072 = vst [vmem:[#allocation305_spill] sm:$0xff] %v14437_v17  ;;  %10126 = vmatprep.subr.bf16.mxu0 %v14111_v41  ;;  %v17162_v12 = vand.u32 4294901760, %v14437_v17 }
 0x3cf   : > { %9416 = vmatprep.mubr.f32.mxu0 %v18073_v13  ;;  %v3484_v16 = vsub.f32 %v14407_v59, %v18075_v45  ;;  %18076 = vst [vmem:[#allocation306_spill] sm:$0xff] %v14447_v6  ;;  %v3479_v5 = vand.u32 4294901760, %v3478_v14  ;;  %v18078_v45 = vld [vmem:[#allocation106_spill] sm:$0xff] }
 0x3d0   : > { %9417 = vmatmul.mubr.f32.gmra.mrb[96].mxu0 %v18074_v3  ;;  %v18238_v3 = vld [vmem:[#allocation218_spill] sm:$0xff] }
 0x3d1   : > { %3456 = vmatmul.mubr.f32.gmra.mrb[56].mxu1 %v3455_v42  ;;  %10128 = vmatpush3.bf16.msra.mxu0 %v14111_v41  ;;  %v3493_v42 = vsub.f32 %v14417_v9, %v17159_v24  ;;  %v3485_v26 = vand.u32 4294901760, %v3484_v16  ;;  %v3499_v41 = vsub.f32 %v14427_v49, %v18079_v44  ;;  %v3508_v24 = vsub.f32 %v14437_v17, %v17162_v12  ;;  %v18081_v16 = vld [vmem:[#allocation116_spill] sm:$0xff]  ;;  %v18091_v49 = vld [vmem:[#allocation159_spill] sm:$0xff] }
 0x3d2   : > { %3465 = vmatprep.mubr.f32.mxu1 %v3464_v29  ;;  %10130 = vmatprep.subr.bf16.mxu0 %v14161_v37  ;;  %v17165_v29 = vand.u32 4294901760, %v14447_v6  ;;  %v18086_v17 = vld [vmem:[#allocation16_spill] sm:$0xff] }
 0x3d3   : > { %9419 = vmatprep.mubr.f32.mxu0 %v18077_v56  ;;  %v3494_v14 = vand.u32 4294901760, %v3493_v42  ;;  %v3500_v9 = vand.u32 4294901760, %v3499_v41  ;;  %v18083_v42 = vld [vmem:[#allocation129_spill] sm:$0xff]  ;;  %v18085_v41 = vld [vmem:[#allocation148_spill] sm:$0xff] }
 0x3d4   : > { %9420 = vmatmul.mubr.f32.gmra.mrb[98].mxu0 %v18078_v45  ;;  %v3514_v44 = vsub.f32 %v14447_v6, %v17165_v29  ;;  %v18087_v29 = vld [vmem:[#allocation152_spill] sm:$0xff]  ;;  %v18228_v45 = vld [vmem:[#allocation269_spill] sm:$0xff] }
 0x3d5   : > { %3471 = vmatmul.mubr.f32.gmra.mrb[58].mxu1 %v3470_v35  ;;  %10132 = vmatpush3.bf16.msra.mxu0 %v14161_v37  ;;  %v18080_v35 = vld [vmem:[#allocation111_spill] sm:$0xff]  ;;  %v3509_v37 = vand.u32 4294901760, %v3508_v24  ;;  %v18089_v24 = vld [vmem:[#allocation154_spill] sm:$0xff]  ;;  %v18090_v6 = vld [vmem:[#allocation20_spill] sm:$0xff] }
 0x3d6   : > { %3480 = vmatprep.mubr.f32.mxu1 %v3479_v5  ;;  %10134 = vmatprep.subr.bf16.mxu0 %v14181_v51  ;;  %v18082_v5 = vld [vmem:[#allocation119_spill] sm:$0xff]  ;;  %v3515_v12 = vand.u32 4294901760, %v3514_v44  ;;  %v18093_v44 = vld [vmem:[#allocation182_spill] sm:$0xff] }
 0x3d7   : > { %9422 = vmatprep.mubr.f32.mxu0 %v18080_v35  ;;  %v18223_v35 = vld [vmem:[#allocation260_spill] sm:$0xff] }
 0x3d8   : > { %9423 = vmatmul.mubr.f32.gmra.mrb[100].mxu0 %v18081_v16  ;;  %v18221_v16 = vld [vmem:[#allocation255_spill] sm:$0xff] }
 0x3d9   : > { %3486 = vmatmul.mubr.f32.gmra.mrb[60].mxu1 %v3485_v26  ;;  %10136 = vmatpush3.bf16.msra.mxu0 %v14181_v51  ;;  %v18084_v26 = vld [vmem:[#allocation139_spill] sm:$0xff] }
 0x3da   : > { %3495 = vmatprep.mubr.f32.mxu1 %v3494_v14  ;;  %10138 = vmatprep.subr.bf16.mxu0 %v13341_v18  ;;  %v18088_v51 = vld [vmem:[#allocation155_spill] sm:$0xff] }
 0x3db   : > { %9425 = vmatprep.mubr.f32.mxu0 %v18082_v5  ;;  %v9898_v14 = vpack.c.bf16 %v18089_v24, %v18088_v51  ;;  %v18098_v24 = vld [vmem:[#allocation28_spill] sm:$0xff]  ;;  %v18219_v5 = vld [vmem:[#allocation251_spill] sm:$0xff] }
 0x3dc   : > { %9426 = vmatmul.mubr.f32.gmra.mrb[102].mxu0 %v18083_v42  ;;  %v18217_v42 = vld [vmem:[#allocation247_spill] sm:$0xff] }
 0x3dd   : > { %3501 = vmatmul.mubr.f32.gmra.mrb[62].mxu1 %v3500_v9  ;;  %9428 = vmatprep.mubr.f32.mxu0 %v18084_v26  ;;  %v18092_v9 = vld [vmem:[#allocation24_spill] sm:$0xff] }
 0x3de   : > { %3510 = vmatprep.mubr.f32.mxu1 %v3509_v37  ;;  %v18095_v37 = vld [vmem:[#allocation160_spill] sm:$0xff] }
 0x3df   : > { %v18215_v26 = vld [vmem:[#allocation244_spill] sm:$0xff] }
 0x3e0   : > { %9429 = vmatmul.mubr.f32.gmra.mrb[104].mxu0 %v18085_v41  ;;  %v18211_v41 = vld [vmem:[#allocation239_spill] sm:$0xff] }
 0x3e1   : > { %3516 = vmatmul.mubr.f32.gmra.mrb[64].mxu1 %v3515_v12  ;;  %9431 = vmatprep.mubr.f32.mxu0 %v18087_v29  ;;  %v18094_v12 = vld [vmem:[#allocation161_spill] sm:$0xff]  ;;  %v18209_v29 = vld [vmem:[#allocation162_spill] sm:$0xff] }
 0x3e2   : > { %3746 = vmatprep.mubr.f32.mxu1 %v18086_v17  ;;  %v9901_v59 = vpack.c.bf16 %v18095_v37, %v18094_v12  ;;  %v18096_v17 = vld [vmem:[#allocation26_spill] sm:$0xff]  ;;  %v18103_v37 = vld [vmem:[#allocation44_spill] sm:$0xff]  ;;  %v18106_v12 = vld [vmem:[#allocation47_spill] sm:$0xff] }
 0x3e4   : > { %9432 = vmatmul.mubr.f32.gmra.mrb[106].mxu0 %v18091_v49  ;;  %v18102_v49 = vld [vmem:[#allocation36_spill] sm:$0xff] }
 0x3e5   : > { %3748 = vmatmul.mubr.f32.vlgmr.msra.gmra.mrb[66].mxu1 %v18090_v6  ;;  %9434 = vmatprep.mubr.f32.mxu0 %v18093_v44  ;;  %v18099_v6 = vld [vmem:[#allocation211_spill] sm:$0xff]  ;;  %v18207_v44 = vld [vmem:[#allocation137_spill] sm:$0xff] }
 0x3e6   : > { %9899 = vmatpush1.bf16.msra.mxu1 %v9898_v14  ;;  %3753 = vmatprep.mubr.f32.mxu1 %v18092_v9  ;;  %v18100_v14 = vld [vmem:[#allocation170_spill] sm:$0xff]  ;;  %v18101_v9 = vld [vmem:[#allocation169_spill] sm:$0xff] }
 0x3e7   : > { %9900 = vmatprep.subr.bf16.mxu1 %v17543_v43  ;;  %v9904_v51 = vpack.c.bf16 %v18101_v9, %v18100_v14  ;;  %v18107_v9 = vld [vmem:[#allocation35_spill] sm:$0xff]  ;;  %v18110_v14 = vld [vmem:[#allocation45_spill] sm:$0xff] }
 0x3e8   : > { %9435 = vmatmul.mubr.f32.gmra.mrb[108].mxu0 %v18097_v50  ;;  %v18205_v50 = vld [vmem:[#allocation132_spill] sm:$0xff] }
 0x3e9   : > { %3755 = vmatmul.mubr.f32.gmra.mrb[68].mxu1 %v18096_v17  ;;  %9437 = vmatprep.mubr.f32.mxu0 %v18099_v6  ;;  %v18203_v6 = vld [vmem:[#allocation237_spill] sm:$0xff] }
 0x3ea   : > { %9902 = vmatpush1.bf16.msra.mxu1 %v9901_v59  ;;  %3760 = vmatprep.mubr.f32.mxu1 %v18098_v24  ;;  %v18104_v59 = vld [vmem:[#allocation181_spill] sm:$0xff]  ;;  %v18105_v24 = vld [vmem:[#allocation179_spill] sm:$0xff] }
 0x3eb   : > { %9903 = vmatprep.subr.bf16.mxu1 %v17543_v43  ;;  %v9907_v17 = vpack.c.bf16 %v18105_v24, %v18104_v59  ;;  %v18111_v24 = vld [vmem:[#allocation55_spill] sm:$0xff]  ;;  %v18114_v59 = vld [vmem:[#allocation57_spill] sm:$0xff] }
 0x3ec   : > { %9438 = vmatmul.mubr.f32.gmra.mrb[110].mxu0 %v13517_v33  ;;  %v18201_v33 = vld [vmem:[#allocation103_spill] sm:$0xff] }
 0x3ed   : > { %3762 = vmatmul.mubr.f32.gmra.mrb[70].mxu1 %v18102_v49  ;;  %9440 = vmatprep.mubr.f32.mxu0 %v13655_v55  ;;  %v18199_v55 = vld [vmem:[#allocation95_spill] sm:$0xff] }
 0x3ee   : > { %9905 = vmatpush1.bf16.msra.mxu1 %v9904_v51  ;;  %3767 = vmatprep.mubr.f32.mxu1 %v18103_v37  ;;  %v18108_v51 = vld [vmem:[#allocation186_spill] sm:$0xff]  ;;  %v18109_v37 = vld [vmem:[#allocation185_spill] sm:$0xff] }
 0x3ef   : > { %9906 = vmatprep.subr.bf16.mxu1 %v17543_v43  ;;  %v9910_v49 = vpack.c.bf16 %v18109_v37, %v18108_v51  ;;  %v18115_v37 = vld [vmem:[#allocation62_spill] sm:$0xff] }
 0x3f0   : > { %9441 = vmatmul.mubr.f32.gmra.mrb[112].mxu0 %v13674_v46  ;;  %v18118_v51 = vld [vmem:[#allocation66_spill] sm:$0xff]  ;;  %v18197_v46 = vld [vmem:[#allocation93_spill] sm:$0xff] }
 0x3f1   : > { %3769 = vmatmul.mubr.f32.gmra.mrb[72].mxu1 %v18106_v12  ;;  %9443 = vmatprep.mubr.f32.mxu0 %v13707_v38  ;;  %v18195_v38 = vld [vmem:[#allocation235_spill] sm:$0xff] }
 0x3f2   : > { %9908 = vmatpush1.bf16.msra.mxu1 %v9907_v17  ;;  %3774 = vmatprep.mubr.f32.mxu1 %v18107_v9  ;;  %v18112_v17 = vld [vmem:[#allocation189_spill] sm:$0xff]  ;;  %v18113_v9 = vld [vmem:[#allocation187_spill] sm:$0xff] }
 0x3f3   : > { %9909 = vmatprep.subr.bf16.mxu1 %v17543_v43  ;;  %v9913_v12 = vpack.c.bf16 %v18113_v9, %v18112_v17  ;;  %v18120_v9 = vld [vmem:[#allocation17_spill] sm:$0xff] }
 0x3f4   : > { %9444 = vmatmul.mubr.f32.gmra.mrb[114].mxu0 %v13755_v62  ;;  %v18123_v17 = vld [vmem:[#allocation21_spill] sm:$0xff]  ;;  %v18193_v62 = vld [vmem:[#allocation216_spill] sm:$0xff] }
 0x3f5   : > { %3776 = vmatmul.mubr.f32.gmra.mrb[74].mxu1 %v18110_v14  ;;  %9446 = vmatprep.mubr.f32.mxu0 %v13810_v31  ;;  %v18119_v31 = vld [vmem:[#allocation240_spill] sm:$0xff] }
 0x3f6   : > { %9911 = vmatpush1.bf16.msra.mxu1 %v9910_v49  ;;  %3781 = vmatprep.mubr.f32.mxu1 %v18111_v24  ;;  %v18116_v49 = vld [vmem:[#allocation192_spill] sm:$0xff]  ;;  %v18117_v24 = vld [vmem:[#allocation191_spill] sm:$0xff] }
 0x3f7   : > { %9912 = vmatprep.subr.bf16.mxu1 %v17543_v43  ;;  %v9916_v14 = vpack.c.bf16 %v18117_v24, %v18116_v49  ;;  %v18124_v24 = vld [vmem:[#allocation25_spill] sm:$0xff]  ;;  %v18127_v49 = vld [vmem:[#allocation27_spill] sm:$0xff] }
 0x3f8   : > { %9447 = vmatmul.mubr.f32.gmra.mrb[116].mxu0 %v13832_v11  ;;  %v18191_v11 = vld [vmem:[#allocation200_spill] sm:$0xff] }
 0x3f9   : > { %3783 = vmatmul.mubr.f32.gmra.mrb[76].mxu1 %v18114_v59  ;;  %9449 = vmatprep.mubr.f32.mxu0 %v13854_v58  ;;  %v18189_v58 = vld [vmem:[#allocation184_spill] sm:$0xff] }
 0x3fa   : > { %9914 = vmatpush1.bf16.msra.mxu1 %v9913_v12  ;;  %3788 = vmatprep.mubr.f32.mxu1 %v18115_v37  ;;  %v18121_v12 = vld [vmem:[#allocation203_spill] sm:$0xff] }
 0x3fb   : > { %9915 = vmatprep.subr.bf16.mxu1 %v17543_v43  ;;  %v18122_v37 = vld [vmem:[#allocation199_spill] sm:$0xff] }
 0x3fc   : > { %9450 = vmatmul.mubr.f32.gmra.mrb[118].mxu0 %v18119_v31  ;;  %v9919_v59 = vpack.c.bf16 %v18122_v37, %v18121_v12  ;;  %v18128_v37 = vld [vmem:[#allocation33_spill] sm:$0xff]  ;;  %v18131_v12 = vld [vmem:[#allocation38_spill] sm:$0xff]  ;;  %v18187_v31 = vld [vmem:[#allocation168_spill] sm:$0xff] }
 0x3fd   : > { %3790 = vmatmul.mubr.f32.gmra.mrb[78].mxu1 %v18118_v51  ;;  %9452 = vmatprep.mubr.f32.mxu0 %v13931_v25  ;;  %v18186_v25 = vld [vmem:[#allocation167_spill] sm:$0xff] }
 0x3fe   : > { %9917 = vmatpush1.bf16.msra.mxu1 %v9916_v14  ;;  %3795 = vmatprep.mubr.f32.mxu1 %v18120_v9  ;;  %v18125_v14 = vld [vmem:[#allocation209_spill] sm:$0xff]  ;;  %v18126_v9 = vld [vmem:[#allocation206_spill] sm:$0xff] }
 0x3ff   : > { %9918 = vmatprep.subr.bf16.mxu1 %v17543_v43  ;;  %v9922_v51 = vpack.c.bf16 %v18126_v9, %v18125_v14  ;;  %v18132_v9 = vld [vmem:[#allocation46_spill] sm:$0xff] }
 0x400   : > { %9453 = vmatmul.mubr.f32.gmra.mrb[120].mxu0 %v13933_v21  ;;  %v18135_v14 = vld [vmem:[#allocation50_spill] sm:$0xff]  ;;  %v18180_v21 = vld [vmem:[#allocation145_spill] sm:$0xff] }
 0x401   : > { %3797 = vmatmul.mubr.f32.gmra.mrb[0].mxu1 %v18123_v17  ;;  %9455 = vmatprep.mubr.f32.mxu0 %v13961_v7  ;;  %v18178_v7 = vld [vmem:[#allocation135_spill] sm:$0xff] }
 0x402   : > { %9920 = vmatpush1.bf16.msra.mxu1 %v9919_v59  ;;  %3802 = vmatprep.mubr.f32.mxu1 %v18124_v24  ;;  %v18129_v59 = vld [vmem:[#allocation217_spill] sm:$0xff]  ;;  %v18130_v24 = vld [vmem:[#allocation215_spill] sm:$0xff] }
 0x403   : > { %9921 = vmatprep.subr.bf16.mxu1 %v17543_v43  ;;  %v9925_v17 = vpack.c.bf16 %v18130_v24, %v18129_v59  ;;  %v18136_v24 = vld [vmem:[#allocation42_spill] sm:$0xff]  ;;  %v18139_v59 = vld [vmem:[#allocation48_spill] sm:$0xff] }
 0x404   : > { %9456 = vmatmul.mubr.f32.gmra.mrb[122].mxu0 %v14005_v8  ;;  %v18177_v8 = vld [vmem:[#allocation120_spill] sm:$0xff] }
 0x405   : > { %3804 = vmatmul.mubr.f32.gmra.mrb[2].mxu1 %v18127_v49  ;;  %9458 = vmatprep.mubr.f32.mxu0 %v14020_v1 }
 0x406   : > { %9923 = vmatpush1.bf16.msra.mxu1 %v9922_v51  ;;  %3809 = vmatprep.mubr.f32.mxu1 %v18128_v37  ;;  %v18133_v51 = vld [vmem:[#allocation226_spill] sm:$0xff] }
 0x407   : > { %9924 = vmatprep.subr.bf16.mxu1 %v17543_v43  ;;  %v18134_v37 = vld [vmem:[#allocation222_spill] sm:$0xff] }
 0x408   : > { %9459 = vmatmul.mubr.f32.gmra.mrb[124].mxu0 %v14076_v40  ;;  %v9928_v49 = vpack.c.bf16 %v18134_v37, %v18133_v51  ;;  %v18140_v37 = vld [vmem:[#allocation56_spill] sm:$0xff]  ;;  %v18143_v51 = vld [vmem:[#allocation58_spill] sm:$0xff] }
 0x409   : > { %3811 = vmatmul.mubr.f32.gmra.mrb[4].mxu1 %v18131_v12  ;;  %9461 = vmatprep.mubr.f32.mxu0 %v14118_v32  ;;  %v18173_v32 = vld [vmem:[#allocation212_spill] sm:$0xff] }
 0x40a   : > { %9926 = vmatpush1.bf16.msra.mxu1 %v9925_v17  ;;  %3816 = vmatprep.mubr.f32.mxu1 %v18132_v9  ;;  %v18137_v17 = vld [vmem:[#allocation228_spill] sm:$0xff]  ;;  %v18138_v9 = vld [vmem:[#allocation227_spill] sm:$0xff]  ;;  %v18174_v40 = vand.u32 4294901760, %v18173_v32  ;;  %v18183_v32 = vld [vmem:[#allocation149_spill] sm:$0xff] }
 0x40b   : > { %9927 = vmatprep.subr.bf16.mxu1 %v17543_v43  ;;  %v9931_v12 = vpack.c.bf16 %v18138_v9, %v18137_v17  ;;  %v18144_v9 = vld [vmem:[#allocation64_spill] sm:$0xff]  ;;  %v18147_v17 = vld [vmem:[#allocation67_spill] sm:$0xff] }
 0x40c   : > { %9462 = vmatmul.mubr.f32.gmra.mrb[126].mxu0 %v14146_v30 }
 0x40d   : > { %3818 = vmatmul.mubr.f32.gmra.mrb[6].mxu1 %v18135_v14  ;;  %9464 = vmatprep.mubr.f32.mxu0 %v14196_v19  ;;  %v18170_v19 = vld [vmem:[#allocation125_spill] sm:$0xff] }
 0x40e   : > { %9929 = vmatpush1.bf16.msra.mxu1 %v9928_v49  ;;  %3823 = vmatprep.mubr.f32.mxu1 %v18136_v24  ;;  %v18141_v49 = vld [vmem:[#allocation234_spill] sm:$0xff]  ;;  %v18142_v24 = vld [vmem:[#allocation233_spill] sm:$0xff] }
 0x40f   : > { %9930 = vmatprep.subr.bf16.mxu1 %v17543_v43  ;;  %v9934_v14 = vpack.c.bf16 %v18142_v24, %v18141_v49  ;;  %v18148_v24 = vld [vmem:[#allocation68_spill] sm:$0xff] }
 0x410   : > { %9465 = vmatmul.mubr.f32.gmra.mrb[128].mxu0 %v14201_v63  ;;  %v18165_v63 = vld [vmem:[#allocation115_spill] sm:$0xff] }
 0x411   : > { %3825 = vmatmul.mubr.f32.gmra.mrb[8].mxu1 %v18139_v59  ;;  %9467 = vmatprep.mubr.f32.mxu0 %v14234_v48  ;;  %v18159_v48 = vld [vmem:[#allocation83_spill] sm:$0xff] }
 0x412   : > { %9932 = vmatpush1.bf16.msra.mxu1 %v9931_v12  ;;  %3830 = vmatprep.mubr.f32.mxu1 %v18140_v37  ;;  %v18145_v12 = vld [vmem:[#allocation86_spill] sm:$0xff]  ;;  %v18146_v37 = vld [vmem:[#allocation84_spill] sm:$0xff] }
 0x413   : > { %9933 = vmatprep.subr.bf16.mxu1 %v17543_v43  ;;  %v9937_v59 = vpack.c.bf16 %v18146_v37, %v18145_v12  ;;  %v18155_v37 = vld [vmem:[#allocation75_spill] sm:$0xff]  ;;  %v18158_v12 = vld [vmem:[#allocation89_spill] sm:$0xff] }
 0x414   : > { %9468 = vmatmul.mubr.f32.gmra.mrb[130].mxu0 %v14250_v53  ;;  %v18152_v53 = vld [vmem:[#allocation70_spill] sm:$0xff] }
 0x415   : > { %3832 = vmatmul.mubr.f32.gmra.mrb[10].mxu1 %v18143_v51  ;;  %9470 = vmatprep.mubr.f32.mxu0 %v14273_v54  ;;  %v18149_v51 = vld [vmem:[#allocation79_spill] sm:$0xff]  ;;  %v18153_v54 = vld [vmem:[#allocation81_spill] sm:$0xff] }
 0x416   : > { %9935 = vmatpush1.bf16.msra.mxu1 %v9934_v14  ;;  %3837 = vmatprep.mubr.f32.mxu1 %v18144_v9  ;;  %v18150_v14 = vld [vmem:[#allocation197_spill] sm:$0xff]  ;;  %v18151_v9 = vld [vmem:[#allocation87_spill] sm:$0xff]  ;;  %v18235_v56 = vand.u32 4294901760, %v18153_v54 }
 0x417   : > { %9936 = vmatprep.subr.bf16.mxu1 %v17543_v43  ;;  %v9940_v49 = vpack.c.bf16 %v18151_v9, %v18150_v14  ;;  %v18160_v9 = vld [vmem:[#allocation97_spill] sm:$0xff]  ;;  %v18163_v14 = vld [vmem:[#allocation104_spill] sm:$0xff] }
 0x418   : > { %9471 = vmatmul.mubr.f32.gmra.mrb[132].mxu0 %v14298_v61 }
 0x419   : > { %3839 = vmatmul.mubr.f32.gmra.mrb[12].mxu1 %v18147_v17  ;;  %9489 = vmatprep.mubr.f32.mxu0 %v18149_v51  ;;  %v18154_v17 = vld [vmem:[#allocation219_spill] sm:$0xff] }
 0x41a   : > { %9938 = vmatpush1.bf16.msra.mxu1 %v9937_v59  ;;  %3844 = vmatprep.mubr.f32.mxu1 %v18148_v24  ;;  %v18156_v59 = vld [vmem:[#allocation85_spill] sm:$0xff]  ;;  %v18157_v24 = vld [vmem:[#allocation92_spill] sm:$0xff] }
 0x41b   : > { %9939 = vmatprep.subr.bf16.mxu1 %v17543_v43  ;;  %v9943_v61 = vpack.c.bf16 %v18158_v12, %v18157_v24  ;;  %v18167_v12 = vld [vmem:[#allocation230_spill] sm:$0xff]  ;;  %v18169_v24 = vld [vmem:[#allocation108_spill] sm:$0xff] }
 0x41c   : > { %9490 = vmatmul.mubr.f32.vlgmr.msra.gmra.mrb[134].mxu0 %v18153_v54  ;;  %v18242_v54 = vld [vmem:[#allocation225_spill] sm:$0xff] }
 0x41d   : > { %3846 = vmatmul.mubr.f32.gmra.mrb[14].mxu1 %v18152_v53  ;;  %10140 = vmatpush3.bf16.msra.mxu0 %v13341_v18  ;;  %v18162_v53 = vld [vmem:[#allocation91_spill] sm:$0xff] }
 0x41e   : > { %9941 = vmatpush1.bf16.msra.mxu1 %v9940_v49  ;;  %10142 = vmatprep.subr.bf16.mxu0 %v18154_v17  ;;  %v18161_v49 = vld [vmem:[#allocation224_spill] sm:$0xff] }
 0x41f   : > { %3851 = vmatprep.mubr.f32.mxu1 %v18155_v37  ;;  %9942 = vmatprep.subr.bf16.mxu1 %v17543_v43  ;;  %v18164_v37 = vld [vmem:[#allocation102_spill] sm:$0xff] }
 0x420   : > { %9492 = vmatprep.mubr.f32.mxu0 %v18156_v59 }
 0x421   : > { %3853 = vmatmul.mubr.f32.gmra.mrb[16].mxu1 %v18159_v48  ;;  %9493 = vmatmul.mubr.f32.gmra.mrb[136].mxu0 %v18160_v9  ;;  %v18166_v48 = vld [vmem:[#allocation107_spill] sm:$0xff] }
 0x422   : > { %9944 = vmatpush1.bf16.msra.mxu1 %v9943_v61  ;;  %10144 = vmatpush3.bf16.msra.mxu0 %v18154_v17  ;;  %v18168_v61 = vld [vmem:[#allocation122_spill] sm:$0xff] }
 0x423   : > { %10146 = vmatprep.subr.bf16.mxu0 %v18161_v49  ;;  %3858 = vmatprep.mubr.f32.mxu1 %v18162_v53  ;;  %v18171_v53 = vld [vmem:[#allocation213_spill] sm:$0xff] }
 0x424   : > { %9495 = vmatprep.mubr.f32.mxu0 %v18163_v14  ;;  %9945 = vmatprep.subr.bf16.mxu1 %v17543_v43  ;;  %v18172_v30 = vand.u32 4294901760, %v18171_v53  ;;  %v18181_v53 = vld [vmem:[#allocation142_spill] sm:$0xff] }
 0x425   : > { %3860 = vmatmul.mubr.f32.gmra.mrb[18].mxu1 %v18164_v37  ;;  %9496 = vmatmul.mubr.f32.gmra.mrb[138].mxu0 %v18165_v63  ;;  %v18175_v37 = vld [vmem:[#allocation112_spill] sm:$0xff] }
 0x426   : > { %10148 = vmatpush3.bf16.msra.mxu0 %v18161_v49  ;;  %3865 = vmatprep.mubr.f32.mxu1 %v18166_v48  ;;  %v14607_v1 = vpack.c.bf16 %v18174_v40, %v18172_v30  ;;  %v18176_v48 = vld [vmem:[#allocation126_spill] sm:$0xff]  ;;  %v18182_v40 = vld [vmem:[#allocation157_spill] sm:$0xff]  ;;  %v18184_v30 = vld [vmem:[#allocation163_spill] sm:$0xff] }
 0x427   : > { %10150 = vmatprep.subr.bf16.mxu0 %v18167_v12  ;;  %9498 = vmatprep.mubr.f32.mxu0 %v18168_v61 }
 0x429   : > { %3867 = vmatmul.mubr.f32.gmra.mrb[20].mxu1 %v18169_v24  ;;  %9499 = vmatmul.mubr.f32.gmra.mrb[140].mxu0 %v18170_v19  ;;  %v18179_v24 = vld [vmem:[#allocation130_spill] sm:$0xff] }
 0x42a   : > { %10152 = vmatpush3.bf16.msra.mxu0 %v18167_v12  ;;  %3872 = vmatprep.mubr.f32.mxu1 %v18175_v37  ;;  %v18185_v37 = vld [vmem:[#allocation153_spill] sm:$0xff]  ;;  %v18226_v12 = vld [vmem:[#allocation266_spill] sm:$0xff] }
 0x42b   : > { %10154 = vmatprep.subr.bf16.mxu0 %v14607_v1  ;;  %9501 = vmatprep.mubr.f32.mxu0 %v18176_v48 }
 0x42d   : > { %3874 = vmatmul.mubr.f32.gmra.mrb[22].mxu1 %v18177_v8  ;;  %9502 = vmatmul.mubr.f32.gmra.mrb[142].mxu0 %v18178_v7  ;;  %v18188_v8 = vld [vmem:[#allocation190_spill] sm:$0xff] }
 0x42e   : > { %3879 = vmatprep.mubr.f32.mxu1 %v18179_v24  ;;  %9504 = vmatprep.mubr.f32.mxu0 %v18180_v21  ;;  %v18190_v24 = vld [vmem:[#allocation198_spill] sm:$0xff] }
 0x431   : > { %3881 = vmatmul.mubr.f32.gmra.mrb[24].mxu1 %v18181_v53  ;;  %9505 = vmatmul.mubr.f32.gmra.mrb[144].mxu0 %v18182_v40  ;;  %v18192_v53 = vld [vmem:[#allocation214_spill] sm:$0xff] }
 0x432   : > { %3886 = vmatprep.mubr.f32.mxu1 %v18183_v32  ;;  %9507 = vmatprep.mubr.f32.mxu0 %v18184_v30  ;;  %v18194_v32 = vld [vmem:[#allocation236_spill] sm:$0xff] }
 0x435   : > { %3888 = vmatmul.mubr.f32.gmra.mrb[26].mxu1 %v18185_v37  ;;  %9508 = vmatmul.mubr.f32.gmra.mrb[146].mxu0 %v18186_v25  ;;  %v18196_v37 = vld [vmem:[#allocation207_spill] sm:$0xff] }
 0x436   : > { %3893 = vmatprep.mubr.f32.mxu1 %v18187_v31  ;;  %9510 = vmatprep.mubr.f32.mxu0 %v18188_v8  ;;  %v18198_v31 = vld [vmem:[#allocation101_spill] sm:$0xff] }
 0x439   : > { %3895 = vmatmul.mubr.f32.gmra.mrb[28].mxu1 %v18189_v58  ;;  %9511 = vmatmul.mubr.f32.gmra.mrb[148].mxu0 %v18190_v24  ;;  %v18200_v58 = vld [vmem:[#allocation114_spill] sm:$0xff] }
 0x43a   : > { %3900 = vmatprep.mubr.f32.mxu1 %v18191_v11  ;;  %9513 = vmatprep.mubr.f32.mxu0 %v18192_v53  ;;  %v18202_v11 = vld [vmem:[#allocation133_spill] sm:$0xff] }
 0x43d   : > { %3902 = vmatmul.mubr.f32.gmra.mrb[30].mxu1 %v18193_v62  ;;  %9514 = vmatmul.mubr.f32.gmra.mrb[150].mxu0 %v18194_v32  ;;  %v18204_v62 = vld [vmem:[#allocation143_spill] sm:$0xff] }
 0x43e   : > { %3907 = vmatprep.mubr.f32.mxu1 %v18195_v38  ;;  %9516 = vmatprep.mubr.f32.mxu0 %v18196_v37  ;;  %v18206_v38 = vld [vmem:[#allocation151_spill] sm:$0xff] }
 0x441   : > { %3909 = vmatmul.mubr.f32.gmra.mrb[32].mxu1 %v18197_v46  ;;  %9517 = vmatmul.mubr.f32.gmra.mrb[152].mxu0 %v18198_v31  ;;  %v18208_v46 = vld [vmem:[#allocation166_spill] sm:$0xff] }
 0x442   : > { %3914 = vmatprep.mubr.f32.mxu1 %v18199_v55  ;;  %9519 = vmatprep.mubr.f32.mxu0 %v18200_v58  ;;  %v18210_v55 = vld [vmem:[#allocation241_spill] sm:$0xff] }
 0x445   : > { %3916 = vmatmul.mubr.f32.gmra.mrb[34].mxu1 %v18201_v33  ;;  %9520 = vmatmul.mubr.f32.gmra.mrb[154].mxu0 %v18202_v11  ;;  %v18212_v33 = vld [vmem:[#allocation172_spill] sm:$0xff] }
 0x446   : > { %3921 = vmatprep.mubr.f32.mxu1 %v18203_v6  ;;  %9522 = vmatprep.mubr.f32.mxu0 %v18204_v62  ;;  %v18213_v6 = vld [vmem:[#allocation176_spill] sm:$0xff] }
 0x449   : > { %3923 = vmatmul.mubr.f32.gmra.mrb[36].mxu1 %v18205_v50  ;;  %9523 = vmatmul.mubr.f32.gmra.mrb[156].mxu0 %v18206_v38  ;;  %v18214_v50 = vld [vmem:[#allocation245_spill] sm:$0xff] }
 0x44a   : > { %3928 = vmatprep.mubr.f32.mxu1 %v18207_v44  ;;  %9525 = vmatprep.mubr.f32.mxu0 %v18208_v46  ;;  %v18216_v44 = vld [vmem:[#allocation250_spill] sm:$0xff] }
 0x44d   : > { %3930 = vmatmul.mubr.f32.gmra.mrb[38].mxu1 %v18209_v29  ;;  %9526 = vmatmul.mubr.f32.gmra.mrb[158].mxu0 %v18210_v55  ;;  %v18218_v29 = vld [vmem:[#allocation253_spill] sm:$0xff] }
 0x44e   : > { %3935 = vmatprep.mubr.f32.mxu1 %v18211_v41  ;;  %9528 = vmatprep.mubr.f32.mxu0 %v13975_v15  ;;  %v18220_v41 = vld [vmem:[#allocation257_spill] sm:$0xff] }
 0x451   : > { %3937 = vmatmul.mubr.f32.gmra.mrb[40].mxu1 %v18212_v33  ;;  %9529 = vmatmul.mubr.f32.gmra.mrb[160].mxu0 %v13978_v27  ;;  %v18222_v33 = vld [vmem:[#allocation262_spill] sm:$0xff] }
 0x452   : > { %3942 = vmatprep.mubr.f32.mxu1 %v18213_v6  ;;  %9531 = vmatprep.mubr.f32.mxu0 %v18214_v50  ;;  %v18224_v6 = vld [vmem:[#allocation263_spill] sm:$0xff] }
 0x455   : > { %3944 = vmatmul.mubr.f32.gmra.mrb[42].mxu1 %v18215_v26  ;;  %9532 = vmatmul.mubr.f32.gmra.mrb[162].mxu0 %v18216_v44  ;;  %v18225_v26 = vld [vmem:[#allocation270_spill] sm:$0xff] }
 0x456   : > { %3949 = vmatprep.mubr.f32.mxu1 %v18217_v42  ;;  %9534 = vmatprep.mubr.f32.mxu0 %v18218_v29  ;;  %v18227_v42 = vld [vmem:[#allocation273_spill] sm:$0xff] }
 0x459   : > { %3951 = vmatmul.mubr.f32.gmra.mrb[44].mxu1 %v18219_v5  ;;  %9535 = vmatmul.mubr.f32.gmra.mrb[164].mxu0 %v18220_v41  ;;  %v18229_v5 = vld [vmem:[#allocation274_spill] sm:$0xff] }
 0x45a   : > { %3956 = vmatprep.mubr.f32.mxu1 %v18221_v16  ;;  %9537 = vmatprep.mubr.f32.mxu0 %v18222_v33  ;;  %v18230_v16 = vld [vmem:[#allocation277_spill] sm:$0xff] }
 0x45d   : > { %3958 = vmatmul.mubr.f32.gmra.mrb[46].mxu1 %v18223_v35  ;;  %9538 = vmatmul.mubr.f32.gmra.mrb[166].mxu0 %v14194_v0  ;;  %v18231_v35 = vld [vmem:[#allocation280_spill] sm:$0xff] }
 0x45e   : > { %3963 = vmatprep.mubr.f32.mxu1 %v18224_v6  ;;  %9540 = vmatprep.mubr.f32.mxu0 %v18225_v26  ;;  %v18232_v6 = vld [vmem:[#allocation283_spill] sm:$0xff] }
 0x461   : > { %3965 = vmatmul.mubr.f32.gmra.mrb[48].mxu1 %v18226_v12  ;;  %9541 = vmatmul.mubr.f32.gmra.mrb[168].mxu0 %v18227_v42  ;;  %v18233_v12 = vand.u32 4294901760, %v18149_v51  ;;  %v18241_v51 = vand.u32 4294901760, %v18160_v9 }
 0x462   : > { %3970 = vmatprep.mubr.f32.mxu1 %v18228_v45  ;;  %9543 = vmatprep.mubr.f32.mxu0 %v14271_v52  ;;  %v18234_v45 = vld [vmem:[#allocation285_spill] sm:$0xff] }
 0x465   : > { %3972 = vmatmul.mubr.f32.gmra.mrb[50].mxu1 %v18229_v5  ;;  %9544 = vmatmul.mubr.f32.gmra.mrb[170].mxu0 %v14288_v60  ;;  %v18236_v5 = vld [vmem:[#allocation220_spill] sm:$0xff] }
 0x466   : > { %3977 = vmatprep.mubr.f32.mxu1 %v18230_v16  ;;  %9546 = vmatprep.mubr.f32.mxu0 %v14305_v57  ;;  %v18237_v49 = vand.u32 4294901760, %v18236_v5  ;;  %v18239_v16 = vand.u32 4294901760, %v18238_v3  ;;  %v18246_v3 = vld [vmem:[#allocation291_spill] sm:$0xff] }
 0x468   : > { %v10157_v13 = vpack.c.bf16 %v18239_v16, %v18237_v49  ;;  %v18249_v16 = vld [vmem:[#allocation231_spill] sm:$0xff] }
 0x469   : > { %3979 = vmatmul.mubr.f32.gmra.mrb[52].mxu1 %v18231_v35  ;;  %9547 = vmatmul.mubr.f32.gmra.mrb[172].mxu0 %v14327_v28  ;;  %v18250_v9 = vand.u32 4294901760, %v18249_v16  ;;  %v18271_v16 = vld [vmem:[#allocation63_spill] sm:$0xff] }
 0x46a   : > { %3984 = vmatprep.mubr.f32.mxu1 %v18232_v6  ;;  %9565 = vmatprep.mubr.f32.mxu0 %v18233_v12  ;;  %v18240_v6 = vand.u32 4294901760, %v18156_v59  ;;  %v18244_v12 = vld [vmem:[#allocation223_spill] sm:$0xff]  ;;  %v18251_v59 = vld [vmem:[#allocation229_spill] sm:$0xff] }
 0x46b   : > { %v18245_v5 = vand.u32 4294901760, %v18244_v12  ;;  %v18252_v49 = vand.u32 4294901760, %v18251_v59  ;;  %v18263_v12 = vld [vmem:[#allocation105_spill] sm:$0xff]  ;;  %v18274_v59 = vld [vmem:[#allocation34_spill] sm:$0xff]  ;;  %v18348_v35 = vld [vmem:[#allocation123_spill] sm:$0xff] }
 0x46d   : > { %3986 = vmatmul.mubr.f32.gmra.mrb[54].mxu1 %v18234_v45  ;;  %9566 = vmatmul.mubr.f32.vlgmr.msra.gmra.mrb[174].mxu0 %v18235_v56  ;;  %v18243_v56 = vand.u32 4294901760, %v18242_v54  ;;  %v18259_v54 = vld [vmem:[#allocation18_spill] sm:$0xff] }
 0x46e   : > { %10156 = vmatpush3.bf16.msra.mxu0 %v14607_v1  ;;  %3991 = vmatprep.mubr.f32.mxu1 %v14329_v23  ;;  %v18247_v1 = vand.u32 4294901760, %v18163_v14  ;;  %v18254_v14 = vand.u32 4294901760, %v18170_v19  ;;  %v18258_v19 = vand.u32 4294901760, %v18182_v40  ;;  %v18266_v40 = vld [vmem:[#allocation32_spill] sm:$0xff] }
 0x46f   : > { %10158 = vmatprep.subr.bf16.mxu0 %v10157_v13  ;;  %9568 = vmatprep.mubr.f32.mxu0 %v18240_v6  ;;  %v10161_v45 = vpack.c.bf16 %v18245_v5, %v18243_v56  ;;  %v18248_v6 = vand.u32 4294901760, %v18165_v63  ;;  %v18255_v63 = vand.u32 4294901760, %v18176_v48  ;;  %v18260_v48 = vand.u32 4294901760, %v18184_v30  ;;  %v18261_v56 = vld [vmem:[#allocation22_spill] sm:$0xff]  ;;  %v18264_v5 = vld [vmem:[#allocation29_spill] sm:$0xff]  ;;  %v18347_v23 = vld [vmem:[#allocation116_spill] sm:$0xff] }
 0x470   : > { %v18268_v30 = vld [vmem:[#allocation113_spill] sm:$0xff] }
 0x471   : > { %3993 = vmatmul.mubr.f32.gmra.mrb[56].mxu1 %v14348_v47  ;;  %9569 = vmatmul.mubr.f32.gmra.mrb[176].mxu0 %v18241_v51  ;;  %v10165_v51 = vpack.c.bf16 %v18252_v49, %v18250_v9  ;;  %v18272_v9 = vand.u32 4294901760, %v18194_v32  ;;  %v18276_v49 = vld [vmem:[#allocation39_spill] sm:$0xff]  ;;  %v18280_v32 = vand.u32 4294901760, %v18200_v58  ;;  %v18288_v58 = vld [vmem:[#allocation146_spill] sm:$0xff] }
 0x472   : > { %10160 = vmatpush3.bf16.msra.mxu0 %v10157_v13  ;;  %3998 = vmatprep.mubr.f32.mxu1 %v18246_v3  ;;  %v18253_v13 = vand.u32 4294901760, %v18168_v61  ;;  %v18257_v61 = vand.u32 4294901760, %v18180_v21  ;;  %v18265_v21 = vand.u32 4294901760, %v18188_v8  ;;  %v18273_v8 = vld [vmem:[#allocation124_spill] sm:$0xff]  ;;  %v18344_v3 = vld [vmem:[#allocation230_spill] sm:$0xff]  ;;  %v18345_v47 = vld [vmem:[#allocation111_spill] sm:$0xff] }
 0x473   : > { %10162 = vmatprep.subr.bf16.mxu0 %v10161_v45  ;;  %9571 = vmatprep.mubr.f32.mxu0 %v18247_v1  ;;  %v18267_v1 = vand.u32 4294901760, %v18190_v24  ;;  %v18275_v24 = vand.u32 4294901760, %v18196_v37  ;;  %v18283_v37 = vld [vmem:[#allocation140_spill] sm:$0xff] }
 0x475   : > { %4000 = vmatmul.mubr.f32.gmra.mrb[58].mxu1 %v14374_v20  ;;  %9572 = vmatmul.mubr.f32.gmra.mrb[178].mxu0 %v18248_v6  ;;  %v18269_v6 = vld [vmem:[#allocation41_spill] sm:$0xff] }
 0x476   : > { %10164 = vmatpush3.bf16.msra.mxu0 %v10161_v45  ;;  %4005 = vmatprep.mubr.f32.mxu1 %v14382_v36  ;;  %v18256_v45 = vand.u32 4294901760, %v18178_v7  ;;  %v18262_v7 = vand.u32 4294901760, %v18186_v25  ;;  %v18270_v25 = vand.u32 4294901760, %v18192_v53  ;;  %v18278_v53 = vld [vmem:[#allocation131_spill] sm:$0xff]  ;;  %v18342_v36 = vld [vmem:[#allocation106_spill] sm:$0xff]  ;;  %v18343_v20 = vld [vmem:[#allocation117_spill] sm:$0xff] }
 0x477   : > { %10166 = vmatprep.subr.bf16.mxu0 %v10165_v51  ;;  %9574 = vmatprep.mubr.f32.mxu0 %v18253_v13  ;;  %v18279_v13 = vld [vmem:[#allocation49_spill] sm:$0xff] }
 0x479   : > { %4007 = vmatmul.mubr.f32.gmra.mrb[60].mxu1 %v14394_v22  ;;  %9575 = vmatmul.mubr.f32.gmra.mrb[180].mxu0 %v18254_v14  ;;  %v18281_v14 = vld [vmem:[#allocation52_spill] sm:$0xff]  ;;  %v18341_v22 = vld [vmem:[#allocation110_spill] sm:$0xff] }
 0x47a   : > { %10168 = vmatpush3.bf16.msra.mxu0 %v10165_v51  ;;  %4012 = vmatprep.mubr.f32.mxu1 %v14400_v2  ;;  %v18277_v51 = vand.u32 4294901760, %v18198_v31  ;;  %v18285_v31 = vand.u32 4294901760, %v18204_v62  ;;  %v18293_v62 = vld [vmem:[#allocation156_spill] sm:$0xff]  ;;  %v18339_v2 = vld [vmem:[#allocation99_spill] sm:$0xff] }
 0x47b   : > { %10170 = vmatprep.subr.bf16.mxu0 %v13341_v18  ;;  %9577 = vmatprep.mubr.f32.mxu0 %v18255_v63  ;;  %v18282_v63 = vand.u32 4294901760, %v18202_v11  ;;  %v18290_v11 = vand.u32 4294901760, %v18208_v46  ;;  %v18298_v46 = vld [vmem:[#allocation165_spill] sm:$0xff] }
 0x47d   : > { %4014 = vmatmul.mubr.f32.gmra.mrb[62].mxu1 %v14409_v34  ;;  %9578 = vmatmul.mubr.f32.gmra.mrb[182].mxu0 %v18256_v45  ;;  %v18284_v45 = vld [vmem:[#allocation59_spill] sm:$0xff]  ;;  %v18338_v34 = vld [vmem:[#allocation224_spill] sm:$0xff] }
 0x47e   : > { %4019 = vmatprep.mubr.f32.mxu1 %v14419_v39  ;;  %9580 = vmatprep.mubr.f32.mxu0 %v18257_v61  ;;  %v18286_v61 = vld [vmem:[#allocation61_spill] sm:$0xff]  ;;  %v18337_v39 = vld [vmem:[#allocation210_spill] sm:$0xff] }
 0x481   : > { %4021 = vmatmul.mubr.f32.gmra.mrb[64].mxu1 %v14429_v4  ;;  %9581 = vmatmul.mubr.f32.gmra.mrb[184].mxu0 %v18258_v19  ;;  %v18287_v19 = vand.u32 4294901760, %v18206_v38  ;;  %v18295_v38 = vand.u32 4294901760, %v13975_v15  ;;  %v18303_v15 = vld [vmem:[#allocation171_spill] sm:$0xff]  ;;  %v18332_v4 = vld [vmem:[#allocation205_spill] sm:$0xff] }
 0x482   : > { %4156 = vmatprep.mubr.f32.mxu1 %v18259_v54  ;;  %9583 = vmatprep.mubr.f32.mxu0 %v18260_v48  ;;  %v18289_v48 = vld [vmem:[#allocation71_spill] sm:$0xff] }
 0x485   : > { %4159 = vmatmul.mubr.f32.vlgmr.msra.gmra.mrb[66].mxu1 %v18261_v56  ;;  %9584 = vmatmul.mubr.f32.gmra.mrb[186].mxu0 %v18262_v7  ;;  %v18291_v7 = vld [vmem:[#allocation74_spill] sm:$0xff] }
 0x486   : > { %9947 = vmatpush1.bf16.msra.mxu1 %v18263_v12  ;;  %4165 = vmatprep.mubr.f32.mxu1 %v18264_v5  ;;  %v18366_v12 = vld [vmem:[#allocation221_spill] sm:$0xff] }
 0x487   : > { %9948 = vmatprep.subr.bf16.mxu1 %v17543_v43  ;;  %9586 = vmatprep.mubr.f32.mxu0 %v18265_v21  ;;  %v18292_v21 = vand.u32 4294901760, %v18210_v55  ;;  %v18300_v55 = vand.u32 4294901760, %v18214_v50  ;;  %v18308_v50 = vld [vmem:[#allocation177_spill] sm:$0xff] }
 0x489   : > { %4168 = vmatmul.mubr.f32.gmra.mrb[68].mxu1 %v18266_v40  ;;  %9587 = vmatmul.mubr.f32.gmra.mrb[188].mxu0 %v18267_v1  ;;  %v18294_v1 = vld [vmem:[#allocation19_spill] sm:$0xff] }
 0x48a   : > { %9950 = vmatpush1.bf16.msra.mxu1 %v18268_v30  ;;  %4174 = vmatprep.mubr.f32.mxu1 %v18269_v6  ;;  %v18365_v30 = vld [vmem:[#allocation211_spill] sm:$0xff] }
 0x48b   : > { %9951 = vmatprep.subr.bf16.mxu1 %v17543_v43  ;;  %9589 = vmatprep.mubr.f32.mxu0 %v18270_v25  ;;  %v18296_v25 = vld [vmem:[#allocation23_spill] sm:$0xff] }
 0x48d   : > { %4177 = vmatmul.mubr.f32.gmra.mrb[70].mxu1 %v18271_v16  ;;  %9590 = vmatmul.mubr.f32.gmra.mrb[190].mxu0 %v18272_v9  ;;  %v18297_v9 = vand.u32 4294901760, %v13978_v27  ;;  %v18305_v27 = vand.u32 4294901760, %v18218_v29  ;;  %v18313_v29 = vld [vmem:[#allocation180_spill] sm:$0xff] }
 0x48e   : > { %9953 = vmatpush1.bf16.msra.mxu1 %v18273_v8  ;;  %4183 = vmatprep.mubr.f32.mxu1 %v18274_v59  ;;  %v18364_v8 = vld [vmem:[#allocation204_spill] sm:$0xff] }
 0x48f   : > { %9954 = vmatprep.subr.bf16.mxu1 %v17543_v43  ;;  %9592 = vmatprep.mubr.f32.mxu0 %v18275_v24  ;;  %v18299_v24 = vld [vmem:[#allocation30_spill] sm:$0xff] }
 0x491   : > { %4186 = vmatmul.mubr.f32.gmra.mrb[72].mxu1 %v18276_v49  ;;  %9593 = vmatmul.mubr.f32.gmra.mrb[192].mxu0 %v18277_v51  ;;  %v18301_v51 = vld [vmem:[#allocation40_spill] sm:$0xff] }
 0x492   : > { %9956 = vmatpush1.bf16.msra.mxu1 %v18278_v53  ;;  %4192 = vmatprep.mubr.f32.mxu1 %v18279_v13  ;;  %v18363_v53 = vld [vmem:[#allocation193_spill] sm:$0xff] }
 0x493   : > { %9957 = vmatprep.subr.bf16.mxu1 %v17543_v43  ;;  %9595 = vmatprep.mubr.f32.mxu0 %v18280_v32  ;;  %v18302_v32 = vand.u32 4294901760, %v18216_v44  ;;  %v18310_v44 = vand.u32 4294901760, %v18222_v33  ;;  %v18318_v33 = vld [vmem:[#allocation188_spill] sm:$0xff] }
 0x495   : > { %4195 = vmatmul.mubr.f32.gmra.mrb[74].mxu1 %v18281_v14  ;;  %9596 = vmatmul.mubr.f32.gmra.mrb[194].mxu0 %v18282_v63  ;;  %v18304_v63 = vld [vmem:[#allocation54_spill] sm:$0xff] }
 0x496   : > { %9959 = vmatpush1.bf16.msra.mxu1 %v18283_v37  ;;  %4201 = vmatprep.mubr.f32.mxu1 %v18284_v45  ;;  %v18362_v37 = vld [vmem:[#allocation194_spill] sm:$0xff] }
 0x497   : > { %9960 = vmatprep.subr.bf16.mxu1 %v17543_v43  ;;  %9598 = vmatprep.mubr.f32.mxu0 %v18285_v31  ;;  %v18306_v31 = vld [vmem:[#allocation31_spill] sm:$0xff] }
 0x499   : > { %4204 = vmatmul.mubr.f32.gmra.mrb[76].mxu1 %v18286_v61  ;;  %9599 = vmatmul.mubr.f32.gmra.mrb[196].mxu0 %v18287_v19  ;;  %v18307_v19 = vand.u32 4294901760, %v18220_v41  ;;  %v18315_v41 = vand.u32 4294901760, %v18225_v26  ;;  %v18323_v26 = vld [vmem:[#allocation196_spill] sm:$0xff] }
 0x49a   : > { %9962 = vmatpush1.bf16.msra.mxu1 %v18288_v58  ;;  %4210 = vmatprep.mubr.f32.mxu1 %v18289_v48  ;;  %v18361_v58 = vld [vmem:[#allocation182_spill] sm:$0xff] }
 0x49b   : > { %9963 = vmatprep.subr.bf16.mxu1 %v17543_v43  ;;  %9601 = vmatprep.mubr.f32.mxu0 %v18290_v11  ;;  %v18309_v11 = vld [vmem:[#allocation37_spill] sm:$0xff] }
 0x49d   : > { %4213 = vmatmul.mubr.f32.gmra.mrb[78].mxu1 %v18291_v7  ;;  %9602 = vmatmul.mubr.f32.gmra.mrb[198].mxu0 %v18292_v21  ;;  %v18311_v21 = vld [vmem:[#allocation43_spill] sm:$0xff] }
 0x49e   : > { %9965 = vmatpush1.bf16.msra.mxu1 %v18293_v62  ;;  %4219 = vmatprep.mubr.f32.mxu1 %v18294_v1  ;;  %v18360_v62 = vld [vmem:[#allocation173_spill] sm:$0xff] }
 0x49f   : > { %9966 = vmatprep.subr.bf16.mxu1 %v17543_v43  ;;  %9604 = vmatprep.mubr.f32.mxu0 %v18295_v38  ;;  %v18312_v38 = vand.u32 4294901760, %v14194_v0  ;;  %v18320_v0 = vand.u32 4294901760, %v14271_v52  ;;  %v18328_v52 = vld [vmem:[#allocation201_spill] sm:$0xff] }
 0x4a1   : > { %4222 = vmatmul.mubr.f32.gmra.mrb[0].mxu1 %v18296_v25  ;;  %9605 = vmatmul.mubr.f32.gmra.mrb[200].mxu0 %v18297_v9  ;;  %v18314_v9 = vld [vmem:[#allocation51_spill] sm:$0xff] }
 0x4a2   : > { %9968 = vmatpush1.bf16.msra.mxu1 %v18298_v46  ;;  %4228 = vmatprep.mubr.f32.mxu1 %v18299_v24  ;;  %v18359_v46 = vld [vmem:[#allocation159_spill] sm:$0xff] }
 0x4a3   : > { %9969 = vmatprep.subr.bf16.mxu1 %v17543_v43  ;;  %9607 = vmatprep.mubr.f32.mxu0 %v18300_v55  ;;  %v18316_v55 = vld [vmem:[#allocation53_spill] sm:$0xff] }
 0x4a5   : > { %4231 = vmatmul.mubr.f32.gmra.mrb[2].mxu1 %v18301_v51  ;;  %9608 = vmatmul.mubr.f32.gmra.mrb[202].mxu0 %v18302_v32  ;;  %v18317_v32 = vand.u32 4294901760, %v18227_v42  ;;  %v18325_v42 = vand.u32 4294901760, %v14305_v57  ;;  %v18333_v57 = vld [vmem:[#allocation82_spill] sm:$0xff] }
 0x4a6   : > { %9971 = vmatpush1.bf16.msra.mxu1 %v18303_v15  ;;  %4237 = vmatprep.mubr.f32.mxu1 %v18304_v63  ;;  %v18357_v15 = vld [vmem:[#allocation152_spill] sm:$0xff] }
 0x4a7   : > { %9972 = vmatprep.subr.bf16.mxu1 %v17543_v43  ;;  %9610 = vmatprep.mubr.f32.mxu0 %v18305_v27  ;;  %v18319_v27 = vld [vmem:[#allocation60_spill] sm:$0xff] }
 0x4a9   : > { %4240 = vmatmul.mubr.f32.gmra.mrb[4].mxu1 %v18306_v31  ;;  %9611 = vmatmul.mubr.f32.gmra.mrb[204].mxu0 %v18307_v19  ;;  %v18321_v19 = vld [vmem:[#allocation65_spill] sm:$0xff] }
 0x4aa   : > { %9974 = vmatpush1.bf16.msra.mxu1 %v18308_v50  ;;  %4246 = vmatprep.mubr.f32.mxu1 %v18309_v11  ;;  %v18356_v50 = vld [vmem:[#allocation158_spill] sm:$0xff]  ;;  %v18406_v11 = vld [vmem:[#allocation279_spill] sm:$0xff] }
 0x4ab   : > { %9975 = vmatprep.subr.bf16.mxu1 %v17543_v43  ;;  %9613 = vmatprep.mubr.f32.mxu0 %v18310_v44  ;;  %v18322_v44 = vand.u32 4294901760, %v14288_v60  ;;  %v18330_v60 = vld [vmem:[#allocation80_spill] sm:$0xff] }
 0x4ad   : > { %4249 = vmatmul.mubr.f32.gmra.mrb[6].mxu1 %v18311_v21  ;;  %9614 = vmatmul.mubr.f32.gmra.mrb[206].mxu0 %v18312_v38  ;;  %v18324_v38 = vld [vmem:[#allocation72_spill] sm:$0xff] }
 0x4ae   : > { %9977 = vmatpush1.bf16.msra.mxu1 %v18313_v29  ;;  %4255 = vmatprep.mubr.f32.mxu1 %v18314_v9  ;;  %v18355_v29 = vld [vmem:[#allocation148_spill] sm:$0xff] }
 0x4af   : > { %9978 = vmatprep.subr.bf16.mxu1 %v17543_v43  ;;  %9616 = vmatprep.mubr.f32.mxu0 %v18315_v41  ;;  %v18326_v41 = vld [vmem:[#allocation76_spill] sm:$0xff] }
 0x4b0   : > { %v18402_v9 = vld [vmem:[#allocation272_spill] sm:$0xff] }
 0x4b1   : > { %4258 = vmatmul.mubr.f32.gmra.mrb[8].mxu1 %v18316_v55  ;;  %9617 = vmatmul.mubr.f32.gmra.mrb[208].mxu0 %v18317_v32  ;;  %v18327_v32 = vand.u32 4294901760, %v14327_v28  ;;  %v18334_v28 = vld [vmem:[#allocation78_spill] sm:$0xff]  ;;  %v18400_v55 = vld [vmem:[#allocation268_spill] sm:$0xff] }
 0x4b2   : > { %9980 = vmatpush1.bf16.msra.mxu1 %v18318_v33  ;;  %4264 = vmatprep.mubr.f32.mxu1 %v18319_v27  ;;  %v18354_v33 = vld [vmem:[#allocation147_spill] sm:$0xff]  ;;  %v18398_v27 = vld [vmem:[#allocation264_spill] sm:$0xff] }
 0x4b3   : > { %9981 = vmatprep.subr.bf16.mxu1 %v17543_v43  ;;  %9619 = vmatprep.mubr.f32.mxu0 %v18320_v0  ;;  %v18329_v0 = vld [vmem:[#allocation77_spill] sm:$0xff]  ;;  %v18404_v21 = vld [vmem:[#allocation276_spill] sm:$0xff] }
 0x4b5   : > { %4267 = vmatmul.mubr.f32.gmra.mrb[10].mxu1 %v18321_v19  ;;  %9620 = vmatmul.mubr.f32.gmra.mrb[210].mxu0 %v18322_v44  ;;  %v18331_v44 = vld [vmem:[#allocation73_spill] sm:$0xff]  ;;  %v18396_v19 = vld [vmem:[#allocation259_spill] sm:$0xff] }
 0x4b6   : > { %9983 = vmatpush1.bf16.msra.mxu1 %v18323_v26  ;;  %4273 = vmatprep.mubr.f32.mxu1 %v18324_v38  ;;  %v18353_v26 = vld [vmem:[#allocation139_spill] sm:$0xff]  ;;  %v18394_v38 = vld [vmem:[#allocation256_spill] sm:$0xff] }
 0x4b7   : > { %9984 = vmatprep.subr.bf16.mxu1 %v17543_v43  ;;  %9622 = vmatprep.mubr.f32.mxu0 %v18325_v42  ;;  %v18335_v42 = vld [vmem:[#allocation90_spill] sm:$0xff] }
 0x4b9   : > { %4276 = vmatmul.mubr.f32.gmra.mrb[12].mxu1 %v18326_v41  ;;  %9623 = vmatmul.mubr.f32.gmra.mrb[212].mxu0 %v18327_v32  ;;  %v18336_v32 = vld [vmem:[#allocation88_spill] sm:$0xff] }
 0x4ba   : > { %9986 = vmatpush1.bf16.msra.mxu1 %v18328_v52  ;;  %4282 = vmatprep.mubr.f32.mxu1 %v18329_v0  ;;  %v18351_v52 = vld [vmem:[#allocation129_spill] sm:$0xff]  ;;  %v18392_v41 = vld [vmem:[#allocation252_spill] sm:$0xff] }
 0x4bb   : > { %9987 = vmatprep.subr.bf16.mxu1 %v17543_v43  ;;  %9641 = vmatprep.mubr.f32.mxu0 %v18065_v10  ;;  %v18390_v0 = vld [vmem:[#allocation249_spill] sm:$0xff] }
 0x4bd   : > { %4285 = vmatmul.mubr.f32.gmra.mrb[14].mxu1 %v18330_v60  ;;  %9642 = vmatmul.mubr.f32.vlgmr.msra.gmra.mrb[214].mxu0 %v18331_v44  ;;  %v18388_v60 = vld [vmem:[#allocation208_spill] sm:$0xff] }
 0x4be   : > { %9989 = vmatpush1.bf16.msra.mxu1 %v18332_v4  ;;  %10172 = vmatpush3.bf16.msra.mxu0 %v13341_v18  ;;  %v18340_v18 = vld [vmem:[#allocation100_spill] sm:$0xff] }
 0x4bf   : > { %10174 = vmatprep.subr.bf16.mxu0 %v18154_v17  ;;  %4291 = vmatprep.mubr.f32.mxu1 %v18333_v57  ;;  %v18350_v4 = vld [vmem:[#allocation128_spill] sm:$0xff]  ;;  %v18386_v57 = vld [vmem:[#allocation178_spill] sm:$0xff] }
 0x4c0   : > { %9990 = vmatprep.subr.bf16.mxu1 %v17543_v43  ;;  %9644 = vmatprep.mubr.f32.mxu0 %v18334_v28 }
 0x4c1   : > { %4294 = vmatmul.mubr.f32.gmra.mrb[16].mxu1 %v18335_v42  ;;  %9645 = vmatmul.mubr.f32.gmra.mrb[216].mxu0 %v18336_v32  ;;  %v18384_v42 = vld [vmem:[#allocation175_spill] sm:$0xff] }
 0x4c2   : > { %9992 = vmatpush1.bf16.msra.mxu1 %v18337_v39  ;;  %10176 = vmatpush3.bf16.msra.mxu0 %v18154_v17  ;;  %v18346_v17 = vld [vmem:[#allocation118_spill] sm:$0xff]  ;;  %v18349_v39 = vld [vmem:[#allocation119_spill] sm:$0xff] }
 0x4c3   : > { %10178 = vmatprep.subr.bf16.mxu0 %v18338_v34  ;;  %4300 = vmatprep.mubr.f32.mxu1 %v18339_v2  ;;  %v18382_v2 = vld [vmem:[#allocation174_spill] sm:$0xff] }
 0x4c4   : > { %9993 = vmatprep.subr.bf16.mxu1 %v17543_v43  ;;  %9647 = vmatprep.mubr.f32.mxu0 %v18340_v18 }
 0x4c5   : > { %4303 = vmatmul.mubr.f32.gmra.mrb[18].mxu1 %v18341_v22  ;;  %9648 = vmatmul.mubr.f32.gmra.mrb[218].mxu0 %v18342_v36  ;;  %v18380_v22 = vld [vmem:[#allocation150_spill] sm:$0xff] }
 0x4c6   : > { %10180 = vmatpush3.bf16.msra.mxu0 %v18338_v34  ;;  %4309 = vmatprep.mubr.f32.mxu1 %v18343_v20  ;;  %v18352_v34 = vld [vmem:[#allocation138_spill] sm:$0xff]  ;;  %v18378_v20 = vld [vmem:[#allocation141_spill] sm:$0xff] }
 0x4c7   : > { %10182 = vmatprep.subr.bf16.mxu0 %v18344_v3  ;;  %9650 = vmatprep.mubr.f32.mxu0 %v18345_v47 }
 0x4c9   : > { %4312 = vmatmul.mubr.f32.gmra.mrb[20].mxu1 %v18346_v17  ;;  %9651 = vmatmul.mubr.f32.gmra.mrb[220].mxu0 %v18347_v23  ;;  %v18376_v17 = vld [vmem:[#allocation136_spill] sm:$0xff] }
 0x4ca   : > { %10184 = vmatpush3.bf16.msra.mxu0 %v18344_v3  ;;  %4318 = vmatprep.mubr.f32.mxu1 %v18348_v35  ;;  %v18358_v3 = vld [vmem:[#allocation164_spill] sm:$0xff]  ;;  %v18374_v35 = vld [vmem:[#allocation127_spill] sm:$0xff] }
 0x4cb   : > { %9653 = vmatprep.mubr.f32.mxu0 %v18349_v39 }
 0x4cd   : > { %4321 = vmatmul.mubr.f32.gmra.mrb[22].mxu1 %v18350_v4  ;;  %9654 = vmatmul.mubr.f32.gmra.mrb[222].mxu0 %v18351_v52  ;;  %v18372_v4 = vld [vmem:[#allocation109_spill] sm:$0xff] }
 0x4ce   : > { %4327 = vmatprep.mubr.f32.mxu1 %v18352_v34  ;;  %9656 = vmatprep.mubr.f32.mxu0 %v18353_v26  ;;  %v18370_v34 = vld [vmem:[#allocation98_spill] sm:$0xff] }
 0x4d1   : > { %4330 = vmatmul.mubr.f32.gmra.mrb[24].mxu1 %v18354_v33  ;;  %9657 = vmatmul.mubr.f32.gmra.mrb[224].mxu0 %v18355_v29  ;;  %v18368_v33 = vld [vmem:[#allocation195_spill] sm:$0xff] }
 0x4d2   : > { %4336 = vmatprep.mubr.f32.mxu1 %v18356_v50  ;;  %9659 = vmatprep.mubr.f32.mxu0 %v18357_v15  ;;  %v18367_v50 = vld [vmem:[#allocation232_spill] sm:$0xff] }
 0x4d5   : > { %4339 = vmatmul.mubr.f32.gmra.mrb[26].mxu1 %v18358_v3  ;;  %9660 = vmatmul.mubr.f32.gmra.mrb[226].mxu0 %v18359_v46  ;;  %v18369_v3 = vld [vmem:[#allocation202_spill] sm:$0xff] }
 0x4d6   : > { %4345 = vmatprep.mubr.f32.mxu1 %v18360_v62  ;;  %9662 = vmatprep.mubr.f32.mxu0 %v18361_v58  ;;  %v18371_v62 = vld [vmem:[#allocation94_spill] sm:$0xff] }
 0x4d9   : > { %4348 = vmatmul.mubr.f32.gmra.mrb[28].mxu1 %v18362_v37  ;;  %9663 = vmatmul.mubr.f32.gmra.mrb[228].mxu0 %v18363_v53  ;;  %v18373_v37 = vld [vmem:[#allocation96_spill] sm:$0xff] }
 0x4da   : > { %4354 = vmatprep.mubr.f32.mxu1 %v18364_v8  ;;  %9665 = vmatprep.mubr.f32.mxu0 %v18365_v30  ;;  %v18375_v8 = vld [vmem:[#allocation121_spill] sm:$0xff] }
 0x4dd   : > { %4357 = vmatmul.mubr.f32.gmra.mrb[30].mxu1 %v18366_v12  ;;  %9666 = vmatmul.mubr.f32.gmra.mrb[230].mxu0 %v18367_v50  ;;  %v18377_v12 = vld [vmem:[#allocation134_spill] sm:$0xff] }
 0x4de   : > { %4363 = vmatprep.mubr.f32.mxu1 %v18368_v33  ;;  %9668 = vmatprep.mubr.f32.mxu0 %v18369_v3  ;;  %v18379_v33 = vld [vmem:[#allocation238_spill] sm:$0xff] }
 0x4e1   : > { %4366 = vmatmul.mubr.f32.gmra.mrb[32].mxu1 %v18370_v34  ;;  %9669 = vmatmul.mubr.f32.gmra.mrb[232].mxu0 %v18371_v62  ;;  %v18381_v34 = vld [vmem:[#allocation144_spill] sm:$0xff] }
 0x4e2   : > { %4372 = vmatprep.mubr.f32.mxu1 %v18372_v4  ;;  %9671 = vmatprep.mubr.f32.mxu0 %v18373_v37  ;;  %v18383_v4 = vld [vmem:[#allocation240_spill] sm:$0xff] }
 0x4e5   : > { %4375 = vmatmul.mubr.f32.gmra.mrb[34].mxu1 %v18374_v35  ;;  %9672 = vmatmul.mubr.f32.gmra.mrb[234].mxu0 %v18375_v8  ;;  %v18385_v35 = vld [vmem:[#allocation242_spill] sm:$0xff] }
 0x4e6   : > { %4381 = vmatprep.mubr.f32.mxu1 %v18376_v17  ;;  %9674 = vmatprep.mubr.f32.mxu0 %v18377_v12  ;;  %v18387_v17 = vld [vmem:[#allocation243_spill] sm:$0xff] }
 0x4e9   : > { %4384 = vmatmul.mubr.f32.gmra.mrb[36].mxu1 %v18378_v20  ;;  %9675 = vmatmul.mubr.f32.gmra.mrb[236].mxu0 %v18379_v33  ;;  %v18389_v20 = vld [vmem:[#allocation183_spill] sm:$0xff] }
 0x4ea   : > { %4390 = vmatprep.mubr.f32.mxu1 %v18380_v22  ;;  %9677 = vmatprep.mubr.f32.mxu0 %v18381_v34  ;;  %v18391_v22 = vld [vmem:[#allocation246_spill] sm:$0xff] }
 0x4ed   : > { %4393 = vmatmul.mubr.f32.gmra.mrb[38].mxu1 %v18382_v2  ;;  %9678 = vmatmul.mubr.f32.gmra.mrb[238].mxu0 %v18383_v4  ;;  %v18393_v2 = vld [vmem:[#allocation248_spill] sm:$0xff] }
 0x4ee   : > { %4399 = vmatprep.mubr.f32.mxu1 %v18384_v42  ;;  %9680 = vmatprep.mubr.f32.mxu0 %v18385_v35  ;;  %v18395_v42 = vld [vmem:[#allocation254_spill] sm:$0xff] }
 0x4f1   : > { %4402 = vmatmul.mubr.f32.gmra.mrb[40].mxu1 %v18386_v57  ;;  %9681 = vmatmul.mubr.f32.gmra.mrb[240].mxu0 %v18387_v17  ;;  %v18397_v57 = vld [vmem:[#allocation258_spill] sm:$0xff] }
 0x4f2   : > { %4408 = vmatprep.mubr.f32.mxu1 %v18388_v60  ;;  %9683 = vmatprep.mubr.f32.mxu0 %v18389_v20  ;;  %v18399_v60 = vld [vmem:[#allocation261_spill] sm:$0xff] }
 0x4f5   : > { %4411 = vmatmul.mubr.f32.gmra.mrb[42].mxu1 %v18390_v0  ;;  %9684 = vmatmul.mubr.f32.gmra.mrb[242].mxu0 %v18391_v22  ;;  %v18401_v0 = vld [vmem:[#allocation265_spill] sm:$0xff] }
 0x4f6   : > { %4417 = vmatprep.mubr.f32.mxu1 %v18392_v41  ;;  %9686 = vmatprep.mubr.f32.mxu0 %v18393_v2  ;;  %v18403_v41 = vld [vmem:[#allocation267_spill] sm:$0xff] }
 0x4f9   : > { %4420 = vmatmul.mubr.f32.gmra.mrb[44].mxu1 %v18394_v38  ;;  %9687 = vmatmul.mubr.f32.gmra.mrb[244].mxu0 %v18395_v42  ;;  %v18405_v38 = vld [vmem:[#allocation271_spill] sm:$0xff] }
 0x4fa   : > { %4426 = vmatprep.mubr.f32.mxu1 %v18396_v19  ;;  %9689 = vmatprep.mubr.f32.mxu0 %v18397_v57  ;;  %v18407_v19 = vld [vmem:[#allocation275_spill] sm:$0xff]  ;;  %v18408_v57 = vld [vmem:[#allocation281_spill] sm:$0xff] }
 0x4fd   : > { %4429 = vmatmul.mubr.f32.gmra.mrb[46].mxu1 %v18398_v27  ;;  %9690 = vmatmul.mubr.f32.gmra.mrb[246].mxu0 %v18399_v60  ;;  %v18409_v27 = vld [vmem:[#allocation278_spill] sm:$0xff]  ;;  %v18410_v60 = vld [vmem:[#allocation284_spill] sm:$0xff] }
 0x4fe   : > { %4435 = vmatprep.mubr.f32.mxu1 %v18400_v55  ;;  %9692 = vmatprep.mubr.f32.mxu0 %v18401_v0  ;;  %v18411_v55 = vld [vmem:[#allocation282_spill] sm:$0xff]  ;;  %v18412_v0 = vld [vmem:[#allocation287_spill] sm:$0xff] }
 0x501   : > { %4438 = vmatmul.mubr.f32.gmra.mrb[48].mxu1 %v18402_v9  ;;  %9693 = vmatmul.mubr.f32.gmra.mrb[248].mxu0 %v18403_v41  ;;  %v18413_v9 = vld [vmem:[#allocation288_spill] sm:$0xff] }
 0x502   : > { %4444 = vmatprep.mubr.f32.mxu1 %v18404_v21  ;;  %9695 = vmatprep.mubr.f32.mxu0 %v18405_v38  ;;  %v18414_v21 = vld [vmem:[#allocation290_spill] sm:$0xff] }
 0x505   : > { %4447 = vmatmul.mubr.f32.gmra.mrb[50].mxu1 %v18406_v11  ;;  %9696 = vmatmul.mubr.f32.gmra.mrb[250].mxu0 %v18407_v19  ;;  %v18415_v11 = vld [vmem:[#allocation292_spill] sm:$0xff] }
 0x506   : > { %4453 = vmatprep.mubr.f32.mxu1 %v18408_v57  ;;  %9698 = vmatprep.mubr.f32.mxu0 %v18409_v27  ;;  %v18416_v57 = vld [vmem:[#allocation294_spill] sm:$0xff] }
 0x509   : > { %4456 = vmatmul.mubr.f32.gmra.mrb[52].mxu1 %v18410_v60  ;;  %9699 = vmatmul.mubr.f32.gmra.mrb[252].mxu0 %v18411_v55  ;;  %v18417_v60 = vld [vmem:[#allocation296_spill] sm:$0xff] }
 0x50a   : > { %4462 = vmatprep.mubr.f32.mxu1 %v18412_v0  ;;  %9717 = vmatprep.mubr.f32.mxu0 %v18065_v10  ;;  %v18418_v10 = vld [vmem:[#allocation298_spill] sm:$0xff] }
 0x50d   : > { %4465 = vmatmul.mubr.f32.gmra.mrb[54].mxu1 %v18413_v9  ;;  %9718 = vmatmul.mubr.f32.vlgmr.msra.gmra.mrb[254].mxu0 %v18331_v44  ;;  %v18419_v44 = vld [vmem:[#allocation300_spill] sm:$0xff] }
 0x50e   : > { %4471 = vmatprep.mubr.f32.mxu1 %v18414_v21  ;;  %9720 = vmatprep.mubr.f32.mxu0 %v18334_v28  ;;  %v18420_v28 = vld [vmem:[#allocation69_spill] sm:$0xff] }
 0x511   : > { %4474 = vmatmul.mubr.f32.gmra.mrb[56].mxu1 %v18415_v11  ;;  %9721 = vmatmul.mubr.f32.gmra.mrb[0].mxu0 %v18336_v32  ;;  %v18421_v32 = vld [vmem:[#allocation303_spill] sm:$0xff] }
 0x512   : > { %4480 = vmatprep.mubr.f32.mxu1 %v18416_v57  ;;  %9723 = vmatprep.mubr.f32.mxu0 %v18340_v18  ;;  %v18422_v18 = vld [vmem:[#allocation305_spill] sm:$0xff] }
 0x515   : > { %4483 = vmatmul.mubr.f32.gmra.mrb[58].mxu1 %v18417_v60  ;;  %9724 = vmatmul.mubr.f32.gmra.mrb[2].mxu0 %v18342_v36  ;;  %v18423_v36 = vld [vmem:[#allocation306_spill] sm:$0xff] }
 0x516   : > { %4489 = vmatprep.mubr.f32.mxu1 %v18418_v10  ;;  %9726 = vmatprep.mubr.f32.mxu0 %v18345_v47  ;;  %v18424_v47 = vand.u32 4294901760, %v18259_v54  ;;  %v18431_v54 = vld [vmem:[#allocation161_spill] sm:$0xff] }
 0x519   : > { %4492 = vmatmul.mubr.f32.gmra.mrb[60].mxu1 %v18419_v44  ;;  %9727 = vmatmul.mubr.f32.gmra.mrb[4].mxu0 %v18347_v23  ;;  %v18425_v23 = vld [vmem:[#allocation155_spill] sm:$0xff] }
 0x51a   : > { %4498 = vmatprep.mubr.f32.mxu1 %v18420_v28  ;;  %9729 = vmatprep.mubr.f32.mxu0 %v18349_v39  ;;  %v18426_v28 = vand.u32 4294901760, %v18425_v23  ;;  %v18427_v39 = vld [vmem:[#allocation154_spill] sm:$0xff] }
 0x51b   : > { %v18428_v44 = vand.u32 4294901760, %v18427_v39  ;;  %v18441_v39 = vand.u32 4294901760, %v18271_v16  ;;  %v18448_v16 = vand.u32 4294901760, %v18279_v13  ;;  %v18455_v13 = vld [vmem:[#allocation189_spill] sm:$0xff] }
 0x51d   : > { %4501 = vmatmul.mubr.f32.gmra.mrb[62].mxu1 %v18421_v32  ;;  %9730 = vmatmul.mubr.f32.gmra.mrb[6].mxu0 %v18351_v52  ;;  %v9994_v32 = vpack.c.bf16 %v18428_v44, %v18426_v28  ;;  %v18429_v52 = vand.u32 4294901760, %v18261_v56  ;;  %v18435_v44 = vand.u32 4294901760, %v18266_v40  ;;  %v18436_v56 = vand.u32 4294901760, %v18269_v6  ;;  %v18443_v6 = vld [vmem:[#allocation181_spill] sm:$0xff] }
 0x51e   : > { %4507 = vmatprep.mubr.f32.mxu1 %v18422_v18  ;;  %9732 = vmatprep.mubr.f32.mxu0 %v18353_v26  ;;  %v18430_v26 = vand.u32 4294901760, %v18264_v5  ;;  %v18437_v5 = vld [vmem:[#allocation170_spill] sm:$0xff]  ;;  %v18442_v40 = vand.u32 4294901760, %v18274_v59 }
 0x51f   : > { %v18449_v59 = vld [vmem:[#allocation186_spill] sm:$0xff] }
 0x521   : > { %4510 = vmatmul.mubr.f32.gmra.mrb[64].mxu1 %v18423_v36  ;;  %9733 = vmatmul.mubr.f32.gmra.mrb[8].mxu0 %v18355_v29  ;;  %v18433_v29 = vld [vmem:[#allocation160_spill] sm:$0xff] }
 0x522   : > { %4614 = vmatprep.mubr.f32.mxu1 %v18424_v47  ;;  %9735 = vmatprep.mubr.f32.mxu0 %v18357_v15  ;;  %v18432_v15 = vand.u32 4294901760, %v18431_v54  ;;  %v18434_v47 = vand.u32 4294901760, %v18433_v29  ;;  %v18447_v54 = vand.u32 4294901760, %v18276_v49  ;;  %v18454_v49 = vand.u32 4294901760, %v18284_v45  ;;  %v18463_v45 = vld [vmem:[#allocation191_spill] sm:$0xff] }
 0x524   : > { %v9997_v23 = vpack.c.bf16 %v18434_v47, %v18432_v15  ;;  %v18453_v47 = vand.u32 4294901760, %v18281_v14  ;;  %v18461_v14 = vld [vmem:[#allocation192_spill] sm:$0xff] }
 0x525   : > { %4618 = vmatmul.mubr.f32.vlgmr.msra.gmra.mrb[66].mxu1 %v18429_v52  ;;  %9736 = vmatmul.mubr.f32.gmra.mrb[10].mxu0 %v18359_v46  ;;  %v18439_v46 = vld [vmem:[#allocation169_spill] sm:$0xff] }
 0x526   : > { %9995 = vmatpush1.bf16.msra.mxu1 %v9994_v32  ;;  %4625 = vmatprep.mubr.f32.mxu1 %v18430_v26  ;;  %v18440_v28 = vand.u32 4294901760, %v18439_v46  ;;  %v18465_v46 = vand.u32 4294901760, %v18291_v7  ;;  %v18473_v7 = vld [vmem:[#allocation209_spill] sm:$0xff] }
 0x527   : > { %9996 = vmatprep.subr.bf16.mxu1 %v17543_v43  ;;  %9738 = vmatprep.mubr.f32.mxu0 %v18361_v58  ;;  %v18438_v58 = vand.u32 4294901760, %v18437_v5  ;;  %v18464_v5 = vand.u32 4294901760, %v18463_v45 }
 0x529   : > { %4629 = vmatmul.mubr.f32.gmra.mrb[68].mxu1 %v18435_v44  ;;  %9739 = vmatmul.mubr.f32.gmra.mrb[12].mxu0 %v18363_v53  ;;  %v10000_v32 = vpack.c.bf16 %v18440_v28, %v18438_v58  ;;  %v18445_v53 = vld [vmem:[#allocation179_spill] sm:$0xff] }
 0x52a   : > { %9998 = vmatpush1.bf16.msra.mxu1 %v9997_v23  ;;  %4636 = vmatprep.mubr.f32.mxu1 %v18436_v56  ;;  %v18446_v52 = vand.u32 4294901760, %v18445_v53  ;;  %v18459_v56 = vand.u32 4294901760, %v18286_v61  ;;  %v18466_v61 = vand.u32 4294901760, %v18294_v1  ;;  %v18475_v1 = vld [vmem:[#allocation206_spill] sm:$0xff] }
 0x52b   : > { %9999 = vmatprep.subr.bf16.mxu1 %v17543_v43  ;;  %9741 = vmatprep.mubr.f32.mxu0 %v18365_v30  ;;  %v18444_v30 = vand.u32 4294901760, %v18443_v6 }
 0x52d   : > { %4640 = vmatmul.mubr.f32.gmra.mrb[70].mxu1 %v18441_v39  ;;  %9742 = vmatmul.mubr.f32.gmra.mrb[14].mxu0 %v18367_v50  ;;  %v10003_v26 = vpack.c.bf16 %v18446_v52, %v18444_v30  ;;  %v18450_v50 = vand.u32 4294901760, %v18449_v59  ;;  %v18471_v39 = vand.u32 4294901760, %v18296_v25  ;;  %v18477_v30 = vand.u32 4294901760, %v18301_v51 }
 0x52e   : > { %10001 = vmatpush1.bf16.msra.mxu1 %v10000_v32  ;;  %4647 = vmatprep.mubr.f32.mxu1 %v18442_v40  ;;  %v18476_v40 = vand.u32 4294901760, %v18475_v1  ;;  %v18478_v25 = vand.u32 4294901760, %v18304_v63  ;;  %v18486_v63 = vld [vmem:[#allocation258_spill] sm:$0xff]  ;;  %v18521_v1 = vld [vmem:[#allocation197_spill] sm:$0xff] }
 0x52f   : > { %10002 = vmatprep.subr.bf16.mxu1 %v17543_v43  ;;  %9744 = vmatprep.mubr.f32.mxu0 %v18369_v3  ;;  %v18451_v3 = vld [vmem:[#allocation185_spill] sm:$0xff] }
 0x530   : > { %v18452_v15 = vand.u32 4294901760, %v18451_v3  ;;  %v18491_v3 = vld [vmem:[#allocation43_spill] sm:$0xff] }
 0x531   : > { %4651 = vmatmul.mubr.f32.gmra.mrb[72].mxu1 %v18447_v54  ;;  %9745 = vmatmul.mubr.f32.gmra.mrb[16].mxu0 %v18371_v62  ;;  %v18457_v62 = vld [vmem:[#allocation187_spill] sm:$0xff]  ;;  %v18487_v54 = vld [vmem:[#allocation226_spill] sm:$0xff] }
 0x532   : > { %10004 = vmatpush1.bf16.msra.mxu1 %v10003_v26  ;;  %4658 = vmatprep.mubr.f32.mxu1 %v18448_v16  ;;  %v10006_v29 = vpack.c.bf16 %v18452_v15, %v18450_v50  ;;  %v18458_v23 = vand.u32 4294901760, %v18457_v62  ;;  %v18483_v26 = vand.u32 4294901760, %v18306_v31  ;;  %v18489_v16 = vld [vmem:[#allocation222_spill] sm:$0xff]  ;;  %v18492_v15 = vand.u32 4294901760, %v18491_v3  ;;  %v18493_v31 = vld [vmem:[#allocation261_spill] sm:$0xff] }
 0x533   : > { %10005 = vmatprep.subr.bf16.mxu1 %v17543_v43  ;;  %9747 = vmatprep.mubr.f32.mxu0 %v18373_v37  ;;  %v18456_v37 = vand.u32 4294901760, %v18455_v13  ;;  %v18490_v59 = vand.u32 4294901760, %v18489_v16  ;;  %v15125_v16 = vpop.f32.mrb[40].mxu0 }
 0x534   : > { %18537 = vst [vmem:[#allocation79_spill] sm:$0xff] %v15125_v16 }
 0x535   : > { %4662 = vmatmul.mubr.f32.gmra.mrb[74].mxu1 %v18453_v47  ;;  %9748 = vmatmul.mubr.f32.gmra.mrb[18].mxu0 %v18375_v8  ;;  %v10009_v44 = vpack.c.bf16 %v18458_v23, %v18456_v37  ;;  %v18460_v8 = vand.u32 4294901760, %v18289_v48  ;;  %v18467_v48 = vld [vmem:[#allocation203_spill] sm:$0xff]  ;;  %v18496_v47 = vld [vmem:[#allocation265_spill] sm:$0xff] }
 0x536   : > { %10007 = vmatpush1.bf16.msra.mxu1 %v10006_v29  ;;  %4669 = vmatprep.mubr.f32.mxu1 %v18454_v49  ;;  %v18497_v49 = vld [vmem:[#allocation228_spill] sm:$0xff]  ;;  %v18499_v37 = vld [vmem:[#allocation227_spill] sm:$0xff] }
 0x537   : > { %10008 = vmatprep.subr.bf16.mxu1 %v17543_v43  ;;  %9750 = vmatprep.mubr.f32.mxu0 %v18377_v12  ;;  %v18462_v12 = vand.u32 4294901760, %v18461_v14  ;;  %v18498_v13 = vand.u32 4294901760, %v18497_v49  ;;  %v18500_v62 = vand.u32 4294901760, %v18499_v37 }
 0x539   : > { %4673 = vmatmul.mubr.f32.gmra.mrb[76].mxu1 %v18459_v56  ;;  %9751 = vmatmul.mubr.f32.gmra.mrb[20].mxu0 %v18379_v33  ;;  %v10012_v58 = vpack.c.bf16 %v18464_v5, %v18462_v12  ;;  %v18468_v33 = vand.u32 4294901760, %v18467_v48  ;;  %v10027_v23 = vpack.c.bf16 %v18500_v62, %v18498_v13  ;;  %v18505_v12 = vld [vmem:[#allocation234_spill] sm:$0xff]  ;;  %v18507_v5 = vld [vmem:[#allocation233_spill] sm:$0xff]  ;;  %v18545_v13 = vld [vmem:[#allocation123_spill] sm:$0xff] }
 0x53a   : > { %10010 = vmatpush1.bf16.msra.mxu1 %v10009_v44  ;;  %4680 = vmatprep.mubr.f32.mxu1 %v18460_v8  ;;  %v18501_v44 = vld [vmem:[#allocation53_spill] sm:$0xff]  ;;  %v18503_v8 = vld [vmem:[#allocation60_spill] sm:$0xff]  ;;  %v18506_v45 = vand.u32 4294901760, %v18505_v12  ;;  %v18546_v37 = vand.u32 4294901760, %v18545_v13  ;;  %v18592_v13 = vld [vmem:[#allocation174_spill] sm:$0xff] }
 0x53b   : > { %10011 = vmatprep.subr.bf16.mxu1 %v17543_v43  ;;  %9753 = vmatprep.mubr.f32.mxu0 %v18381_v34  ;;  %v18469_v34 = vld [vmem:[#allocation199_spill] sm:$0xff]  ;;  %v18502_v56 = vand.u32 4294901760, %v18501_v44  ;;  %v18504_v14 = vand.u32 4294901760, %v18503_v8  ;;  %v18548_v44 = vld [vmem:[#allocation128_spill] sm:$0xff]  ;;  %v18550_v8 = vld [vmem:[#allocation138_spill] sm:$0xff] }
 0x53c   : > { %v18470_v28 = vand.u32 4294901760, %v18469_v34  ;;  %v18513_v34 = vld [vmem:[#allocation86_spill] sm:$0xff] }
 0x53d   : > { %4684 = vmatmul.mubr.f32.gmra.mrb[78].mxu1 %v18465_v46  ;;  %9754 = vmatmul.mubr.f32.gmra.mrb[22].mxu0 %v18383_v4  ;;  %v18472_v4 = vand.u32 4294901760, %v18299_v24  ;;  %v18479_v24 = vld [vmem:[#allocation217_spill] sm:$0xff] }
 0x53e   : > { %10013 = vmatpush1.bf16.msra.mxu1 %v10012_v58  ;;  %4691 = vmatprep.mubr.f32.mxu1 %v18466_v61  ;;  %v10015_v32 = vpack.c.bf16 %v18470_v28, %v18468_v33  ;;  %v18508_v58 = vand.u32 4294901760, %v18507_v5  ;;  %v18509_v61 = vld [vmem:[#allocation65_spill] sm:$0xff]  ;;  %v18515_v28 = vld [vmem:[#allocation84_spill] sm:$0xff]  ;;  %v18553_v5 = vld [vmem:[#allocation147_spill] sm:$0xff] }
 0x53f   : > { %10014 = vmatprep.subr.bf16.mxu1 %v17543_v43  ;;  %9756 = vmatprep.mubr.f32.mxu0 %v18385_v35  ;;  %v18474_v35 = vand.u32 4294901760, %v18473_v7  ;;  %v18510_v48 = vand.u32 4294901760, %v18509_v61 }
 0x540   : > { %v10030_v46 = vpack.c.bf16 %v18508_v58, %v18506_v45  ;;  %v18554_v58 = vand.u32 4294901760, %v18553_v5 }
 0x541   : > { %4695 = vmatmul.mubr.f32.gmra.mrb[0].mxu1 %v18471_v39  ;;  %9757 = vmatmul.mubr.f32.gmra.mrb[24].mxu0 %v18387_v17  ;;  %v10018_v6 = vpack.c.bf16 %v18476_v40, %v18474_v35  ;;  %v18481_v17 = vld [vmem:[#allocation215_spill] sm:$0xff]  ;;  %v18522_v40 = vand.u32 4294901760, %v18521_v1 }
 0x542   : > { %10016 = vmatpush1.bf16.msra.mxu1 %v10015_v32  ;;  %4702 = vmatprep.mubr.f32.mxu1 %v18472_v4  ;;  %v18482_v53 = vand.u32 4294901760, %v18481_v17  ;;  %v18516_v32 = vand.u32 4294901760, %v18515_v28  ;;  %v18517_v4 = vld [vmem:[#allocation76_spill] sm:$0xff] }
 0x543   : > { %10017 = vmatprep.subr.bf16.mxu1 %v17543_v43  ;;  %9759 = vmatprep.mubr.f32.mxu0 %v18389_v20  ;;  %v18480_v20 = vand.u32 4294901760, %v18479_v24  ;;  %v18518_v7 = vand.u32 4294901760, %v18517_v4  ;;  %v18563_v4 = vld [vmem:[#allocation194_spill] sm:$0xff] }
 0x545   : > { %4706 = vmatmul.mubr.f32.gmra.mrb[2].mxu1 %v18477_v30  ;;  %9760 = vmatmul.mubr.f32.gmra.mrb[26].mxu0 %v18391_v22  ;;  %v10021_v52 = vpack.c.bf16 %v18482_v53, %v18480_v20  ;;  %v18484_v22 = vld [vmem:[#allocation37_spill] sm:$0xff]  ;;  %v18527_v20 = vld [vmem:[#allocation82_spill] sm:$0xff] }
 0x546   : > { %10019 = vmatpush1.bf16.msra.mxu1 %v10018_v6  ;;  %4713 = vmatprep.mubr.f32.mxu1 %v18478_v25  ;;  %v18485_v51 = vand.u32 4294901760, %v18484_v22  ;;  %v18523_v6 = vld [vmem:[#allocation87_spill] sm:$0xff]  ;;  %v18525_v25 = vld [vmem:[#allocation80_spill] sm:$0xff]  ;;  %v18528_v17 = vand.u32 4294901760, %v18527_v20 }
 0x547   : > { %10020 = vmatprep.subr.bf16.mxu1 %v17543_v43  ;;  %9762 = vmatprep.mubr.f32.mxu0 %v18393_v2  ;;  %v18488_v2 = vand.u32 4294901760, %v18487_v54  ;;  %v18526_v24 = vand.u32 4294901760, %v18525_v25  ;;  %v18535_v54 = vld [vmem:[#allocation99_spill] sm:$0xff] }
 0x549   : > { %4717 = vmatmul.mubr.f32.gmra.mrb[4].mxu1 %v18483_v26  ;;  %9763 = vmatmul.mubr.f32.gmra.mrb[28].mxu0 %v18395_v42  ;;  %v10024_v50 = vpack.c.bf16 %v18490_v59, %v18488_v2  ;;  %v18494_v42 = vld [vmem:[#allocation51_spill] sm:$0xff]  ;;  %v18536_v2 = vand.u32 4294901760, %v18535_v54  ;;  %v2934_v59 = vpop.f32.mrb[41].mxu0 }
 0x54a   : > { %10022 = vmatpush1.bf16.msra.mxu1 %v10021_v52  ;;  %4724 = vmatprep.mubr.f32.mxu1 %v18485_v51  ;;  %v18495_v29 = vand.u32 4294901760, %v18494_v42  ;;  %v18531_v52 = vld [vmem:[#allocation89_spill] sm:$0xff]  ;;  %v18533_v51 = vld [vmem:[#allocation90_spill] sm:$0xff]  ;;  %v15132_v42 = vpop.f32.mrb[42].mxu0 }
 0x54b   : > { %10023 = vmatprep.subr.bf16.mxu1 %v17543_v43  ;;  %9765 = vmatprep.mubr.f32.mxu0 %v18486_v63  ;;  %v18532_v26 = vand.u32 4294901760, %v18531_v52  ;;  %v18534_v63 = vand.u32 4294901760, %v18533_v51  ;;  %18542 = vst [vmem:[#allocation81_spill] sm:$0xff] %v15132_v42  ;;  %v18580_v51 = vld [vmem:[#allocation127_spill] sm:$0xff] }
 0x54d   : > { %4728 = vmatmul.mubr.f32.gmra.mrb[6].mxu1 %v18492_v15  ;;  %9766 = vmatmul.mubr.f32.gmra.mrb[30].mxu0 %v18493_v31  ;;  %v18540_v15 = vld [vmem:[#allocation117_spill] sm:$0xff] }
 0x54e   : > { %10025 = vmatpush1.bf16.msra.mxu1 %v10024_v50  ;;  %4735 = vmatprep.mubr.f32.mxu1 %v18495_v29  ;;  %v18538_v50 = vld [vmem:[#allocation110_spill] sm:$0xff]  ;;  %v18541_v31 = vand.u32 4294901760, %v18540_v15  ;;  %v2949_v29 = vpop.f32.mrb[43].mxu0 }
 0x54f   : > { %10026 = vmatprep.subr.bf16.mxu1 %v17543_v43  ;;  %9768 = vmatprep.mubr.f32.mxu0 %v18496_v47  ;;  %v18539_v3 = vand.u32 4294901760, %v18538_v50  ;;  %v18543_v47 = vld [vmem:[#allocation118_spill] sm:$0xff]  ;;  %v15138_v62 = vpop.f32.mrb[44].mxu0 }
 0x550   : > { %v18544_v49 = vand.u32 4294901760, %v18543_v47  ;;  %18547 = vst [vmem:[#allocation219_spill] sm:$0xff] %v15138_v62  ;;  %v18589_v29 = vld [vmem:[#allocation150_spill] sm:$0xff] }
 0x551   : > { %4739 = vmatmul.mubr.f32.gmra.mrb[8].mxu1 %v18502_v56  ;;  %9769 = vmatmul.mubr.f32.gmra.mrb[32].mxu0 %v18403_v41  ;;  %v18511_v41 = vld [vmem:[#allocation72_spill] sm:$0xff]  ;;  %v18549_v56 = vand.u32 4294901760, %v18548_v44  ;;  %v18590_v47 = vand.u32 4294901760, %v18589_v29  ;;  %v18595_v44 = vld [vmem:[#allocation175_spill] sm:$0xff] }
 0x552   : > { %10028 = vmatpush1.bf16.msra.mxu1 %v10027_v23  ;;  %4746 = vmatprep.mubr.f32.mxu1 %v18504_v14  ;;  %v18512_v33 = vand.u32 4294901760, %v18511_v41  ;;  %v2964_v23 = vpop.f32.mrb[45].mxu0  ;;  %v18551_v14 = vand.u32 4294901760, %v18550_v8 }
 0x553   : > { %10029 = vmatprep.subr.bf16.mxu1 %v17543_v43  ;;  %9771 = vmatprep.mubr.f32.mxu0 %v18405_v38  ;;  %v18514_v38 = vand.u32 4294901760, %v18513_v34  ;;  %v15144_v12 = vpop.f32.mrb[46].mxu0 }
 0x554   : > { %18552 = vst [vmem:[#allocation85_spill] sm:$0xff] %v15144_v12  ;;  %v2979_v45 = vpop.f32.mrb[47].mxu0 }
 0x555   : > { %4750 = vmatmul.mubr.f32.gmra.mrb[10].mxu1 %v18510_v48  ;;  %9772 = vmatmul.mubr.f32.gmra.mrb[34].mxu0 %v18407_v19  ;;  %v10033_v39 = vpack.c.bf16 %v18516_v32, %v18514_v38  ;;  %v18519_v19 = vld [vmem:[#allocation77_spill] sm:$0xff]  ;;  %v15150_v48 = vpop.f32.mrb[48].mxu0 }
 0x556   : > { %10031 = vmatpush1.bf16.msra.mxu1 %v10030_v46  ;;  %4757 = vmatprep.mubr.f32.mxu1 %v18512_v33  ;;  %v18520_v35 = vand.u32 4294901760, %v18519_v19  ;;  %v18555_v46 = vld [vmem:[#allocation158_spill] sm:$0xff]  ;;  %18557 = vst [vmem:[#allocation97_spill] sm:$0xff] %v15150_v48  ;;  %v2994_v41 = vpop.f32.mrb[49].mxu0  ;;  %v18558_v33 = vld [vmem:[#allocation164_spill] sm:$0xff]  ;;  %v18560_v38 = vld [vmem:[#allocation173_spill] sm:$0xff] }
 0x557   : > { %10032 = vmatprep.subr.bf16.mxu1 %v17543_v43  ;;  %9774 = vmatprep.mubr.f32.mxu0 %v18409_v27  ;;  %v18524_v27 = vand.u32 4294901760, %v18523_v6  ;;  %v18556_v61 = vand.u32 4294901760, %v18555_v46  ;;  %v18559_v34 = vand.u32 4294901760, %v18558_v33  ;;  %v18561_v28 = vand.u32 4294901760, %v18560_v38  ;;  %v15156_v32 = vpop.f32.mrb[50].mxu0  ;;  %v18565_v19 = vld [vmem:[#allocation204_spill] sm:$0xff] }
 0x558   : > { %18562 = vst [vmem:[#allocation104_spill] sm:$0xff] %v15156_v32  ;;  %v18568_v6 = vld [vmem:[#allocation221_spill] sm:$0xff]  ;;  %v18607_v38 = vld [vmem:[#allocation252_spill] sm:$0xff] }
 0x559   : > { %4761 = vmatmul.mubr.f32.gmra.mrb[12].mxu1 %v18518_v7  ;;  %9775 = vmatmul.mubr.f32.gmra.mrb[36].mxu0 %v18411_v55  ;;  %v10036_v30 = vpack.c.bf16 %v18524_v27, %v18522_v40  ;;  %v18529_v55 = vld [vmem:[#allocation92_spill] sm:$0xff]  ;;  %v18564_v7 = vand.u32 4294901760, %v18563_v4  ;;  %v18569_v27 = vand.u32 4294901760, %v18568_v6  ;;  %v18604_v41 = vld [vmem:[#allocation249_spill] sm:$0xff] }
 0x55a   : > { %10034 = vmatpush1.bf16.msra.mxu1 %v10033_v39  ;;  %4768 = vmatprep.mubr.f32.mxu1 %v18520_v35  ;;  %v18530_v53 = vand.u32 4294901760, %v18529_v55  ;;  %v3009_v39 = vpop.f32.mrb[51].mxu0  ;;  %v18566_v35 = vand.u32 4294901760, %v18565_v19  ;;  %v18605_v33 = vand.u32 4294901760, %v18604_v41  ;;  %v18610_v4 = vld [vmem:[#allocation256_spill] sm:$0xff]  ;;  %v18639_v41 = vand.u32 4294901760, %v18413_v9 }
 0x55b   : > { %10035 = vmatprep.subr.bf16.mxu1 %v17543_v43  ;;  %v15162_v1 = vpop.f32.mrb[52].mxu0  ;;  %v18647_v9 = vand.u32 4294901760, %v18417_v60 }
 0x55c   : > { %v10039_v22 = vpack.c.bf16 %v18532_v26, %v18530_v53  ;;  %18567 = vst [vmem:[#allocation115_spill] sm:$0xff] %v15162_v1  ;;  %v3024_v40 = vpop.f32.mrb[53].mxu0  ;;  %v18576_v53 = vld [vmem:[#allocation109_spill] sm:$0xff] }
 0x55d   : > { %4772 = vmatmul.mubr.f32.gmra.mrb[14].mxu1 %v18526_v24  ;;  %v15168_v24 = vpop.f32.mrb[54].mxu0  ;;  %v18577_v52 = vand.u32 4294901760, %v18576_v53 }
 0x55e   : > { %10037 = vmatpush1.bf16.msra.mxu1 %v10036_v30  ;;  %4779 = vmatprep.mubr.f32.mxu1 %v18528_v17  ;;  %v18570_v30 = vld [vmem:[#allocation195_spill] sm:$0xff]  ;;  %18572 = vst [vmem:[#allocation122_spill] sm:$0xff] %v15168_v24  ;;  %v15170_v20 = vpop.f32.mrb[55].mxu0  ;;  %v18574_v17 = vld [vmem:[#allocation98_spill] sm:$0xff] }
 0x55f   : > { %10038 = vmatprep.subr.bf16.mxu1 %v17543_v43  ;;  %v18571_v25 = vand.u32 4294901760, %v18570_v30  ;;  %18573 = vst [vmem:[#allocation125_spill] sm:$0xff] %v15170_v20  ;;  %v18575_v55 = vand.u32 4294901760, %v18574_v17  ;;  %v15176_v26 = vpop.f32.mrb[56].mxu0  ;;  %v18619_v17 = vld [vmem:[#allocation268_spill] sm:$0xff] }
 0x560   : > { %18578 = vst [vmem:[#allocation213_spill] sm:$0xff] %v15176_v26 }
 0x561   : > { %4783 = vmatmul.mubr.f32.gmra.mrb[16].mxu1 %v18534_v63  ;;  %v18581_v63 = vand.u32 4294901760, %v18580_v51 }
 0x562   : > { %10040 = vmatpush1.bf16.msra.mxu1 %v10039_v22  ;;  %4790 = vmatprep.mubr.f32.mxu1 %v18536_v2  ;;  %v15178_v22 = vpop.f32.mrb[57].mxu0  ;;  %v18583_v2 = vld [vmem:[#allocation136_spill] sm:$0xff] }
 0x563   : > { %10041 = vmatprep.subr.bf16.mxu1 %v17543_v43  ;;  %18579 = vst [vmem:[#allocation212_spill] sm:$0xff] %v15178_v22  ;;  %v15182_v54 = vpop.f32.mrb[58].mxu0  ;;  %v18584_v59 = vand.u32 4294901760, %v18583_v2  ;;  %v18625_v2 = vld [vmem:[#allocation276_spill] sm:$0xff] }
 0x564   : > { %18582 = vst [vmem:[#allocation126_spill] sm:$0xff] %v15182_v54  ;;  %v15186_v50 = vpop.f32.mrb[59].mxu0 }
 0x565   : > { %4794 = vmatmul.mubr.f32.gmra.mrb[18].mxu1 %v18539_v3  ;;  %18585 = vst [vmem:[#allocation135_spill] sm:$0xff] %v15186_v50  ;;  %v18586_v3 = vld [vmem:[#allocation141_spill] sm:$0xff] }
 0x566   : > { %4801 = vmatprep.mubr.f32.mxu1 %v18541_v31  ;;  %v18587_v15 = vand.u32 4294901760, %v18586_v3  ;;  %v15190_v31 = vpop.f32.mrb[60].mxu0 }
 0x567   : > { %18588 = vst [vmem:[#allocation145_spill] sm:$0xff] %v15190_v31  ;;  %v18752_v31 = vld [vmem:[#allocation112_spill] sm:$0xff] }
 0x569   : > { %4805 = vmatmul.mubr.f32.gmra.mrb[20].mxu1 %v18544_v49  ;;  %v15194_v49 = vpop.f32.mrb[61].mxu0 }
 0x56a   : > { %4812 = vmatprep.mubr.f32.mxu1 %v18546_v37  ;;  %18591 = vst [vmem:[#allocation157_spill] sm:$0xff] %v15194_v49  ;;  %v18593_v37 = vand.u32 4294901760, %v18592_v13  ;;  %v15198_v23 = vpop.f32.mrb[62].mxu0  ;;  %v18631_v13 = vld [vmem:[#allocation281_spill] sm:$0xff] }
 0x56b   : > { %18594 = vst [vmem:[#allocation163_spill] sm:$0xff] %v15198_v23  ;;  %v15202_v8 = vpop.f32.mrb[63].mxu0  ;;  %v18743_v23 = vld [vmem:[#allocation210_spill] sm:$0xff] }
 0x56c   : > { %18597 = vst [vmem:[#allocation167_spill] sm:$0xff] %v15202_v8  ;;  %v15206_v5 = vpop.f32.mrb[64].mxu0  ;;  %v18746_v8 = vld [vmem:[#allocation102_spill] sm:$0xff] }
 0x56d   : > { %4816 = vmatmul.mubr.f32.gmra.mrb[22].mxu1 %v18549_v56  ;;  %v18596_v56 = vand.u32 4294901760, %v18595_v44  ;;  %18600 = vst [vmem:[#allocation190_spill] sm:$0xff] %v15206_v5  ;;  %v18733_v5 = vld [vmem:[#allocation201_spill] sm:$0xff] }
 0x56e   : > { %4823 = vmatprep.mubr.f32.mxu1 %v18551_v14  ;;  %v18598_v14 = vld [vmem:[#allocation178_spill] sm:$0xff] }
 0x56f   : > { %v18599_v45 = vand.u32 4294901760, %v18598_v14 }
 0x571   : > { %4827 = vmatmul.mubr.f32.gmra.mrb[24].mxu1 %v18554_v58  ;;  %v18601_v58 = vld [vmem:[#allocation208_spill] sm:$0xff] }
 0x572   : > { %4834 = vmatprep.mubr.f32.mxu1 %v18556_v61  ;;  %v18602_v46 = vand.u32 4294901760, %v18601_v58  ;;  %v15210_v61 = vpop.f32.mrb[65].mxu0  ;;  %v18637_v58 = vand.u32 4294901760, %v18412_v0  ;;  %v18645_v0 = vand.u32 4294901760, %v18416_v57 }
 0x573   : > { %18603 = vst [vmem:[#allocation198_spill] sm:$0xff] %v15210_v61  ;;  %v18738_v61 = vld [vmem:[#allocation205_spill] sm:$0xff] }
 0x575   : > { %4838 = vmatmul.mubr.f32.gmra.mrb[26].mxu1 %v18559_v34  ;;  %v15214_v34 = vpop.f32.mrb[66].mxu0 }
 0x576   : > { %4845 = vmatprep.mubr.f32.mxu1 %v18561_v28  ;;  %18606 = vst [vmem:[#allocation214_spill] sm:$0xff] %v15214_v34  ;;  %v18608_v28 = vand.u32 4294901760, %v18607_v38  ;;  %v15218_v39 = vpop.f32.mrb[67].mxu0  ;;  %v18641_v38 = vand.u32 4294901760, %v18414_v21  ;;  %v18649_v21 = vand.u32 4294901760, %v18418_v10  ;;  %v18660_v10 = vand.u32 4294901760, %v18422_v18 }
 0x577   : > { %18609 = vst [vmem:[#allocation236_spill] sm:$0xff] %v15218_v39  ;;  %v15222_v19 = vpop.f32.mrb[68].mxu0  ;;  %v18723_v34 = vld [vmem:[#allocation188_spill] sm:$0xff] }
 0x578   : > { %18612 = vst [vmem:[#allocation207_spill] sm:$0xff] %v15222_v19  ;;  %v15226_v6 = vpop.f32.mrb[69].mxu0  ;;  %v18718_v19 = vld [vmem:[#allocation180_spill] sm:$0xff] }
 0x579   : > { %4849 = vmatmul.mubr.f32.gmra.mrb[28].mxu1 %v18564_v7  ;;  %v18611_v7 = vand.u32 4294901760, %v18610_v4  ;;  %18615 = vst [vmem:[#allocation101_spill] sm:$0xff] %v15226_v6  ;;  %v18643_v4 = vand.u32 4294901760, %v18415_v11  ;;  %v18719_v6 = vld [vmem:[#allocation42_spill] sm:$0xff]  ;;  %v18728_v39 = vld [vmem:[#allocation196_spill] sm:$0xff] }
 0x57a   : > { %4856 = vmatprep.mubr.f32.mxu1 %v18566_v35  ;;  %v18613_v35 = vld [vmem:[#allocation259_spill] sm:$0xff] }
 0x57b   : > { %v18614_v40 = vand.u32 4294901760, %v18613_v35 }
 0x57d   : > { %4860 = vmatmul.mubr.f32.gmra.mrb[30].mxu1 %v18569_v27  ;;  %v18616_v27 = vld [vmem:[#allocation264_spill] sm:$0xff] }
 0x57e   : > { %4867 = vmatprep.mubr.f32.mxu1 %v18571_v25  ;;  %v18617_v30 = vand.u32 4294901760, %v18616_v27  ;;  %v15230_v25 = vpop.f32.mrb[70].mxu0 }
 0x57f   : > { %18618 = vst [vmem:[#allocation114_spill] sm:$0xff] %v15230_v25  ;;  %v15234_v53 = vpop.f32.mrb[71].mxu0 }
 0x580   : > { %18621 = vst [vmem:[#allocation133_spill] sm:$0xff] %v15234_v53  ;;  %v18716_v53 = vld [vmem:[#allocation50_spill] sm:$0xff] }
 0x581   : > { %4871 = vmatmul.mubr.f32.gmra.mrb[32].mxu1 %v18575_v55  ;;  %v18620_v55 = vand.u32 4294901760, %v18619_v17 }
 0x582   : > { %4878 = vmatprep.mubr.f32.mxu1 %v18577_v52  ;;  %v18622_v52 = vld [vmem:[#allocation272_spill] sm:$0xff] }
 0x583   : > { %v18623_v51 = vand.u32 4294901760, %v18622_v52 }
 0x585   : > { %4882 = vmatmul.mubr.f32.gmra.mrb[34].mxu1 %v18581_v63  ;;  %v15238_v63 = vpop.f32.mrb[72].mxu0 }
 0x586   : > { %4889 = vmatprep.mubr.f32.mxu1 %v18584_v59  ;;  %18624 = vst [vmem:[#allocation143_spill] sm:$0xff] %v15238_v63  ;;  %v18626_v59 = vand.u32 4294901760, %v18625_v2  ;;  %v15242_v3 = vpop.f32.mrb[73].mxu0  ;;  %v18713_v63 = vld [vmem:[#allocation177_spill] sm:$0xff] }
 0x587   : > { %18627 = vst [vmem:[#allocation151_spill] sm:$0xff] %v15242_v3  ;;  %v18714_v3 = vld [vmem:[#allocation46_spill] sm:$0xff] }
 0x589   : > { %4893 = vmatmul.mubr.f32.gmra.mrb[36].mxu1 %v18587_v15  ;;  %v18628_v15 = vld [vmem:[#allocation279_spill] sm:$0xff] }
 0x58a   : > { %4900 = vmatprep.mubr.f32.mxu1 %v18590_v47  ;;  %v18629_v29 = vand.u32 4294901760, %v18628_v15  ;;  %v15246_v47 = vpop.f32.mrb[74].mxu0  ;;  %v18662_v15 = vand.u32 4294901760, %v18423_v36  ;;  %v18671_v36 = vld [vmem:[#allocation26_spill] sm:$0xff] }
 0x58b   : > { %18630 = vst [vmem:[#allocation166_spill] sm:$0xff] %v15246_v47  ;;  %v15250_v44 = vpop.f32.mrb[75].mxu0 }
 0x58c   : > { %18633 = vst [vmem:[#allocation241_spill] sm:$0xff] %v15250_v44  ;;  %v18711_v44 = vld [vmem:[#allocation38_spill] sm:$0xff] }
 0x58d   : > { %4904 = vmatmul.mubr.f32.gmra.mrb[38].mxu1 %v18593_v37  ;;  %v18632_v37 = vand.u32 4294901760, %v18631_v13  ;;  %v18664_v13 = vld [vmem:[#allocation16_spill] sm:$0xff] }
 0x58e   : > { %4911 = vmatprep.mubr.f32.mxu1 %v18596_v56  ;;  %v18634_v56 = vld [vmem:[#allocation284_spill] sm:$0xff] }
 0x58f   : > { %v18635_v14 = vand.u32 4294901760, %v18634_v56  ;;  %v18666_v56 = vld [vmem:[#allocation20_spill] sm:$0xff] }
 0x591   : > { %4915 = vmatmul.mubr.f32.gmra.mrb[40].mxu1 %v18599_v45  ;;  %v15254_v45 = vpop.f32.mrb[76].mxu0 }
 0x592   : > { %4922 = vmatprep.mubr.f32.mxu1 %v18602_v46  ;;  %18636 = vst [vmem:[#allocation245_spill] sm:$0xff] %v15254_v45  ;;  %v15258_v46 = vpop.f32.mrb[77].mxu0  ;;  %v18708_v45 = vld [vmem:[#allocation171_spill] sm:$0xff] }
 0x593   : > { %18638 = vst [vmem:[#allocation250_spill] sm:$0xff] %v15258_v46  ;;  %v18709_v46 = vld [vmem:[#allocation33_spill] sm:$0xff] }
 0x595   : > { %4926 = vmatmul.mubr.f32.gmra.mrb[42].mxu1 %v18605_v33  ;;  %v15262_v33 = vpop.f32.mrb[78].mxu0 }
 0x596   : > { %4933 = vmatprep.mubr.f32.mxu1 %v18608_v28  ;;  %18640 = vst [vmem:[#allocation253_spill] sm:$0xff] %v15262_v33  ;;  %v15266_v28 = vpop.f32.mrb[79].mxu0 }
 0x597   : > { %18642 = vst [vmem:[#allocation257_spill] sm:$0xff] %v15266_v28  ;;  %v18706_v28 = vld [vmem:[#allocation27_spill] sm:$0xff] }
 0x599   : > { %4937 = vmatmul.mubr.f32.gmra.mrb[44].mxu1 %v18611_v7  ;;  %v15270_v7 = vpop.f32.mrb[80].mxu0 }
 0x59a   : > { %4944 = vmatprep.mubr.f32.mxu1 %v18614_v40  ;;  %18644 = vst [vmem:[#allocation262_spill] sm:$0xff] %v15270_v7  ;;  %v15274_v35 = vpop.f32.mrb[81].mxu0  ;;  %v18703_v7 = vld [vmem:[#allocation165_spill] sm:$0xff] }
 0x59b   : > { %18646 = vst [vmem:[#allocation270_spill] sm:$0xff] %v15274_v35  ;;  %v15278_v40 = vpop.f32.mrb[82].mxu0  ;;  %v18704_v35 = vld [vmem:[#allocation25_spill] sm:$0xff] }
 0x59c   : > { %18648 = vst [vmem:[#allocation273_spill] sm:$0xff] %v15278_v40  ;;  %v15282_v27 = vpop.f32.mrb[83].mxu0 }
 0x59d   : > { %4948 = vmatmul.mubr.f32.gmra.mrb[46].mxu1 %v18617_v30  ;;  %18650 = vst [vmem:[#allocation220_spill] sm:$0xff] %v15282_v27  ;;  %v18651_v30 = vld [vmem:[#allocation300_spill] sm:$0xff]  ;;  %v15286_v17 = vpop.f32.mrb[84].mxu0  ;;  %v18701_v27 = vld [vmem:[#allocation21_spill] sm:$0xff] }
 0x59e   : > { %4955 = vmatprep.mubr.f32.mxu1 %v18620_v55  ;;  %v18652_v11 = vand.u32 4294901760, %v18651_v30  ;;  %18653 = vst [vmem:[#allocation218_spill] sm:$0xff] %v15286_v17  ;;  %v18654_v55 = vld [vmem:[#allocation69_spill] sm:$0xff]  ;;  %v15290_v52 = vpop.f32.mrb[85].mxu0  ;;  %v18698_v17 = vld [vmem:[#allocation156_spill] sm:$0xff] }
 0x59f   : > { %v18655_v57 = vand.u32 4294901760, %v18654_v55  ;;  %18656 = vst [vmem:[#allocation225_spill] sm:$0xff] %v15290_v52  ;;  %v15294_v2 = vpop.f32.mrb[86].mxu0  ;;  %v18679_v55 = vld [vmem:[#allocation44_spill] sm:$0xff]  ;;  %v18699_v52 = vld [vmem:[#allocation17_spill] sm:$0xff] }
 0x5a0   : > { %18659 = vst [vmem:[#allocation223_spill] sm:$0xff] %v15294_v2 }
 0x5a1   : > { %4959 = vmatmul.mubr.f32.gmra.mrb[48].mxu1 %v18623_v51  ;;  %v18657_v51 = vld [vmem:[#allocation303_spill] sm:$0xff] }
 0x5a2   : > { %4966 = vmatprep.mubr.f32.mxu1 %v18626_v59  ;;  %v18658_v60 = vand.u32 4294901760, %v18657_v51  ;;  %v15298_v59 = vpop.f32.mrb[87].mxu0  ;;  %v18681_v51 = vld [vmem:[#allocation47_spill] sm:$0xff] }
 0x5a3   : > { %18661 = vst [vmem:[#allocation231_spill] sm:$0xff] %v15298_v59  ;;  %v18696_v59 = vld [vmem:[#allocation66_spill] sm:$0xff] }
 0x5a5   : > { %4970 = vmatmul.mubr.f32.gmra.mrb[50].mxu1 %v18629_v29  ;;  %v15302_v29 = vpop.f32.mrb[88].mxu0 }
 0x5a6   : > { %4977 = vmatprep.mubr.f32.mxu1 %v18632_v37  ;;  %18663 = vst [vmem:[#allocation229_spill] sm:$0xff] %v15302_v29  ;;  %v15305_v37 = vpop.f32.mrb[89].mxu0  ;;  %v18693_v29 = vld [vmem:[#allocation146_spill] sm:$0xff] }
 0x5a7   : > { %18665 = vst [vmem:[#allocation18_spill] sm:$0xff] %v15305_v37  ;;  %v18694_v37 = vld [vmem:[#allocation62_spill] sm:$0xff] }
 0x5a9   : > { %4981 = vmatmul.mubr.f32.gmra.mrb[52].mxu1 %v18635_v14  ;;  %v15308_v14 = vpop.f32.mrb[90].mxu0 }
 0x5aa   : > { %4988 = vmatprep.mubr.f32.mxu1 %v18637_v58  ;;  %18667 = vst [vmem:[#allocation22_spill] sm:$0xff] %v15308_v14  ;;  %v18668_v58 = vld [vmem:[#allocation105_spill] sm:$0xff]  ;;  %v15312_v18 = vpop.f32.mrb[91].mxu0 }
 0x5ab   : > { %18670 = vst [vmem:[#allocation29_spill] sm:$0xff] %v15312_v18  ;;  %v18691_v18 = vld [vmem:[#allocation57_spill] sm:$0xff] }
 0x5ad   : > { %4992 = vmatmul.mubr.f32.gmra.mrb[54].mxu1 %v18639_v41  ;;  %v18669_v41 = vld [vmem:[#allocation24_spill] sm:$0xff] }
 0x5ae   : > { %4999 = vmatprep.mubr.f32.mxu1 %v18641_v38  ;;  %v15316_v38 = vpop.f32.mrb[92].mxu0 }
 0x5af   : > { %18672 = vst [vmem:[#allocation32_spill] sm:$0xff] %v15316_v38  ;;  %v18688_v38 = vld [vmem:[#allocation140_spill] sm:$0xff] }
 0x5b1   : > { %5003 = vmatmul.mubr.f32.gmra.mrb[56].mxu1 %v18643_v4  ;;  %v18673_v4 = vld [vmem:[#allocation113_spill] sm:$0xff] }
 0x5b2   : > { %5010 = vmatprep.mubr.f32.mxu1 %v18645_v0  ;;  %v18674_v0 = vld [vmem:[#allocation28_spill] sm:$0xff] }
 0x5b5   : > { %5014 = vmatmul.mubr.f32.gmra.mrb[58].mxu1 %v18647_v9  ;;  %v15320_v9 = vpop.f32.mrb[93].mxu0 }
 0x5b6   : > { %5021 = vmatprep.mubr.f32.mxu1 %v18649_v21  ;;  %18675 = vst [vmem:[#allocation41_spill] sm:$0xff] %v15320_v9  ;;  %v18676_v21 = vld [vmem:[#allocation36_spill] sm:$0xff]  ;;  %v15324_v30 = vpop.f32.mrb[94].mxu0  ;;  %v18689_v9 = vld [vmem:[#allocation55_spill] sm:$0xff] }
 0x5b7   : > { %18677 = vst [vmem:[#allocation63_spill] sm:$0xff] %v15324_v30  ;;  %v18784_v30 = vld [vmem:[#allocation137_spill] sm:$0xff] }
 0x5b9   : > { %5025 = vmatmul.mubr.f32.gmra.mrb[60].mxu1 %v18652_v11  ;;  %v18678_v11 = vld [vmem:[#allocation124_spill] sm:$0xff] }
 0x5ba   : > { %5032 = vmatprep.mubr.f32.mxu1 %v18655_v57  ;;  %v15328_v57 = vpop.f32.mrb[95].mxu0 }
 0x5bb   : > { %18680 = vst [vmem:[#allocation34_spill] sm:$0xff] %v15328_v57 }
 0x5bd   : > { %5036 = vmatmul.mubr.f32.gmra.mrb[62].mxu1 %v18658_v60  ;;  %v15332_v60 = vpop.f32.mrb[96].mxu0 }
 0x5be   : > { %5043 = vmatprep.mubr.f32.mxu1 %v18660_v10  ;;  %18682 = vst [vmem:[#allocation39_spill] sm:$0xff] %v15332_v60  ;;  %v18683_v10 = vld [vmem:[#allocation131_spill] sm:$0xff] }
 0x5c1   : > { %5047 = vmatmul.mubr.f32.gmra.mrb[64].mxu1 %v18662_v15  ;;  %v18684_v15 = vld [vmem:[#allocation35_spill] sm:$0xff] }
 0x5c2   : > { %5213 = vmatprep.mubr.f32.mxu1 %v18664_v13 }
 0x5c5   : > { %5215 = vmatmul.mubr.f32.vlgmr.msra.gmra.mrb[66].mxu1 %v18666_v56 }
 0x5c6   : > { %10043 = vmatpush1.bf16.msra.mxu1 %v18668_v58  ;;  %5220 = vmatprep.mubr.f32.mxu1 %v18669_v41  ;;  %v15336_v58 = vpop.f32.mrb[97].mxu0 }
 0x5c7   : > { %10044 = vmatprep.subr.bf16.mxu1 %v17543_v43  ;;  %18685 = vst [vmem:[#allocation49_spill] sm:$0xff] %v15336_v58 }
 0x5c9   : > { %5222 = vmatmul.mubr.f32.gmra.mrb[68].mxu1 %v18671_v36 }
 0x5ca   : > { %10046 = vmatpush1.bf16.msra.mxu1 %v18673_v4  ;;  %5227 = vmatprep.mubr.f32.mxu1 %v18674_v0  ;;  %v18686_v4 = vld [vmem:[#allocation45_spill] sm:$0xff] }
 0x5cb   : > { %10047 = vmatprep.subr.bf16.mxu1 %v17543_v43 }
 0x5cd   : > { %5229 = vmatmul.mubr.f32.gmra.mrb[70].mxu1 %v18676_v21 }
 0x5ce   : > { %10049 = vmatpush1.bf16.msra.mxu1 %v18678_v11  ;;  %5234 = vmatprep.mubr.f32.mxu1 %v18679_v55  ;;  %v15340_v11 = vpop.f32.mrb[98].mxu0 }
 0x5cf   : > { %10050 = vmatprep.subr.bf16.mxu1 %v17543_v43  ;;  %18687 = vst [vmem:[#allocation52_spill] sm:$0xff] %v15340_v11  ;;  %v15344_v14 = vpop.f32.mrb[99].mxu0 }
 0x5d0   : > { %18690 = vst [vmem:[#allocation59_spill] sm:$0xff] %v15344_v14 }
 0x5d1   : > { %5236 = vmatmul.mubr.f32.gmra.mrb[72].mxu1 %v18681_v51 }
 0x5d2   : > { %10052 = vmatpush1.bf16.msra.mxu1 %v18683_v10  ;;  %5241 = vmatprep.mubr.f32.mxu1 %v18684_v15  ;;  %v15348_v10 = vpop.f32.mrb[100].mxu0 }
 0x5d3   : > { %10053 = vmatprep.subr.bf16.mxu1 %v17543_v43  ;;  %18692 = vst [vmem:[#allocation61_spill] sm:$0xff] %v15348_v10  ;;  %v15352_v2 = vpop.f32.mrb[101].mxu0 }
 0x5d4   : > { %18695 = vst [vmem:[#allocation71_spill] sm:$0xff] %v15352_v2 }
 0x5d5   : > { %5243 = vmatmul.mubr.f32.gmra.mrb[74].mxu1 %v18686_v4 }
 0x5d6   : > { %10055 = vmatpush1.bf16.msra.mxu1 %v18688_v38  ;;  %5248 = vmatprep.mubr.f32.mxu1 %v18689_v9  ;;  %v15356_v38 = vpop.f32.mrb[102].mxu0 }
 0x5d7   : > { %10056 = vmatprep.subr.bf16.mxu1 %v17543_v43  ;;  %18697 = vst [vmem:[#allocation74_spill] sm:$0xff] %v15356_v38  ;;  %v15360_v40 = vpop.f32.mrb[103].mxu0 }
 0x5d8   : > { %18700 = vst [vmem:[#allocation19_spill] sm:$0xff] %v15360_v40 }
 0x5d9   : > { %5250 = vmatmul.mubr.f32.gmra.mrb[76].mxu1 %v18691_v18 }
 0x5da   : > { %10058 = vmatpush1.bf16.msra.mxu1 %v18693_v29  ;;  %5255 = vmatprep.mubr.f32.mxu1 %v18694_v37  ;;  %v15364_v29 = vpop.f32.mrb[104].mxu0 }
 0x5db   : > { %10059 = vmatprep.subr.bf16.mxu1 %v17543_v43  ;;  %18702 = vst [vmem:[#allocation23_spill] sm:$0xff] %v15364_v29  ;;  %v15368_v33 = vpop.f32.mrb[105].mxu0 }
 0x5dc   : > { %18705 = vst [vmem:[#allocation30_spill] sm:$0xff] %v15368_v33 }
 0x5dd   : > { %5257 = vmatmul.mubr.f32.gmra.mrb[78].mxu1 %v18696_v59 }
 0x5de   : > { %10061 = vmatpush1.bf16.msra.mxu1 %v18698_v17  ;;  %5262 = vmatprep.mubr.f32.mxu1 %v18699_v52  ;;  %v15372_v17 = vpop.f32.mrb[106].mxu0 }
 0x5df   : > { %10062 = vmatprep.subr.bf16.mxu1 %v17543_v43  ;;  %18707 = vst [vmem:[#allocation40_spill] sm:$0xff] %v15372_v17  ;;  %v15376_v47 = vpop.f32.mrb[107].mxu0 }
 0x5e0   : > { %18710 = vst [vmem:[#allocation54_spill] sm:$0xff] %v15376_v47 }
 0x5e1   : > { %5264 = vmatmul.mubr.f32.gmra.mrb[0].mxu1 %v18701_v27 }
 0x5e2   : > { %10064 = vmatpush1.bf16.msra.mxu1 %v18703_v7  ;;  %5269 = vmatprep.mubr.f32.mxu1 %v18704_v35  ;;  %v15380_v7 = vpop.f32.mrb[108].mxu0 }
 0x5e3   : > { %10065 = vmatprep.subr.bf16.mxu1 %v17543_v43  ;;  %18712 = vst [vmem:[#allocation31_spill] sm:$0xff] %v15380_v7  ;;  %v15384_v25 = vpop.f32.mrb[109].mxu0  ;;  %v18721_v7 = vld [vmem:[#allocation48_spill] sm:$0xff] }
 0x5e4   : > { %18715 = vst [vmem:[#allocation73_spill] sm:$0xff] %v15384_v25  ;;  %v18724_v25 = vld [vmem:[#allocation56_spill] sm:$0xff] }
 0x5e5   : > { %5271 = vmatmul.mubr.f32.gmra.mrb[2].mxu1 %v18706_v28 }
 0x5e6   : > { %10067 = vmatpush1.bf16.msra.mxu1 %v18708_v45  ;;  %5276 = vmatprep.mubr.f32.mxu1 %v18709_v46  ;;  %v15388_v45 = vpop.f32.mrb[110].mxu0 }
 0x5e7   : > { %10068 = vmatprep.subr.bf16.mxu1 %v17543_v43  ;;  %18717 = vst [vmem:[#allocation78_spill] sm:$0xff] %v15388_v45  ;;  %v15392_v17 = vpop.f32.mrb[111].mxu0  ;;  %v18726_v45 = vld [vmem:[#allocation58_spill] sm:$0xff] }
 0x5e8   : > { %18720 = vst [vmem:[#allocation88_spill] sm:$0xff] %v15392_v17  ;;  %v18729_v17 = vld [vmem:[#allocation64_spill] sm:$0xff] }
 0x5e9   : > { %5278 = vmatmul.mubr.f32.gmra.mrb[4].mxu1 %v18711_v44 }
 0x5ea   : > { %10070 = vmatpush1.bf16.msra.mxu1 %v18713_v63  ;;  %5283 = vmatprep.mubr.f32.mxu1 %v18714_v3  ;;  %v15396_v63 = vpop.f32.mrb[112].mxu0 }
 0x5eb   : > { %10071 = vmatprep.subr.bf16.mxu1 %v17543_v43  ;;  %18722 = vst [vmem:[#allocation224_spill] sm:$0xff] %v15396_v63  ;;  %v15400_v47 = vpop.f32.mrb[113].mxu0  ;;  %v18731_v63 = vld [vmem:[#allocation67_spill] sm:$0xff] }
 0x5ec   : > { %18725 = vst [vmem:[#allocation100_spill] sm:$0xff] %v15400_v47  ;;  %v18734_v47 = vld [vmem:[#allocation68_spill] sm:$0xff] }
 0x5ed   : > { %5285 = vmatmul.mubr.f32.gmra.mrb[6].mxu1 %v18716_v53 }
 0x5ee   : > { %10073 = vmatpush1.bf16.msra.mxu1 %v18718_v19  ;;  %5290 = vmatprep.mubr.f32.mxu1 %v18719_v6  ;;  %v15404_v19 = vpop.f32.mrb[114].mxu0 }
 0x5ef   : > { %10074 = vmatprep.subr.bf16.mxu1 %v17543_v43  ;;  %18727 = vst [vmem:[#allocation106_spill] sm:$0xff] %v15404_v19  ;;  %v15408_v29 = vpop.f32.mrb[115].mxu0  ;;  %v18736_v19 = vld [vmem:[#allocation70_spill] sm:$0xff] }
 0x5f0   : > { %18730 = vst [vmem:[#allocation230_spill] sm:$0xff] %v15408_v29  ;;  %v18739_v29 = vld [vmem:[#allocation75_spill] sm:$0xff] }
 0x5f1   : > { %5292 = vmatmul.mubr.f32.gmra.mrb[8].mxu1 %v18721_v7 }
 0x5f2   : > { %10076 = vmatpush1.bf16.msra.mxu1 %v18723_v34  ;;  %5297 = vmatprep.mubr.f32.mxu1 %v18724_v25  ;;  %v15412_v34 = vpop.f32.mrb[116].mxu0 }
 0x5f3   : > { %10077 = vmatprep.subr.bf16.mxu1 %v17543_v43  ;;  %18732 = vst [vmem:[#allocation111_spill] sm:$0xff] %v15412_v34  ;;  %v15416_v33 = vpop.f32.mrb[117].mxu0  ;;  %v18741_v34 = vld [vmem:[#allocation83_spill] sm:$0xff] }
 0x5f4   : > { %18735 = vst [vmem:[#allocation116_spill] sm:$0xff] %v15416_v33  ;;  %v18744_v33 = vld [vmem:[#allocation91_spill] sm:$0xff] }
 0x5f5   : > { %5299 = vmatmul.mubr.f32.gmra.mrb[10].mxu1 %v18726_v45 }
 0x5f6   : > { %10079 = vmatpush1.bf16.msra.mxu1 %v18728_v39  ;;  %5304 = vmatprep.mubr.f32.mxu1 %v18729_v17  ;;  %v15420_v39 = vpop.f32.mrb[118].mxu0 }
 0x5f7   : > { %10080 = vmatprep.subr.bf16.mxu1 %v17543_v43  ;;  %18737 = vst [vmem:[#allocation119_spill] sm:$0xff] %v15420_v39  ;;  %v15424_v38 = vpop.f32.mrb[119].mxu0 }
 0x5f8   : > { %18740 = vst [vmem:[#allocation129_spill] sm:$0xff] %v15424_v38  ;;  %v18750_v38 = vld [vmem:[#allocation108_spill] sm:$0xff] }
 0x5f9   : > { %5306 = vmatmul.mubr.f32.gmra.mrb[12].mxu1 %v18731_v63 }
 0x5fa   : > { %10082 = vmatpush1.bf16.msra.mxu1 %v18733_v5  ;;  %5311 = vmatprep.mubr.f32.mxu1 %v18734_v47  ;;  %v15428_v5 = vpop.f32.mrb[120].mxu0 }
 0x5fb   : > { %10083 = vmatprep.subr.bf16.mxu1 %v17543_v43  ;;  %18742 = vst [vmem:[#allocation139_spill] sm:$0xff] %v15428_v5  ;;  %v15432_v40 = vpop.f32.mrb[121].mxu0 }
 0x5fc   : > { %18745 = vst [vmem:[#allocation148_spill] sm:$0xff] %v15432_v40  ;;  %v15435_v39 = vpop.f32.mrb[122].mxu0  ;;  %v18756_v40 = vld [vmem:[#allocation130_spill] sm:$0xff] }
 0x5fd   : > { %5313 = vmatmul.mubr.f32.gmra.mrb[14].mxu1 %v18736_v19  ;;  %18747 = vst [vmem:[#allocation152_spill] sm:$0xff] %v15435_v39  ;;  %v15438_v10 = vpop.f32.mrb[123].mxu0  ;;  %v18758_v39 = vld [vmem:[#allocation142_spill] sm:$0xff] }
 0x5fe   : > { %10085 = vmatpush1.bf16.msra.mxu1 %v18738_v61  ;;  %5318 = vmatprep.mubr.f32.mxu1 %v18739_v29  ;;  %v18748_v61 = vld [vmem:[#allocation107_spill] sm:$0xff]  ;;  %18749 = vst [vmem:[#allocation159_spill] sm:$0xff] %v15438_v10  ;;  %v18760_v10 = vld [vmem:[#allocation149_spill] sm:$0xff] }
 0x5ff   : > { %10086 = vmatprep.subr.bf16.mxu1 %v17543_v43  ;;  %v15441_v43 = vpop.f32.mrb[124].mxu0 }
 0x600   : > { %18751 = vst [vmem:[#allocation182_spill] sm:$0xff] %v15441_v43  ;;  %v15444_v5 = vpop.f32.mrb[125].mxu0  ;;  %v18762_v43 = vld [vmem:[#allocation153_spill] sm:$0xff] }
 0x601   : > { %5320 = vmatmul.mubr.f32.gmra.mrb[16].mxu1 %v18741_v34  ;;  %18753 = vst [vmem:[#allocation193_spill] sm:$0xff] %v15444_v5  ;;  %v15447_v2 = vpop.f32.mrb[126].mxu0  ;;  %v18764_v5 = vld [vmem:[#allocation168_spill] sm:$0xff] }
 0x602   : > { %10088 = vmatpush1.bf16.msra.mxu1 %v18743_v23  ;;  %5325 = vmatprep.mubr.f32.mxu1 %v18744_v33  ;;  %v18754_v23 = vld [vmem:[#allocation120_spill] sm:$0xff]  ;;  %18755 = vst [vmem:[#allocation211_spill] sm:$0xff] %v15447_v2  ;;  %v15450_v49 = vpop.f32.mrb[127].mxu0 }
 0x603   : > { %18757 = vst [vmem:[#allocation232_spill] sm:$0xff] %v15450_v49  ;;  %v15453_v1 = vpop.f32.mrb[128].mxu0  ;;  %v18766_v2 = vld [vmem:[#allocation184_spill] sm:$0xff] }
 0x604   : > { %18759 = vst [vmem:[#allocation202_spill] sm:$0xff] %v15453_v1  ;;  %v15456_v11 = vpop.f32.mrb[129].mxu0  ;;  %v18768_v49 = vld [vmem:[#allocation200_spill] sm:$0xff] }
 0x605   : > { %5327 = vmatmul.mubr.f32.gmra.mrb[18].mxu1 %v18746_v8  ;;  %18761 = vst [vmem:[#allocation94_spill] sm:$0xff] %v15456_v11  ;;  %v15459_v54 = vpop.f32.mrb[130].mxu0  ;;  %v18770_v1 = vld [vmem:[#allocation216_spill] sm:$0xff]  ;;  %v18772_v11 = vld [vmem:[#allocation235_spill] sm:$0xff] }
 0x606   : > { %5332 = vmatprep.mubr.f32.mxu1 %v18748_v61  ;;  %18763 = vst [vmem:[#allocation96_spill] sm:$0xff] %v15459_v54  ;;  %v15462_v32 = vpop.f32.mrb[131].mxu0  ;;  %v18774_v54 = vld [vmem:[#allocation93_spill] sm:$0xff] }
 0x607   : > { %18765 = vst [vmem:[#allocation121_spill] sm:$0xff] %v15462_v32  ;;  %v15465_v14 = vpop.f32.mrb[132].mxu0  ;;  %v18776_v32 = vld [vmem:[#allocation95_spill] sm:$0xff] }
 0x608   : > { %18767 = vst [vmem:[#allocation134_spill] sm:$0xff] %v15465_v14  ;;  %v15468_v50 = vpop.f32.mrb[133].mxu0  ;;  %v18778_v14 = vld [vmem:[#allocation103_spill] sm:$0xff] }
 0x609   : > { %5334 = vmatmul.mubr.f32.gmra.mrb[20].mxu1 %v18750_v38  ;;  %18769 = vst [vmem:[#allocation238_spill] sm:$0xff] %v15468_v50  ;;  %v15471_v48 = vpop.f32.mrb[134].mxu0  ;;  %v18780_v50 = vld [vmem:[#allocation237_spill] sm:$0xff] }
 0x60a   : > { %5339 = vmatprep.mubr.f32.mxu1 %v18752_v31  ;;  %18771 = vst [vmem:[#allocation144_spill] sm:$0xff] %v15471_v48  ;;  %v15474_v60 = vpop.f32.mrb[135].mxu0  ;;  %v18782_v48 = vld [vmem:[#allocation132_spill] sm:$0xff] }
 0x60b   : > { %18773 = vst [vmem:[#allocation240_spill] sm:$0xff] %v15474_v60  ;;  %v15477_v26 = vpop.f32.mrb[136].mxu0 }
 0x60c   : > { %18775 = vst [vmem:[#allocation242_spill] sm:$0xff] %v15477_v26  ;;  %v15480_v12 = vpop.f32.mrb[137].mxu0  ;;  %v18786_v26 = vld [vmem:[#allocation162_spill] sm:$0xff] }
 0x60d   : > { %5341 = vmatmul.mubr.f32.gmra.mrb[22].mxu1 %v18754_v23  ;;  %18777 = vst [vmem:[#allocation243_spill] sm:$0xff] %v15480_v12  ;;  %v15483_v58 = vpop.f32.mrb[138].mxu0  ;;  %v18788_v12 = vld [vmem:[#allocation239_spill] sm:$0xff] }
 0x60e   : > { %5346 = vmatprep.mubr.f32.mxu1 %v18756_v40  ;;  %18779 = vst [vmem:[#allocation183_spill] sm:$0xff] %v15483_v58  ;;  %v15486_v22 = vpop.f32.mrb[139].mxu0  ;;  %v18790_v58 = vld [vmem:[#allocation172_spill] sm:$0xff] }
 0x60f   : > { %18781 = vst [vmem:[#allocation246_spill] sm:$0xff] %v15486_v22  ;;  %v15489_v62 = vpop.f32.mrb[140].mxu0  ;;  %v18792_v22 = vld [vmem:[#allocation176_spill] sm:$0xff] }
 0x610   : > { %18783 = vst [vmem:[#allocation248_spill] sm:$0xff] %v15489_v62  ;;  %v15492_v60 = vpop.f32.mrb[141].mxu0  ;;  %v18794_v62 = vld [vmem:[#allocation244_spill] sm:$0xff] }
 0x611   : > { %5348 = vmatmul.mubr.f32.gmra.mrb[24].mxu1 %v18758_v39  ;;  %18785 = vst [vmem:[#allocation254_spill] sm:$0xff] %v15492_v60  ;;  %v15495_v24 = vpop.f32.mrb[142].mxu0  ;;  %v18796_v60 = vld [vmem:[#allocation247_spill] sm:$0xff] }
 0x612   : > { %5353 = vmatprep.mubr.f32.mxu1 %v18760_v10  ;;  %18787 = vst [vmem:[#allocation267_spill] sm:$0xff] %v15495_v24  ;;  %v15498_v42 = vpop.f32.mrb[143].mxu0  ;;  %v18798_v24 = vld [vmem:[#allocation251_spill] sm:$0xff] }
 0x613   : > { %18789 = vst [vmem:[#allocation271_spill] sm:$0xff] %v15498_v42  ;;  %v15501_v57 = vpop.f32.mrb[144].mxu0  ;;  %v18800_v42 = vld [vmem:[#allocation255_spill] sm:$0xff] }
 0x614   : > { %18791 = vst [vmem:[#allocation275_spill] sm:$0xff] %v15501_v57  ;;  %v15504_v20 = vpop.f32.mrb[145].mxu0  ;;  %v18802_v57 = vld [vmem:[#allocation260_spill] sm:$0xff] }
 0x615   : > { %5355 = vmatmul.mubr.f32.gmra.mrb[26].mxu1 %v18762_v43  ;;  %18793 = vst [vmem:[#allocation278_spill] sm:$0xff] %v15504_v20  ;;  %v15507_v16 = vpop.f32.mrb[146].mxu0  ;;  %v18804_v20 = vld [vmem:[#allocation263_spill] sm:$0xff] }
 0x616   : > { %5360 = vmatprep.mubr.f32.mxu1 %v18764_v5  ;;  %18795 = vst [vmem:[#allocation282_spill] sm:$0xff] %v15507_v16  ;;  %v18806_v16 = vld [vmem:[#allocation266_spill] sm:$0xff] }
 0x619   : > { %5362 = vmatmul.mubr.f32.gmra.mrb[28].mxu1 %v18766_v2 }
 0x61a   : > { %5367 = vmatprep.mubr.f32.mxu1 %v18768_v49 }
 0x61d   : > { %5369 = vmatmul.mubr.f32.gmra.mrb[30].mxu1 %v18770_v1 }
 0x61e   : > { %5374 = vmatprep.mubr.f32.mxu1 %v18772_v11 }
 0x621   : > { %5376 = vmatmul.mubr.f32.gmra.mrb[32].mxu1 %v18774_v54 }
 0x622   : > { %5381 = vmatprep.mubr.f32.mxu1 %v18776_v32 }
 0x625   : > { %5383 = vmatmul.mubr.f32.gmra.mrb[34].mxu1 %v18778_v14 }
 0x626   : > { %5388 = vmatprep.mubr.f32.mxu1 %v18780_v50 }
 0x629   : > { %5390 = vmatmul.mubr.f32.gmra.mrb[36].mxu1 %v18782_v48 }
 0x62a   : > { %5395 = vmatprep.mubr.f32.mxu1 %v18784_v30 }
 0x62d   : > { %5397 = vmatmul.mubr.f32.gmra.mrb[38].mxu1 %v18786_v26  ;;  %v15510_v26 = vpop.f32.mrb[147].mxu0 }
 0x62e   : > { %5402 = vmatprep.mubr.f32.mxu1 %v18788_v12  ;;  %18797 = vst [vmem:[#allocation287_spill] sm:$0xff] %v15510_v26  ;;  %v15513_v12 = vpop.f32.mrb[148].mxu0  ;;  %v18808_v26 = vld [vmem:[#allocation269_spill] sm:$0xff] }
 0x62f   : > { %18799 = vst [vmem:[#allocation288_spill] sm:$0xff] %v15513_v12  ;;  %v18810_v12 = vld [vmem:[#allocation274_spill] sm:$0xff] }
 0x631   : > { %5404 = vmatmul.mubr.f32.gmra.mrb[40].mxu1 %v18790_v58  ;;  %v15516_v58 = vpop.f32.mrb[149].mxu0 }
 0x632   : > { %5409 = vmatprep.mubr.f32.mxu1 %v18792_v22  ;;  %18801 = vst [vmem:[#allocation290_spill] sm:$0xff] %v15516_v58  ;;  %v15519_v22 = vpop.f32.mrb[150].mxu0  ;;  %v18812_v58 = vld [vmem:[#allocation277_spill] sm:$0xff] }
 0x633   : > { %18803 = vst [vmem:[#allocation292_spill] sm:$0xff] %v15519_v22  ;;  %v18814_v22 = vld [vmem:[#allocation280_spill] sm:$0xff] }
 0x635   : > { %5411 = vmatmul.mubr.f32.gmra.mrb[42].mxu1 %v18794_v62  ;;  %v15522_v62 = vpop.f32.mrb[151].mxu0 }
 0x636   : > { %5416 = vmatprep.mubr.f32.mxu1 %v18796_v60  ;;  %18805 = vst [vmem:[#allocation294_spill] sm:$0xff] %v15522_v62  ;;  %v15525_v60 = vpop.f32.mrb[152].mxu0  ;;  %v18816_v62 = vld [vmem:[#allocation283_spill] sm:$0xff] }
 0x637   : > { %18807 = vst [vmem:[#allocation296_spill] sm:$0xff] %v15525_v60  ;;  %v18818_v60 = vld [vmem:[#allocation285_spill] sm:$0xff] }
 0x639   : > { %5418 = vmatmul.mubr.f32.gmra.mrb[44].mxu1 %v18798_v24  ;;  %v15528_v24 = vpop.f32.mrb[153].mxu0 }
 0x63a   : > { %5423 = vmatprep.mubr.f32.mxu1 %v18800_v42  ;;  %18809 = vst [vmem:[#allocation298_spill] sm:$0xff] %v15528_v24  ;;  %v15531_v42 = vpop.f32.mrb[154].mxu0  ;;  %v18820_v24 = vld [vmem:[#allocation286_spill] sm:$0xff] }
 0x63b   : > { %18811 = vst [vmem:[#allocation305_spill] sm:$0xff] %v15531_v42  ;;  %v18822_v42 = vld [vmem:[#allocation289_spill] sm:$0xff] }
 0x63d   : > { %5425 = vmatmul.mubr.f32.gmra.mrb[46].mxu1 %v18802_v57  ;;  %v15534_v57 = vpop.f32.mrb[155].mxu0 }
 0x63e   : > { %5430 = vmatprep.mubr.f32.mxu1 %v18804_v20  ;;  %18813 = vst [vmem:[#allocation306_spill] sm:$0xff] %v15534_v57  ;;  %v15537_v20 = vpop.f32.mrb[156].mxu0  ;;  %v18824_v57 = vld [vmem:[#allocation291_spill] sm:$0xff] }
 0x63f   : > { %18815 = vst [vmem:[#allocation155_spill] sm:$0xff] %v15537_v20  ;;  %v18826_v20 = vld [vmem:[#allocation293_spill] sm:$0xff] }
 0x641   : > { %5432 = vmatmul.mubr.f32.gmra.mrb[48].mxu1 %v18806_v16  ;;  %v15540_v16 = vpop.f32.mrb[157].mxu0 }
 0x642   : > { %5437 = vmatprep.mubr.f32.mxu1 %v18808_v26  ;;  %18817 = vst [vmem:[#allocation154_spill] sm:$0xff] %v15540_v16  ;;  %v15543_v26 = vpop.f32.mrb[158].mxu0  ;;  %v18828_v16 = vld [vmem:[#allocation295_spill] sm:$0xff] }
 0x643   : > { %18819 = vst [vmem:[#allocation161_spill] sm:$0xff] %v15543_v26  ;;  %v18830_v26 = vld [vmem:[#allocation297_spill] sm:$0xff] }
 0x645   : > { %5439 = vmatmul.mubr.f32.gmra.mrb[50].mxu1 %v18810_v12  ;;  %v15546_v12 = vpop.f32.mrb[159].mxu0 }
 0x646   : > { %5444 = vmatprep.mubr.f32.mxu1 %v18812_v58  ;;  %18821 = vst [vmem:[#allocation160_spill] sm:$0xff] %v15546_v12  ;;  %v15549_v58 = vpop.f32.mrb[160].mxu0  ;;  %v18832_v12 = vld [vmem:[#allocation299_spill] sm:$0xff] }
 0x647   : > { %18823 = vst [vmem:[#allocation170_spill] sm:$0xff] %v15549_v58  ;;  %v18834_v58 = vld [vmem:[#allocation301_spill] sm:$0xff] }
 0x649   : > { %5446 = vmatmul.mubr.f32.gmra.mrb[52].mxu1 %v18814_v22  ;;  %v15552_v22 = vpop.f32.mrb[161].mxu0 }
 0x64a   : > { %5451 = vmatprep.mubr.f32.mxu1 %v18816_v62  ;;  %18825 = vst [vmem:[#allocation169_spill] sm:$0xff] %v15552_v22  ;;  %v15555_v62 = vpop.f32.mrb[162].mxu0  ;;  %v18836_v22 = vld [vmem:[#allocation302_spill] sm:$0xff] }
 0x64b   : > { %18827 = vst [vmem:[#allocation181_spill] sm:$0xff] %v15555_v62  ;;  %v18838_v62 = vld [vmem:[#allocation304_spill] sm:$0xff] }
 0x64d   : > { %5453 = vmatmul.mubr.f32.gmra.mrb[54].mxu1 %v18818_v60  ;;  %v15558_v60 = vpop.f32.mrb[163].mxu0 }
 0x64e   : > { %5458 = vmatprep.mubr.f32.mxu1 %v18820_v24  ;;  %18829 = vst [vmem:[#allocation179_spill] sm:$0xff] %v15558_v60  ;;  %v15561_v24 = vpop.f32.mrb[164].mxu0 }
 0x64f   : > { %18831 = vst [vmem:[#allocation186_spill] sm:$0xff] %v15561_v24 }
 0x651   : > { %5460 = vmatmul.mubr.f32.gmra.mrb[56].mxu1 %v18822_v42  ;;  %v15564_v42 = vpop.f32.mrb[165].mxu0 }
 0x652   : > { %5465 = vmatprep.mubr.f32.mxu1 %v18824_v57  ;;  %18833 = vst [vmem:[#allocation185_spill] sm:$0xff] %v15564_v42  ;;  %v15567_v57 = vpop.f32.mrb[166].mxu0 }
 0x653   : > { %18835 = vst [vmem:[#allocation189_spill] sm:$0xff] %v15567_v57 }
 0x655   : > { %5467 = vmatmul.mubr.f32.gmra.mrb[58].mxu1 %v18826_v20  ;;  %v15570_v20 = vpop.f32.mrb[167].mxu0 }
 0x656   : > { %5472 = vmatprep.mubr.f32.mxu1 %v18828_v16  ;;  %18837 = vst [vmem:[#allocation187_spill] sm:$0xff] %v15570_v20  ;;  %v15573_v16 = vpop.f32.mrb[168].mxu0 }
 0x657   : > { %18839 = vst [vmem:[#allocation192_spill] sm:$0xff] %v15573_v16  ;;  %v15576_v60 = vpop.f32.mrb[169].mxu0 }
 0x658   : > { %18840 = vst [vmem:[#allocation191_spill] sm:$0xff] %v15576_v60  ;;  %v15579_v24 = vpop.f32.mrb[170].mxu0 }
 0x659   : > { %5474 = vmatmul.mubr.f32.gmra.mrb[60].mxu1 %v18830_v26  ;;  %18841 = vst [vmem:[#allocation203_spill] sm:$0xff] %v15579_v24  ;;  %v15582_v42 = vpop.f32.mrb[171].mxu0 }
 0x65a   : > { %5479 = vmatprep.mubr.f32.mxu1 %v18832_v12  ;;  %18842 = vst [vmem:[#allocation199_spill] sm:$0xff] %v15582_v42  ;;  %v15585_v57 = vpop.f32.mrb[172].mxu0 }
 0x65b   : > { %18843 = vst [vmem:[#allocation209_spill] sm:$0xff] %v15585_v57  ;;  %v15588_v20 = vpop.f32.mrb[173].mxu0 }
 0x65c   : > { %18844 = vst [vmem:[#allocation206_spill] sm:$0xff] %v15588_v20 }
 0x65d   : > { %5481 = vmatmul.mubr.f32.gmra.mrb[62].mxu1 %v18834_v58 }
 0x65e   : > { %5486 = vmatprep.mubr.f32.mxu1 %v18836_v22 }
 0x661   : > { %5488 = vmatmul.mubr.f32.gmra.mrb[64].mxu1 %v18838_v62 }
 0x662   : > { %5590 = vmatprep.mubr.f32.mxu1 %v18664_v13  ;;  %v15591_v13 = vpop.f32.mrb[174].mxu0 }
 0x665   : > { %5592 = vmatmul.mubr.f32.vlgmr.msra.gmra.mrb[66].mxu1 %v18666_v56  ;;  %v15594_v56 = vpop.f32.mrb[175].mxu0 }
 0x666   : > { %5597 = vmatprep.mubr.f32.mxu1 %v18669_v41  ;;  %v15597_v41 = vpop.f32.mrb[176].mxu0 }
 0x669   : > { %5599 = vmatmul.mubr.f32.gmra.mrb[68].mxu1 %v18671_v36  ;;  %v15600_v36 = vpop.f32.mrb[177].mxu0 }
 0x66a   : > { %5604 = vmatprep.mubr.f32.mxu1 %v18674_v0  ;;  %v15603_v0 = vpop.f32.mrb[178].mxu0 }
 0x66d   : > { %5606 = vmatmul.mubr.f32.gmra.mrb[70].mxu1 %v18676_v21  ;;  %v15606_v21 = vpop.f32.mrb[179].mxu0 }
 0x66e   : > { %5611 = vmatprep.mubr.f32.mxu1 %v18679_v55  ;;  %v15609_v55 = vpop.f32.mrb[180].mxu0 }
 0x671   : > { %5613 = vmatmul.mubr.f32.gmra.mrb[72].mxu1 %v18681_v51  ;;  %v15612_v51 = vpop.f32.mrb[181].mxu0 }
 0x672   : > { %5618 = vmatprep.mubr.f32.mxu1 %v18684_v15  ;;  %v15614_v57 = vpop.f32.mrb[182].mxu0 }
 0x673   : > { %v15616_v15 = vpop.f32.mrb[183].mxu0 }
 0x675   : > { %5620 = vmatmul.mubr.f32.gmra.mrb[74].mxu1 %v18686_v4  ;;  %v15619_v4 = vpop.f32.mrb[184].mxu0 }
 0x676   : > { %5625 = vmatprep.mubr.f32.mxu1 %v18689_v9  ;;  %v15622_v9 = vpop.f32.mrb[185].mxu0 }
 0x677   : > { %v15624_v20 = vpop.f32.mrb[186].mxu0 }
 0x679   : > { %5627 = vmatmul.mubr.f32.gmra.mrb[76].mxu1 %v18691_v18  ;;  %v15626_v18 = vpop.f32.mrb[187].mxu0 }
 0x67a   : > { %5632 = vmatprep.mubr.f32.mxu1 %v18694_v37  ;;  %v15629_v37 = vpop.f32.mrb[188].mxu0 }
 0x67b   : > { %18845 = vst [vmem:[#allocation217_spill] sm:$0xff] %v15629_v37  ;;  %v15632_v24 = vpop.f32.mrb[189].mxu0  ;;  %v18939_v37 = vld [vmem:[#allocation63_spill] sm:$0xff] }
 0x67c   : > { %v15634_v42 = vpop.f32.mrb[190].mxu0 }
 0x67d   : > { %5634 = vmatmul.mubr.f32.gmra.mrb[78].mxu1 %v18696_v59  ;;  %18846 = vst [vmem:[#allocation215_spill] sm:$0xff] %v15634_v42  ;;  %v15636_v59 = vpop.f32.mrb[191].mxu0 }
 0x67e   : > { %5639 = vmatprep.mubr.f32.mxu1 %v18699_v52  ;;  %18847 = vst [vmem:[#allocation37_spill] sm:$0xff] %v15636_v59  ;;  %v15639_v52 = vpop.f32.mrb[192].mxu0 }
 0x67f   : > { %18848 = vst [vmem:[#allocation258_spill] sm:$0xff] %v15639_v52  ;;  %v15642_v16 = vpop.f32.mrb[193].mxu0 }
 0x680   : > { %18849 = vst [vmem:[#allocation226_spill] sm:$0xff] %v15642_v16  ;;  %v15644_v60 = vpop.f32.mrb[194].mxu0 }
 0x681   : > { %5641 = vmatmul.mubr.f32.gmra.mrb[0].mxu1 %v18701_v27  ;;  %18850 = vst [vmem:[#allocation222_spill] sm:$0xff] %v15644_v60  ;;  %v15646_v27 = vpop.f32.mrb[195].mxu0 }
 0x682   : > { %5646 = vmatprep.mubr.f32.mxu1 %v18704_v35  ;;  %18851 = vst [vmem:[#allocation43_spill] sm:$0xff] %v15646_v27  ;;  %v15649_v35 = vpop.f32.mrb[196].mxu0 }
 0x683   : > { %18852 = vst [vmem:[#allocation261_spill] sm:$0xff] %v15649_v35  ;;  %v15652_v42 = vpop.f32.mrb[197].mxu0 }
 0x684   : > { %18853 = vst [vmem:[#allocation51_spill] sm:$0xff] %v15652_v42  ;;  %v15654_v59 = vpop.f32.mrb[198].mxu0 }
 0x685   : > { %5648 = vmatmul.mubr.f32.gmra.mrb[2].mxu1 %v18706_v28  ;;  %18854 = vst [vmem:[#allocation265_spill] sm:$0xff] %v15654_v59  ;;  %v15656_v28 = vpop.f32.mrb[199].mxu0 }
 0x686   : > { %5653 = vmatprep.mubr.f32.mxu1 %v18709_v46  ;;  %18855 = vst [vmem:[#allocation228_spill] sm:$0xff] %v15656_v28  ;;  %v15659_v46 = vpop.f32.mrb[200].mxu0 }
 0x687   : > { %18856 = vst [vmem:[#allocation227_spill] sm:$0xff] %v15659_v46  ;;  %v15662_v60 = vpop.f32.mrb[201].mxu0 }
 0x688   : > { %18857 = vst [vmem:[#allocation53_spill] sm:$0xff] %v15662_v60  ;;  %v15664_v27 = vpop.f32.mrb[202].mxu0 }
 0x689   : > { %5655 = vmatmul.mubr.f32.gmra.mrb[4].mxu1 %v18711_v44  ;;  %18858 = vst [vmem:[#allocation60_spill] sm:$0xff] %v15664_v27  ;;  %v15666_v44 = vpop.f32.mrb[203].mxu0 }
 0x68a   : > { %5660 = vmatprep.mubr.f32.mxu1 %v18714_v3  ;;  %18859 = vst [vmem:[#allocation234_spill] sm:$0xff] %v15666_v44  ;;  %v15669_v3 = vpop.f32.mrb[204].mxu0 }
 0x68b   : > { %18860 = vst [vmem:[#allocation233_spill] sm:$0xff] %v15669_v3  ;;  %v15672_v59 = vpop.f32.mrb[205].mxu0 }
 0x68c   : > { %18861 = vst [vmem:[#allocation65_spill] sm:$0xff] %v15672_v59  ;;  %v15674_v28 = vpop.f32.mrb[206].mxu0 }
 0x68d   : > { %5662 = vmatmul.mubr.f32.gmra.mrb[6].mxu1 %v18716_v53  ;;  %18862 = vst [vmem:[#allocation72_spill] sm:$0xff] %v15674_v28  ;;  %v15676_v53 = vpop.f32.mrb[207].mxu0 }
 0x68e   : > { %5667 = vmatprep.mubr.f32.mxu1 %v18719_v6  ;;  %18863 = vst [vmem:[#allocation86_spill] sm:$0xff] %v15676_v53  ;;  %v15679_v6 = vpop.f32.mrb[208].mxu0 }
 0x68f   : > { %18864 = vst [vmem:[#allocation84_spill] sm:$0xff] %v15679_v6  ;;  %v15682_v27 = vpop.f32.mrb[209].mxu0 }
 0x690   : > { %18865 = vst [vmem:[#allocation76_spill] sm:$0xff] %v15682_v27  ;;  %v15684_v44 = vpop.f32.mrb[210].mxu0 }
 0x691   : > { %5669 = vmatmul.mubr.f32.gmra.mrb[8].mxu1 %v18721_v7  ;;  %18866 = vst [vmem:[#allocation77_spill] sm:$0xff] %v15684_v44  ;;  %v15686_v7 = vpop.f32.mrb[211].mxu0 }
 0x692   : > { %5674 = vmatprep.mubr.f32.mxu1 %v18724_v25  ;;  %18867 = vst [vmem:[#allocation197_spill] sm:$0xff] %v15686_v7  ;;  %v15689_v25 = vpop.f32.mrb[212].mxu0 }
 0x693   : > { %18868 = vst [vmem:[#allocation87_spill] sm:$0xff] %v15689_v25  ;;  %v15692_v28 = vpop.f32.mrb[213].mxu0 }
 0x694   : > { %18869 = vst [vmem:[#allocation80_spill] sm:$0xff] %v15692_v28  ;;  %v15694_v53 = vpop.f32.mrb[214].mxu0 }
 0x695   : > { %5676 = vmatmul.mubr.f32.gmra.mrb[10].mxu1 %v18726_v45  ;;  %v15696_v45 = vpop.f32.mrb[215].mxu0 }
 0x696   : > { %5681 = vmatprep.mubr.f32.mxu1 %v18729_v17  ;;  %v15699_v17 = vpop.f32.mrb[216].mxu0 }
 0x697   : > { %v15702_v44 = vpop.f32.mrb[217].mxu0 }
 0x698   : > { %v15704_v7 = vpop.f32.mrb[218].mxu0 }
 0x699   : > { %5683 = vmatmul.mubr.f32.gmra.mrb[12].mxu1 %v18731_v63  ;;  %v15706_v63 = vpop.f32.mrb[219].mxu0 }
 0x69a   : > { %5688 = vmatprep.mubr.f32.mxu1 %v18734_v47  ;;  %v15709_v47 = vpop.f32.mrb[220].mxu0 }
 0x69b   : > { %v15712_v25 = vpop.f32.mrb[221].mxu0 }
 0x69c   : > { %v15714_v28 = vpop.f32.mrb[222].mxu0 }
 0x69d   : > { %5690 = vmatmul.mubr.f32.gmra.mrb[14].mxu1 %v18736_v19  ;;  %v15716_v19 = vpop.f32.mrb[223].mxu0 }
 0x69e   : > { %5695 = vmatprep.mubr.f32.mxu1 %v18739_v29  ;;  %v15719_v29 = vpop.f32.mrb[224].mxu0 }
 0x69f   : > { %v15722_v6 = vpop.f32.mrb[225].mxu0 }
 0x6a0   : > { %v15724_v27 = vpop.f32.mrb[226].mxu0 }
 0x6a1   : > { %5697 = vmatmul.mubr.f32.gmra.mrb[16].mxu1 %v18741_v34  ;;  %v15726_v34 = vpop.f32.mrb[227].mxu0 }
 0x6a2   : > { %5702 = vmatprep.mubr.f32.mxu1 %v18744_v33  ;;  %v15729_v33 = vpop.f32.mrb[228].mxu0 }
 0x6a3   : > { %18870 = vst [vmem:[#allocation82_spill] sm:$0xff] %v15729_v33  ;;  %v15732_v3 = vpop.f32.mrb[229].mxu0  ;;  %v18938_v33 = vld [vmem:[#allocation240_spill] sm:$0xff] }
 0x6a4   : > { %18871 = vst [vmem:[#allocation92_spill] sm:$0xff] %v15732_v3  ;;  %v15734_v59 = vpop.f32.mrb[230].mxu0 }
 0x6a5   : > { %5704 = vmatmul.mubr.f32.gmra.mrb[18].mxu1 %v18746_v8  ;;  %18872 = vst [vmem:[#allocation89_spill] sm:$0xff] %v15734_v59  ;;  %v15736_v8 = vpop.f32.mrb[231].mxu0 }
 0x6a6   : > { %5709 = vmatprep.mubr.f32.mxu1 %v18748_v61  ;;  %18873 = vst [vmem:[#allocation90_spill] sm:$0xff] %v15736_v8  ;;  %v15739_v61 = vpop.f32.mrb[232].mxu0 }
 0x6a7   : > { %18874 = vst [vmem:[#allocation99_spill] sm:$0xff] %v15739_v61  ;;  %v15742_v46 = vpop.f32.mrb[233].mxu0 }
 0x6a8   : > { %18875 = vst [vmem:[#allocation110_spill] sm:$0xff] %v15742_v46  ;;  %v15744_v60 = vpop.f32.mrb[234].mxu0  ;;  %v18931_v46 = vld [vmem:[#allocation79_spill] sm:$0xff] }
 0x6a9   : > { %5711 = vmatmul.mubr.f32.gmra.mrb[20].mxu1 %v18750_v38  ;;  %18876 = vst [vmem:[#allocation117_spill] sm:$0xff] %v15744_v60  ;;  %v15746_v38 = vpop.f32.mrb[235].mxu0 }
 0x6aa   : > { %5716 = vmatprep.mubr.f32.mxu1 %v18752_v31  ;;  %18877 = vst [vmem:[#allocation118_spill] sm:$0xff] %v15746_v38  ;;  %v15749_v31 = vpop.f32.mrb[236].mxu0 }
 0x6ab   : > { %18878 = vst [vmem:[#allocation123_spill] sm:$0xff] %v15749_v31  ;;  %v15752_v35 = vpop.f32.mrb[237].mxu0  ;;  %v18917_v31 = vld [vmem:[#allocation295_spill] sm:$0xff] }
 0x6ac   : > { %18879 = vst [vmem:[#allocation128_spill] sm:$0xff] %v15752_v35  ;;  %v15754_v42 = vpop.f32.mrb[238].mxu0 }
 0x6ad   : > { %5718 = vmatmul.mubr.f32.gmra.mrb[22].mxu1 %v18754_v23  ;;  %18880 = vst [vmem:[#allocation138_spill] sm:$0xff] %v15754_v42  ;;  %v15756_v23 = vpop.f32.mrb[239].mxu0 }
 0x6ae   : > { %5723 = vmatprep.mubr.f32.mxu1 %v18756_v40  ;;  %18881 = vst [vmem:[#allocation147_spill] sm:$0xff] %v15756_v23  ;;  %v15759_v40 = vpop.f32.mrb[240].mxu0  ;;  %v18914_v23 = vld [vmem:[#allocation289_spill] sm:$0xff] }
 0x6af   : > { %18882 = vst [vmem:[#allocation158_spill] sm:$0xff] %v15759_v40  ;;  %v15762_v60 = vpop.f32.mrb[241].mxu0 }
 0x6b0   : > { %18883 = vst [vmem:[#allocation164_spill] sm:$0xff] %v15762_v60  ;;  %v15764_v38 = vpop.f32.mrb[242].mxu0  ;;  %v18911_v60 = vld [vmem:[#allocation283_spill] sm:$0xff] }
 0x6b1   : > { %5725 = vmatmul.mubr.f32.gmra.mrb[24].mxu1 %v18758_v39  ;;  %18884 = vst [vmem:[#allocation173_spill] sm:$0xff] %v15764_v38 }
 0x6b2   : > { %5730 = vmatprep.mubr.f32.mxu1 %v18760_v10  ;;  %v15769_v10 = vpop.f32.mrb[243].mxu0 }
 0x6b3   : > { %18885 = vst [vmem:[#allocation194_spill] sm:$0xff] %v15769_v10  ;;  %v15772_v39 = vpop.f32.mrb[244].mxu0 }
 0x6b4   : > { %18886 = vst [vmem:[#allocation204_spill] sm:$0xff] %v15772_v39 }
 0x6b5   : > { %5732 = vmatmul.mubr.f32.gmra.mrb[26].mxu1 %v18762_v43  ;;  %v15774_v43 = vpop.f32.mrb[245].mxu0 }
 0x6b6   : > { %5737 = vmatprep.mubr.f32.mxu1 %v18764_v5  ;;  %18887 = vst [vmem:[#allocation221_spill] sm:$0xff] %v15774_v43  ;;  %v15776_v40 = vpop.f32.mrb[246].mxu0 }
 0x6b7   : > { %18888 = vst [vmem:[#allocation195_spill] sm:$0xff] %v15776_v40  ;;  %v15779_v5 = vpop.f32.mrb[247].mxu0 }
 0x6b8   : > { %18889 = vst [vmem:[#allocation98_spill] sm:$0xff] %v15779_v5  ;;  %v18903_v5 = vld [vmem:[#allocation255_spill] sm:$0xff] }
 0x6b9   : > { %5739 = vmatmul.mubr.f32.gmra.mrb[28].mxu1 %v18766_v2  ;;  %v15782_v2 = vpop.f32.mrb[248].mxu0 }
 0x6ba   : > { %5744 = vmatprep.mubr.f32.mxu1 %v18768_v49  ;;  %18890 = vst [vmem:[#allocation109_spill] sm:$0xff] %v15782_v2  ;;  %v15784_v49 = vpop.f32.mrb[249].mxu0  ;;  %v18896_v2 = vld [vmem:[#allocation162_spill] sm:$0xff] }
 0x6bb   : > { %18891 = vst [vmem:[#allocation127_spill] sm:$0xff] %v15784_v49  ;;  %v18901_v49 = vld [vmem:[#allocation247_spill] sm:$0xff] }
 0x6bd   : > { %5746 = vmatmul.mubr.f32.gmra.mrb[30].mxu1 %v18770_v1  ;;  %v15786_v1 = vpop.f32.mrb[250].mxu0 }
 0x6be   : > { %5751 = vmatprep.mubr.f32.mxu1 %v18772_v11  ;;  %18892 = vst [vmem:[#allocation136_spill] sm:$0xff] %v15786_v1  ;;  %v15789_v11 = vpop.f32.mrb[251].mxu0  ;;  %v18897_v1 = vld [vmem:[#allocation239_spill] sm:$0xff] }
 0x6bf   : > { %18893 = vst [vmem:[#allocation141_spill] sm:$0xff] %v15789_v11  ;;  %v15792_v39 = vpop.f32.mrb[252].mxu0  ;;  %v18898_v11 = vld [vmem:[#allocation172_spill] sm:$0xff] }
 0x6c0   : > { %18894 = vst [vmem:[#allocation150_spill] sm:$0xff] %v15792_v39  ;;  %v15794_v40 = vpop.f32.mrb[253].mxu0 }
 0x6c1   : > { %5753 = vmatmul.mubr.f32.gmra.mrb[32].mxu1 %v18774_v54  ;;  %18895 = vst [vmem:[#allocation174_spill] sm:$0xff] %v15794_v40  ;;  %v15796_v54 = vpop.f32.mrb[254].mxu0  ;;  %v18900_v40 = vld [vmem:[#allocation244_spill] sm:$0xff] }
 0x6c2   : > { %5758 = vmatprep.mubr.f32.mxu1 %v18776_v32  ;;  %v15800_v32 = vpop.f32.mrb[255].mxu0 }
 0x6c5   : > { %5760 = vmatmul.mubr.f32.gmra.mrb[34].mxu1 %v18778_v14  ;;  %v15804_v14 = vpop.f32.mrb[0].mxu0 }
 0x6c6   : > { %5765 = vmatprep.mubr.f32.mxu1 %v18780_v50  ;;  %v18899_v50 = vld [vmem:[#allocation176_spill] sm:$0xff]  ;;  %v15808_v39 = vpop.f32.mrb[1].mxu0 }
 0x6c9   : > { %5767 = vmatmul.mubr.f32.gmra.mrb[36].mxu1 %v18782_v48  ;;  %v15812_v48 = vpop.f32.mrb[2].mxu0 }
 0x6ca   : > { %5772 = vmatprep.mubr.f32.mxu1 %v18784_v30  ;;  %v18902_v30 = vld [vmem:[#allocation251_spill] sm:$0xff] }
 0x6cd   : > { %5774 = vmatmul.mubr.f32.gmra.mrb[38].mxu1 %v18896_v2  ;;  %v15816_v2 = vpop.f32.mrb[3].mxu0 }
 0x6ce   : > { %5779 = vmatprep.mubr.f32.mxu1 %v18897_v1  ;;  %v18904_v1 = vld [vmem:[#allocation260_spill] sm:$0xff]  ;;  %v15819_v43 = vpop.f32.mrb[4].mxu0 }
 0x6cf   : > { %v15823_v38 = vpop.f32.mrb[5].mxu0 }
 0x6d0   : > { %v15827_v10 = vpop.f32.mrb[6].mxu0 }
 0x6d1   : > { %5781 = vmatmul.mubr.f32.gmra.mrb[40].mxu1 %v18898_v11  ;;  %v18905_v11 = vld [vmem:[#allocation263_spill] sm:$0xff]  ;;  %v15833_v42 = vpop.f32.mrb[7].mxu0 }
 0x6d2   : > { %5786 = vmatprep.mubr.f32.mxu1 %v18899_v50  ;;  %v18906_v50 = vld [vmem:[#allocation266_spill] sm:$0xff] }
 0x6d5   : > { %5788 = vmatmul.mubr.f32.gmra.mrb[42].mxu1 %v18900_v40  ;;  %v18907_v40 = vld [vmem:[#allocation269_spill] sm:$0xff] }
 0x6d6   : > { %5793 = vmatprep.mubr.f32.mxu1 %v18901_v49  ;;  %v18908_v49 = vld [vmem:[#allocation274_spill] sm:$0xff] }
 0x6d9   : > { %5795 = vmatmul.mubr.f32.gmra.mrb[44].mxu1 %v18902_v30  ;;  %v18909_v30 = vld [vmem:[#allocation277_spill] sm:$0xff] }
 0x6da   : > { %5800 = vmatprep.mubr.f32.mxu1 %v18903_v5  ;;  %v18910_v5 = vld [vmem:[#allocation280_spill] sm:$0xff] }
 0x6dd   : > { %5802 = vmatmul.mubr.f32.gmra.mrb[46].mxu1 %v18904_v1  ;;  %v18912_v1 = vld [vmem:[#allocation285_spill] sm:$0xff] }
 0x6de   : > { %5807 = vmatprep.mubr.f32.mxu1 %v18905_v11  ;;  %v18913_v11 = vld [vmem:[#allocation286_spill] sm:$0xff] }
 0x6e1   : > { %5809 = vmatmul.mubr.f32.gmra.mrb[48].mxu1 %v18906_v50  ;;  %v15836_v50 = vpop.f32.mrb[8].mxu0 }
 0x6e2   : > { %5814 = vmatprep.mubr.f32.mxu1 %v18907_v40  ;;  %v18915_v40 = vld [vmem:[#allocation291_spill] sm:$0xff] }
 0x6e5   : > { %5816 = vmatmul.mubr.f32.gmra.mrb[50].mxu1 %v18908_v49  ;;  %v18916_v49 = vld [vmem:[#allocation293_spill] sm:$0xff] }
 0x6e6   : > { %5821 = vmatprep.mubr.f32.mxu1 %v18909_v30  ;;  %v15842_v30 = vpop.f32.mrb[9].mxu0 }
 0x6e9   : > { %5823 = vmatmul.mubr.f32.gmra.mrb[52].mxu1 %v18910_v5  ;;  %v15844_v5 = vpop.f32.mrb[10].mxu0 }
 0x6ea   : > { %5828 = vmatprep.mubr.f32.mxu1 %v18911_v60  ;;  %v15849_v60 = vpop.f32.mrb[11].mxu0 }
 0x6ed   : > { %5830 = vmatmul.mubr.f32.gmra.mrb[54].mxu1 %v18912_v1 }
 0x6ee   : > { %5835 = vmatprep.mubr.f32.mxu1 %v18913_v11 }
 0x6f1   : > { %5837 = vmatmul.mubr.f32.gmra.mrb[56].mxu1 %v18914_v23  ;;  %v15852_v23 = vpop.f32.mrb[12].mxu0 }
 0x6f2   : > { %5842 = vmatprep.mubr.f32.mxu1 %v18915_v40  ;;  %18918 = vst [vmem:[#allocation175_spill] sm:$0xff] %v15852_v23  ;;  %v15855_v1 = vpop.f32.mrb[13].mxu0  ;;  %v18937_v23 = vld [vmem:[#allocation122_spill] sm:$0xff] }
 0x6f3   : > { %18919 = vst [vmem:[#allocation178_spill] sm:$0xff] %v15855_v1 }
 0x6f5   : > { %5844 = vmatmul.mubr.f32.gmra.mrb[58].mxu1 %v18916_v49 }
 0x6f6   : > { %5849 = vmatprep.mubr.f32.mxu1 %v18917_v31  ;;  %v15857_v31 = vpop.f32.mrb[14].mxu0 }
 0x6f7   : > { %18920 = vst [vmem:[#allocation208_spill] sm:$0xff] %v15857_v31  ;;  %v15859_v11 = vpop.f32.mrb[15].mxu0 }
 0x6f8   : > { %18921 = vst [vmem:[#allocation249_spill] sm:$0xff] %v15859_v11  ;;  %v15861_v40 = vpop.f32.mrb[16].mxu0 }
 0x6f9   : > { %5851 = vmatmul.mubr.f32.gmra.mrb[60].mxu1 %v18830_v26  ;;  %18922 = vst [vmem:[#allocation252_spill] sm:$0xff] %v15861_v40  ;;  %v15863_v26 = vpop.f32.mrb[17].mxu0 }
 0x6fa   : > { %5856 = vmatprep.mubr.f32.mxu1 %v18832_v12  ;;  %18923 = vst [vmem:[#allocation256_spill] sm:$0xff] %v15863_v26  ;;  %v15865_v12 = vpop.f32.mrb[18].mxu0 }
 0x6fb   : > { %18924 = vst [vmem:[#allocation259_spill] sm:$0xff] %v15865_v12  ;;  %v18934_v12 = vld [vmem:[#allocation125_spill] sm:$0xff] }
 0x6fd   : > { %5858 = vmatmul.mubr.f32.gmra.mrb[62].mxu1 %v18834_v58  ;;  %v15867_v58 = vpop.f32.mrb[19].mxu0 }
 0x6fe   : > { %5863 = vmatprep.mubr.f32.mxu1 %v18836_v22  ;;  %18925 = vst [vmem:[#allocation264_spill] sm:$0xff] %v15867_v58  ;;  %v15869_v49 = vpop.f32.mrb[20].mxu0 }
 0x6ff   : > { %18926 = vst [vmem:[#allocation268_spill] sm:$0xff] %v15869_v49  ;;  %v15871_v22 = vpop.f32.mrb[21].mxu0  ;;  %v18935_v49 = vld [vmem:[#allocation34_spill] sm:$0xff] }
 0x700   : > { %18927 = vst [vmem:[#allocation272_spill] sm:$0xff] %v15871_v22  ;;  %v15873_v35 = vpop.f32.mrb[22].mxu0  ;;  %v18936_v22 = vld [vmem:[#allocation81_spill] sm:$0xff] }
 0x701   : > { %5865 = vmatmul.mubr.f32.gmra.mrb[64].mxu1 %v18838_v62  ;;  %18928 = vst [vmem:[#allocation276_spill] sm:$0xff] %v15873_v35  ;;  %v15875_v62 = vpop.f32.mrb[23].mxu0 }
 0x702   : > { %18929 = vst [vmem:[#allocation279_spill] sm:$0xff] %v15875_v62  ;;  %v15877_v61 = vpop.f32.mrb[24].mxu0 }
 0x703   : > { %18930 = vst [vmem:[#allocation281_spill] sm:$0xff] %v15877_v61  ;;  %v15880_v31 = vpop.f32.mrb[25].mxu0 }
 0x704   : > { %18932 = vst [vmem:[#allocation284_spill] sm:$0xff] %v15880_v31  ;;  %v15882_v26 = vpop.f32.mrb[26].mxu0 }
 0x705   : > { %18933 = vst [vmem:[#allocation300_spill] sm:$0xff] %v15882_v26  ;;  %v15892_v3 = vpop.f32.mrb[27].mxu0 }
 0x738   : > { %v5593_v52 = vpop.f32.mrb[66].mxu1 }
 0x739   : > { %v10217_v16 = vadd.f32 %v5593_v52, %v18931_v46  ;;  %v5595_v40 = vpop.f32.mrb[67].mxu1  ;;  %v18940_v46 = vld [vmem:[#allocation219_spill] sm:$0xff] }
 0x73b   : > { %v5950_v58 = vadd.f32 %v10217_v16, %v18934_v12  ;;  %v18941_v16 = vld [vmem:[#allocation212_spill] sm:$0xff] }
 0x73c   : > { %v5600_v11 = vpop.f32.mrb[68].mxu1 }
 0x73d   : > { %v6451_v59 = vadd.f32 %v18935_v49, %v5950_v58  ;;  %v10218_v8 = vadd.f32 %v5600_v11, %v18936_v22  ;;  %v5602_v35 = vpop.f32.mrb[69].mxu1  ;;  %v18942_v58 = vld [vmem:[#allocation144_spill] sm:$0xff]  ;;  %v15897_v11 = vpop.f32.mrb[28].mxu0  ;;  %v18945_v22 = vld [vmem:[#allocation213_spill] sm:$0xff] }
 0x73f   : > { %v5960_v62 = vadd.f32 %v10218_v8, %v18937_v23  ;;  %v6773_v61 = vadd.f32 %v18938_v33, %v6451_v59  ;;  %v18943_v59 = vld [vmem:[#allocation49_spill] sm:$0xff] }
 0x740   : > { %v5607_v1 = vpop.f32.mrb[70].mxu1  ;;  %v18944_v23 = vld [vmem:[#allocation85_spill] sm:$0xff] }
 0x741   : > { %v6457_v52 = vadd.f32 %v18939_v37, %v5960_v62  ;;  %v10219_v40 = vadd.f32 %v5607_v1, %v18940_v46  ;;  %v5609_v31 = vpop.f32.mrb[71].mxu1  ;;  %v7127_v26 = vadd.f32 %v15594_v56, %v6773_v61 }
 0x743   : > { %v5970_v12 = vadd.f32 %v10219_v40, %v18941_v16  ;;  %v6780_v49 = vadd.f32 %v18942_v58, %v6457_v52  ;;  %v7534_v35 = vadd.f32 %v15696_v45, %v7127_v26  ;;  %v18946_v52 = vld [vmem:[#allocation243_spill] sm:$0xff] }
 0x744   : > { %v5614_v8 = vpop.f32.mrb[72].mxu1  ;;  %v18947_v40 = vld [vmem:[#allocation39_spill] sm:$0xff] }
 0x745   : > { %v6463_v33 = vadd.f32 %v18943_v59, %v5970_v12  ;;  %v7135_v37 = vadd.f32 %v15591_v13, %v6780_v49  ;;  %v10220_v1 = vadd.f32 %v5614_v8, %v18944_v23  ;;  %v15903_v31 = vadd.f32 %v15800_v32, %v7534_v35  ;;  %v5616_v56 = vpop.f32.mrb[73].mxu1  ;;  %v18948_v12 = vld [vmem:[#allocation97_spill] sm:$0xff]  ;;  %v15914_v32 = vpop.f32.mrb[29].mxu0  ;;  %v18950_v59 = vld [vmem:[#allocation242_spill] sm:$0xff] }
 0x746   : > { %v15916_v35 = vpop.f32.mrb[30].mxu0 }
 0x747   : > { %v7540_v61 = vadd.f32 %v15694_v53, %v7135_v37  ;;  %v5980_v62 = vadd.f32 %v10220_v1, %v18945_v22  ;;  %v6787_v46 = vadd.f32 %v18946_v52, %v6463_v33  ;;  %v18949_v53 = vld [vmem:[#allocation135_spill] sm:$0xff] }
 0x748   : > { %v5621_v45 = vpop.f32.mrb[74].mxu1 }
 0x749   : > { %v15909_v26 = vadd.f32 %v15796_v54, %v7540_v61  ;;  %v6469_v16 = vadd.f32 %v18947_v40, %v5980_v62  ;;  %v10221_v13 = vadd.f32 %v5621_v45, %v18948_v12  ;;  %v5623_v58 = vpop.f32.mrb[75].mxu1  ;;  %v7143_v49 = vadd.f32 %v15600_v36, %v6787_v46  ;;  %v18951_v54 = vld [vmem:[#allocation59_spill] sm:$0xff]  ;;  %v18952_v61 = vld [vmem:[#allocation104_spill] sm:$0xff]  ;;  %v18953_v46 = vld [vmem:[#allocation126_spill] sm:$0xff] }
 0x74a   : > { %v18954_v40 = vld [vmem:[#allocation246_spill] sm:$0xff] }
 0x74b   : > { %v5990_v8 = vadd.f32 %v10221_v13, %v18949_v53  ;;  %v6794_v37 = vadd.f32 %v18950_v59, %v6469_v16  ;;  %v7546_v33 = vadd.f32 %v15702_v44, %v7143_v49  ;;  %v18955_v13 = vld [vmem:[#allocation52_spill] sm:$0xff]  ;;  %v18956_v49 = vld [vmem:[#allocation115_spill] sm:$0xff] }
 0x74c   : > { %v5628_v23 = vpop.f32.mrb[76].mxu1 }
 0x74d   : > { %v6475_v1 = vadd.f32 %v18951_v54, %v5990_v8  ;;  %v7151_v56 = vadd.f32 %v15597_v41, %v6794_v37  ;;  %v10222_v22 = vadd.f32 %v5628_v23, %v18952_v61  ;;  %v15925_v62 = vadd.f32 %v15808_v39, %v7546_v33  ;;  %v5630_v36 = vpop.f32.mrb[77].mxu1  ;;  %v18957_v39 = vld [vmem:[#allocation157_spill] sm:$0xff]  ;;  %v18958_v37 = vld [vmem:[#allocation183_spill] sm:$0xff]  ;;  %v15939_v23 = vpop.f32.mrb[31].mxu0 }
 0x74f   : > { %v7552_v52 = vadd.f32 %v15699_v17, %v7151_v56  ;;  %v6000_v45 = vadd.f32 %v10222_v22, %v18953_v46  ;;  %v6801_v12 = vadd.f32 %v18954_v40, %v6475_v1  ;;  %v15941_v1 = vpop.f32.mrb[32].mxu0  ;;  %v18961_v22 = vld [vmem:[#allocation145_spill] sm:$0xff] }
 0x750   : > { %v5635_v16 = vpop.f32.mrb[78].mxu1  ;;  %18959 = vst [vmem:[#allocation69_spill] sm:$0xff] %v15941_v1 }
 0x751   : > { %v15931_v44 = vadd.f32 %v15804_v14, %v7552_v52  ;;  %v6481_v58 = vadd.f32 %v18955_v13, %v6000_v45  ;;  %v10223_v41 = vadd.f32 %v5635_v16, %v18956_v49  ;;  %v5637_v53 = vpop.f32.mrb[79].mxu1  ;;  %v7159_v8 = vadd.f32 %v15606_v21, %v6801_v12  ;;  %v18960_v14 = vld [vmem:[#allocation71_spill] sm:$0xff]  ;;  %v18962_v45 = vld [vmem:[#allocation61_spill] sm:$0xff] }
 0x753   : > { %v6010_v59 = vadd.f32 %v10223_v41, %v18957_v39  ;;  %v6808_v33 = vadd.f32 %v18958_v37, %v6481_v58  ;;  %v7558_v17 = vadd.f32 %v15706_v63, %v7159_v8  ;;  %v18963_v63 = vld [vmem:[#allocation254_spill] sm:$0xff]  ;;  %v18964_v58 = vld [vmem:[#allocation248_spill] sm:$0xff]  ;;  %v18965_v41 = vld [vmem:[#allocation167_spill] sm:$0xff] }
 0x754   : > { %v5642_v54 = vpop.f32.mrb[0].mxu1  ;;  %v18966_v39 = vld [vmem:[#allocation19_spill] sm:$0xff] }
 0x755   : > { %v6487_v56 = vadd.f32 %v18960_v14, %v6010_v59  ;;  %v7167_v61 = vadd.f32 %v15603_v0, %v6808_v33  ;;  %v6020_v36 = vadd.f32 %v18961_v22, %v5642_v54  ;;  %v15947_v52 = vadd.f32 %v15816_v2, %v7558_v17  ;;  %v5644_v21 = vpop.f32.mrb[1].mxu1  ;;  %v15958_v2 = vpop.f32.mrb[33].mxu0 }
 0x756   : > { %v15963_v33 = vpop.f32.mrb[34].mxu0  ;;  %v18970_v21 = vld [vmem:[#allocation74_spill] sm:$0xff] }
 0x757   : > { %v7564_v46 = vadd.f32 %v15704_v7, %v7167_v61  ;;  %v6493_v40 = vadd.f32 %v18962_v45, %v6020_v36  ;;  %v6815_v12 = vadd.f32 %v18963_v63, %v6487_v56  ;;  %18967 = vst [vmem:[#allocation303_spill] sm:$0xff] %v15963_v33  ;;  %v18969_v56 = vld [vmem:[#allocation163_spill] sm:$0xff] }
 0x758   : > { %v5649_v16 = vpop.f32.mrb[2].mxu1  ;;  %v18973_v63 = vld [vmem:[#allocation267_spill] sm:$0xff] }
 0x759   : > { %v15953_v13 = vadd.f32 %v15812_v48, %v7564_v46  ;;  %v6822_v49 = vadd.f32 %v18964_v58, %v6493_v40  ;;  %v6030_v0 = vadd.f32 %v18965_v41, %v5649_v16  ;;  %v5651_v53 = vpop.f32.mrb[3].mxu1  ;;  %v7175_v8 = vadd.f32 %v15612_v51, %v6815_v12  ;;  %v18968_v48 = vld [vmem:[#allocation271_spill] sm:$0xff]  ;;  %v15976_v46 = vpop.f32.mrb[35].mxu0  ;;  %v18974_v12 = vld [vmem:[#allocation198_spill] sm:$0xff] }
 0x75a   : > { %18971 = vst [vmem:[#allocation16_spill] sm:$0xff] %v15976_v46  ;;  %v15978_v40 = vpop.f32.mrb[36].mxu0 }
 0x75b   : > { %v6499_v59 = vadd.f32 %v18966_v39, %v6030_v0  ;;  %v7183_v7 = vadd.f32 %v15609_v55, %v6822_v49  ;;  %v7570_v37 = vadd.f32 %v15712_v25, %v7175_v8  ;;  %18972 = vst [vmem:[#allocation20_spill] sm:$0xff] %v15978_v40  ;;  %v18975_v49 = vld [vmem:[#allocation30_spill] sm:$0xff] }
 0x75c   : > { %v5656_v17 = vpop.f32.mrb[4].mxu1  ;;  %v18976_v8 = vld [vmem:[#allocation278_spill] sm:$0xff] }
 0x75d   : > { %v6829_v54 = vadd.f32 %v18968_v48, %v6499_v59  ;;  %v7576_v14 = vadd.f32 %v15709_v47, %v7183_v7  ;;  %v6040_v61 = vadd.f32 %v18969_v56, %v5656_v17  ;;  %v15969_v22 = vadd.f32 %v15823_v38, %v7570_v37  ;;  %v5658_v51 = vpop.f32.mrb[5].mxu1  ;;  %v15997_v17 = vpop.f32.mrb[37].mxu0  ;;  %v18979_v56 = vld [vmem:[#allocation23_spill] sm:$0xff] }
 0x75e   : > { %18977 = vst [vmem:[#allocation105_spill] sm:$0xff] %v15997_v17 }
 0x75f   : > { %v15972_v36 = vadd.f32 %v15819_v43, %v7576_v14  ;;  %v6505_v55 = vadd.f32 %v18970_v21, %v6040_v61  ;;  %v7191_v25 = vadd.f32 %v15616_v15, %v6829_v54  ;;  %v15988_v15 = vmul.f32 %v15903_v31, %v15903_v31 }
 0x760   : > { %v5663_v45 = vpop.f32.mrb[6].mxu1 }
 0x761   : > { %v6836_v47 = vadd.f32 %v18973_v63, %v6505_v55  ;;  %v6050_v16 = vadd.f32 %v18974_v12, %v5663_v45  ;;  %v5665_v58 = vpop.f32.mrb[7].mxu1  ;;  %v7582_v38 = vadd.f32 %v15716_v19, %v7191_v25  ;;  %v18981_v45 = vld [vmem:[#allocation236_spill] sm:$0xff]  ;;  %v18982_v12 = vld [vmem:[#allocation54_spill] sm:$0xff] }
 0x763   : > { %v6511_v41 = vadd.f32 %v18975_v49, %v6050_v16  ;;  %v7199_v43 = vadd.f32 %v15614_v57, %v6836_v47  ;;  %v7895_v0 = vadd.f32 %v15833_v42, %v7582_v38  ;;  %v18978_v57 = vld [vmem:[#allocation190_spill] sm:$0xff] }
 0x764   : > { %v5670_v53 = vpop.f32.mrb[8].mxu1 }
 0x765   : > { %v6843_v39 = vadd.f32 %v18976_v8, %v6511_v41  ;;  %v7588_v59 = vadd.f32 %v15714_v28, %v7199_v43  ;;  %v15992_v7 = vmul.f32 %v7895_v0, %v7895_v0  ;;  %v15995_v37 = vmul.f32 %v7895_v0, %v15903_v31  ;;  %v5672_v19 = vpop.f32.mrb[9].mxu1  ;;  %v18983_v41 = vld [vmem:[#allocation214_spill] sm:$0xff] }
 0x766   : > { %v6060_v48 = vadd.f32 %v18978_v57, %v5670_v53  ;;  %v16009_v31 = vmul.f32 %v15909_v26, %v15909_v26  ;;  %v18984_v53 = vld [vmem:[#allocation287_spill] sm:$0xff] }
 0x767   : > { %v7901_v42 = vadd.f32 %v15827_v10, %v7588_v59  ;;  %v16003_v54 = vadd.f32 %v15992_v7, %v15988_v15  ;;  %v7207_v14 = vadd.f32 %v15622_v9, %v6843_v39  ;;  %v18980_v10 = vld [vmem:[#allocation275_spill] sm:$0xff] }
 0x768   : > { %v6517_v28 = vadd.f32 %v18979_v56, %v6060_v48  ;;  %v5677_v61 = vpop.f32.mrb[10].mxu1 }
 0x769   : > { %v16011_v51 = vmul.f32 %v7901_v42, %v7901_v42  ;;  %v16014_v21 = vmul.f32 %v7901_v42, %v15909_v26  ;;  %v5679_v55 = vpop.f32.mrb[11].mxu1  ;;  %v6070_v63 = vadd.f32 %v18981_v45, %v5677_v61  ;;  %v7594_v47 = vadd.f32 %v15722_v6, %v7207_v14  ;;  %v18986_v14 = vld [vmem:[#allocation282_spill] sm:$0xff] }
 0x76a   : > { %v6850_v25 = vadd.f32 %v18980_v10, %v6517_v28  ;;  %v16028_v26 = vmul.f32 %v15925_v62, %v15925_v62  ;;  %v18987_v28 = vld [vmem:[#allocation101_spill] sm:$0xff] }
 0x76b   : > { %v16021_v9 = vadd.f32 %v16011_v51, %v16009_v31  ;;  %v6523_v16 = vadd.f32 %v18982_v12, %v6070_v63  ;;  %v7907_v38 = vadd.f32 %v15842_v30, %v7594_v47  ;;  %v18989_v10 = vld [vmem:[#allocation73_spill] sm:$0xff]  ;;  %v18990_v12 = vld [vmem:[#allocation290_spill] sm:$0xff] }
 0x76c   : > { %v7215_v58 = vadd.f32 %v15619_v4, %v6850_v25  ;;  %v5684_v49 = vpop.f32.mrb[12].mxu1  ;;  %v18985_v4 = vld [vmem:[#allocation40_spill] sm:$0xff] }
 0x76d   : > { %v6080_v43 = vadd.f32 %v18983_v41, %v5684_v49  ;;  %v5686_v0 = vpop.f32.mrb[13].mxu1  ;;  %v6857_v6 = vadd.f32 %v18984_v53, %v6523_v16  ;;  %v16033_v39 = vmul.f32 %v7907_v38, %v7907_v38  ;;  %v16036_v59 = vmul.f32 %v7907_v38, %v15925_v62  ;;  %v18991_v49 = vld [vmem:[#allocation207_spill] sm:$0xff] }
 0x76e   : > { %v7600_v8 = vadd.f32 %v15719_v29, %v7215_v58  ;;  %v16049_v62 = vmul.f32 %v15931_v44, %v15931_v44  ;;  %v18993_v53 = vld [vmem:[#allocation31_spill] sm:$0xff] }
 0x76f   : > { %v6529_v19 = vadd.f32 %v18985_v4, %v6080_v43  ;;  %v16042_v57 = vadd.f32 %v16033_v39, %v16028_v26  ;;  %v7223_v42 = vadd.f32 %v15626_v18, %v6857_v6  ;;  %v16069_v43 = vmul.f32 %v15947_v52, %v15947_v52 }
 0x770   : > { %v7913_v30 = vadd.f32 %v15836_v50, %v7600_v8  ;;  %v5691_v48 = vpop.f32.mrb[14].mxu1 }
 0x771   : > { %v6864_v56 = vadd.f32 %v18986_v14, %v6529_v19  ;;  %v6090_v29 = vadd.f32 %v18987_v28, %v5691_v48  ;;  %v5693_v61 = vpop.f32.mrb[15].mxu1  ;;  %v7606_v18 = vadd.f32 %v15726_v34, %v7223_v42  ;;  %v18996_v42 = vld [vmem:[#allocation133_spill] sm:$0xff] }
 0x772   : > { %v16051_v55 = vmul.f32 %v7913_v30, %v7913_v30  ;;  %v16054_v50 = vmul.f32 %v7913_v30, %v15931_v44  ;;  %v18995_v30 = vld [vmem:[#allocation288_spill] sm:$0xff] }
 0x773   : > { %v6535_v25 = vadd.f32 %v18989_v10, %v6090_v29  ;;  %v7231_v45 = vadd.f32 %v15624_v20, %v6864_v56  ;;  %v7919_v38 = vadd.f32 %v15849_v60, %v7606_v18  ;;  %v16081_v60 = vmul.f32 %v15953_v13, %v15953_v13  ;;  %v18997_v56 = vld [vmem:[#allocation92_spill] sm:$0xff]  ;;  %v18999_v10 = vld [vmem:[#allocation217_spill] sm:$0xff] }
 0x774   : > { %18988 = vst [vmem:[#allocation24_spill] sm:$0xff] %v16054_v50  ;;  %v16061_v63 = vadd.f32 %v16051_v55, %v16049_v62  ;;  %v5698_v47 = vpop.f32.mrb[16].mxu1  ;;  %v18998_v29 = vld [vmem:[#allocation88_spill] sm:$0xff]  ;;  %v19065_v50 = vld [vmem:[#allocation262_spill] sm:$0xff] }
 0x775   : > { %v6871_v16 = vadd.f32 %v18990_v12, %v6535_v25  ;;  %v7612_v58 = vadd.f32 %v15724_v27, %v7231_v45  ;;  %v6100_v44 = vadd.f32 %v18991_v49, %v5698_v47  ;;  %v5700_v41 = vpop.f32.mrb[17].mxu1  ;;  %v16072_v34 = vmul.f32 %v7919_v38, %v7919_v38  ;;  %v19000_v25 = vld [vmem:[#allocation178_spill] sm:$0xff] }
 0x776   : > { %v16075_v0 = vmul.f32 %v7919_v38, %v15947_v52  ;;  %v16104_v47 = vmul.f32 %v15969_v22, %v15969_v22  ;;  %v19001_v12 = vld [vmem:[#allocation114_spill] sm:$0xff] }
 0x777   : > { %v7925_v20 = vadd.f32 %v15844_v5, %v7612_v58  ;;  %v6541_v6 = vadd.f32 %v18993_v53, %v6100_v44  ;;  %v7239_v27 = vadd.f32 %v15632_v24, %v6871_v16  ;;  %v16090_v5 = vadd.f32 %v16072_v34, %v16069_v43  ;;  %v19002_v38 = vld [vmem:[#allocation294_spill] sm:$0xff] }
 0x778   : > { %18992 = vst [vmem:[#allocation26_spill] sm:$0xff] %v16075_v0  ;;  %v5705_v8 = vpop.f32.mrb[18].mxu1  ;;  %v19003_v44 = vld [vmem:[#allocation82_spill] sm:$0xff] }
 0x779   : > { %v16083_v4 = vmul.f32 %v7925_v20, %v7925_v20  ;;  %v16086_v19 = vmul.f32 %v7925_v20, %v15953_v13  ;;  %v5707_v52 = vpop.f32.mrb[19].mxu1  ;;  %v6878_v48 = vadd.f32 %v18995_v30, %v6541_v6  ;;  %v6110_v14 = vadd.f32 %v18996_v42, %v5705_v8  ;;  %v19005_v6 = vld [vmem:[#allocation78_spill] sm:$0xff]  ;;  %v19007_v42 = vld [vmem:[#allocation37_spill] sm:$0xff] }
 0x77a   : > { %v7618_v24 = vadd.f32 %v18997_v56, %v7239_v27  ;;  %v19006_v27 = vld [vmem:[#allocation175_spill] sm:$0xff]  ;;  %v19008_v56 = vld [vmem:[#allocation292_spill] sm:$0xff] }
 0x77b   : > { %18994 = vst [vmem:[#allocation113_spill] sm:$0xff] %v16086_v19  ;;  %v16097_v28 = vadd.f32 %v16083_v4, %v16081_v60  ;;  %v6547_v61 = vadd.f32 %v18998_v29, %v6110_v14  ;;  %v7247_v13 = vadd.f32 %v18999_v10, %v6878_v48  ;;  %v19009_v29 = vld [vmem:[#allocation151_spill] sm:$0xff] }
 0x77c   : > { %v7931_v45 = vadd.f32 %v19000_v25, %v7618_v24  ;;  %v5712_v18 = vpop.f32.mrb[20].mxu1 }
 0x77d   : > { %v6120_v16 = vadd.f32 %v19001_v12, %v5712_v18  ;;  %v5714_v58 = vpop.f32.mrb[21].mxu1  ;;  %v6885_v49 = vadd.f32 %v19002_v38, %v6547_v61  ;;  %v7624_v41 = vadd.f32 %v19003_v44, %v7247_v13  ;;  %v19012_v12 = vld [vmem:[#allocation215_spill] sm:$0xff] }
 0x77e   : > { %v16109_v20 = vmul.f32 %v7931_v45, %v7931_v45  ;;  %v16112_v53 = vmul.f32 %v7931_v45, %v15969_v22  ;;  %v16125_v22 = vmul.f32 %v15972_v36, %v15972_v36  ;;  %v19011_v45 = vld [vmem:[#allocation100_spill] sm:$0xff]  ;;  %v19013_v58 = vld [vmem:[#allocation90_spill] sm:$0xff] }
 0x77f   : > { %v6553_v8 = vadd.f32 %v19005_v6, %v6120_v16  ;;  %v7937_v52 = vadd.f32 %v19006_v27, %v7624_v41  ;;  %v7255_v14 = vadd.f32 %v19007_v42, %v6885_v49  ;;  %v19014_v41 = vld [vmem:[#allocation298_spill] sm:$0xff] }
 0x780   : > { %19004 = vst [vmem:[#allocation28_spill] sm:$0xff] %v16112_v53  ;;  %v16118_v30 = vadd.f32 %v16109_v20, %v16104_v47  ;;  %v5719_v48 = vpop.f32.mrb[22].mxu1 }
 0x781   : > { %v6892_v24 = vadd.f32 %v19008_v56, %v6553_v8  ;;  %v6130_v61 = vadd.f32 %v19009_v29, %v5719_v48  ;;  %v5721_v10 = vpop.f32.mrb[23].mxu1  ;;  %v16127_v13 = vmul.f32 %v7937_v52, %v7937_v52  ;;  %v16130_v25 = vmul.f32 %v7937_v52, %v15972_v36  ;;  %v19015_v8 = vld [vmem:[#allocation89_spill] sm:$0xff]  ;;  %v19017_v36 = vld [vmem:[#allocation143_spill] sm:$0xff]  ;;  %v19018_v29 = vld [vmem:[#allocation208_spill] sm:$0xff] }
 0x782   : > { %v7630_v38 = vadd.f32 %v19013_v58, %v7255_v14  ;;  %v19016_v48 = vld [vmem:[#allocation249_spill] sm:$0xff]  ;;  %v19026_v14 = vld [vmem:[#allocation256_spill] sm:$0xff] }
 0x783   : > { %19010 = vst [vmem:[#allocation36_spill] sm:$0xff] %v16130_v25  ;;  %v6559_v18 = vadd.f32 %v19011_v45, %v6130_v61  ;;  %v7263_v16 = vadd.f32 %v19012_v12, %v6892_v24  ;;  %v16137_v49 = vadd.f32 %v16127_v13, %v16125_v22  ;;  %v19019_v24 = vld [vmem:[#allocation224_spill] sm:$0xff]  ;;  %v19020_v45 = vld [vmem:[#allocation226_spill] sm:$0xff] }
 0x784   : > { %v5726_v44 = vpop.f32.mrb[24].mxu1  ;;  %v16142_v42 = vadd.f32 %v19016_v48, %v7630_v38  ;;  %v19023_v48 = vld [vmem:[#allocation110_spill] sm:$0xff] }
 0x785   : > { %v6899_v6 = vadd.f32 %v19014_v41, %v6559_v18  ;;  %v7636_v27 = vadd.f32 %v19015_v8, %v7263_v16  ;;  %v6140_v52 = vadd.f32 %v19017_v36, %v5726_v44  ;;  %v5728_v56 = vpop.f32.mrb[25].mxu1  ;;  %v19021_v16 = vld [vmem:[#allocation296_spill] sm:$0xff]  ;;  %v19022_v41 = vld [vmem:[#allocation241_spill] sm:$0xff] }
 0x787   : > { %v16146_v61 = vadd.f32 %v19018_v29, %v7636_v27  ;;  %v6565_v10 = vadd.f32 %v19019_v24, %v6140_v52  ;;  %v7271_v12 = vadd.f32 %v19020_v45, %v6899_v6  ;;  %v19024_v27 = vld [vmem:[#allocation230_spill] sm:$0xff]  ;;  %v19028_v45 = vld [vmem:[#allocation99_spill] sm:$0xff] }
 0x788   : > { %v5733_v58 = vpop.f32.mrb[26].mxu1  ;;  %v19025_v29 = vld [vmem:[#allocation258_spill] sm:$0xff] }
 0x789   : > { %v6906_v38 = vadd.f32 %v19021_v16, %v6565_v10  ;;  %v6150_v8 = vadd.f32 %v19022_v41, %v5733_v58  ;;  %v5735_v44 = vpop.f32.mrb[27].mxu1  ;;  %v7642_v36 = vadd.f32 %v19023_v48, %v7271_v12  ;;  %v19027_v6 = vld [vmem:[#allocation306_spill] sm:$0xff] }
 0x78a   : > { %v19029_v16 = vld [vmem:[#allocation166_spill] sm:$0xff]  ;;  %v19030_v44 = vld [vmem:[#allocation252_spill] sm:$0xff] }
 0x78b   : > { %v6571_v56 = vadd.f32 %v19024_v27, %v6150_v8  ;;  %v7279_v25 = vadd.f32 %v19025_v29, %v6906_v38  ;;  %v16160_v40 = vadd.f32 %v19026_v14, %v7642_v36  ;;  %v19031_v8 = vld [vmem:[#allocation106_spill] sm:$0xff]  ;;  %v19032_v38 = vld [vmem:[#allocation43_spill] sm:$0xff] }
 0x78c   : > { %v5740_v52 = vpop.f32.mrb[28].mxu1  ;;  %v19035_v10 = vld [vmem:[#allocation118_spill] sm:$0xff] }
 0x78d   : > { %v6913_v24 = vadd.f32 %v19027_v6, %v6571_v56  ;;  %v7648_v53 = vadd.f32 %v19028_v45, %v7279_v25  ;;  %v6160_v58 = vadd.f32 %v19029_v16, %v5740_v52  ;;  %v5742_v41 = vpop.f32.mrb[29].mxu1  ;;  %v19033_v56 = vld [vmem:[#allocation305_spill] sm:$0xff]  ;;  %v19034_v25 = vld [vmem:[#allocation250_spill] sm:$0xff]  ;;  %v19036_v52 = vld [vmem:[#allocation116_spill] sm:$0xff] }
 0x78e   : > { %v19037_v41 = vld [vmem:[#allocation222_spill] sm:$0xff] }
 0x78f   : > { %v16168_v12 = vadd.f32 %v19030_v44, %v7648_v53  ;;  %v6577_v48 = vadd.f32 %v19031_v8, %v6160_v58  ;;  %v7287_v27 = vadd.f32 %v19032_v38, %v6913_v24  ;;  %v19038_v44 = vld [vmem:[#allocation264_spill] sm:$0xff]  ;;  %v19039_v24 = vld [vmem:[#allocation154_spill] sm:$0xff]  ;;  %v19040_v38 = vld [vmem:[#allocation117_spill] sm:$0xff] }
 0x790   : > { %v5747_v14 = vpop.f32.mrb[30].mxu1 }
 0x791   : > { %v6920_v29 = vadd.f32 %v19033_v56, %v6577_v48  ;;  %v6170_v6 = vadd.f32 %v19034_v25, %v5747_v14  ;;  %v5749_v45 = vpop.f32.mrb[31].mxu1  ;;  %v7654_v18 = vadd.f32 %v19035_v10, %v7287_v27  ;;  %v19041_v56 = vld [vmem:[#allocation245_spill] sm:$0xff]  ;;  %v19043_v27 = vld [vmem:[#allocation111_spill] sm:$0xff]  ;;  %v19047_v48 = vld [vmem:[#allocation128_spill] sm:$0xff] }
 0x792   : > { %v19042_v45 = vld [vmem:[#allocation259_spill] sm:$0xff] }
 0x793   : > { %v6583_v16 = vadd.f32 %v19036_v52, %v6170_v6  ;;  %v7295_v53 = vadd.f32 %v19037_v41, %v6920_v29  ;;  %v16180_v17 = vadd.f32 %v19038_v44, %v7654_v18  ;;  %v19044_v29 = vld [vmem:[#allocation51_spill] sm:$0xff] }
 0x794   : > { %v5754_v58 = vpop.f32.mrb[32].mxu1 }
 0x795   : > { %v6927_v8 = vadd.f32 %v19039_v24, %v6583_v16  ;;  %v7660_v19 = vadd.f32 %v19040_v38, %v7295_v53  ;;  %v6180_v14 = vadd.f32 %v19041_v56, %v5754_v58  ;;  %v5756_v25 = vpop.f32.mrb[33].mxu1  ;;  %v19045_v16 = vld [vmem:[#allocation155_spill] sm:$0xff]  ;;  %v19046_v53 = vld [vmem:[#allocation257_spill] sm:$0xff] }
 0x796   : > { %v19048_v58 = vld [vmem:[#allocation129_spill] sm:$0xff] }
 0x797   : > { %v16188_v10 = vadd.f32 %v19042_v45, %v7660_v19  ;;  %v6589_v6 = vadd.f32 %v19043_v27, %v6180_v14  ;;  %v7303_v52 = vadd.f32 %v19044_v29, %v6927_v8  ;;  %v19049_v25 = vld [vmem:[#allocation261_spill] sm:$0xff]  ;;  %v19050_v45 = vld [vmem:[#allocation272_spill] sm:$0xff]  ;;  %v19052_v29 = vld [vmem:[#allocation123_spill] sm:$0xff] }
 0x798   : > { %v5761_v18 = vpop.f32.mrb[34].mxu1  ;;  %v19051_v8 = vld [vmem:[#allocation160_spill] sm:$0xff] }
 0x799   : > { %v6934_v44 = vadd.f32 %v19045_v16, %v6589_v6  ;;  %v6190_v24 = vadd.f32 %v19046_v53, %v5761_v18  ;;  %v5763_v38 = vpop.f32.mrb[35].mxu1  ;;  %v7666_v36 = vadd.f32 %v19047_v48, %v7303_v52  ;;  %v19053_v16 = vld [vmem:[#allocation253_spill] sm:$0xff]  ;;  %v19055_v52 = vld [vmem:[#allocation119_spill] sm:$0xff] }
 0x79a   : > { %v19054_v38 = vld [vmem:[#allocation268_spill] sm:$0xff]  ;;  %v19059_v6 = vld [vmem:[#allocation147_spill] sm:$0xff] }
 0x79b   : > { %v6595_v56 = vadd.f32 %v19048_v58, %v6190_v24  ;;  %v7311_v19 = vadd.f32 %v19049_v25, %v6934_v44  ;;  %v16200_v33 = vadd.f32 %v19050_v45, %v7666_v36  ;;  %v19056_v44 = vld [vmem:[#allocation228_spill] sm:$0xff] }
 0x79c   : > { %v5768_v14 = vpop.f32.mrb[36].mxu1 }
 0x79d   : > { %v6941_v27 = vadd.f32 %v19051_v8, %v6595_v56  ;;  %v7672_v0 = vadd.f32 %v19052_v29, %v7311_v19  ;;  %v6200_v18 = vadd.f32 %v19053_v16, %v5768_v14  ;;  %v5770_v53 = vpop.f32.mrb[37].mxu1  ;;  %v19057_v56 = vld [vmem:[#allocation161_spill] sm:$0xff]  ;;  %v19058_v19 = vld [vmem:[#allocation270_spill] sm:$0xff]  ;;  %v19060_v14 = vld [vmem:[#allocation148_spill] sm:$0xff] }
 0x79e   : > { %v19061_v53 = vld [vmem:[#allocation265_spill] sm:$0xff] }
 0x79f   : > { %v16208_v48 = vadd.f32 %v19054_v38, %v7672_v0  ;;  %v6601_v24 = vadd.f32 %v19055_v52, %v6200_v18  ;;  %v7319_v58 = vadd.f32 %v19056_v44, %v6941_v27  ;;  %v19062_v38 = vld [vmem:[#allocation279_spill] sm:$0xff]  ;;  %v19063_v52 = vld [vmem:[#allocation169_spill] sm:$0xff]  ;;  %v19064_v44 = vld [vmem:[#allocation138_spill] sm:$0xff] }
 0x7a0   : > { %v5775_v36 = vpop.f32.mrb[38].mxu1 }
 0x7a1   : > { %v6948_v45 = vadd.f32 %v19057_v56, %v6601_v24  ;;  %v6210_v8 = vadd.f32 %v19058_v19, %v5775_v36  ;;  %v5777_v29 = vpop.f32.mrb[39].mxu1  ;;  %v7678_v41 = vadd.f32 %v19059_v6, %v7319_v58  ;;  %v19066_v36 = vld [vmem:[#allocation276_spill] sm:$0xff]  ;;  %v19067_v6 = vsub.f32 %v16142_v42, %v15988_v15 }
 0x7a2   : > { %v19069_v29 = vld [vmem:[#allocation53_spill] sm:$0xff]  ;;  %v19073_v15 = vsub.f32 %v16146_v61, %v16009_v31 }
 0x7a3   : > { %v6607_v16 = vadd.f32 %v19060_v14, %v6210_v8  ;;  %v7327_v0 = vadd.f32 %v19061_v53, %v6948_v45  ;;  %v7991_v46 = vadd.f32 %v19062_v38, %v7678_v41  ;;  %v19068_v8 = vld [vmem:[#allocation139_spill] sm:$0xff]  ;;  %v8180_v14 = vadd.f32 0.0001, %v16003_v54  ;;  %v19079_v61 = vld [vmem:[#allocation273_spill] sm:$0xff] }
 0x7a4   : > { %v5782_v18 = vpop.f32.mrb[40].mxu1  ;;  %v19075_v54 = vld [vmem:[#allocation227_spill] sm:$0xff] }
 0x7a5   : > { %v6955_v27 = vadd.f32 %v19063_v52, %v6607_v16  ;;  %v7684_v1 = vadd.f32 %v19064_v44, %v7327_v0  ;;  %v8116_v25 = vsub.f32 %v7991_v46, %v15992_v7  ;;  %v6220_v24 = vadd.f32 %v19065_v50, %v5782_v18  ;;  %v5784_v56 = vpop.f32.mrb[41].mxu1  ;;  %v19070_v46 = vld [vmem:[#allocation170_spill] sm:$0xff]  ;;  %v19071_v50 = vld [vmem:[#allocation220_spill] sm:$0xff] }
 0x7a6   : > { %v19076_v56 = vld [vmem:[#allocation284_spill] sm:$0xff] }
 0x7a7   : > { %v7997_v19 = vadd.f32 %v19066_v36, %v7684_v1  ;;  %v8188_v58 = vadd.f32 %v8116_v25, %v19067_v6  ;;  %v6613_v45 = vadd.f32 %v19068_v8, %v6220_v24  ;;  %v7335_v41 = vadd.f32 %v19069_v29, %v6955_v27  ;;  %v19072_v1 = vld [vmem:[#allocation164_spill] sm:$0xff]  ;;  %v19074_v27 = vld [vmem:[#allocation159_spill] sm:$0xff] }
 0x7a8   : > { %v5789_v16 = vpop.f32.mrb[42].mxu1 }
 0x7a9   : > { %v8117_v53 = vsub.f32 %v7997_v19, %v16011_v51  ;;  %v8196_v0 = vadd.f32 0.0009, %v8188_v58  ;;  %v6962_v7 = vadd.f32 %v19070_v46, %v6613_v45  ;;  %v6230_v38 = vadd.f32 %v19071_v50, %v5789_v16  ;;  %v5791_v18 = vpop.f32.mrb[43].mxu1  ;;  %v19077_v58 = vld [vmem:[#allocation179_spill] sm:$0xff]  ;;  %v19078_v45 = vld [vmem:[#allocation158_spill] sm:$0xff] }
 0x7aa   : > { %v7690_v52 = vadd.f32 %v19072_v1, %v7335_v41  ;;  %v8181_v19 = vadd.f32 0.0001, %v16021_v9  ;;  %v19081_v46 = vld [vmem:[#allocation234_spill] sm:$0xff]  ;;  %v19082_v50 = vsub.f32 %v16160_v40, %v16028_v26  ;;  %v19088_v26 = vld [vmem:[#allocation193_spill] sm:$0xff] }
 0x7ab   : > { %v8189_v42 = vadd.f32 %v8117_v53, %v19073_v15  ;;  %v16238_v25 = vmul.f32 %v8196_v0, %v8180_v14  ;;  %v6619_v44 = vadd.f32 %v19074_v27, %v6230_v38  ;;  %v7343_v24 = vadd.f32 %v19075_v54, %v6962_v7  ;;  %v19080_v53 = vld [vmem:[#allocation281_spill] sm:$0xff]  ;;  %v19083_v38 = vld [vmem:[#allocation152_spill] sm:$0xff]  ;;  %v19085_v27 = vld [vmem:[#allocation194_spill] sm:$0xff] }
 0x7ac   : > { %v8003_v51 = vadd.f32 %v19076_v56, %v7690_v52  ;;  %v5796_v36 = vpop.f32.mrb[44].mxu1  ;;  %v19084_v15 = vld [vmem:[#allocation225_spill] sm:$0xff]  ;;  %v8182_v54 = vadd.f32 0.0001, %v16042_v57 }
 0x7ad   : > { %v8197_v6 = vadd.f32 0.0009, %v8189_v42  ;;  %v6969_v8 = vadd.f32 %v19077_v58, %v6619_v44  ;;  %v7696_v29 = vadd.f32 %v19078_v45, %v7343_v24  ;;  %v5798_v41 = vpop.f32.mrb[45].mxu1  ;;  %v6240_v14 = vadd.f32 %v19079_v61, %v5796_v36  ;;  %v19086_v56 = vld [vmem:[#allocation181_spill] sm:$0xff] }
 0x7ae   : > { %v8118_v31 = vsub.f32 %v8003_v51, %v16033_v39  ;;  %v19087_v36 = vsub.f32 %v16168_v12, %v16049_v62  ;;  %v19090_v57 = vld [vmem:[#allocation185_spill] sm:$0xff]  ;;  %10889 = vrcp.f32 %v16238_v25  ;;  %v19115_v25 = vld [vmem:[#allocation191_spill] sm:$0xff] }
 0x7af   : > { %v16248_v16 = vmul.f32 %v8197_v6, %v8181_v19  ;;  %v8009_v0 = vadd.f32 %v19080_v53, %v7696_v29  ;;  %v7351_v7 = vadd.f32 %v19081_v46, %v6969_v8  ;;  %v6625_v18 = vadd.f32 %v19083_v38, %v6240_v14  ;;  %v19089_v8 = vld [vmem:[#allocation60_spill] sm:$0xff]  ;;  %v19091_v14 = vld [vmem:[#allocation218_spill] sm:$0xff]  ;;  %v19092_v12 = vld [vmem:[#allocation173_spill] sm:$0xff] }
 0x7b0   : > { %v8190_v9 = vadd.f32 %v8118_v31, %v19082_v50  ;;  %v5803_v1 = vpop.f32.mrb[46].mxu1 }
 0x7b1   : > { %v8119_v52 = vsub.f32 %v8009_v0, %v16051_v55  ;;  %v6250_v42 = vadd.f32 %v19084_v15, %v5803_v1  ;;  %v5805_v39 = vpop.f32.mrb[47].mxu1  ;;  %v7702_v44 = vadd.f32 %v19085_v27, %v7351_v7  ;;  %v6976_v51 = vadd.f32 %v19086_v56, %v6625_v18  ;;  %v19094_v7 = vld [vmem:[#allocation182_spill] sm:$0xff]  ;;  %v19096_v18 = vld [vmem:[#allocation300_spill] sm:$0xff]  ;;  %v19098_v27 = vld [vmem:[#allocation231_spill] sm:$0xff] }
 0x7b2   : > { %v8198_v24 = vadd.f32 0.0009, %v8190_v9  ;;  %v8183_v55 = vadd.f32 0.0001, %v16061_v63  ;;  %v19095_v9 = vld [vmem:[#allocation65_spill] sm:$0xff]  ;;  %10891 = vrcp.f32 %v16248_v16 }
 0x7b3   : > { %v8191_v40 = vadd.f32 %v8119_v52, %v19087_v36  ;;  %v6631_v19 = vadd.f32 %v19088_v26, %v6250_v42  ;;  %v8015_v6 = vadd.f32 %v15892_v3, %v7702_v44  ;;  %v7359_v45 = vadd.f32 %v19089_v8, %v6976_v51  ;;  %v19097_v42 = vld [vmem:[#allocation186_spill] sm:$0xff]  ;;  %v19099_v56 = vld [vmem:[#allocation221_spill] sm:$0xff]  ;;  %v19100_v51 = vld [vmem:[#allocation232_spill] sm:$0xff] }
 0x7b4   : > { %v16267_v58 = vmul.f32 %v8198_v24, %v8182_v54  ;;  %v5810_v29 = vpop.f32.mrb[48].mxu1  ;;  %v19093_v3 = vsub.f32 %v16180_v17, %v16069_v43  ;;  %v19103_v8 = vld [vmem:[#allocation187_spill] sm:$0xff] }
 0x7b5   : > { %v8199_v41 = vadd.f32 0.0009, %v8191_v40  ;;  %v6983_v31 = vadd.f32 %v19090_v57, %v6631_v19  ;;  %v8120_v61 = vsub.f32 %v8015_v6, %v16072_v34  ;;  %v6260_v53 = vadd.f32 %v19091_v14, %v5810_v29  ;;  %v5812_v62 = vpop.f32.mrb[49].mxu1  ;;  %v19101_v40 = vld [vmem:[#allocation233_spill] sm:$0xff]  ;;  %v19104_v29 = vld [vmem:[#allocation204_spill] sm:$0xff] }
 0x7b6   : > { %v7708_v0 = vadd.f32 %v19092_v12, %v7359_v45  ;;  %v8184_v34 = vadd.f32 0.0001, %v16090_v5  ;;  %v19102_v19 = vsub.f32 %v16188_v10, %v16081_v60  ;;  %v19106_v12 = vld [vmem:[#allocation211_spill] sm:$0xff]  ;;  %v19107_v10 = vld [vmem:[#allocation86_spill] sm:$0xff]  ;;  %10893 = vrcp.f32 %v16267_v58 }
 0x7b7   : > { %v16274_v46 = vmul.f32 %v8199_v41, %v8183_v55  ;;  %v8192_v63 = vadd.f32 %v8120_v61, %v19093_v3  ;;  %v6637_v50 = vadd.f32 %v19094_v7, %v6260_v53  ;;  %v7367_v38 = vadd.f32 %v19095_v9, %v6983_v31  ;;  %v19109_v9 = vld [vmem:[#allocation189_spill] sm:$0xff] }
 0x7b8   : > { %v8021_v1 = vadd.f32 %v19096_v18, %v7708_v0  ;;  %v5817_v52 = vpop.f32.mrb[50].mxu1  ;;  %v8185_v61 = vadd.f32 0.0001, %v16097_v28  ;;  %v19108_v3 = vsub.f32 %v16200_v33, %v16104_v47  ;;  %v19113_v47 = vld [vmem:[#allocation94_spill] sm:$0xff] }
 0x7b9   : > { %v8200_v15 = vadd.f32 0.0009, %v8192_v63  ;;  %v6990_v39 = vadd.f32 %v19097_v42, %v6637_v50  ;;  %v6270_v44 = vadd.f32 %v19098_v27, %v5817_v52  ;;  %v5819_v54 = vpop.f32.mrb[51].mxu1  ;;  %v7714_v17 = vadd.f32 %v19099_v56, %v7367_v38  ;;  %v19110_v38 = vld [vmem:[#allocation18_spill] sm:$0xff] }
 0x7ba   : > { %v8121_v24 = vsub.f32 %v8021_v1, %v16083_v4  ;;  %v19105_v4 = vld [vmem:[#allocation223_spill] sm:$0xff]  ;;  %v19111_v1 = vld [vmem:[#allocation98_spill] sm:$0xff]  ;;  %v8186_v52 = vadd.f32 0.0001, %v16118_v30  ;;  %v8187_v54 = vadd.f32 0.0001, %v16137_v49  ;;  %10895 = vrcp.f32 %v16274_v46 }
 0x7bb   : > { %v16287_v43 = vmul.f32 %v8200_v15, %v8184_v34  ;;  %v6643_v36 = vadd.f32 %v19100_v51, %v6270_v44  ;;  %v7375_v26 = vadd.f32 %v19101_v40, %v6990_v39  ;;  %v8027_v6 = vadd.f32 %v15914_v32, %v7714_v17  ;;  %v19114_v39 = vld [vmem:[#allocation72_spill] sm:$0xff]  ;;  %v19116_v51 = vld [vmem:[#allocation195_spill] sm:$0xff]  ;;  %v19117_v40 = vld [vmem:[#allocation229_spill] sm:$0xff] }
 0x7bc   : > { %v8193_v5 = vadd.f32 %v8121_v24, %v19102_v19  ;;  %v5824_v55 = vpop.f32.mrb[52].mxu1  ;;  %v19112_v15 = vsub.f32 %v16208_v48, %v16125_v22  ;;  %v8132_v44 = vmul.f32 2.0, %v15995_v37  ;;  %v19134_v46 = vld [vmem:[#allocation141_spill] sm:$0xff] }
 0x7bd   : > { %v6997_v45 = vadd.f32 %v19103_v8, %v6643_v36  ;;  %v7720_v41 = vadd.f32 %v19104_v29, %v7375_v26  ;;  %v6280_v57 = vadd.f32 %v19105_v4, %v5824_v55  ;;  %v5826_v31 = vpop.f32.mrb[53].mxu1  ;;  %v8122_v53 = vsub.f32 %v8027_v6, %v16109_v20  ;;  %v19119_v8 = vld [vmem:[#allocation202_spill] sm:$0xff] }
 0x7be   : > { %v8201_v14 = vadd.f32 0.0009, %v8193_v5  ;;  %v19118_v5 = vld [vmem:[#allocation76_spill] sm:$0xff]  ;;  %v8133_v55 = vmul.f32 2.0, %v16014_v21  ;;  %10897 = vrcp.f32 %v16287_v43 }
 0x7bf   : > { %v8033_v62 = vadd.f32 %v15897_v11, %v7720_v41  ;;  %v6649_v60 = vadd.f32 %v19106_v12, %v6280_v57  ;;  %v7383_v0 = vadd.f32 %v19107_v10, %v6997_v45  ;;  %v8194_v63 = vadd.f32 %v8122_v53, %v19108_v3  ;;  %v19120_v57 = vld [vmem:[#allocation29_spill] sm:$0xff]  ;;  %v19122_v53 = vld [vmem:[#allocation127_spill] sm:$0xff] }
 0x7c0   : > { %v16303_v32 = vmul.f32 %v8201_v14, %v8185_v61  ;;  %v5831_v7 = vpop.f32.mrb[54].mxu1  ;;  %v8140_v41 = vadd.f32 0.0001, %v8132_v44  ;;  %v19121_v61 = vld [vmem:[#allocation192_spill] sm:$0xff]  ;;  %v8141_v3 = vadd.f32 0.0001, %v8133_v55 }
 0x7c1   : > { %v8123_v50 = vsub.f32 %v8033_v62, %v16127_v13  ;;  %v7004_v28 = vadd.f32 %v19109_v9, %v6649_v60  ;;  %v6290_v18 = vadd.f32 %v19110_v38, %v5831_v7  ;;  %v5833_v20 = vpop.f32.mrb[55].mxu1  ;;  %v7726_v11 = vadd.f32 %v19111_v1, %v7383_v0  ;;  %v19123_v60 = vld [vmem:[#allocation121_spill] sm:$0xff]  ;;  %v10890_v0 = vpop.eup %10889  ;;  %v19124_v7 = vld [vmem:[#allocation84_spill] sm:$0xff]  ;;  %v19126_v1 = vld [vmem:[#allocation22_spill] sm:$0xff] }
 0x7c2   : > { %v8202_v34 = vadd.f32 0.0009, %v8194_v63  ;;  %v8134_v63 = vmul.f32 2.0, %v16036_v59  ;;  %v19135_v55 = vld [vmem:[#allocation238_spill] sm:$0xff]  ;;  %10899 = vrcp.f32 %v16303_v32  ;;  %v19146_v32 = vld [vmem:[#allocation209_spill] sm:$0xff] }
 0x7c3   : > { %v8195_v33 = vadd.f32 %v8123_v50, %v19112_v15  ;;  %v6655_v42 = vadd.f32 %v19113_v47, %v6290_v18  ;;  %v7391_v13 = vadd.f32 %v19114_v39, %v7004_v28  ;;  %v8039_v27 = vadd.f32 %v15939_v23, %v7726_v11  ;;  %v19125_v18 = vld [vmem:[#allocation199_spill] sm:$0xff]  ;;  %v19128_v47 = vld [vmem:[#allocation96_spill] sm:$0xff]  ;;  %v19129_v39 = vld [vmem:[#allocation197_spill] sm:$0xff] }
 0x7c4   : > { %v16322_v24 = vmul.f32 %v8202_v34, %v8186_v52  ;;  %v5838_v30 = vpop.f32.mrb[56].mxu1  ;;  %v19127_v52 = vld [vmem:[#allocation109_spill] sm:$0xff] }
 0x7c5   : > { %v8203_v56 = vadd.f32 0.0009, %v8195_v33  ;;  %v7011_v17 = vadd.f32 %v19115_v25, %v6655_v42  ;;  %v7732_v36 = vadd.f32 %v19116_v51, %v7391_v13  ;;  %v8124_v22 = vsub.f32 %v8039_v27, %v15995_v37  ;;  %v5840_v48 = vpop.f32.mrb[57].mxu1  ;;  %v19130_v27 = vld [vmem:[#allocation24_spill] sm:$0xff] }
 0x7c6   : > { %v6300_v26 = vadd.f32 %v19117_v40, %v5838_v30  ;;  %v8135_v44 = vmul.f32 2.0, %v19130_v27  ;;  %v19131_v30 = vld [vmem:[#allocation69_spill] sm:$0xff]  ;;  %10901 = vrcp.f32 %v16322_v24 }
 0x7c7   : > { %v16329_v23 = vmul.f32 %v8203_v56, %v8187_v54  ;;  %v8045_v19 = vadd.f32 %v15916_v35, %v7732_v36  ;;  %v8148_v49 = vmul.f32 2.0, %v8124_v22  ;;  %v7399_v6 = vadd.f32 %v19118_v5, %v7011_v17  ;;  %v19132_v36 = vld [vmem:[#allocation203_spill] sm:$0xff]  ;;  %v19133_v48 = vld [vmem:[#allocation41_spill] sm:$0xff] }
 0x7c8   : > { %v6661_v45 = vadd.f32 %v19119_v8, %v6300_v26  ;;  %v5845_v29 = vpop.f32.mrb[58].mxu1  ;;  %v8142_v54 = vadd.f32 0.0001, %v8134_v63  ;;  %v8143_v63 = vadd.f32 0.0001, %v8135_v44 }
 0x7c9   : > { %v8125_v37 = vsub.f32 %v8045_v19, %v16014_v21  ;;  %v8156_v4 = vadd.f32 0.0009, %v8148_v49  ;;  %v6310_v16 = vadd.f32 %v19120_v57, %v5845_v29  ;;  %v5847_v31 = vpop.f32.mrb[59].mxu1  ;;  %v7738_v62 = vadd.f32 %v19122_v53, %v7399_v6  ;;  %v19139_v53 = vld [vmem:[#allocation206_spill] sm:$0xff] }
 0x7ca   : > { %v7018_v14 = vadd.f32 %v19121_v61, %v6661_v45  ;;  %v19136_v45 = vld [vmem:[#allocation77_spill] sm:$0xff]  ;;  %10903 = vrcp.f32 %v16329_v23 }
 0x7cb   : > { %v8149_v35 = vmul.f32 2.0, %v8125_v37  ;;  %v8164_v12 = vmul.f32 %v8156_v4, %v8140_v41  ;;  %v6667_v10 = vadd.f32 %v19123_v60, %v6310_v16  ;;  %v8051_v50 = vadd.f32 %v15958_v2, %v7738_v62  ;;  %v10892_v2 = vpop.eup %10891  ;;  %v19137_v41 = vld [vmem:[#allocation16_spill] sm:$0xff]  ;;  %v19138_v4 = vld [vmem:[#allocation26_spill] sm:$0xff] }
 0x7cc   : > { %v7407_v21 = vadd.f32 %v19124_v7, %v7018_v14  ;;  %v5852_v9 = vpop.f32.mrb[60].mxu1  ;;  %v8136_v57 = vmul.f32 2.0, %v19138_v4  ;;  %v10894_v43 = vpop.eup %10893 }
 0x7cd   : > { %v8157_v28 = vadd.f32 0.0009, %v8149_v35  ;;  %v8213_v38 = vmul.f32 %v10890_v0, %v8164_v12  ;;  %v7025_v20 = vadd.f32 %v19125_v18, %v6667_v10  ;;  %v6320_v11 = vadd.f32 %v19126_v1, %v5852_v9  ;;  %v5854_v58 = vpop.f32.mrb[61].mxu1  ;;  %v19140_v35 = vld [vmem:[#allocation136_spill] sm:$0xff] }
 0x7ce   : > { %v7744_v34 = vadd.f32 %v19127_v52, %v7407_v21  ;;  %v8126_v15 = vsub.f32 %v8051_v50, %v16036_v59  ;;  %v19141_v10 = vld [vmem:[#allocation32_spill] sm:$0xff]  ;;  %v19142_v50 = vld [vmem:[#allocation303_spill] sm:$0xff]  ;;  %v8144_v52 = vadd.f32 0.0001, %v8136_v57 }
 0x7cf   : > { %v8165_v33 = vmul.f32 %v8157_v28, %v8141_v3  ;;  %v6673_v42 = vadd.f32 %v19128_v47, %v6320_v11  ;;  %v7415_v13 = vadd.f32 %v19129_v39, %v7025_v20  ;;  %v8228_v19 = vsel %vm326_vm0, %v8213_v38, 0.0  ;;  %v19143_v38 = vld [vmem:[#allocation134_spill] sm:$0xff]  ;;  %v19144_v20 = vld [vmem:[#allocation80_spill] sm:$0xff]  ;;  %v19145_v11 = vld [vmem:[#allocation113_spill] sm:$0xff] }
 0x7d0   : > { %v8057_v56 = vadd.f32 %v19131_v30, %v7744_v34  ;;  %v8150_v25 = vmul.f32 2.0, %v8126_v15  ;;  %v5859_v17 = vpop.f32.mrb[62].mxu1  ;;  %v8137_v58 = vmul.f32 2.0, %v19145_v11  ;;  %v19153_v57 = vld [vmem:[#allocation36_spill] sm:$0xff] }
 0x7d1   : > { %v8215_v51 = vmul.f32 %v10892_v2, %v8165_v33  ;;  %v7032_v22 = vadd.f32 %v19132_v36, %v6673_v42  ;;  %v6330_v59 = vadd.f32 %v19133_v48, %v5859_v17  ;;  %v5861_v40 = vpop.f32.mrb[63].mxu1  ;;  %v7750_v26 = vadd.f32 %v19134_v46, %v7415_v13  ;;  %v10896_v33 = vpop.eup %10895  ;;  %v19147_v13 = vld [vmem:[#allocation174_spill] sm:$0xff]  ;;  %v19149_v17 = vld [vmem:[#allocation105_spill] sm:$0xff]  ;;  %v19150_v48 = vld [vmem:[#allocation28_spill] sm:$0xff] }
 0x7d2   : > { %v8127_v49 = vsub.f32 %v8057_v56, %v19130_v27  ;;  %v8158_v5 = vadd.f32 0.0009, %v8150_v25  ;;  %v19148_v56 = vld [vmem:[#allocation87_spill] sm:$0xff]  ;;  %v10898_v36 = vpop.eup %10897 }
 0x7d3   : > { %v8229_v6 = vsel %vm326_vm0, %v8215_v51, 0.0  ;;  %v6679_v8 = vadd.f32 %v19135_v55, %v6330_v59  ;;  %v7423_v29 = vadd.f32 %v19136_v45, %v7032_v22  ;;  %v8063_v37 = vadd.f32 %v19137_v41, %v7750_v26  ;;  %v19152_v55 = vld [vmem:[#allocation20_spill] sm:$0xff]  ;;  %v10900_v41 = vpop.eup %10899 }
 0x7d4   : > { %v8230_v16 = vadd.f32 %v8229_v6, %v8228_v19  ;;  %v8151_v31 = vmul.f32 2.0, %v8127_v49  ;;  %v8166_v61 = vmul.f32 %v8158_v5, %v8142_v54  ;;  %v5866_v14 = vpop.f32.mrb[64].mxu1  ;;  %v8145_v22 = vadd.f32 0.0001, %v8137_v58  ;;  %v19151_v19 = vld [vmem:[#allocation150_spill] sm:$0xff] }
 0x7d5   : > { %v7039_v62 = vadd.f32 %v19139_v53, %v6679_v8  ;;  %v7756_v12 = vadd.f32 %v19140_v35, %v7423_v29  ;;  %v8128_v60 = vsub.f32 %v8063_v37, %v19138_v4  ;;  %v6340_v0 = vadd.f32 %v19141_v10, %v5866_v14  ;;  %v5868_v3 = vpop.f32.mrb[65].mxu1 }
 0x7d6   : > { %v8159_v7 = vadd.f32 0.0009, %v8151_v31  ;;  %v8217_v21 = vmul.f32 %v10894_v43, %v8166_v61  ;;  %v8138_v59 = vmul.f32 2.0, %v19150_v48 }
 0x7d7   : > { %v8069_v9 = vadd.f32 %v19142_v50, %v7756_v12  ;;  %v8152_v28 = vmul.f32 2.0, %v8128_v60  ;;  %v6685_v18 = vadd.f32 %v19143_v38, %v6340_v0  ;;  %v7431_v1 = vadd.f32 %v19144_v20, %v7039_v62  ;;  %v10902_v62 = vpop.eup %10901 }
 0x7d8   : > { %v8167_v34 = vmul.f32 %v8159_v7, %v8143_v63  ;;  %v8231_v15 = vsel %vm326_vm0, %v8217_v21, 0.0  ;;  %v8146_v37 = vadd.f32 0.0001, %v8138_v59  ;;  %v10904_v63 = vpop.eup %10903 }
 0x7d9   : > { %v8129_v47 = vsub.f32 %v8069_v9, %v19145_v11  ;;  %v8160_v42 = vadd.f32 0.0009, %v8152_v28  ;;  %v7046_v39 = vadd.f32 %v19146_v32, %v6685_v18  ;;  %v7762_v2 = vadd.f32 %v19147_v13, %v7431_v1 }
 0x7da   : > { %v8219_v27 = vmul.f32 %v10896_v33, %v8167_v34  ;;  %v8232_v44 = vadd.f32 %v8231_v15, %v8230_v16  ;;  %v8139_v16 = vmul.f32 2.0, %v19153_v57 }
 0x7db   : > { %v8153_v54 = vmul.f32 2.0, %v8129_v47  ;;  %v8168_v30 = vmul.f32 %v8160_v42, %v8144_v52  ;;  %v7439_v25 = vadd.f32 %v19148_v56, %v7046_v39  ;;  %v8075_v51 = vadd.f32 %v19149_v17, %v7762_v2 }
 0x7dc   : > { %v8233_v40 = vsel %vm326_vm0, %v8219_v27, 0.0  ;;  %v8147_v12 = vadd.f32 0.0001, %v8139_v16 }
 0x7dd   : > { %v8161_v46 = vadd.f32 0.0009, %v8153_v54  ;;  %v8221_v26 = vmul.f32 %v10898_v36, %v8168_v30  ;;  %v7768_v49 = vadd.f32 %v19151_v19, %v7439_v25  ;;  %v8130_v24 = vsub.f32 %v8075_v51, %v19150_v48 }
 0x7de   : > { %v8234_v5 = vadd.f32 %v8233_v40, %v8232_v44 }
 0x7df   : > { %v8169_v6 = vmul.f32 %v8161_v46, %v8145_v22  ;;  %v8081_v8 = vadd.f32 %v19152_v55, %v7768_v49  ;;  %v8154_v45 = vmul.f32 2.0, %v8130_v24  ;;  %v8235_v29 = vsel %vm326_vm0, %v8221_v26, 0.0 }
 0x7e0   : > { %v8236_v4 = vadd.f32 %v8235_v29, %v8234_v5 }
 0x7e1   : > { %v8131_v31 = vsub.f32 %v8081_v8, %v19153_v57  ;;  %v8162_v61 = vadd.f32 0.0009, %v8154_v45  ;;  %v8223_v14 = vmul.f32 %v10900_v41, %v8169_v6 }
 0x7e3   : > { %v8155_v43 = vmul.f32 2.0, %v8131_v31  ;;  %v8170_v53 = vmul.f32 %v8162_v61, %v8146_v37  ;;  %v8237_v23 = vsel %vm326_vm0, %v8223_v14, 0.0 }
 0x7e4   : > { %v8238_v35 = vadd.f32 %v8237_v23, %v8236_v4 }
 0x7e5   : > { %v8163_v60 = vadd.f32 0.0009, %v8155_v43  ;;  %v8225_v10 = vmul.f32 %v10902_v62, %v8170_v53 }
 0x7e7   : > { %v8171_v0 = vmul.f32 %v8163_v60, %v8147_v12  ;;  %v8239_v3 = vsel %vm326_vm0, %v8225_v10, 0.0 }
 0x7e8   : > { %v8240_v7 = vadd.f32 %v8239_v3, %v8238_v35 }
 0x7e9   : > { %v8227_v21 = vmul.f32 %v10904_v63, %v8171_v0 }
 0x7eb   : > { %v8241_v50 = vsel %vm326_vm0, %v8227_v21, 0.0 }
 0x7ec   : > { %v8242_v9 = vadd.f32 %v8241_v50, %v8240_v7 }
 0x7ee   : > { %8243 = vadd.xlane.f32.xlu0 %v8242_v9 }
 0x87b   : > { %v8244_v28 = vpop.xlane.xlu0 %8243 }
 0x87c   : > { %v8245_v38 = vrot.slane %v8244_v28, 4 }
 0x87e   : > { %v8246_v18 = vadd.f32 %v8245_v38, %v8244_v28 }
 0x880   : > { %v8247_v20 = vrot.slane %v8246_v18, 2 }
 0x882   : > { %v8248_v1 = vadd.f32 %v8247_v20, %v8246_v18 }
 0x884   : > { %v8249_v11 = vrot.slane %v8248_v1, 1 }
 0x886   : > { %v8250_v58 = vadd.f32 %v8249_v11, %v8248_v1 }
 0x888   : > { %10810 = vpush %v8250_v58 }
 0x8b9   : > { %s10811_s25 = spop %10810 }
 0x8ba   : > { %s8252_s10 = smul.f32 0.0009765625, %s10811_s25 }
 0x8bc   : > { %v8253_v52 = vstv %s8252_s10 }
 0x8bd   : > { %8254 = vst [vmem:[%s283_s21] sm:$0x1] %v8253_v52 }
 0x8be   : > { %11034 = shalt.err (!%p11031_p5)
}
 0x8bf   : > { %s11035_s9 = scalar_lea.hbm %s16397_s6, 16  ;;  %s11039_s8 = scalar_lea.hbm %s16445_s4, 32 }
 0x8c0   : > { %p11036_p9 = scmp.ne.s32.totalorder %s16397_s6, %s11035_s9  ;;  %p11040_p11 = scmp.lt.u32.totalorder %s16397_s6, %s16445_s4 }
 0x8c1   : > { %p11041_p2 = scmp.lt.u32.totalorder %s11039_s8, %s11035_s9  ;;  %p11043_p1 = scmp.lt.u32.totalorder %s11035_s9, %s16397_s6 }
 0x8c2   : > { %p11037_p0 = pnand %p11036_p9, %p19154_p13 }
 0x8c3   : > { %p11042_p12 = por %p11041_p2, %p11040_p11 }
 0x8c4   : > { %p11038_p8 = pneg %p11037_p0 }
 0x8c5   : > { %p11044_p6 = por %p11043_p1, %p11042_p12 }
 0x8c7   : > { %p11045_p10 = pnand %p11044_p6, %p11038_p8 }
 0x8c9   : > { %11048 = shalt.err (!%p11045_p10)
}
 0x8ca   : > { %10824 = dma.vmem_to_hbm [thread:$0]  (%p19154_p13), %s16399_s30, 16, %s16397_s6, %s8256_s7  }
 0x8cb PF: > { %s8280_s21 = sand.u32 1, %s11087_s15   ;;  %p19155_p4 = scmp.ne.s32.totalorder %s17245_s22, 0 }
 0x8cc   : > { %p19156_p7 = scmp.ge.s32.totalorder %s11099_s18, 2  ;;  %s8281_s20 = scalar_lea.sflag [#allocation4], %s8280_s21 }
 0x8ce   : > { %p10841_p3 = pnand %p19156_p7, %p19155_p4 }
 0x8d0   : > { %11082 = dma.done.wait (!%p10841_p3), %s8281_s20, 16  }
 0x8d1   : > { %11084 = vsyncadd (!%p10841_p3), %s8281_s20, 4294967280  ;;  %p21_p5 = scmp.ge.s32.totalorder %s11249_s13, 4   ;;  %s19157_s15 = smov %s11091_s16 }
 0x8d2   : > { %s19158_s16 = smov %s11095_s17  ;;  %s19159_s17 = smov %s11258_s24 }
 0x8d3   : > { %s19160_s18 = smov %s11249_s13  ;;  %23 = sbr.rel (!%p21_p5) target bundleno = 10 (0xa), region = 102 }
 0x8da   :  { %8285 = vsyncpa [#allocation3], 1 }
 0x8db   :  { %8287 = vsyncpa [#allocation3 + $0x1], 1 }
 0x8dc   :  { %8288 = vsyncpa [#allocation6], 1 }
 0x8dd   :  { %8290 = vsyncpa [#allocation6 + $0x1], 1 }
 0x8de   :  { %8291 = vsyncpa [#allocation9], 1 }
 0x8df   :  { %8292 = vsyncpa [#allocation4], 1 }
 0x8e0   :  { %8294 = vsyncpa [#allocation4 + $0x1], 1 }

</bundles_post_ra>
